<compile_context>
chip_gen: v5e
topology: v5e:2x2
jax: 0.10.0
libtpu: 0.0.40
codegen_flags: <defaults>
</compile_context>

<pallas_src>
import functools

import jax
import jax.numpy as jnp
import numpy as np
from jax import lax
from jax.experimental import pallas as pl
from jax.experimental.pallas import tpu as pltpu


def _spatial_attention_kernel(w_ref, b_ref, x_ref, o_ref, *, H, W, K, CC=8):
    """One grid step processes a (BN, C, HWp) lane-dense block of x.

    w_ref: SMEM (2*K*K,) f32  conv weight, layout [in_ch, ky, kx]
           (in_ch 0 = channel-mean map, in_ch 1 = channel-max map)
    b_ref: SMEM (1,)     f32  conv bias
    x_ref: VMEM (BN, C, HWp)  input block (flattened, zero-padded spatial)
    o_ref: VMEM (BN, C, HWp)  output block
    """
    BN, C, HWp = x_ref.shape
    P = K // 2
    inv_c = 1.0 / C
    inv6 = 1.0 / 6.0

    # ---- hoisted once per grid step --------------------------------------
    # All conv taps + bias read from SMEM once (no per-tap re-read / re-splat).
    w_taps = [w_ref[i] for i in range(2 * K * K)]
    bias = b_ref[0]

    # Flat position p along the lane axis; row recovered with H-1 compares
    # (no integer div/mod on the VPU), col = p - W*row.  Hoisted: paid once.
    idx = lax.broadcasted_iota(jnp.int32, (1, HWp), 1)
    row = jnp.zeros((1, HWp), jnp.int32)
    for r in range(1, H):
        row = row + (idx >= r * W).astype(jnp.int32)
    col = idx - W * row  # == p % W for p < H*W

    # Zero-padding border masks (0/1 f32), one per vertical / horizontal tap
    # offset.  Together they also kill any roll wrap-around contributions.
    row_mask = {}
    col_mask = {}
    for d in range(-P, P + 1):
        lo = max(0, -d) * W
        hi = min(H, H - d) * W
        row_mask[d] = jnp.logical_and(idx >= lo, idx < hi).astype(jnp.float32)
        col_mask[d] = jnp.logical_and(col + d >= 0, col + d < W).astype(jnp.float32)

    for b in range(BN):
        # ---- channel mean / max (chunked: never hold the full block) -----
        sum_acc = jnp.zeros((1, HWp), jnp.float32)
        max_acc = jnp.full((1, HWp), -jnp.inf, jnp.float32)
        for c0 in range(0, C, CC):
            cc = min(CC, C - c0)
            chunk = x_ref[b, pl.ds(c0, cc), :].astype(jnp.float32)  # (cc, HWp)
            sum_acc = sum_acc + jnp.sum(chunk, axis=0, keepdims=True)
            max_acc = jnp.maximum(max_acc, jnp.max(chunk, axis=0, keepdims=True))
        mean_flat = sum_acc * inv_c
        max_flat = max_acc

        # ---- 7x7 conv (2->1 ch, zero pad) on the flat maps ---------------
        # out[p] = bias + sum_{dy,dx} w[.,dy,dx] * f[p + dy*W + dx]  (masked)
        acc = jnp.zeros((1, HWp), jnp.float32)
        for dy in range(-P, P + 1):
            acc_dy = jnp.zeros((1, HWp), jnp.float32)
            for dx in range(-P, P + 1):
                sh = (-(dy * W + dx)) % HWp
                if sh:
                    rm = pltpu.roll(mean_flat, sh, axis=1)
                    rx = pltpu.roll(max_flat, sh, axis=1)
                else:
                    rm, rx = mean_flat, max_flat
                wm = w_taps[(dy + P) * K + (dx + P)]
                wx = w_taps[K * K + (dy + P) * K + (dx + P)]
                acc_dy = acc_dy + col_mask[dx] * (wm * rm + wx * rx)
            acc = acc + row_mask[dy] * acc_dy

        # Hardsigmoid(conv + bias) = clip(x/6 + 0.5, 0, 1)
        att = jnp.clip((acc + bias) * inv6 + 0.5, 0.0, 1.0)
        att = att.astype(o_ref.dtype)  # keep the apply stage in the I/O dtype

        # ---- apply: out = att * x, channel-chunked, lane-dense stores ----
        for c0 in range(0, C, CC):
            cc = min(CC, C - c0)
            chunk = x_ref[b, pl.ds(c0, cc), :]
            o_ref[b, pl.ds(c0, cc), :] = (chunk * att).astype(o_ref.dtype)


def spatial_attention(x, weight, bias, *, block_budget_bytes=2 << 20):
    """x: (N, C, H, W); weight: (1, 2, K, K); bias: (1,). Returns (N, C, H, W)."""
    N, C, H, W = x.shape
    K = weight.shape[-1]
    assert K % 2 == 1, "kernel_size must be odd"
    HW = H * W
    HWp = max(128, ((HW + 127) // 128) * 128)  # lane-dense, multiple of 128

    x_flat = x.reshape(N, C, HW)
    if HWp != HW:
        x_flat = jnp.pad(x_flat, ((0, 0), (0, 0), (0, HWp - HW)))

    w_flat = jnp.asarray(weight, jnp.float32).reshape(-1)  # (2*K*K,)
    b_vec = jnp.asarray(bias, jnp.float32).reshape(-1)     # (1,)

    # Pack as many batch elements per grid step as fit a modest VMEM budget
    # (per-step overhead dominates at tiny shapes).
    itemsize = x.dtype.itemsize
    per_sample = C * HWp * itemsize
    bn = 1
    for cand in range(1, N + 1):
        if N % cand == 0 and 4 * cand * per_sample <= block_budget_bytes:
            bn = cand
    grid = (N // bn,)

    kernel = functools.partial(_spatial_attention_kernel, H=H, W=W, K=K)

    # 2x(in block) + 2x(out block) double buffering, plus slack for temporaries.
    vmem_limit = int(min(100 << 20, max(32 << 20, 4 * bn * per_sample + (8 << 20))))
    flops = int(N * HW * (2 * C + 4 * K * K + 16))
    bytes_accessed = int(2 * N * C * HW * itemsize + (2 * K * K + 1) * 4)

    out_flat = pl.pallas_call(
        kernel,
        out_shape=jax.ShapeDtypeStruct((N, C, HWp), x.dtype),
        grid_spec=pltpu.PrefetchScalarGridSpec(
            num_scalar_prefetch=2,
            grid=grid,
            in_specs=[pl.BlockSpec((bn, C, HWp), lambda i, w, b: (i, 0, 0))],
            out_specs=pl.BlockSpec((bn, C, HWp), lambda i, w, b: (i, 0, 0)),
        ),
        compiler_params=pltpu.CompilerParams(
            dimension_semantics=("parallel",),
            vmem_limit_bytes=vmem_limit,
        ),
        cost_estimate=pl.CostEstimate(
            flops=flops, transcendentals=0, bytes_accessed=bytes_accessed),
    )(w_flat, b_vec, x_flat)

    out = out_flat[..., :HW] if HWp != HW else out_flat
    return out.reshape(N, C, H, W)


def spatial_attention_reference(x, weight, bias):
    f = jnp.concatenate(
        [jnp.mean(x, axis=1, keepdims=True),
         jnp.max(x, axis=1, keepdims=True)], axis=1)
    pad = weight.shape[-1] // 2
    conv = jax.lax.conv_general_dilated(
        f, weight, window_strides=(1, 1), padding=((pad, pad), (pad, pad)),
        dimension_numbers=("NCHW", "OIHW", "NCHW"))
    conv = conv + bias.reshape(1, 1, 1, 1)
    att = jnp.clip(conv / 6.0 + 0.5, 0.0, 1.0)  # Hardsigmoid
    return att * x


if __name__ == "__main__":
    key = jax.random.PRNGKey(0)
    kx, kw, kb = jax.random.split(key, 3)

    N, C, H, W = 2, 4, 16, 16
    K = 7
    x = jax.random.normal(kx, (N, C, H, W), dtype=jnp.float32)

    # Deterministic Conv2d(2, 1, 7) params (PyTorch-style uniform init bound).
    fan_in = 2 * K * K
    bound = 1.0 / np.sqrt(fan_in)
    weight = jax.random.uniform(kw, (1, 2, K, K), jnp.float32, -bound, bound)
    bias = jax.random.uniform(kb, (1,), jnp.float32, -bound, bound)

    out = spatial_attention(x, weight, bias)
    out = jax.block_until_ready(out)

    ref = spatial_attention_reference(x, weight, bias)
    np.testing.assert_allclose(np.asarray(out), np.asarray(ref),
                               rtol=1e-4, atol=1e-4)
    print("KERNEL_OK")
</pallas_src>

<mosaic_0001>
module attributes {stable_mosaic.version = 11 : i64} {
  func.func @_spatial_attention_kernel(%arg0: i32, %arg1: memref<98xf32, #tpu.memory_space<smem>>, %arg2: memref<1xf32, #tpu.memory_space<smem>>, %arg3: memref<2x4x256xf32, #tpu.memory_space<vmem>>, %arg4: memref<2x4x256xf32, #tpu.memory_space<vmem>>) attributes {dimension_semantics = [#tpu.dimension_semantics<parallel>], iteration_bounds = array<i64: 1>, scalar_prefetch = 2 : i64, scratch_operands = 0 : i64, tpu.core_type = #tpu.core_type<tc>, window_params = [{transform_indices = @transform_0, window_bounds = array<i64: 2, 4, 256>}, {transform_indices = @transform_1, window_bounds = array<i64: 2, 4, 256>}]} {
    %c0 = arith.constant 0 : index
    %0 = memref.load %arg1[%c0] : memref<98xf32, #tpu.memory_space<smem>>
    %c1 = arith.constant 1 : index
    %1 = memref.load %arg1[%c1] : memref<98xf32, #tpu.memory_space<smem>>
    %c2 = arith.constant 2 : index
    %2 = memref.load %arg1[%c2] : memref<98xf32, #tpu.memory_space<smem>>
    %c3 = arith.constant 3 : index
    %3 = memref.load %arg1[%c3] : memref<98xf32, #tpu.memory_space<smem>>
    %c4 = arith.constant 4 : index
    %4 = memref.load %arg1[%c4] : memref<98xf32, #tpu.memory_space<smem>>
    %c5 = arith.constant 5 : index
    %5 = memref.load %arg1[%c5] : memref<98xf32, #tpu.memory_space<smem>>
    %c6 = arith.constant 6 : index
    %6 = memref.load %arg1[%c6] : memref<98xf32, #tpu.memory_space<smem>>
    %c7 = arith.constant 7 : index
    %7 = memref.load %arg1[%c7] : memref<98xf32, #tpu.memory_space<smem>>
    %c8 = arith.constant 8 : index
    %8 = memref.load %arg1[%c8] : memref<98xf32, #tpu.memory_space<smem>>
    %c9 = arith.constant 9 : index
    %9 = memref.load %arg1[%c9] : memref<98xf32, #tpu.memory_space<smem>>
    %c10 = arith.constant 10 : index
    %10 = memref.load %arg1[%c10] : memref<98xf32, #tpu.memory_space<smem>>
    %c11 = arith.constant 11 : index
    %11 = memref.load %arg1[%c11] : memref<98xf32, #tpu.memory_space<smem>>
    %c12 = arith.constant 12 : index
    %12 = memref.load %arg1[%c12] : memref<98xf32, #tpu.memory_space<smem>>
    %c13 = arith.constant 13 : index
    %13 = memref.load %arg1[%c13] : memref<98xf32, #tpu.memory_space<smem>>
    %c14 = arith.constant 14 : index
    %14 = memref.load %arg1[%c14] : memref<98xf32, #tpu.memory_space<smem>>
    %c15 = arith.constant 15 : index
    %15 = memref.load %arg1[%c15] : memref<98xf32, #tpu.memory_space<smem>>
    %c16 = arith.constant 16 : index
    %16 = memref.load %arg1[%c16] : memref<98xf32, #tpu.memory_space<smem>>
    %c17 = arith.constant 17 : index
    %17 = memref.load %arg1[%c17] : memref<98xf32, #tpu.memory_space<smem>>
    %c18 = arith.constant 18 : index
    %18 = memref.load %arg1[%c18] : memref<98xf32, #tpu.memory_space<smem>>
    %c19 = arith.constant 19 : index
    %19 = memref.load %arg1[%c19] : memref<98xf32, #tpu.memory_space<smem>>
    %c20 = arith.constant 20 : index
    %20 = memref.load %arg1[%c20] : memref<98xf32, #tpu.memory_space<smem>>
    %c21 = arith.constant 21 : index
    %21 = memref.load %arg1[%c21] : memref<98xf32, #tpu.memory_space<smem>>
    %c22 = arith.constant 22 : index
    %22 = memref.load %arg1[%c22] : memref<98xf32, #tpu.memory_space<smem>>
    %c23 = arith.constant 23 : index
    %23 = memref.load %arg1[%c23] : memref<98xf32, #tpu.memory_space<smem>>
    %c24 = arith.constant 24 : index
    %24 = memref.load %arg1[%c24] : memref<98xf32, #tpu.memory_space<smem>>
    %c25 = arith.constant 25 : index
    %25 = memref.load %arg1[%c25] : memref<98xf32, #tpu.memory_space<smem>>
    %c26 = arith.constant 26 : index
    %26 = memref.load %arg1[%c26] : memref<98xf32, #tpu.memory_space<smem>>
    %c27 = arith.constant 27 : index
    %27 = memref.load %arg1[%c27] : memref<98xf32, #tpu.memory_space<smem>>
    %c28 = arith.constant 28 : index
    %28 = memref.load %arg1[%c28] : memref<98xf32, #tpu.memory_space<smem>>
    %c29 = arith.constant 29 : index
    %29 = memref.load %arg1[%c29] : memref<98xf32, #tpu.memory_space<smem>>
    %c30 = arith.constant 30 : index
    %30 = memref.load %arg1[%c30] : memref<98xf32, #tpu.memory_space<smem>>
    %c31 = arith.constant 31 : index
    %31 = memref.load %arg1[%c31] : memref<98xf32, #tpu.memory_space<smem>>
    %c32 = arith.constant 32 : index
    %32 = memref.load %arg1[%c32] : memref<98xf32, #tpu.memory_space<smem>>
    %c33 = arith.constant 33 : index
    %33 = memref.load %arg1[%c33] : memref<98xf32, #tpu.memory_space<smem>>
    %c34 = arith.constant 34 : index
    %34 = memref.load %arg1[%c34] : memref<98xf32, #tpu.memory_space<smem>>
    %c35 = arith.constant 35 : index
    %35 = memref.load %arg1[%c35] : memref<98xf32, #tpu.memory_space<smem>>
    %c36 = arith.constant 36 : index
    %36 = memref.load %arg1[%c36] : memref<98xf32, #tpu.memory_space<smem>>
    %c37 = arith.constant 37 : index
    %37 = memref.load %arg1[%c37] : memref<98xf32, #tpu.memory_space<smem>>
    %c38 = arith.constant 38 : index
    %38 = memref.load %arg1[%c38] : memref<98xf32, #tpu.memory_space<smem>>
    %c39 = arith.constant 39 : index
    %39 = memref.load %arg1[%c39] : memref<98xf32, #tpu.memory_space<smem>>
    %c40 = arith.constant 40 : index
    %40 = memref.load %arg1[%c40] : memref<98xf32, #tpu.memory_space<smem>>
    %c41 = arith.constant 41 : index
    %41 = memref.load %arg1[%c41] : memref<98xf32, #tpu.memory_space<smem>>
    %c42 = arith.constant 42 : index
    %42 = memref.load %arg1[%c42] : memref<98xf32, #tpu.memory_space<smem>>
    %c43 = arith.constant 43 : index
    %43 = memref.load %arg1[%c43] : memref<98xf32, #tpu.memory_space<smem>>
    %c44 = arith.constant 44 : index
    %44 = memref.load %arg1[%c44] : memref<98xf32, #tpu.memory_space<smem>>
    %c45 = arith.constant 45 : index
    %45 = memref.load %arg1[%c45] : memref<98xf32, #tpu.memory_space<smem>>
    %c46 = arith.constant 46 : index
    %46 = memref.load %arg1[%c46] : memref<98xf32, #tpu.memory_space<smem>>
    %c47 = arith.constant 47 : index
    %47 = memref.load %arg1[%c47] : memref<98xf32, #tpu.memory_space<smem>>
    %c48 = arith.constant 48 : index
    %48 = memref.load %arg1[%c48] : memref<98xf32, #tpu.memory_space<smem>>
    %c49 = arith.constant 49 : index
    %49 = memref.load %arg1[%c49] : memref<98xf32, #tpu.memory_space<smem>>
    %c50 = arith.constant 50 : index
    %50 = memref.load %arg1[%c50] : memref<98xf32, #tpu.memory_space<smem>>
    %c51 = arith.constant 51 : index
    %51 = memref.load %arg1[%c51] : memref<98xf32, #tpu.memory_space<smem>>
    %c52 = arith.constant 52 : index
    %52 = memref.load %arg1[%c52] : memref<98xf32, #tpu.memory_space<smem>>
    %c53 = arith.constant 53 : index
    %53 = memref.load %arg1[%c53] : memref<98xf32, #tpu.memory_space<smem>>
    %c54 = arith.constant 54 : index
    %54 = memref.load %arg1[%c54] : memref<98xf32, #tpu.memory_space<smem>>
    %c55 = arith.constant 55 : index
    %55 = memref.load %arg1[%c55] : memref<98xf32, #tpu.memory_space<smem>>
    %c56 = arith.constant 56 : index
    %56 = memref.load %arg1[%c56] : memref<98xf32, #tpu.memory_space<smem>>
    %c57 = arith.constant 57 : index
    %57 = memref.load %arg1[%c57] : memref<98xf32, #tpu.memory_space<smem>>
    %c58 = arith.constant 58 : index
    %58 = memref.load %arg1[%c58] : memref<98xf32, #tpu.memory_space<smem>>
    %c59 = arith.constant 59 : index
    %59 = memref.load %arg1[%c59] : memref<98xf32, #tpu.memory_space<smem>>
    %c60 = arith.constant 60 : index
    %60 = memref.load %arg1[%c60] : memref<98xf32, #tpu.memory_space<smem>>
    %c61 = arith.constant 61 : index
    %61 = memref.load %arg1[%c61] : memref<98xf32, #tpu.memory_space<smem>>
    %c62 = arith.constant 62 : index
    %62 = memref.load %arg1[%c62] : memref<98xf32, #tpu.memory_space<smem>>
    %c63 = arith.constant 63 : index
    %63 = memref.load %arg1[%c63] : memref<98xf32, #tpu.memory_space<smem>>
    %c64 = arith.constant 64 : index
    %64 = memref.load %arg1[%c64] : memref<98xf32, #tpu.memory_space<smem>>
    %c65 = arith.constant 65 : index
    %65 = memref.load %arg1[%c65] : memref<98xf32, #tpu.memory_space<smem>>
    %c66 = arith.constant 66 : index
    %66 = memref.load %arg1[%c66] : memref<98xf32, #tpu.memory_space<smem>>
    %c67 = arith.constant 67 : index
    %67 = memref.load %arg1[%c67] : memref<98xf32, #tpu.memory_space<smem>>
    %c68 = arith.constant 68 : index
    %68 = memref.load %arg1[%c68] : memref<98xf32, #tpu.memory_space<smem>>
    %c69 = arith.constant 69 : index
    %69 = memref.load %arg1[%c69] : memref<98xf32, #tpu.memory_space<smem>>
    %c70 = arith.constant 70 : index
    %70 = memref.load %arg1[%c70] : memref<98xf32, #tpu.memory_space<smem>>
    %c71 = arith.constant 71 : index
    %71 = memref.load %arg1[%c71] : memref<98xf32, #tpu.memory_space<smem>>
    %c72 = arith.constant 72 : index
    %72 = memref.load %arg1[%c72] : memref<98xf32, #tpu.memory_space<smem>>
    %c73 = arith.constant 73 : index
    %73 = memref.load %arg1[%c73] : memref<98xf32, #tpu.memory_space<smem>>
    %c74 = arith.constant 74 : index
    %74 = memref.load %arg1[%c74] : memref<98xf32, #tpu.memory_space<smem>>
    %c75 = arith.constant 75 : index
    %75 = memref.load %arg1[%c75] : memref<98xf32, #tpu.memory_space<smem>>
    %c76 = arith.constant 76 : index
    %76 = memref.load %arg1[%c76] : memref<98xf32, #tpu.memory_space<smem>>
    %c77 = arith.constant 77 : index
    %77 = memref.load %arg1[%c77] : memref<98xf32, #tpu.memory_space<smem>>
    %c78 = arith.constant 78 : index
    %78 = memref.load %arg1[%c78] : memref<98xf32, #tpu.memory_space<smem>>
    %c79 = arith.constant 79 : index
    %79 = memref.load %arg1[%c79] : memref<98xf32, #tpu.memory_space<smem>>
    %c80 = arith.constant 80 : index
    %80 = memref.load %arg1[%c80] : memref<98xf32, #tpu.memory_space<smem>>
    %c81 = arith.constant 81 : index
    %81 = memref.load %arg1[%c81] : memref<98xf32, #tpu.memory_space<smem>>
    %c82 = arith.constant 82 : index
    %82 = memref.load %arg1[%c82] : memref<98xf32, #tpu.memory_space<smem>>
    %c83 = arith.constant 83 : index
    %83 = memref.load %arg1[%c83] : memref<98xf32, #tpu.memory_space<smem>>
    %c84 = arith.constant 84 : index
    %84 = memref.load %arg1[%c84] : memref<98xf32, #tpu.memory_space<smem>>
    %c85 = arith.constant 85 : index
    %85 = memref.load %arg1[%c85] : memref<98xf32, #tpu.memory_space<smem>>
    %c86 = arith.constant 86 : index
    %86 = memref.load %arg1[%c86] : memref<98xf32, #tpu.memory_space<smem>>
    %c87 = arith.constant 87 : index
    %87 = memref.load %arg1[%c87] : memref<98xf32, #tpu.memory_space<smem>>
    %c88 = arith.constant 88 : index
    %88 = memref.load %arg1[%c88] : memref<98xf32, #tpu.memory_space<smem>>
    %c89 = arith.constant 89 : index
    %89 = memref.load %arg1[%c89] : memref<98xf32, #tpu.memory_space<smem>>
    %c90 = arith.constant 90 : index
    %90 = memref.load %arg1[%c90] : memref<98xf32, #tpu.memory_space<smem>>
    %c91 = arith.constant 91 : index
    %91 = memref.load %arg1[%c91] : memref<98xf32, #tpu.memory_space<smem>>
    %c92 = arith.constant 92 : index
    %92 = memref.load %arg1[%c92] : memref<98xf32, #tpu.memory_space<smem>>
    %c93 = arith.constant 93 : index
    %93 = memref.load %arg1[%c93] : memref<98xf32, #tpu.memory_space<smem>>
    %c94 = arith.constant 94 : index
    %94 = memref.load %arg1[%c94] : memref<98xf32, #tpu.memory_space<smem>>
    %c95 = arith.constant 95 : index
    %95 = memref.load %arg1[%c95] : memref<98xf32, #tpu.memory_space<smem>>
    %c96 = arith.constant 96 : index
    %96 = memref.load %arg1[%c96] : memref<98xf32, #tpu.memory_space<smem>>
    %c97 = arith.constant 97 : index
    %97 = memref.load %arg1[%c97] : memref<98xf32, #tpu.memory_space<smem>>
    %c0_0 = arith.constant 0 : index
    %98 = memref.load %arg2[%c0_0] : memref<1xf32, #tpu.memory_space<smem>>
    %99 = tpu.iota {dimensions = array<i32: 1>} : vector<1x256xi32>
    %c0_i32 = arith.constant 0 : i32
    %100 = vector.broadcast %c0_i32 : i32 to vector<1x256xi32>
    %c16_i32 = arith.constant 16 : i32
    %101 = vector.broadcast %c16_i32 : i32 to vector<1x256xi32>
    %102 = arith.cmpi sge, %99, %101 : vector<1x256xi32>
    %103 = arith.extui %102 : vector<1x256xi1> to vector<1x256xi32>
    %104 = arith.addi %100, %103 : vector<1x256xi32>
    %c32_i32 = arith.constant 32 : i32
    %105 = vector.broadcast %c32_i32 : i32 to vector<1x256xi32>
    %106 = arith.cmpi sge, %99, %105 : vector<1x256xi32>
    %107 = arith.extui %106 : vector<1x256xi1> to vector<1x256xi32>
    %108 = arith.addi %104, %107 : vector<1x256xi32>
    %c48_i32 = arith.constant 48 : i32
    %109 = vector.broadcast %c48_i32 : i32 to vector<1x256xi32>
    %110 = arith.cmpi sge, %99, %109 : vector<1x256xi32>
    %111 = arith.extui %110 : vector<1x256xi1> to vector<1x256xi32>
    %112 = arith.addi %108, %111 : vector<1x256xi32>
    %c64_i32 = arith.constant 64 : i32
    %113 = vector.broadcast %c64_i32 : i32 to vector<1x256xi32>
    %114 = arith.cmpi sge, %99, %113 : vector<1x256xi32>
    %115 = arith.extui %114 : vector<1x256xi1> to vector<1x256xi32>
    %116 = arith.addi %112, %115 : vector<1x256xi32>
    %c80_i32 = arith.constant 80 : i32
    %117 = vector.broadcast %c80_i32 : i32 to vector<1x256xi32>
    %118 = arith.cmpi sge, %99, %117 : vector<1x256xi32>
    %119 = arith.extui %118 : vector<1x256xi1> to vector<1x256xi32>
    %120 = arith.addi %116, %119 : vector<1x256xi32>
    %c96_i32 = arith.constant 96 : i32
    %121 = vector.broadcast %c96_i32 : i32 to vector<1x256xi32>
    %122 = arith.cmpi sge, %99, %121 : vector<1x256xi32>
    %123 = arith.extui %122 : vector<1x256xi1> to vector<1x256xi32>
    %124 = arith.addi %120, %123 : vector<1x256xi32>
    %c112_i32 = arith.constant 112 : i32
    %125 = vector.broadcast %c112_i32 : i32 to vector<1x256xi32>
    %126 = arith.cmpi sge, %99, %125 : vector<1x256xi32>
    %127 = arith.extui %126 : vector<1x256xi1> to vector<1x256xi32>
    %128 = arith.addi %124, %127 : vector<1x256xi32>
    %c128_i32 = arith.constant 128 : i32
    %129 = vector.broadcast %c128_i32 : i32 to vector<1x256xi32>
    %130 = arith.cmpi sge, %99, %129 : vector<1x256xi32>
    %131 = arith.extui %130 : vector<1x256xi1> to vector<1x256xi32>
    %132 = arith.addi %128, %131 : vector<1x256xi32>
    %c144_i32 = arith.constant 144 : i32
    %133 = vector.broadcast %c144_i32 : i32 to vector<1x256xi32>
    %134 = arith.cmpi sge, %99, %133 : vector<1x256xi32>
    %135 = arith.extui %134 : vector<1x256xi1> to vector<1x256xi32>
    %136 = arith.addi %132, %135 : vector<1x256xi32>
    %c160_i32 = arith.constant 160 : i32
    %137 = vector.broadcast %c160_i32 : i32 to vector<1x256xi32>
    %138 = arith.cmpi sge, %99, %137 : vector<1x256xi32>
    %139 = arith.extui %138 : vector<1x256xi1> to vector<1x256xi32>
    %140 = arith.addi %136, %139 : vector<1x256xi32>
    %c176_i32 = arith.constant 176 : i32
    %141 = vector.broadcast %c176_i32 : i32 to vector<1x256xi32>
    %142 = arith.cmpi sge, %99, %141 : vector<1x256xi32>
    %143 = arith.extui %142 : vector<1x256xi1> to vector<1x256xi32>
    %144 = arith.addi %140, %143 : vector<1x256xi32>
    %c192_i32 = arith.constant 192 : i32
    %145 = vector.broadcast %c192_i32 : i32 to vector<1x256xi32>
    %146 = arith.cmpi sge, %99, %145 : vector<1x256xi32>
    %147 = arith.extui %146 : vector<1x256xi1> to vector<1x256xi32>
    %148 = arith.addi %144, %147 : vector<1x256xi32>
    %c208_i32 = arith.constant 208 : i32
    %149 = vector.broadcast %c208_i32 : i32 to vector<1x256xi32>
    %150 = arith.cmpi sge, %99, %149 : vector<1x256xi32>
    %151 = arith.extui %150 : vector<1x256xi1> to vector<1x256xi32>
    %152 = arith.addi %148, %151 : vector<1x256xi32>
    %c224_i32 = arith.constant 224 : i32
    %153 = vector.broadcast %c224_i32 : i32 to vector<1x256xi32>
    %154 = arith.cmpi sge, %99, %153 : vector<1x256xi32>
    %155 = arith.extui %154 : vector<1x256xi1> to vector<1x256xi32>
    %156 = arith.addi %152, %155 : vector<1x256xi32>
    %c240_i32 = arith.constant 240 : i32
    %157 = vector.broadcast %c240_i32 : i32 to vector<1x256xi32>
    %158 = arith.cmpi sge, %99, %157 : vector<1x256xi32>
    %159 = arith.extui %158 : vector<1x256xi1> to vector<1x256xi32>
    %160 = arith.addi %156, %159 : vector<1x256xi32>
    %c16_i32_1 = arith.constant 16 : i32
    %161 = vector.broadcast %c16_i32_1 : i32 to vector<1x256xi32>
    %162 = arith.muli %161, %160 : vector<1x256xi32>
    %163 = arith.subi %99, %162 : vector<1x256xi32>
    %c48_i32_2 = arith.constant 48 : i32
    %164 = vector.broadcast %c48_i32_2 : i32 to vector<1x256xi32>
    %165 = arith.cmpi sge, %99, %164 : vector<1x256xi32>
    %c256_i32 = arith.constant 256 : i32
    %166 = vector.broadcast %c256_i32 : i32 to vector<1x256xi32>
    %167 = arith.cmpi slt, %99, %166 : vector<1x256xi32>
    %168 = arith.andi %165, %167 : vector<1x256xi1>
    %169 = arith.extui %168 : vector<1x256xi1> to vector<1x256xi32>
    %170 = arith.sitofp %169 : vector<1x256xi32> to vector<1x256xf32>
    %c-3_i32 = arith.constant -3 : i32
    %171 = vector.broadcast %c-3_i32 : i32 to vector<1x256xi32>
    %172 = arith.addi %163, %171 : vector<1x256xi32>
    %c0_i32_3 = arith.constant 0 : i32
    %173 = vector.broadcast %c0_i32_3 : i32 to vector<1x256xi32>
    %174 = arith.cmpi sge, %172, %173 : vector<1x256xi32>
    %c-3_i32_4 = arith.constant -3 : i32
    %175 = vector.broadcast %c-3_i32_4 : i32 to vector<1x256xi32>
    %176 = arith.addi %163, %175 : vector<1x256xi32>
    %c16_i32_5 = arith.constant 16 : i32
    %177 = vector.broadcast %c16_i32_5 : i32 to vector<1x256xi32>
    %178 = arith.cmpi slt, %176, %177 : vector<1x256xi32>
    %179 = arith.andi %174, %178 : vector<1x256xi1>
    %180 = arith.extui %179 : vector<1x256xi1> to vector<1x256xi32>
    %181 = arith.sitofp %180 : vector<1x256xi32> to vector<1x256xf32>
    %c32_i32_6 = arith.constant 32 : i32
    %182 = vector.broadcast %c32_i32_6 : i32 to vector<1x256xi32>
    %183 = arith.cmpi sge, %99, %182 : vector<1x256xi32>
    %c256_i32_7 = arith.constant 256 : i32
    %184 = vector.broadcast %c256_i32_7 : i32 to vector<1x256xi32>
    %185 = arith.cmpi slt, %99, %184 : vector<1x256xi32>
    %186 = arith.andi %183, %185 : vector<1x256xi1>
    %187 = arith.extui %186 : vector<1x256xi1> to vector<1x256xi32>
    %188 = arith.sitofp %187 : vector<1x256xi32> to vector<1x256xf32>
    %c-2_i32 = arith.constant -2 : i32
    %189 = vector.broadcast %c-2_i32 : i32 to vector<1x256xi32>
    %190 = arith.addi %163, %189 : vector<1x256xi32>
    %c0_i32_8 = arith.constant 0 : i32
    %191 = vector.broadcast %c0_i32_8 : i32 to vector<1x256xi32>
    %192 = arith.cmpi sge, %190, %191 : vector<1x256xi32>
    %c-2_i32_9 = arith.constant -2 : i32
    %193 = vector.broadcast %c-2_i32_9 : i32 to vector<1x256xi32>
    %194 = arith.addi %163, %193 : vector<1x256xi32>
    %c16_i32_10 = arith.constant 16 : i32
    %195 = vector.broadcast %c16_i32_10 : i32 to vector<1x256xi32>
    %196 = arith.cmpi slt, %194, %195 : vector<1x256xi32>
    %197 = arith.andi %192, %196 : vector<1x256xi1>
    %198 = arith.extui %197 : vector<1x256xi1> to vector<1x256xi32>
    %199 = arith.sitofp %198 : vector<1x256xi32> to vector<1x256xf32>
    %c16_i32_11 = arith.constant 16 : i32
    %200 = vector.broadcast %c16_i32_11 : i32 to vector<1x256xi32>
    %201 = arith.cmpi sge, %99, %200 : vector<1x256xi32>
    %c256_i32_12 = arith.constant 256 : i32
    %202 = vector.broadcast %c256_i32_12 : i32 to vector<1x256xi32>
    %203 = arith.cmpi slt, %99, %202 : vector<1x256xi32>
    %204 = arith.andi %201, %203 : vector<1x256xi1>
    %205 = arith.extui %204 : vector<1x256xi1> to vector<1x256xi32>
    %206 = arith.sitofp %205 : vector<1x256xi32> to vector<1x256xf32>
    %c-1_i32 = arith.constant -1 : i32
    %207 = vector.broadcast %c-1_i32 : i32 to vector<1x256xi32>
    %208 = arith.addi %163, %207 : vector<1x256xi32>
    %c0_i32_13 = arith.constant 0 : i32
    %209 = vector.broadcast %c0_i32_13 : i32 to vector<1x256xi32>
    %210 = arith.cmpi sge, %208, %209 : vector<1x256xi32>
    %c-1_i32_14 = arith.constant -1 : i32
    %211 = vector.broadcast %c-1_i32_14 : i32 to vector<1x256xi32>
    %212 = arith.addi %163, %211 : vector<1x256xi32>
    %c16_i32_15 = arith.constant 16 : i32
    %213 = vector.broadcast %c16_i32_15 : i32 to vector<1x256xi32>
    %214 = arith.cmpi slt, %212, %213 : vector<1x256xi32>
    %215 = arith.andi %210, %214 : vector<1x256xi1>
    %216 = arith.extui %215 : vector<1x256xi1> to vector<1x256xi32>
    %217 = arith.sitofp %216 : vector<1x256xi32> to vector<1x256xf32>
    %c0_i32_16 = arith.constant 0 : i32
    %218 = vector.broadcast %c0_i32_16 : i32 to vector<1x256xi32>
    %219 = arith.cmpi sge, %99, %218 : vector<1x256xi32>
    %c256_i32_17 = arith.constant 256 : i32
    %220 = vector.broadcast %c256_i32_17 : i32 to vector<1x256xi32>
    %221 = arith.cmpi slt, %99, %220 : vector<1x256xi32>
    %222 = arith.andi %219, %221 : vector<1x256xi1>
    %223 = arith.extui %222 : vector<1x256xi1> to vector<1x256xi32>
    %224 = arith.sitofp %223 : vector<1x256xi32> to vector<1x256xf32>
    %c0_i32_18 = arith.constant 0 : i32
    %225 = vector.broadcast %c0_i32_18 : i32 to vector<1x256xi32>
    %226 = arith.addi %163, %225 : vector<1x256xi32>
    %c0_i32_19 = arith.constant 0 : i32
    %227 = vector.broadcast %c0_i32_19 : i32 to vector<1x256xi32>
    %228 = arith.cmpi sge, %226, %227 : vector<1x256xi32>
    %c0_i32_20 = arith.constant 0 : i32
    %229 = vector.broadcast %c0_i32_20 : i32 to vector<1x256xi32>
    %230 = arith.addi %163, %229 : vector<1x256xi32>
    %c16_i32_21 = arith.constant 16 : i32
    %231 = vector.broadcast %c16_i32_21 : i32 to vector<1x256xi32>
    %232 = arith.cmpi slt, %230, %231 : vector<1x256xi32>
    %233 = arith.andi %228, %232 : vector<1x256xi1>
    %234 = arith.extui %233 : vector<1x256xi1> to vector<1x256xi32>
    %235 = arith.sitofp %234 : vector<1x256xi32> to vector<1x256xf32>
    %c0_i32_22 = arith.constant 0 : i32
    %236 = vector.broadcast %c0_i32_22 : i32 to vector<1x256xi32>
    %237 = arith.cmpi sge, %99, %236 : vector<1x256xi32>
    %c240_i32_23 = arith.constant 240 : i32
    %238 = vector.broadcast %c240_i32_23 : i32 to vector<1x256xi32>
    %239 = arith.cmpi slt, %99, %238 : vector<1x256xi32>
    %240 = arith.andi %237, %239 : vector<1x256xi1>
    %241 = arith.extui %240 : vector<1x256xi1> to vector<1x256xi32>
    %242 = arith.sitofp %241 : vector<1x256xi32> to vector<1x256xf32>
    %c1_i32 = arith.constant 1 : i32
    %243 = vector.broadcast %c1_i32 : i32 to vector<1x256xi32>
    %244 = arith.addi %163, %243 : vector<1x256xi32>
    %c0_i32_24 = arith.constant 0 : i32
    %245 = vector.broadcast %c0_i32_24 : i32 to vector<1x256xi32>
    %246 = arith.cmpi sge, %244, %245 : vector<1x256xi32>
    %c1_i32_25 = arith.constant 1 : i32
    %247 = vector.broadcast %c1_i32_25 : i32 to vector<1x256xi32>
    %248 = arith.addi %163, %247 : vector<1x256xi32>
    %c16_i32_26 = arith.constant 16 : i32
    %249 = vector.broadcast %c16_i32_26 : i32 to vector<1x256xi32>
    %250 = arith.cmpi slt, %248, %249 : vector<1x256xi32>
    %251 = arith.andi %246, %250 : vector<1x256xi1>
    %252 = arith.extui %251 : vector<1x256xi1> to vector<1x256xi32>
    %253 = arith.sitofp %252 : vector<1x256xi32> to vector<1x256xf32>
    %c0_i32_27 = arith.constant 0 : i32
    %254 = vector.broadcast %c0_i32_27 : i32 to vector<1x256xi32>
    %255 = arith.cmpi sge, %99, %254 : vector<1x256xi32>
    %c224_i32_28 = arith.constant 224 : i32
    %256 = vector.broadcast %c224_i32_28 : i32 to vector<1x256xi32>
    %257 = arith.cmpi slt, %99, %256 : vector<1x256xi32>
    %258 = arith.andi %255, %257 : vector<1x256xi1>
    %259 = arith.extui %258 : vector<1x256xi1> to vector<1x256xi32>
    %260 = arith.sitofp %259 : vector<1x256xi32> to vector<1x256xf32>
    %c2_i32 = arith.constant 2 : i32
    %261 = vector.broadcast %c2_i32 : i32 to vector<1x256xi32>
    %262 = arith.addi %163, %261 : vector<1x256xi32>
    %c0_i32_29 = arith.constant 0 : i32
    %263 = vector.broadcast %c0_i32_29 : i32 to vector<1x256xi32>
    %264 = arith.cmpi sge, %262, %263 : vector<1x256xi32>
    %c2_i32_30 = arith.constant 2 : i32
    %265 = vector.broadcast %c2_i32_30 : i32 to vector<1x256xi32>
    %266 = arith.addi %163, %265 : vector<1x256xi32>
    %c16_i32_31 = arith.constant 16 : i32
    %267 = vector.broadcast %c16_i32_31 : i32 to vector<1x256xi32>
    %268 = arith.cmpi slt, %266, %267 : vector<1x256xi32>
    %269 = arith.andi %264, %268 : vector<1x256xi1>
    %270 = arith.extui %269 : vector<1x256xi1> to vector<1x256xi32>
    %271 = arith.sitofp %270 : vector<1x256xi32> to vector<1x256xf32>
    %c0_i32_32 = arith.constant 0 : i32
    %272 = vector.broadcast %c0_i32_32 : i32 to vector<1x256xi32>
    %273 = arith.cmpi sge, %99, %272 : vector<1x256xi32>
    %c208_i32_33 = arith.constant 208 : i32
    %274 = vector.broadcast %c208_i32_33 : i32 to vector<1x256xi32>
    %275 = arith.cmpi slt, %99, %274 : vector<1x256xi32>
    %276 = arith.andi %273, %275 : vector<1x256xi1>
    %277 = arith.extui %276 : vector<1x256xi1> to vector<1x256xi32>
    %278 = arith.sitofp %277 : vector<1x256xi32> to vector<1x256xf32>
    %c3_i32 = arith.constant 3 : i32
    %279 = vector.broadcast %c3_i32 : i32 to vector<1x256xi32>
    %280 = arith.addi %163, %279 : vector<1x256xi32>
    %c0_i32_34 = arith.constant 0 : i32
    %281 = vector.broadcast %c0_i32_34 : i32 to vector<1x256xi32>
    %282 = arith.cmpi sge, %280, %281 : vector<1x256xi32>
    %c3_i32_35 = arith.constant 3 : i32
    %283 = vector.broadcast %c3_i32_35 : i32 to vector<1x256xi32>
    %284 = arith.addi %163, %283 : vector<1x256xi32>
    %c16_i32_36 = arith.constant 16 : i32
    %285 = vector.broadcast %c16_i32_36 : i32 to vector<1x256xi32>
    %286 = arith.cmpi slt, %284, %285 : vector<1x256xi32>
    %287 = arith.andi %282, %286 : vector<1x256xi1>
    %288 = arith.extui %287 : vector<1x256xi1> to vector<1x256xi32>
    %289 = arith.sitofp %288 : vector<1x256xi32> to vector<1x256xf32>
    %cst = arith.constant 0.000000e+00 : f32
    %290 = vector.broadcast %cst : f32 to vector<1x256xf32>
    %cst_37 = arith.constant 0xFF800000 : f32
    %291 = vector.broadcast %cst_37 : f32 to vector<1x256xf32>
    %c0_38 = arith.constant 0 : index
    %c0_39 = arith.constant 0 : index
    %c0_40 = arith.constant 0 : index
    %292 = vector.load %arg3[%c0_38, %c0_39, %c0_40] : memref<2x4x256xf32, #tpu.memory_space<vmem>>, vector<1x4x256xf32>
    %293 = vector.shape_cast %292 : vector<1x4x256xf32> to vector<4x256xf32>
    %cst_41 = arith.constant dense<0.000000e+00> : vector<256xf32>
    %294 = vector.multi_reduction <add>, %293, %cst_41 [0] : vector<4x256xf32> to vector<256xf32>
    %295 = vector.shape_cast %294 : vector<256xf32> to vector<1x256xf32>
    %296 = arith.addf %290, %295 : vector<1x256xf32>
    %cst_42 = arith.constant dense<0xFF800000> : vector<256xf32>
    %297 = vector.multi_reduction <maximumf>, %293, %cst_42 [0] : vector<4x256xf32> to vector<256xf32>
    %298 = vector.shape_cast %297 : vector<256xf32> to vector<1x256xf32>
    %299 = arith.maximumf %291, %298 : vector<1x256xf32>
    %cst_43 = arith.constant 2.500000e-01 : f32
    %300 = vector.broadcast %cst_43 : f32 to vector<1x256xf32>
    %301 = arith.mulf %296, %300 : vector<1x256xf32>
    %cst_44 = arith.constant 0.000000e+00 : f32
    %302 = vector.broadcast %cst_44 : f32 to vector<1x256xf32>
    %cst_45 = arith.constant 0.000000e+00 : f32
    %303 = vector.broadcast %cst_45 : f32 to vector<1x256xf32>
    %c51_i32 = arith.constant 51 : i32
    %304 = tpu.dynamic_rotate %301 by %c51_i32 dim 1 : vector<1x256xf32>, i32 -> vector<1x256xf32>
    %c51_i32_46 = arith.constant 51 : i32
    %305 = tpu.dynamic_rotate %299 by %c51_i32_46 dim 1 : vector<1x256xf32>, i32 -> vector<1x256xf32>
    %306 = vector.broadcast %0 : f32 to vector<1x256xf32>
    %307 = arith.mulf %306, %304 : vector<1x256xf32>
    %308 = vector.broadcast %49 : f32 to vector<1x256xf32>
    %309 = arith.mulf %308, %305 : vector<1x256xf32>
    %310 = arith.addf %307, %309 : vector<1x256xf32>
    %311 = arith.mulf %181, %310 : vector<1x256xf32>
    %312 = arith.addf %303, %311 : vector<1x256xf32>
    %c50_i32 = arith.constant 50 : i32
    %313 = tpu.dynamic_rotate %301 by %c50_i32 dim 1 : vector<1x256xf32>, i32 -> vector<1x256xf32>
    %c50_i32_47 = arith.constant 50 : i32
    %314 = tpu.dynamic_rotate %299 by %c50_i32_47 dim 1 : vector<1x256xf32>, i32 -> vector<1x256xf32>
    %315 = vector.broadcast %1 : f32 to vector<1x256xf32>
    %316 = arith.mulf %315, %313 : vector<1x256xf32>
    %317 = vector.broadcast %50 : f32 to vector<1x256xf32>
    %318 = arith.mulf %317, %314 : vector<1x256xf32>
    %319 = arith.addf %316, %318 : vector<1x256xf32>
    %320 = arith.mulf %199, %319 : vector<1x256xf32>
    %321 = arith.addf %312, %320 : vector<1x256xf32>
    %c49_i32 = arith.constant 49 : i32
    %322 = tpu.dynamic_rotate %301 by %c49_i32 dim 1 : vector<1x256xf32>, i32 -> vector<1x256xf32>
    %c49_i32_48 = arith.constant 49 : i32
    %323 = tpu.dynamic_rotate %299 by %c49_i32_48 dim 1 : vector<1x256xf32>, i32 -> vector<1x256xf32>
    %324 = vector.broadcast %2 : f32 to vector<1x256xf32>
    %325 = arith.mulf %324, %322 : vector<1x256xf32>
    %326 = vector.broadcast %51 : f32 to vector<1x256xf32>
    %327 = arith.mulf %326, %323 : vector<1x256xf32>
    %328 = arith.addf %325, %327 : vector<1x256xf32>
    %329 = arith.mulf %217, %328 : vector<1x256xf32>
    %330 = arith.addf %321, %329 : vector<1x256xf32>
    %c48_i32_49 = arith.constant 48 : i32
    %331 = tpu.dynamic_rotate %301 by %c48_i32_49 dim 1 : vector<1x256xf32>, i32 -> vector<1x256xf32>
    %c48_i32_50 = arith.constant 48 : i32
    %332 = tpu.dynamic_rotate %299 by %c48_i32_50 dim 1 : vector<1x256xf32>, i32 -> vector<1x256xf32>
    %333 = vector.broadcast %3 : f32 to vector<1x256xf32>
    %334 = arith.mulf %333, %331 : vector<1x256xf32>
    %335 = vector.broadcast %52 : f32 to vector<1x256xf32>
    %336 = arith.mulf %335, %332 : vector<1x256xf32>
    %337 = arith.addf %334, %336 : vector<1x256xf32>
    %338 = arith.mulf %235, %337 : vector<1x256xf32>
    %339 = arith.addf %330, %338 : vector<1x256xf32>
    %c47_i32 = arith.constant 47 : i32
    %340 = tpu.dynamic_rotate %301 by %c47_i32 dim 1 : vector<1x256xf32>, i32 -> vector<1x256xf32>
    %c47_i32_51 = arith.constant 47 : i32
    %341 = tpu.dynamic_rotate %299 by %c47_i32_51 dim 1 : vector<1x256xf32>, i32 -> vector<1x256xf32>
    %342 = vector.broadcast %4 : f32 to vector<1x256xf32>
    %343 = arith.mulf %342, %340 : vector<1x256xf32>
    %344 = vector.broadcast %53 : f32 to vector<1x256xf32>
    %345 = arith.mulf %344, %341 : vector<1x256xf32>
    %346 = arith.addf %343, %345 : vector<1x256xf32>
    %347 = arith.mulf %253, %346 : vector<1x256xf32>
    %348 = arith.addf %339, %347 : vector<1x256xf32>
    %c46_i32 = arith.constant 46 : i32
    %349 = tpu.dynamic_rotate %301 by %c46_i32 dim 1 : vector<1x256xf32>, i32 -> vector<1x256xf32>
    %c46_i32_52 = arith.constant 46 : i32
    %350 = tpu.dynamic_rotate %299 by %c46_i32_52 dim 1 : vector<1x256xf32>, i32 -> vector<1x256xf32>
    %351 = vector.broadcast %5 : f32 to vector<1x256xf32>
    %352 = arith.mulf %351, %349 : vector<1x256xf32>
    %353 = vector.broadcast %54 : f32 to vector<1x256xf32>
    %354 = arith.mulf %353, %350 : vector<1x256xf32>
    %355 = arith.addf %352, %354 : vector<1x256xf32>
    %356 = arith.mulf %271, %355 : vector<1x256xf32>
    %357 = arith.addf %348, %356 : vector<1x256xf32>
    %c45_i32 = arith.constant 45 : i32
    %358 = tpu.dynamic_rotate %301 by %c45_i32 dim 1 : vector<1x256xf32>, i32 -> vector<1x256xf32>
    %c45_i32_53 = arith.constant 45 : i32
    %359 = tpu.dynamic_rotate %299 by %c45_i32_53 dim 1 : vector<1x256xf32>, i32 -> vector<1x256xf32>
    %360 = vector.broadcast %6 : f32 to vector<1x256xf32>
    %361 = arith.mulf %360, %358 : vector<1x256xf32>
    %362 = vector.broadcast %55 : f32 to vector<1x256xf32>
    %363 = arith.mulf %362, %359 : vector<1x256xf32>
    %364 = arith.addf %361, %363 : vector<1x256xf32>
    %365 = arith.mulf %289, %364 : vector<1x256xf32>
    %366 = arith.addf %357, %365 : vector<1x256xf32>
    %367 = arith.mulf %170, %366 : vector<1x256xf32>
    %368 = arith.addf %302, %367 : vector<1x256xf32>
    %cst_54 = arith.constant 0.000000e+00 : f32
    %369 = vector.broadcast %cst_54 : f32 to vector<1x256xf32>
    %c35_i32 = arith.constant 35 : i32
    %370 = tpu.dynamic_rotate %301 by %c35_i32 dim 1 : vector<1x256xf32>, i32 -> vector<1x256xf32>
    %c35_i32_55 = arith.constant 35 : i32
    %371 = tpu.dynamic_rotate %299 by %c35_i32_55 dim 1 : vector<1x256xf32>, i32 -> vector<1x256xf32>
    %372 = vector.broadcast %7 : f32 to vector<1x256xf32>
    %373 = arith.mulf %372, %370 : vector<1x256xf32>
    %374 = vector.broadcast %56 : f32 to vector<1x256xf32>
    %375 = arith.mulf %374, %371 : vector<1x256xf32>
    %376 = arith.addf %373, %375 : vector<1x256xf32>
    %377 = arith.mulf %181, %376 : vector<1x256xf32>
    %378 = arith.addf %369, %377 : vector<1x256xf32>
    %c34_i32 = arith.constant 34 : i32
    %379 = tpu.dynamic_rotate %301 by %c34_i32 dim 1 : vector<1x256xf32>, i32 -> vector<1x256xf32>
    %c34_i32_56 = arith.constant 34 : i32
    %380 = tpu.dynamic_rotate %299 by %c34_i32_56 dim 1 : vector<1x256xf32>, i32 -> vector<1x256xf32>
    %381 = vector.broadcast %8 : f32 to vector<1x256xf32>
    %382 = arith.mulf %381, %379 : vector<1x256xf32>
    %383 = vector.broadcast %57 : f32 to vector<1x256xf32>
    %384 = arith.mulf %383, %380 : vector<1x256xf32>
    %385 = arith.addf %382, %384 : vector<1x256xf32>
    %386 = arith.mulf %199, %385 : vector<1x256xf32>
    %387 = arith.addf %378, %386 : vector<1x256xf32>
    %c33_i32 = arith.constant 33 : i32
    %388 = tpu.dynamic_rotate %301 by %c33_i32 dim 1 : vector<1x256xf32>, i32 -> vector<1x256xf32>
    %c33_i32_57 = arith.constant 33 : i32
    %389 = tpu.dynamic_rotate %299 by %c33_i32_57 dim 1 : vector<1x256xf32>, i32 -> vector<1x256xf32>
    %390 = vector.broadcast %9 : f32 to vector<1x256xf32>
    %391 = arith.mulf %390, %388 : vector<1x256xf32>
    %392 = vector.broadcast %58 : f32 to vector<1x256xf32>
    %393 = arith.mulf %392, %389 : vector<1x256xf32>
    %394 = arith.addf %391, %393 : vector<1x256xf32>
    %395 = arith.mulf %217, %394 : vector<1x256xf32>
    %396 = arith.addf %387, %395 : vector<1x256xf32>
    %c32_i32_58 = arith.constant 32 : i32
    %397 = tpu.dynamic_rotate %301 by %c32_i32_58 dim 1 : vector<1x256xf32>, i32 -> vector<1x256xf32>
    %c32_i32_59 = arith.constant 32 : i32
    %398 = tpu.dynamic_rotate %299 by %c32_i32_59 dim 1 : vector<1x256xf32>, i32 -> vector<1x256xf32>
    %399 = vector.broadcast %10 : f32 to vector<1x256xf32>
    %400 = arith.mulf %399, %397 : vector<1x256xf32>
    %401 = vector.broadcast %59 : f32 to vector<1x256xf32>
    %402 = arith.mulf %401, %398 : vector<1x256xf32>
    %403 = arith.addf %400, %402 : vector<1x256xf32>
    %404 = arith.mulf %235, %403 : vector<1x256xf32>
    %405 = arith.addf %396, %404 : vector<1x256xf32>
    %c31_i32 = arith.constant 31 : i32
    %406 = tpu.dynamic_rotate %301 by %c31_i32 dim 1 : vector<1x256xf32>, i32 -> vector<1x256xf32>
    %c31_i32_60 = arith.constant 31 : i32
    %407 = tpu.dynamic_rotate %299 by %c31_i32_60 dim 1 : vector<1x256xf32>, i32 -> vector<1x256xf32>
    %408 = vector.broadcast %11 : f32 to vector<1x256xf32>
    %409 = arith.mulf %408, %406 : vector<1x256xf32>
    %410 = vector.broadcast %60 : f32 to vector<1x256xf32>
    %411 = arith.mulf %410, %407 : vector<1x256xf32>
    %412 = arith.addf %409, %411 : vector<1x256xf32>
    %413 = arith.mulf %253, %412 : vector<1x256xf32>
    %414 = arith.addf %405, %413 : vector<1x256xf32>
    %c30_i32 = arith.constant 30 : i32
    %415 = tpu.dynamic_rotate %301 by %c30_i32 dim 1 : vector<1x256xf32>, i32 -> vector<1x256xf32>
    %c30_i32_61 = arith.constant 30 : i32
    %416 = tpu.dynamic_rotate %299 by %c30_i32_61 dim 1 : vector<1x256xf32>, i32 -> vector<1x256xf32>
    %417 = vector.broadcast %12 : f32 to vector<1x256xf32>
    %418 = arith.mulf %417, %415 : vector<1x256xf32>
    %419 = vector.broadcast %61 : f32 to vector<1x256xf32>
    %420 = arith.mulf %419, %416 : vector<1x256xf32>
    %421 = arith.addf %418, %420 : vector<1x256xf32>
    %422 = arith.mulf %271, %421 : vector<1x256xf32>
    %423 = arith.addf %414, %422 : vector<1x256xf32>
    %c29_i32 = arith.constant 29 : i32
    %424 = tpu.dynamic_rotate %301 by %c29_i32 dim 1 : vector<1x256xf32>, i32 -> vector<1x256xf32>
    %c29_i32_62 = arith.constant 29 : i32
    %425 = tpu.dynamic_rotate %299 by %c29_i32_62 dim 1 : vector<1x256xf32>, i32 -> vector<1x256xf32>
    %426 = vector.broadcast %13 : f32 to vector<1x256xf32>
    %427 = arith.mulf %426, %424 : vector<1x256xf32>
    %428 = vector.broadcast %62 : f32 to vector<1x256xf32>
    %429 = arith.mulf %428, %425 : vector<1x256xf32>
    %430 = arith.addf %427, %429 : vector<1x256xf32>
    %431 = arith.mulf %289, %430 : vector<1x256xf32>
    %432 = arith.addf %423, %431 : vector<1x256xf32>
    %433 = arith.mulf %188, %432 : vector<1x256xf32>
    %434 = arith.addf %368, %433 : vector<1x256xf32>
    %cst_63 = arith.constant 0.000000e+00 : f32
    %435 = vector.broadcast %cst_63 : f32 to vector<1x256xf32>
    %c19_i32 = arith.constant 19 : i32
    %436 = tpu.dynamic_rotate %301 by %c19_i32 dim 1 : vector<1x256xf32>, i32 -> vector<1x256xf32>
    %c19_i32_64 = arith.constant 19 : i32
    %437 = tpu.dynamic_rotate %299 by %c19_i32_64 dim 1 : vector<1x256xf32>, i32 -> vector<1x256xf32>
    %438 = vector.broadcast %14 : f32 to vector<1x256xf32>
    %439 = arith.mulf %438, %436 : vector<1x256xf32>
    %440 = vector.broadcast %63 : f32 to vector<1x256xf32>
    %441 = arith.mulf %440, %437 : vector<1x256xf32>
    %442 = arith.addf %439, %441 : vector<1x256xf32>
    %443 = arith.mulf %181, %442 : vector<1x256xf32>
    %444 = arith.addf %435, %443 : vector<1x256xf32>
    %c18_i32 = arith.constant 18 : i32
    %445 = tpu.dynamic_rotate %301 by %c18_i32 dim 1 : vector<1x256xf32>, i32 -> vector<1x256xf32>
    %c18_i32_65 = arith.constant 18 : i32
    %446 = tpu.dynamic_rotate %299 by %c18_i32_65 dim 1 : vector<1x256xf32>, i32 -> vector<1x256xf32>
    %447 = vector.broadcast %15 : f32 to vector<1x256xf32>
    %448 = arith.mulf %447, %445 : vector<1x256xf32>
    %449 = vector.broadcast %64 : f32 to vector<1x256xf32>
    %450 = arith.mulf %449, %446 : vector<1x256xf32>
    %451 = arith.addf %448, %450 : vector<1x256xf32>
    %452 = arith.mulf %199, %451 : vector<1x256xf32>
    %453 = arith.addf %444, %452 : vector<1x256xf32>
    %c17_i32 = arith.constant 17 : i32
    %454 = tpu.dynamic_rotate %301 by %c17_i32 dim 1 : vector<1x256xf32>, i32 -> vector<1x256xf32>
    %c17_i32_66 = arith.constant 17 : i32
    %455 = tpu.dynamic_rotate %299 by %c17_i32_66 dim 1 : vector<1x256xf32>, i32 -> vector<1x256xf32>
    %456 = vector.broadcast %16 : f32 to vector<1x256xf32>
    %457 = arith.mulf %456, %454 : vector<1x256xf32>
    %458 = vector.broadcast %65 : f32 to vector<1x256xf32>
    %459 = arith.mulf %458, %455 : vector<1x256xf32>
    %460 = arith.addf %457, %459 : vector<1x256xf32>
    %461 = arith.mulf %217, %460 : vector<1x256xf32>
    %462 = arith.addf %453, %461 : vector<1x256xf32>
    %c16_i32_67 = arith.constant 16 : i32
    %463 = tpu.dynamic_rotate %301 by %c16_i32_67 dim 1 : vector<1x256xf32>, i32 -> vector<1x256xf32>
    %c16_i32_68 = arith.constant 16 : i32
    %464 = tpu.dynamic_rotate %299 by %c16_i32_68 dim 1 : vector<1x256xf32>, i32 -> vector<1x256xf32>
    %465 = vector.broadcast %17 : f32 to vector<1x256xf32>
    %466 = arith.mulf %465, %463 : vector<1x256xf32>
    %467 = vector.broadcast %66 : f32 to vector<1x256xf32>
    %468 = arith.mulf %467, %464 : vector<1x256xf32>
    %469 = arith.addf %466, %468 : vector<1x256xf32>
    %470 = arith.mulf %235, %469 : vector<1x256xf32>
    %471 = arith.addf %462, %470 : vector<1x256xf32>
    %c15_i32 = arith.constant 15 : i32
    %472 = tpu.dynamic_rotate %301 by %c15_i32 dim 1 : vector<1x256xf32>, i32 -> vector<1x256xf32>
    %c15_i32_69 = arith.constant 15 : i32
    %473 = tpu.dynamic_rotate %299 by %c15_i32_69 dim 1 : vector<1x256xf32>, i32 -> vector<1x256xf32>
    %474 = vector.broadcast %18 : f32 to vector<1x256xf32>
    %475 = arith.mulf %474, %472 : vector<1x256xf32>
    %476 = vector.broadcast %67 : f32 to vector<1x256xf32>
    %477 = arith.mulf %476, %473 : vector<1x256xf32>
    %478 = arith.addf %475, %477 : vector<1x256xf32>
    %479 = arith.mulf %253, %478 : vector<1x256xf32>
    %480 = arith.addf %471, %479 : vector<1x256xf32>
    %c14_i32 = arith.constant 14 : i32
    %481 = tpu.dynamic_rotate %301 by %c14_i32 dim 1 : vector<1x256xf32>, i32 -> vector<1x256xf32>
    %c14_i32_70 = arith.constant 14 : i32
    %482 = tpu.dynamic_rotate %299 by %c14_i32_70 dim 1 : vector<1x256xf32>, i32 -> vector<1x256xf32>
    %483 = vector.broadcast %19 : f32 to vector<1x256xf32>
    %484 = arith.mulf %483, %481 : vector<1x256xf32>
    %485 = vector.broadcast %68 : f32 to vector<1x256xf32>
    %486 = arith.mulf %485, %482 : vector<1x256xf32>
    %487 = arith.addf %484, %486 : vector<1x256xf32>
    %488 = arith.mulf %271, %487 : vector<1x256xf32>
    %489 = arith.addf %480, %488 : vector<1x256xf32>
    %c13_i32 = arith.constant 13 : i32
    %490 = tpu.dynamic_rotate %301 by %c13_i32 dim 1 : vector<1x256xf32>, i32 -> vector<1x256xf32>
    %c13_i32_71 = arith.constant 13 : i32
    %491 = tpu.dynamic_rotate %299 by %c13_i32_71 dim 1 : vector<1x256xf32>, i32 -> vector<1x256xf32>
    %492 = vector.broadcast %20 : f32 to vector<1x256xf32>
    %493 = arith.mulf %492, %490 : vector<1x256xf32>
    %494 = vector.broadcast %69 : f32 to vector<1x256xf32>
    %495 = arith.mulf %494, %491 : vector<1x256xf32>
    %496 = arith.addf %493, %495 : vector<1x256xf32>
    %497 = arith.mulf %289, %496 : vector<1x256xf32>
    %498 = arith.addf %489, %497 : vector<1x256xf32>
    %499 = arith.mulf %206, %498 : vector<1x256xf32>
    %500 = arith.addf %434, %499 : vector<1x256xf32>
    %cst_72 = arith.constant 0.000000e+00 : f32
    %501 = vector.broadcast %cst_72 : f32 to vector<1x256xf32>
    %c3_i32_73 = arith.constant 3 : i32
    %502 = tpu.dynamic_rotate %301 by %c3_i32_73 dim 1 : vector<1x256xf32>, i32 -> vector<1x256xf32>
    %c3_i32_74 = arith.constant 3 : i32
    %503 = tpu.dynamic_rotate %299 by %c3_i32_74 dim 1 : vector<1x256xf32>, i32 -> vector<1x256xf32>
    %504 = vector.broadcast %21 : f32 to vector<1x256xf32>
    %505 = arith.mulf %504, %502 : vector<1x256xf32>
    %506 = vector.broadcast %70 : f32 to vector<1x256xf32>
    %507 = arith.mulf %506, %503 : vector<1x256xf32>
    %508 = arith.addf %505, %507 : vector<1x256xf32>
    %509 = arith.mulf %181, %508 : vector<1x256xf32>
    %510 = arith.addf %501, %509 : vector<1x256xf32>
    %c2_i32_75 = arith.constant 2 : i32
    %511 = tpu.dynamic_rotate %301 by %c2_i32_75 dim 1 : vector<1x256xf32>, i32 -> vector<1x256xf32>
    %c2_i32_76 = arith.constant 2 : i32
    %512 = tpu.dynamic_rotate %299 by %c2_i32_76 dim 1 : vector<1x256xf32>, i32 -> vector<1x256xf32>
    %513 = vector.broadcast %22 : f32 to vector<1x256xf32>
    %514 = arith.mulf %513, %511 : vector<1x256xf32>
    %515 = vector.broadcast %71 : f32 to vector<1x256xf32>
    %516 = arith.mulf %515, %512 : vector<1x256xf32>
    %517 = arith.addf %514, %516 : vector<1x256xf32>
    %518 = arith.mulf %199, %517 : vector<1x256xf32>
    %519 = arith.addf %510, %518 : vector<1x256xf32>
    %c1_i32_77 = arith.constant 1 : i32
    %520 = tpu.dynamic_rotate %301 by %c1_i32_77 dim 1 : vector<1x256xf32>, i32 -> vector<1x256xf32>
    %c1_i32_78 = arith.constant 1 : i32
    %521 = tpu.dynamic_rotate %299 by %c1_i32_78 dim 1 : vector<1x256xf32>, i32 -> vector<1x256xf32>
    %522 = vector.broadcast %23 : f32 to vector<1x256xf32>
    %523 = arith.mulf %522, %520 : vector<1x256xf32>
    %524 = vector.broadcast %72 : f32 to vector<1x256xf32>
    %525 = arith.mulf %524, %521 : vector<1x256xf32>
    %526 = arith.addf %523, %525 : vector<1x256xf32>
    %527 = arith.mulf %217, %526 : vector<1x256xf32>
    %528 = arith.addf %519, %527 : vector<1x256xf32>
    %529 = vector.broadcast %24 : f32 to vector<1x256xf32>
    %530 = arith.mulf %529, %301 : vector<1x256xf32>
    %531 = vector.broadcast %73 : f32 to vector<1x256xf32>
    %532 = arith.mulf %531, %299 : vector<1x256xf32>
    %533 = arith.addf %530, %532 : vector<1x256xf32>
    %534 = arith.mulf %235, %533 : vector<1x256xf32>
    %535 = arith.addf %528, %534 : vector<1x256xf32>
    %c255_i32 = arith.constant 255 : i32
    %536 = tpu.dynamic_rotate %301 by %c255_i32 dim 1 : vector<1x256xf32>, i32 -> vector<1x256xf32>
    %c255_i32_79 = arith.constant 255 : i32
    %537 = tpu.dynamic_rotate %299 by %c255_i32_79 dim 1 : vector<1x256xf32>, i32 -> vector<1x256xf32>
    %538 = vector.broadcast %25 : f32 to vector<1x256xf32>
    %539 = arith.mulf %538, %536 : vector<1x256xf32>
    %540 = vector.broadcast %74 : f32 to vector<1x256xf32>
    %541 = arith.mulf %540, %537 : vector<1x256xf32>
    %542 = arith.addf %539, %541 : vector<1x256xf32>
    %543 = arith.mulf %253, %542 : vector<1x256xf32>
    %544 = arith.addf %535, %543 : vector<1x256xf32>
    %c254_i32 = arith.constant 254 : i32
    %545 = tpu.dynamic_rotate %301 by %c254_i32 dim 1 : vector<1x256xf32>, i32 -> vector<1x256xf32>
    %c254_i32_80 = arith.constant 254 : i32
    %546 = tpu.dynamic_rotate %299 by %c254_i32_80 dim 1 : vector<1x256xf32>, i32 -> vector<1x256xf32>
    %547 = vector.broadcast %26 : f32 to vector<1x256xf32>
    %548 = arith.mulf %547, %545 : vector<1x256xf32>
    %549 = vector.broadcast %75 : f32 to vector<1x256xf32>
    %550 = arith.mulf %549, %546 : vector<1x256xf32>
    %551 = arith.addf %548, %550 : vector<1x256xf32>
    %552 = arith.mulf %271, %551 : vector<1x256xf32>
    %553 = arith.addf %544, %552 : vector<1x256xf32>
    %c253_i32 = arith.constant 253 : i32
    %554 = tpu.dynamic_rotate %301 by %c253_i32 dim 1 : vector<1x256xf32>, i32 -> vector<1x256xf32>
    %c253_i32_81 = arith.constant 253 : i32
    %555 = tpu.dynamic_rotate %299 by %c253_i32_81 dim 1 : vector<1x256xf32>, i32 -> vector<1x256xf32>
    %556 = vector.broadcast %27 : f32 to vector<1x256xf32>
    %557 = arith.mulf %556, %554 : vector<1x256xf32>
    %558 = vector.broadcast %76 : f32 to vector<1x256xf32>
    %559 = arith.mulf %558, %555 : vector<1x256xf32>
    %560 = arith.addf %557, %559 : vector<1x256xf32>
    %561 = arith.mulf %289, %560 : vector<1x256xf32>
    %562 = arith.addf %553, %561 : vector<1x256xf32>
    %563 = arith.mulf %224, %562 : vector<1x256xf32>
    %564 = arith.addf %500, %563 : vector<1x256xf32>
    %cst_82 = arith.constant 0.000000e+00 : f32
    %565 = vector.broadcast %cst_82 : f32 to vector<1x256xf32>
    %c243_i32 = arith.constant 243 : i32
    %566 = tpu.dynamic_rotate %301 by %c243_i32 dim 1 : vector<1x256xf32>, i32 -> vector<1x256xf32>
    %c243_i32_83 = arith.constant 243 : i32
    %567 = tpu.dynamic_rotate %299 by %c243_i32_83 dim 1 : vector<1x256xf32>, i32 -> vector<1x256xf32>
    %568 = vector.broadcast %28 : f32 to vector<1x256xf32>
    %569 = arith.mulf %568, %566 : vector<1x256xf32>
    %570 = vector.broadcast %77 : f32 to vector<1x256xf32>
    %571 = arith.mulf %570, %567 : vector<1x256xf32>
    %572 = arith.addf %569, %571 : vector<1x256xf32>
    %573 = arith.mulf %181, %572 : vector<1x256xf32>
    %574 = arith.addf %565, %573 : vector<1x256xf32>
    %c242_i32 = arith.constant 242 : i32
    %575 = tpu.dynamic_rotate %301 by %c242_i32 dim 1 : vector<1x256xf32>, i32 -> vector<1x256xf32>
    %c242_i32_84 = arith.constant 242 : i32
    %576 = tpu.dynamic_rotate %299 by %c242_i32_84 dim 1 : vector<1x256xf32>, i32 -> vector<1x256xf32>
    %577 = vector.broadcast %29 : f32 to vector<1x256xf32>
    %578 = arith.mulf %577, %575 : vector<1x256xf32>
    %579 = vector.broadcast %78 : f32 to vector<1x256xf32>
    %580 = arith.mulf %579, %576 : vector<1x256xf32>
    %581 = arith.addf %578, %580 : vector<1x256xf32>
    %582 = arith.mulf %199, %581 : vector<1x256xf32>
    %583 = arith.addf %574, %582 : vector<1x256xf32>
    %c241_i32 = arith.constant 241 : i32
    %584 = tpu.dynamic_rotate %301 by %c241_i32 dim 1 : vector<1x256xf32>, i32 -> vector<1x256xf32>
    %c241_i32_85 = arith.constant 241 : i32
    %585 = tpu.dynamic_rotate %299 by %c241_i32_85 dim 1 : vector<1x256xf32>, i32 -> vector<1x256xf32>
    %586 = vector.broadcast %30 : f32 to vector<1x256xf32>
    %587 = arith.mulf %586, %584 : vector<1x256xf32>
    %588 = vector.broadcast %79 : f32 to vector<1x256xf32>
    %589 = arith.mulf %588, %585 : vector<1x256xf32>
    %590 = arith.addf %587, %589 : vector<1x256xf32>
    %591 = arith.mulf %217, %590 : vector<1x256xf32>
    %592 = arith.addf %583, %591 : vector<1x256xf32>
    %c240_i32_86 = arith.constant 240 : i32
    %593 = tpu.dynamic_rotate %301 by %c240_i32_86 dim 1 : vector<1x256xf32>, i32 -> vector<1x256xf32>
    %c240_i32_87 = arith.constant 240 : i32
    %594 = tpu.dynamic_rotate %299 by %c240_i32_87 dim 1 : vector<1x256xf32>, i32 -> vector<1x256xf32>
    %595 = vector.broadcast %31 : f32 to vector<1x256xf32>
    %596 = arith.mulf %595, %593 : vector<1x256xf32>
    %597 = vector.broadcast %80 : f32 to vector<1x256xf32>
    %598 = arith.mulf %597, %594 : vector<1x256xf32>
    %599 = arith.addf %596, %598 : vector<1x256xf32>
    %600 = arith.mulf %235, %599 : vector<1x256xf32>
    %601 = arith.addf %592, %600 : vector<1x256xf32>
    %c239_i32 = arith.constant 239 : i32
    %602 = tpu.dynamic_rotate %301 by %c239_i32 dim 1 : vector<1x256xf32>, i32 -> vector<1x256xf32>
    %c239_i32_88 = arith.constant 239 : i32
    %603 = tpu.dynamic_rotate %299 by %c239_i32_88 dim 1 : vector<1x256xf32>, i32 -> vector<1x256xf32>
    %604 = vector.broadcast %32 : f32 to vector<1x256xf32>
    %605 = arith.mulf %604, %602 : vector<1x256xf32>
    %606 = vector.broadcast %81 : f32 to vector<1x256xf32>
    %607 = arith.mulf %606, %603 : vector<1x256xf32>
    %608 = arith.addf %605, %607 : vector<1x256xf32>
    %609 = arith.mulf %253, %608 : vector<1x256xf32>
    %610 = arith.addf %601, %609 : vector<1x256xf32>
    %c238_i32 = arith.constant 238 : i32
    %611 = tpu.dynamic_rotate %301 by %c238_i32 dim 1 : vector<1x256xf32>, i32 -> vector<1x256xf32>
    %c238_i32_89 = arith.constant 238 : i32
    %612 = tpu.dynamic_rotate %299 by %c238_i32_89 dim 1 : vector<1x256xf32>, i32 -> vector<1x256xf32>
    %613 = vector.broadcast %33 : f32 to vector<1x256xf32>
    %614 = arith.mulf %613, %611 : vector<1x256xf32>
    %615 = vector.broadcast %82 : f32 to vector<1x256xf32>
    %616 = arith.mulf %615, %612 : vector<1x256xf32>
    %617 = arith.addf %614, %616 : vector<1x256xf32>
    %618 = arith.mulf %271, %617 : vector<1x256xf32>
    %619 = arith.addf %610, %618 : vector<1x256xf32>
    %c237_i32 = arith.constant 237 : i32
    %620 = tpu.dynamic_rotate %301 by %c237_i32 dim 1 : vector<1x256xf32>, i32 -> vector<1x256xf32>
    %c237_i32_90 = arith.constant 237 : i32
    %621 = tpu.dynamic_rotate %299 by %c237_i32_90 dim 1 : vector<1x256xf32>, i32 -> vector<1x256xf32>
    %622 = vector.broadcast %34 : f32 to vector<1x256xf32>
    %623 = arith.mulf %622, %620 : vector<1x256xf32>
    %624 = vector.broadcast %83 : f32 to vector<1x256xf32>
    %625 = arith.mulf %624, %621 : vector<1x256xf32>
    %626 = arith.addf %623, %625 : vector<1x256xf32>
    %627 = arith.mulf %289, %626 : vector<1x256xf32>
    %628 = arith.addf %619, %627 : vector<1x256xf32>
    %629 = arith.mulf %242, %628 : vector<1x256xf32>
    %630 = arith.addf %564, %629 : vector<1x256xf32>
    %cst_91 = arith.constant 0.000000e+00 : f32
    %631 = vector.broadcast %cst_91 : f32 to vector<1x256xf32>
    %c227_i32 = arith.constant 227 : i32
    %632 = tpu.dynamic_rotate %301 by %c227_i32 dim 1 : vector<1x256xf32>, i32 -> vector<1x256xf32>
    %c227_i32_92 = arith.constant 227 : i32
    %633 = tpu.dynamic_rotate %299 by %c227_i32_92 dim 1 : vector<1x256xf32>, i32 -> vector<1x256xf32>
    %634 = vector.broadcast %35 : f32 to vector<1x256xf32>
    %635 = arith.mulf %634, %632 : vector<1x256xf32>
    %636 = vector.broadcast %84 : f32 to vector<1x256xf32>
    %637 = arith.mulf %636, %633 : vector<1x256xf32>
    %638 = arith.addf %635, %637 : vector<1x256xf32>
    %639 = arith.mulf %181, %638 : vector<1x256xf32>
    %640 = arith.addf %631, %639 : vector<1x256xf32>
    %c226_i32 = arith.constant 226 : i32
    %641 = tpu.dynamic_rotate %301 by %c226_i32 dim 1 : vector<1x256xf32>, i32 -> vector<1x256xf32>
    %c226_i32_93 = arith.constant 226 : i32
    %642 = tpu.dynamic_rotate %299 by %c226_i32_93 dim 1 : vector<1x256xf32>, i32 -> vector<1x256xf32>
    %643 = vector.broadcast %36 : f32 to vector<1x256xf32>
    %644 = arith.mulf %643, %641 : vector<1x256xf32>
    %645 = vector.broadcast %85 : f32 to vector<1x256xf32>
    %646 = arith.mulf %645, %642 : vector<1x256xf32>
    %647 = arith.addf %644, %646 : vector<1x256xf32>
    %648 = arith.mulf %199, %647 : vector<1x256xf32>
    %649 = arith.addf %640, %648 : vector<1x256xf32>
    %c225_i32 = arith.constant 225 : i32
    %650 = tpu.dynamic_rotate %301 by %c225_i32 dim 1 : vector<1x256xf32>, i32 -> vector<1x256xf32>
    %c225_i32_94 = arith.constant 225 : i32
    %651 = tpu.dynamic_rotate %299 by %c225_i32_94 dim 1 : vector<1x256xf32>, i32 -> vector<1x256xf32>
    %652 = vector.broadcast %37 : f32 to vector<1x256xf32>
    %653 = arith.mulf %652, %650 : vector<1x256xf32>
    %654 = vector.broadcast %86 : f32 to vector<1x256xf32>
    %655 = arith.mulf %654, %651 : vector<1x256xf32>
    %656 = arith.addf %653, %655 : vector<1x256xf32>
    %657 = arith.mulf %217, %656 : vector<1x256xf32>
    %658 = arith.addf %649, %657 : vector<1x256xf32>
    %c224_i32_95 = arith.constant 224 : i32
    %659 = tpu.dynamic_rotate %301 by %c224_i32_95 dim 1 : vector<1x256xf32>, i32 -> vector<1x256xf32>
    %c224_i32_96 = arith.constant 224 : i32
    %660 = tpu.dynamic_rotate %299 by %c224_i32_96 dim 1 : vector<1x256xf32>, i32 -> vector<1x256xf32>
    %661 = vector.broadcast %38 : f32 to vector<1x256xf32>
    %662 = arith.mulf %661, %659 : vector<1x256xf32>
    %663 = vector.broadcast %87 : f32 to vector<1x256xf32>
    %664 = arith.mulf %663, %660 : vector<1x256xf32>
    %665 = arith.addf %662, %664 : vector<1x256xf32>
    %666 = arith.mulf %235, %665 : vector<1x256xf32>
    %667 = arith.addf %658, %666 : vector<1x256xf32>
    %c223_i32 = arith.constant 223 : i32
    %668 = tpu.dynamic_rotate %301 by %c223_i32 dim 1 : vector<1x256xf32>, i32 -> vector<1x256xf32>
    %c223_i32_97 = arith.constant 223 : i32
    %669 = tpu.dynamic_rotate %299 by %c223_i32_97 dim 1 : vector<1x256xf32>, i32 -> vector<1x256xf32>
    %670 = vector.broadcast %39 : f32 to vector<1x256xf32>
    %671 = arith.mulf %670, %668 : vector<1x256xf32>
    %672 = vector.broadcast %88 : f32 to vector<1x256xf32>
    %673 = arith.mulf %672, %669 : vector<1x256xf32>
    %674 = arith.addf %671, %673 : vector<1x256xf32>
    %675 = arith.mulf %253, %674 : vector<1x256xf32>
    %676 = arith.addf %667, %675 : vector<1x256xf32>
    %c222_i32 = arith.constant 222 : i32
    %677 = tpu.dynamic_rotate %301 by %c222_i32 dim 1 : vector<1x256xf32>, i32 -> vector<1x256xf32>
    %c222_i32_98 = arith.constant 222 : i32
    %678 = tpu.dynamic_rotate %299 by %c222_i32_98 dim 1 : vector<1x256xf32>, i32 -> vector<1x256xf32>
    %679 = vector.broadcast %40 : f32 to vector<1x256xf32>
    %680 = arith.mulf %679, %677 : vector<1x256xf32>
    %681 = vector.broadcast %89 : f32 to vector<1x256xf32>
    %682 = arith.mulf %681, %678 : vector<1x256xf32>
    %683 = arith.addf %680, %682 : vector<1x256xf32>
    %684 = arith.mulf %271, %683 : vector<1x256xf32>
    %685 = arith.addf %676, %684 : vector<1x256xf32>
    %c221_i32 = arith.constant 221 : i32
    %686 = tpu.dynamic_rotate %301 by %c221_i32 dim 1 : vector<1x256xf32>, i32 -> vector<1x256xf32>
    %c221_i32_99 = arith.constant 221 : i32
    %687 = tpu.dynamic_rotate %299 by %c221_i32_99 dim 1 : vector<1x256xf32>, i32 -> vector<1x256xf32>
    %688 = vector.broadcast %41 : f32 to vector<1x256xf32>
    %689 = arith.mulf %688, %686 : vector<1x256xf32>
    %690 = vector.broadcast %90 : f32 to vector<1x256xf32>
    %691 = arith.mulf %690, %687 : vector<1x256xf32>
    %692 = arith.addf %689, %691 : vector<1x256xf32>
    %693 = arith.mulf %289, %692 : vector<1x256xf32>
    %694 = arith.addf %685, %693 : vector<1x256xf32>
    %695 = arith.mulf %260, %694 : vector<1x256xf32>
    %696 = arith.addf %630, %695 : vector<1x256xf32>
    %cst_100 = arith.constant 0.000000e+00 : f32
    %697 = vector.broadcast %cst_100 : f32 to vector<1x256xf32>
    %c211_i32 = arith.constant 211 : i32
    %698 = tpu.dynamic_rotate %301 by %c211_i32 dim 1 : vector<1x256xf32>, i32 -> vector<1x256xf32>
    %c211_i32_101 = arith.constant 211 : i32
    %699 = tpu.dynamic_rotate %299 by %c211_i32_101 dim 1 : vector<1x256xf32>, i32 -> vector<1x256xf32>
    %700 = vector.broadcast %42 : f32 to vector<1x256xf32>
    %701 = arith.mulf %700, %698 : vector<1x256xf32>
    %702 = vector.broadcast %91 : f32 to vector<1x256xf32>
    %703 = arith.mulf %702, %699 : vector<1x256xf32>
    %704 = arith.addf %701, %703 : vector<1x256xf32>
    %705 = arith.mulf %181, %704 : vector<1x256xf32>
    %706 = arith.addf %697, %705 : vector<1x256xf32>
    %c210_i32 = arith.constant 210 : i32
    %707 = tpu.dynamic_rotate %301 by %c210_i32 dim 1 : vector<1x256xf32>, i32 -> vector<1x256xf32>
    %c210_i32_102 = arith.constant 210 : i32
    %708 = tpu.dynamic_rotate %299 by %c210_i32_102 dim 1 : vector<1x256xf32>, i32 -> vector<1x256xf32>
    %709 = vector.broadcast %43 : f32 to vector<1x256xf32>
    %710 = arith.mulf %709, %707 : vector<1x256xf32>
    %711 = vector.broadcast %92 : f32 to vector<1x256xf32>
    %712 = arith.mulf %711, %708 : vector<1x256xf32>
    %713 = arith.addf %710, %712 : vector<1x256xf32>
    %714 = arith.mulf %199, %713 : vector<1x256xf32>
    %715 = arith.addf %706, %714 : vector<1x256xf32>
    %c209_i32 = arith.constant 209 : i32
    %716 = tpu.dynamic_rotate %301 by %c209_i32 dim 1 : vector<1x256xf32>, i32 -> vector<1x256xf32>
    %c209_i32_103 = arith.constant 209 : i32
    %717 = tpu.dynamic_rotate %299 by %c209_i32_103 dim 1 : vector<1x256xf32>, i32 -> vector<1x256xf32>
    %718 = vector.broadcast %44 : f32 to vector<1x256xf32>
    %719 = arith.mulf %718, %716 : vector<1x256xf32>
    %720 = vector.broadcast %93 : f32 to vector<1x256xf32>
    %721 = arith.mulf %720, %717 : vector<1x256xf32>
    %722 = arith.addf %719, %721 : vector<1x256xf32>
    %723 = arith.mulf %217, %722 : vector<1x256xf32>
    %724 = arith.addf %715, %723 : vector<1x256xf32>
    %c208_i32_104 = arith.constant 208 : i32
    %725 = tpu.dynamic_rotate %301 by %c208_i32_104 dim 1 : vector<1x256xf32>, i32 -> vector<1x256xf32>
    %c208_i32_105 = arith.constant 208 : i32
    %726 = tpu.dynamic_rotate %299 by %c208_i32_105 dim 1 : vector<1x256xf32>, i32 -> vector<1x256xf32>
    %727 = vector.broadcast %45 : f32 to vector<1x256xf32>
    %728 = arith.mulf %727, %725 : vector<1x256xf32>
    %729 = vector.broadcast %94 : f32 to vector<1x256xf32>
    %730 = arith.mulf %729, %726 : vector<1x256xf32>
    %731 = arith.addf %728, %730 : vector<1x256xf32>
    %732 = arith.mulf %235, %731 : vector<1x256xf32>
    %733 = arith.addf %724, %732 : vector<1x256xf32>
    %c207_i32 = arith.constant 207 : i32
    %734 = tpu.dynamic_rotate %301 by %c207_i32 dim 1 : vector<1x256xf32>, i32 -> vector<1x256xf32>
    %c207_i32_106 = arith.constant 207 : i32
    %735 = tpu.dynamic_rotate %299 by %c207_i32_106 dim 1 : vector<1x256xf32>, i32 -> vector<1x256xf32>
    %736 = vector.broadcast %46 : f32 to vector<1x256xf32>
    %737 = arith.mulf %736, %734 : vector<1x256xf32>
    %738 = vector.broadcast %95 : f32 to vector<1x256xf32>
    %739 = arith.mulf %738, %735 : vector<1x256xf32>
    %740 = arith.addf %737, %739 : vector<1x256xf32>
    %741 = arith.mulf %253, %740 : vector<1x256xf32>
    %742 = arith.addf %733, %741 : vector<1x256xf32>
    %c206_i32 = arith.constant 206 : i32
    %743 = tpu.dynamic_rotate %301 by %c206_i32 dim 1 : vector<1x256xf32>, i32 -> vector<1x256xf32>
    %c206_i32_107 = arith.constant 206 : i32
    %744 = tpu.dynamic_rotate %299 by %c206_i32_107 dim 1 : vector<1x256xf32>, i32 -> vector<1x256xf32>
    %745 = vector.broadcast %47 : f32 to vector<1x256xf32>
    %746 = arith.mulf %745, %743 : vector<1x256xf32>
    %747 = vector.broadcast %96 : f32 to vector<1x256xf32>
    %748 = arith.mulf %747, %744 : vector<1x256xf32>
    %749 = arith.addf %746, %748 : vector<1x256xf32>
    %750 = arith.mulf %271, %749 : vector<1x256xf32>
    %751 = arith.addf %742, %750 : vector<1x256xf32>
    %c205_i32 = arith.constant 205 : i32
    %752 = tpu.dynamic_rotate %301 by %c205_i32 dim 1 : vector<1x256xf32>, i32 -> vector<1x256xf32>
    %c205_i32_108 = arith.constant 205 : i32
    %753 = tpu.dynamic_rotate %299 by %c205_i32_108 dim 1 : vector<1x256xf32>, i32 -> vector<1x256xf32>
    %754 = vector.broadcast %48 : f32 to vector<1x256xf32>
    %755 = arith.mulf %754, %752 : vector<1x256xf32>
    %756 = vector.broadcast %97 : f32 to vector<1x256xf32>
    %757 = arith.mulf %756, %753 : vector<1x256xf32>
    %758 = arith.addf %755, %757 : vector<1x256xf32>
    %759 = arith.mulf %289, %758 : vector<1x256xf32>
    %760 = arith.addf %751, %759 : vector<1x256xf32>
    %761 = arith.mulf %278, %760 : vector<1x256xf32>
    %762 = arith.addf %696, %761 : vector<1x256xf32>
    %763 = vector.broadcast %98 : f32 to vector<1x256xf32>
    %764 = arith.addf %762, %763 : vector<1x256xf32>
    %cst_109 = arith.constant 0.166666672 : f32
    %765 = vector.broadcast %cst_109 : f32 to vector<1x256xf32>
    %766 = arith.mulf %764, %765 : vector<1x256xf32>
    %cst_110 = arith.constant 5.000000e-01 : f32
    %767 = vector.broadcast %cst_110 : f32 to vector<1x256xf32>
    %768 = arith.addf %766, %767 : vector<1x256xf32>
    %cst_111 = arith.constant 0.000000e+00 : f32
    %cst_112 = arith.constant 1.000000e+00 : f32
    %769 = vector.broadcast %cst_111 : f32 to vector<1x256xf32>
    %770 = arith.maximumf %769, %768 : vector<1x256xf32>
    %771 = vector.broadcast %cst_112 : f32 to vector<1x256xf32>
    %772 = arith.minimumf %771, %770 : vector<1x256xf32>
    %c0_113 = arith.constant 0 : index
    %c0_114 = arith.constant 0 : index
    %c0_115 = arith.constant 0 : index
    %773 = vector.load %arg3[%c0_113, %c0_114, %c0_115] : memref<2x4x256xf32, #tpu.memory_space<vmem>>, vector<1x4x256xf32>
    %774 = vector.shape_cast %773 : vector<1x4x256xf32> to vector<4x256xf32>
    %775 = vector.broadcast %772 : vector<1x256xf32> to vector<4x256xf32>
    %776 = arith.mulf %774, %775 : vector<4x256xf32>
    %c0_116 = arith.constant 0 : index
    %c0_117 = arith.constant 0 : index
    %c0_118 = arith.constant 0 : index
    %777 = vector.load %arg4[%c0_116, %c0_117, %c0_118] : memref<2x4x256xf32, #tpu.memory_space<vmem>>, vector<1x4x256xf32>
    %778 = vector.shape_cast %777 : vector<1x4x256xf32> to vector<4x256xf32>
    %779 = vector.shape_cast %776 : vector<4x256xf32> to vector<1x4x256xf32>
    tpu.vector_store %arg4[%c0_116, %c0_117, %c0_118], %779 {strides = array<i32>} : memref<2x4x256xf32, #tpu.memory_space<vmem>>, vector<1x4x256xf32>,
    %cst_119 = arith.constant 0.000000e+00 : f32
    %780 = vector.broadcast %cst_119 : f32 to vector<1x256xf32>
    %cst_120 = arith.constant 0xFF800000 : f32
    %781 = vector.broadcast %cst_120 : f32 to vector<1x256xf32>
    %c1_121 = arith.constant 1 : index
    %c0_122 = arith.constant 0 : index
    %c0_123 = arith.constant 0 : index
    %782 = vector.load %arg3[%c1_121, %c0_122, %c0_123] : memref<2x4x256xf32, #tpu.memory_space<vmem>>, vector<1x4x256xf32>
    %783 = vector.shape_cast %782 : vector<1x4x256xf32> to vector<4x256xf32>
    %cst_124 = arith.constant dense<0.000000e+00> : vector<256xf32>
    %784 = vector.multi_reduction <add>, %783, %cst_124 [0] : vector<4x256xf32> to vector<256xf32>
    %785 = vector.shape_cast %784 : vector<256xf32> to vector<1x256xf32>
    %786 = arith.addf %780, %785 : vector<1x256xf32>
    %cst_125 = arith.constant dense<0xFF800000> : vector<256xf32>
    %787 = vector.multi_reduction <maximumf>, %783, %cst_125 [0] : vector<4x256xf32> to vector<256xf32>
    %788 = vector.shape_cast %787 : vector<256xf32> to vector<1x256xf32>
    %789 = arith.maximumf %781, %788 : vector<1x256xf32>
    %cst_126 = arith.constant 2.500000e-01 : f32
    %790 = vector.broadcast %cst_126 : f32 to vector<1x256xf32>
    %791 = arith.mulf %786, %790 : vector<1x256xf32>
    %cst_127 = arith.constant 0.000000e+00 : f32
    %792 = vector.broadcast %cst_127 : f32 to vector<1x256xf32>
    %cst_128 = arith.constant 0.000000e+00 : f32
    %793 = vector.broadcast %cst_128 : f32 to vector<1x256xf32>
    %c51_i32_129 = arith.constant 51 : i32
    %794 = tpu.dynamic_rotate %791 by %c51_i32_129 dim 1 : vector<1x256xf32>, i32 -> vector<1x256xf32>
    %c51_i32_130 = arith.constant 51 : i32
    %795 = tpu.dynamic_rotate %789 by %c51_i32_130 dim 1 : vector<1x256xf32>, i32 -> vector<1x256xf32>
    %796 = vector.broadcast %0 : f32 to vector<1x256xf32>
    %797 = arith.mulf %796, %794 : vector<1x256xf32>
    %798 = vector.broadcast %49 : f32 to vector<1x256xf32>
    %799 = arith.mulf %798, %795 : vector<1x256xf32>
    %800 = arith.addf %797, %799 : vector<1x256xf32>
    %801 = arith.mulf %181, %800 : vector<1x256xf32>
    %802 = arith.addf %793, %801 : vector<1x256xf32>
    %c50_i32_131 = arith.constant 50 : i32
    %803 = tpu.dynamic_rotate %791 by %c50_i32_131 dim 1 : vector<1x256xf32>, i32 -> vector<1x256xf32>
    %c50_i32_132 = arith.constant 50 : i32
    %804 = tpu.dynamic_rotate %789 by %c50_i32_132 dim 1 : vector<1x256xf32>, i32 -> vector<1x256xf32>
    %805 = vector.broadcast %1 : f32 to vector<1x256xf32>
    %806 = arith.mulf %805, %803 : vector<1x256xf32>
    %807 = vector.broadcast %50 : f32 to vector<1x256xf32>
    %808 = arith.mulf %807, %804 : vector<1x256xf32>
    %809 = arith.addf %806, %808 : vector<1x256xf32>
    %810 = arith.mulf %199, %809 : vector<1x256xf32>
    %811 = arith.addf %802, %810 : vector<1x256xf32>
    %c49_i32_133 = arith.constant 49 : i32
    %812 = tpu.dynamic_rotate %791 by %c49_i32_133 dim 1 : vector<1x256xf32>, i32 -> vector<1x256xf32>
    %c49_i32_134 = arith.constant 49 : i32
    %813 = tpu.dynamic_rotate %789 by %c49_i32_134 dim 1 : vector<1x256xf32>, i32 -> vector<1x256xf32>
    %814 = vector.broadcast %2 : f32 to vector<1x256xf32>
    %815 = arith.mulf %814, %812 : vector<1x256xf32>
    %816 = vector.broadcast %51 : f32 to vector<1x256xf32>
    %817 = arith.mulf %816, %813 : vector<1x256xf32>
    %818 = arith.addf %815, %817 : vector<1x256xf32>
    %819 = arith.mulf %217, %818 : vector<1x256xf32>
    %820 = arith.addf %811, %819 : vector<1x256xf32>
    %c48_i32_135 = arith.constant 48 : i32
    %821 = tpu.dynamic_rotate %791 by %c48_i32_135 dim 1 : vector<1x256xf32>, i32 -> vector<1x256xf32>
    %c48_i32_136 = arith.constant 48 : i32
    %822 = tpu.dynamic_rotate %789 by %c48_i32_136 dim 1 : vector<1x256xf32>, i32 -> vector<1x256xf32>
    %823 = vector.broadcast %3 : f32 to vector<1x256xf32>
    %824 = arith.mulf %823, %821 : vector<1x256xf32>
    %825 = vector.broadcast %52 : f32 to vector<1x256xf32>
    %826 = arith.mulf %825, %822 : vector<1x256xf32>
    %827 = arith.addf %824, %826 : vector<1x256xf32>
    %828 = arith.mulf %235, %827 : vector<1x256xf32>
    %829 = arith.addf %820, %828 : vector<1x256xf32>
    %c47_i32_137 = arith.constant 47 : i32
    %830 = tpu.dynamic_rotate %791 by %c47_i32_137 dim 1 : vector<1x256xf32>, i32 -> vector<1x256xf32>
    %c47_i32_138 = arith.constant 47 : i32
    %831 = tpu.dynamic_rotate %789 by %c47_i32_138 dim 1 : vector<1x256xf32>, i32 -> vector<1x256xf32>
    %832 = vector.broadcast %4 : f32 to vector<1x256xf32>
    %833 = arith.mulf %832, %830 : vector<1x256xf32>
    %834 = vector.broadcast %53 : f32 to vector<1x256xf32>
    %835 = arith.mulf %834, %831 : vector<1x256xf32>
    %836 = arith.addf %833, %835 : vector<1x256xf32>
    %837 = arith.mulf %253, %836 : vector<1x256xf32>
    %838 = arith.addf %829, %837 : vector<1x256xf32>
    %c46_i32_139 = arith.constant 46 : i32
    %839 = tpu.dynamic_rotate %791 by %c46_i32_139 dim 1 : vector<1x256xf32>, i32 -> vector<1x256xf32>
    %c46_i32_140 = arith.constant 46 : i32
    %840 = tpu.dynamic_rotate %789 by %c46_i32_140 dim 1 : vector<1x256xf32>, i32 -> vector<1x256xf32>
    %841 = vector.broadcast %5 : f32 to vector<1x256xf32>
    %842 = arith.mulf %841, %839 : vector<1x256xf32>
    %843 = vector.broadcast %54 : f32 to vector<1x256xf32>
    %844 = arith.mulf %843, %840 : vector<1x256xf32>
    %845 = arith.addf %842, %844 : vector<1x256xf32>
    %846 = arith.mulf %271, %845 : vector<1x256xf32>
    %847 = arith.addf %838, %846 : vector<1x256xf32>
    %c45_i32_141 = arith.constant 45 : i32
    %848 = tpu.dynamic_rotate %791 by %c45_i32_141 dim 1 : vector<1x256xf32>, i32 -> vector<1x256xf32>
    %c45_i32_142 = arith.constant 45 : i32
    %849 = tpu.dynamic_rotate %789 by %c45_i32_142 dim 1 : vector<1x256xf32>, i32 -> vector<1x256xf32>
    %850 = vector.broadcast %6 : f32 to vector<1x256xf32>
    %851 = arith.mulf %850, %848 : vector<1x256xf32>
    %852 = vector.broadcast %55 : f32 to vector<1x256xf32>
    %853 = arith.mulf %852, %849 : vector<1x256xf32>
    %854 = arith.addf %851, %853 : vector<1x256xf32>
    %855 = arith.mulf %289, %854 : vector<1x256xf32>
    %856 = arith.addf %847, %855 : vector<1x256xf32>
    %857 = arith.mulf %170, %856 : vector<1x256xf32>
    %858 = arith.addf %792, %857 : vector<1x256xf32>
    %cst_143 = arith.constant 0.000000e+00 : f32
    %859 = vector.broadcast %cst_143 : f32 to vector<1x256xf32>
    %c35_i32_144 = arith.constant 35 : i32
    %860 = tpu.dynamic_rotate %791 by %c35_i32_144 dim 1 : vector<1x256xf32>, i32 -> vector<1x256xf32>
    %c35_i32_145 = arith.constant 35 : i32
    %861 = tpu.dynamic_rotate %789 by %c35_i32_145 dim 1 : vector<1x256xf32>, i32 -> vector<1x256xf32>
    %862 = vector.broadcast %7 : f32 to vector<1x256xf32>
    %863 = arith.mulf %862, %860 : vector<1x256xf32>
    %864 = vector.broadcast %56 : f32 to vector<1x256xf32>
    %865 = arith.mulf %864, %861 : vector<1x256xf32>
    %866 = arith.addf %863, %865 : vector<1x256xf32>
    %867 = arith.mulf %181, %866 : vector<1x256xf32>
    %868 = arith.addf %859, %867 : vector<1x256xf32>
    %c34_i32_146 = arith.constant 34 : i32
    %869 = tpu.dynamic_rotate %791 by %c34_i32_146 dim 1 : vector<1x256xf32>, i32 -> vector<1x256xf32>
    %c34_i32_147 = arith.constant 34 : i32
    %870 = tpu.dynamic_rotate %789 by %c34_i32_147 dim 1 : vector<1x256xf32>, i32 -> vector<1x256xf32>
    %871 = vector.broadcast %8 : f32 to vector<1x256xf32>
    %872 = arith.mulf %871, %869 : vector<1x256xf32>
    %873 = vector.broadcast %57 : f32 to vector<1x256xf32>
    %874 = arith.mulf %873, %870 : vector<1x256xf32>
    %875 = arith.addf %872, %874 : vector<1x256xf32>
    %876 = arith.mulf %199, %875 : vector<1x256xf32>
    %877 = arith.addf %868, %876 : vector<1x256xf32>
    %c33_i32_148 = arith.constant 33 : i32
    %878 = tpu.dynamic_rotate %791 by %c33_i32_148 dim 1 : vector<1x256xf32>, i32 -> vector<1x256xf32>
    %c33_i32_149 = arith.constant 33 : i32
    %879 = tpu.dynamic_rotate %789 by %c33_i32_149 dim 1 : vector<1x256xf32>, i32 -> vector<1x256xf32>
    %880 = vector.broadcast %9 : f32 to vector<1x256xf32>
    %881 = arith.mulf %880, %878 : vector<1x256xf32>
    %882 = vector.broadcast %58 : f32 to vector<1x256xf32>
    %883 = arith.mulf %882, %879 : vector<1x256xf32>
    %884 = arith.addf %881, %883 : vector<1x256xf32>
    %885 = arith.mulf %217, %884 : vector<1x256xf32>
    %886 = arith.addf %877, %885 : vector<1x256xf32>
    %c32_i32_150 = arith.constant 32 : i32
    %887 = tpu.dynamic_rotate %791 by %c32_i32_150 dim 1 : vector<1x256xf32>, i32 -> vector<1x256xf32>
    %c32_i32_151 = arith.constant 32 : i32
    %888 = tpu.dynamic_rotate %789 by %c32_i32_151 dim 1 : vector<1x256xf32>, i32 -> vector<1x256xf32>
    %889 = vector.broadcast %10 : f32 to vector<1x256xf32>
    %890 = arith.mulf %889, %887 : vector<1x256xf32>
    %891 = vector.broadcast %59 : f32 to vector<1x256xf32>
    %892 = arith.mulf %891, %888 : vector<1x256xf32>
    %893 = arith.addf %890, %892 : vector<1x256xf32>
    %894 = arith.mulf %235, %893 : vector<1x256xf32>
    %895 = arith.addf %886, %894 : vector<1x256xf32>
    %c31_i32_152 = arith.constant 31 : i32
    %896 = tpu.dynamic_rotate %791 by %c31_i32_152 dim 1 : vector<1x256xf32>, i32 -> vector<1x256xf32>
    %c31_i32_153 = arith.constant 31 : i32
    %897 = tpu.dynamic_rotate %789 by %c31_i32_153 dim 1 : vector<1x256xf32>, i32 -> vector<1x256xf32>
    %898 = vector.broadcast %11 : f32 to vector<1x256xf32>
    %899 = arith.mulf %898, %896 : vector<1x256xf32>
    %900 = vector.broadcast %60 : f32 to vector<1x256xf32>
    %901 = arith.mulf %900, %897 : vector<1x256xf32>
    %902 = arith.addf %899, %901 : vector<1x256xf32>
    %903 = arith.mulf %253, %902 : vector<1x256xf32>
    %904 = arith.addf %895, %903 : vector<1x256xf32>
    %c30_i32_154 = arith.constant 30 : i32
    %905 = tpu.dynamic_rotate %791 by %c30_i32_154 dim 1 : vector<1x256xf32>, i32 -> vector<1x256xf32>
    %c30_i32_155 = arith.constant 30 : i32
    %906 = tpu.dynamic_rotate %789 by %c30_i32_155 dim 1 : vector<1x256xf32>, i32 -> vector<1x256xf32>
    %907 = vector.broadcast %12 : f32 to vector<1x256xf32>
    %908 = arith.mulf %907, %905 : vector<1x256xf32>
    %909 = vector.broadcast %61 : f32 to vector<1x256xf32>
    %910 = arith.mulf %909, %906 : vector<1x256xf32>
    %911 = arith.addf %908, %910 : vector<1x256xf32>
    %912 = arith.mulf %271, %911 : vector<1x256xf32>
    %913 = arith.addf %904, %912 : vector<1x256xf32>
    %c29_i32_156 = arith.constant 29 : i32
    %914 = tpu.dynamic_rotate %791 by %c29_i32_156 dim 1 : vector<1x256xf32>, i32 -> vector<1x256xf32>
    %c29_i32_157 = arith.constant 29 : i32
    %915 = tpu.dynamic_rotate %789 by %c29_i32_157 dim 1 : vector<1x256xf32>, i32 -> vector<1x256xf32>
    %916 = vector.broadcast %13 : f32 to vector<1x256xf32>
    %917 = arith.mulf %916, %914 : vector<1x256xf32>
    %918 = vector.broadcast %62 : f32 to vector<1x256xf32>
    %919 = arith.mulf %918, %915 : vector<1x256xf32>
    %920 = arith.addf %917, %919 : vector<1x256xf32>
    %921 = arith.mulf %289, %920 : vector<1x256xf32>
    %922 = arith.addf %913, %921 : vector<1x256xf32>
    %923 = arith.mulf %188, %922 : vector<1x256xf32>
    %924 = arith.addf %858, %923 : vector<1x256xf32>
    %cst_158 = arith.constant 0.000000e+00 : f32
    %925 = vector.broadcast %cst_158 : f32 to vector<1x256xf32>
    %c19_i32_159 = arith.constant 19 : i32
    %926 = tpu.dynamic_rotate %791 by %c19_i32_159 dim 1 : vector<1x256xf32>, i32 -> vector<1x256xf32>
    %c19_i32_160 = arith.constant 19 : i32
    %927 = tpu.dynamic_rotate %789 by %c19_i32_160 dim 1 : vector<1x256xf32>, i32 -> vector<1x256xf32>
    %928 = vector.broadcast %14 : f32 to vector<1x256xf32>
    %929 = arith.mulf %928, %926 : vector<1x256xf32>
    %930 = vector.broadcast %63 : f32 to vector<1x256xf32>
    %931 = arith.mulf %930, %927 : vector<1x256xf32>
    %932 = arith.addf %929, %931 : vector<1x256xf32>
    %933 = arith.mulf %181, %932 : vector<1x256xf32>
    %934 = arith.addf %925, %933 : vector<1x256xf32>
    %c18_i32_161 = arith.constant 18 : i32
    %935 = tpu.dynamic_rotate %791 by %c18_i32_161 dim 1 : vector<1x256xf32>, i32 -> vector<1x256xf32>
    %c18_i32_162 = arith.constant 18 : i32
    %936 = tpu.dynamic_rotate %789 by %c18_i32_162 dim 1 : vector<1x256xf32>, i32 -> vector<1x256xf32>
    %937 = vector.broadcast %15 : f32 to vector<1x256xf32>
    %938 = arith.mulf %937, %935 : vector<1x256xf32>
    %939 = vector.broadcast %64 : f32 to vector<1x256xf32>
    %940 = arith.mulf %939, %936 : vector<1x256xf32>
    %941 = arith.addf %938, %940 : vector<1x256xf32>
    %942 = arith.mulf %199, %941 : vector<1x256xf32>
    %943 = arith.addf %934, %942 : vector<1x256xf32>
    %c17_i32_163 = arith.constant 17 : i32
    %944 = tpu.dynamic_rotate %791 by %c17_i32_163 dim 1 : vector<1x256xf32>, i32 -> vector<1x256xf32>
    %c17_i32_164 = arith.constant 17 : i32
    %945 = tpu.dynamic_rotate %789 by %c17_i32_164 dim 1 : vector<1x256xf32>, i32 -> vector<1x256xf32>
    %946 = vector.broadcast %16 : f32 to vector<1x256xf32>
    %947 = arith.mulf %946, %944 : vector<1x256xf32>
    %948 = vector.broadcast %65 : f32 to vector<1x256xf32>
    %949 = arith.mulf %948, %945 : vector<1x256xf32>
    %950 = arith.addf %947, %949 : vector<1x256xf32>
    %951 = arith.mulf %217, %950 : vector<1x256xf32>
    %952 = arith.addf %943, %951 : vector<1x256xf32>
    %c16_i32_165 = arith.constant 16 : i32
    %953 = tpu.dynamic_rotate %791 by %c16_i32_165 dim 1 : vector<1x256xf32>, i32 -> vector<1x256xf32>
    %c16_i32_166 = arith.constant 16 : i32
    %954 = tpu.dynamic_rotate %789 by %c16_i32_166 dim 1 : vector<1x256xf32>, i32 -> vector<1x256xf32>
    %955 = vector.broadcast %17 : f32 to vector<1x256xf32>
    %956 = arith.mulf %955, %953 : vector<1x256xf32>
    %957 = vector.broadcast %66 : f32 to vector<1x256xf32>
    %958 = arith.mulf %957, %954 : vector<1x256xf32>
    %959 = arith.addf %956, %958 : vector<1x256xf32>
    %960 = arith.mulf %235, %959 : vector<1x256xf32>
    %961 = arith.addf %952, %960 : vector<1x256xf32>
    %c15_i32_167 = arith.constant 15 : i32
    %962 = tpu.dynamic_rotate %791 by %c15_i32_167 dim 1 : vector<1x256xf32>, i32 -> vector<1x256xf32>
    %c15_i32_168 = arith.constant 15 : i32
    %963 = tpu.dynamic_rotate %789 by %c15_i32_168 dim 1 : vector<1x256xf32>, i32 -> vector<1x256xf32>
    %964 = vector.broadcast %18 : f32 to vector<1x256xf32>
    %965 = arith.mulf %964, %962 : vector<1x256xf32>
    %966 = vector.broadcast %67 : f32 to vector<1x256xf32>
    %967 = arith.mulf %966, %963 : vector<1x256xf32>
    %968 = arith.addf %965, %967 : vector<1x256xf32>
    %969 = arith.mulf %253, %968 : vector<1x256xf32>
    %970 = arith.addf %961, %969 : vector<1x256xf32>
    %c14_i32_169 = arith.constant 14 : i32
    %971 = tpu.dynamic_rotate %791 by %c14_i32_169 dim 1 : vector<1x256xf32>, i32 -> vector<1x256xf32>
    %c14_i32_170 = arith.constant 14 : i32
    %972 = tpu.dynamic_rotate %789 by %c14_i32_170 dim 1 : vector<1x256xf32>, i32 -> vector<1x256xf32>
    %973 = vector.broadcast %19 : f32 to vector<1x256xf32>
    %974 = arith.mulf %973, %971 : vector<1x256xf32>
    %975 = vector.broadcast %68 : f32 to vector<1x256xf32>
    %976 = arith.mulf %975, %972 : vector<1x256xf32>
    %977 = arith.addf %974, %976 : vector<1x256xf32>
    %978 = arith.mulf %271, %977 : vector<1x256xf32>
    %979 = arith.addf %970, %978 : vector<1x256xf32>
    %c13_i32_171 = arith.constant 13 : i32
    %980 = tpu.dynamic_rotate %791 by %c13_i32_171 dim 1 : vector<1x256xf32>, i32 -> vector<1x256xf32>
    %c13_i32_172 = arith.constant 13 : i32
    %981 = tpu.dynamic_rotate %789 by %c13_i32_172 dim 1 : vector<1x256xf32>, i32 -> vector<1x256xf32>
    %982 = vector.broadcast %20 : f32 to vector<1x256xf32>
    %983 = arith.mulf %982, %980 : vector<1x256xf32>
    %984 = vector.broadcast %69 : f32 to vector<1x256xf32>
    %985 = arith.mulf %984, %981 : vector<1x256xf32>
    %986 = arith.addf %983, %985 : vector<1x256xf32>
    %987 = arith.mulf %289, %986 : vector<1x256xf32>
    %988 = arith.addf %979, %987 : vector<1x256xf32>
    %989 = arith.mulf %206, %988 : vector<1x256xf32>
    %990 = arith.addf %924, %989 : vector<1x256xf32>
    %cst_173 = arith.constant 0.000000e+00 : f32
    %991 = vector.broadcast %cst_173 : f32 to vector<1x256xf32>
    %c3_i32_174 = arith.constant 3 : i32
    %992 = tpu.dynamic_rotate %791 by %c3_i32_174 dim 1 : vector<1x256xf32>, i32 -> vector<1x256xf32>
    %c3_i32_175 = arith.constant 3 : i32
    %993 = tpu.dynamic_rotate %789 by %c3_i32_175 dim 1 : vector<1x256xf32>, i32 -> vector<1x256xf32>
    %994 = vector.broadcast %21 : f32 to vector<1x256xf32>
    %995 = arith.mulf %994, %992 : vector<1x256xf32>
    %996 = vector.broadcast %70 : f32 to vector<1x256xf32>
    %997 = arith.mulf %996, %993 : vector<1x256xf32>
    %998 = arith.addf %995, %997 : vector<1x256xf32>
    %999 = arith.mulf %181, %998 : vector<1x256xf32>
    %1000 = arith.addf %991, %999 : vector<1x256xf32>
    %c2_i32_176 = arith.constant 2 : i32
    %1001 = tpu.dynamic_rotate %791 by %c2_i32_176 dim 1 : vector<1x256xf32>, i32 -> vector<1x256xf32>
    %c2_i32_177 = arith.constant 2 : i32
    %1002 = tpu.dynamic_rotate %789 by %c2_i32_177 dim 1 : vector<1x256xf32>, i32 -> vector<1x256xf32>
    %1003 = vector.broadcast %22 : f32 to vector<1x256xf32>
    %1004 = arith.mulf %1003, %1001 : vector<1x256xf32>
    %1005 = vector.broadcast %71 : f32 to vector<1x256xf32>
    %1006 = arith.mulf %1005, %1002 : vector<1x256xf32>
    %1007 = arith.addf %1004, %1006 : vector<1x256xf32>
    %1008 = arith.mulf %199, %1007 : vector<1x256xf32>
    %1009 = arith.addf %1000, %1008 : vector<1x256xf32>
    %c1_i32_178 = arith.constant 1 : i32
    %1010 = tpu.dynamic_rotate %791 by %c1_i32_178 dim 1 : vector<1x256xf32>, i32 -> vector<1x256xf32>
    %c1_i32_179 = arith.constant 1 : i32
    %1011 = tpu.dynamic_rotate %789 by %c1_i32_179 dim 1 : vector<1x256xf32>, i32 -> vector<1x256xf32>
    %1012 = vector.broadcast %23 : f32 to vector<1x256xf32>
    %1013 = arith.mulf %1012, %1010 : vector<1x256xf32>
    %1014 = vector.broadcast %72 : f32 to vector<1x256xf32>
    %1015 = arith.mulf %1014, %1011 : vector<1x256xf32>
    %1016 = arith.addf %1013, %1015 : vector<1x256xf32>
    %1017 = arith.mulf %217, %1016 : vector<1x256xf32>
    %1018 = arith.addf %1009, %1017 : vector<1x256xf32>
    %1019 = vector.broadcast %24 : f32 to vector<1x256xf32>
    %1020 = arith.mulf %1019, %791 : vector<1x256xf32>
    %1021 = vector.broadcast %73 : f32 to vector<1x256xf32>
    %1022 = arith.mulf %1021, %789 : vector<1x256xf32>
    %1023 = arith.addf %1020, %1022 : vector<1x256xf32>
    %1024 = arith.mulf %235, %1023 : vector<1x256xf32>
    %1025 = arith.addf %1018, %1024 : vector<1x256xf32>
    %c255_i32_180 = arith.constant 255 : i32
    %1026 = tpu.dynamic_rotate %791 by %c255_i32_180 dim 1 : vector<1x256xf32>, i32 -> vector<1x256xf32>
    %c255_i32_181 = arith.constant 255 : i32
    %1027 = tpu.dynamic_rotate %789 by %c255_i32_181 dim 1 : vector<1x256xf32>, i32 -> vector<1x256xf32>
    %1028 = vector.broadcast %25 : f32 to vector<1x256xf32>
    %1029 = arith.mulf %1028, %1026 : vector<1x256xf32>
    %1030 = vector.broadcast %74 : f32 to vector<1x256xf32>
    %1031 = arith.mulf %1030, %1027 : vector<1x256xf32>
    %1032 = arith.addf %1029, %1031 : vector<1x256xf32>
    %1033 = arith.mulf %253, %1032 : vector<1x256xf32>
    %1034 = arith.addf %1025, %1033 : vector<1x256xf32>
    %c254_i32_182 = arith.constant 254 : i32
    %1035 = tpu.dynamic_rotate %791 by %c254_i32_182 dim 1 : vector<1x256xf32>, i32 -> vector<1x256xf32>
    %c254_i32_183 = arith.constant 254 : i32
    %1036 = tpu.dynamic_rotate %789 by %c254_i32_183 dim 1 : vector<1x256xf32>, i32 -> vector<1x256xf32>
    %1037 = vector.broadcast %26 : f32 to vector<1x256xf32>
    %1038 = arith.mulf %1037, %1035 : vector<1x256xf32>
    %1039 = vector.broadcast %75 : f32 to vector<1x256xf32>
    %1040 = arith.mulf %1039, %1036 : vector<1x256xf32>
    %1041 = arith.addf %1038, %1040 : vector<1x256xf32>
    %1042 = arith.mulf %271, %1041 : vector<1x256xf32>
    %1043 = arith.addf %1034, %1042 : vector<1x256xf32>
    %c253_i32_184 = arith.constant 253 : i32
    %1044 = tpu.dynamic_rotate %791 by %c253_i32_184 dim 1 : vector<1x256xf32>, i32 -> vector<1x256xf32>
    %c253_i32_185 = arith.constant 253 : i32
    %1045 = tpu.dynamic_rotate %789 by %c253_i32_185 dim 1 : vector<1x256xf32>, i32 -> vector<1x256xf32>
    %1046 = vector.broadcast %27 : f32 to vector<1x256xf32>
    %1047 = arith.mulf %1046, %1044 : vector<1x256xf32>
    %1048 = vector.broadcast %76 : f32 to vector<1x256xf32>
    %1049 = arith.mulf %1048, %1045 : vector<1x256xf32>
    %1050 = arith.addf %1047, %1049 : vector<1x256xf32>
    %1051 = arith.mulf %289, %1050 : vector<1x256xf32>
    %1052 = arith.addf %1043, %1051 : vector<1x256xf32>
    %1053 = arith.mulf %224, %1052 : vector<1x256xf32>
    %1054 = arith.addf %990, %1053 : vector<1x256xf32>
    %cst_186 = arith.constant 0.000000e+00 : f32
    %1055 = vector.broadcast %cst_186 : f32 to vector<1x256xf32>
    %c243_i32_187 = arith.constant 243 : i32
    %1056 = tpu.dynamic_rotate %791 by %c243_i32_187 dim 1 : vector<1x256xf32>, i32 -> vector<1x256xf32>
    %c243_i32_188 = arith.constant 243 : i32
    %1057 = tpu.dynamic_rotate %789 by %c243_i32_188 dim 1 : vector<1x256xf32>, i32 -> vector<1x256xf32>
    %1058 = vector.broadcast %28 : f32 to vector<1x256xf32>
    %1059 = arith.mulf %1058, %1056 : vector<1x256xf32>
    %1060 = vector.broadcast %77 : f32 to vector<1x256xf32>
    %1061 = arith.mulf %1060, %1057 : vector<1x256xf32>
    %1062 = arith.addf %1059, %1061 : vector<1x256xf32>
    %1063 = arith.mulf %181, %1062 : vector<1x256xf32>
    %1064 = arith.addf %1055, %1063 : vector<1x256xf32>
    %c242_i32_189 = arith.constant 242 : i32
    %1065 = tpu.dynamic_rotate %791 by %c242_i32_189 dim 1 : vector<1x256xf32>, i32 -> vector<1x256xf32>
    %c242_i32_190 = arith.constant 242 : i32
    %1066 = tpu.dynamic_rotate %789 by %c242_i32_190 dim 1 : vector<1x256xf32>, i32 -> vector<1x256xf32>
    %1067 = vector.broadcast %29 : f32 to vector<1x256xf32>
    %1068 = arith.mulf %1067, %1065 : vector<1x256xf32>
    %1069 = vector.broadcast %78 : f32 to vector<1x256xf32>
    %1070 = arith.mulf %1069, %1066 : vector<1x256xf32>
    %1071 = arith.addf %1068, %1070 : vector<1x256xf32>
    %1072 = arith.mulf %199, %1071 : vector<1x256xf32>
    %1073 = arith.addf %1064, %1072 : vector<1x256xf32>
    %c241_i32_191 = arith.constant 241 : i32
    %1074 = tpu.dynamic_rotate %791 by %c241_i32_191 dim 1 : vector<1x256xf32>, i32 -> vector<1x256xf32>
    %c241_i32_192 = arith.constant 241 : i32
    %1075 = tpu.dynamic_rotate %789 by %c241_i32_192 dim 1 : vector<1x256xf32>, i32 -> vector<1x256xf32>
    %1076 = vector.broadcast %30 : f32 to vector<1x256xf32>
    %1077 = arith.mulf %1076, %1074 : vector<1x256xf32>
    %1078 = vector.broadcast %79 : f32 to vector<1x256xf32>
    %1079 = arith.mulf %1078, %1075 : vector<1x256xf32>
    %1080 = arith.addf %1077, %1079 : vector<1x256xf32>
    %1081 = arith.mulf %217, %1080 : vector<1x256xf32>
    %1082 = arith.addf %1073, %1081 : vector<1x256xf32>
    %c240_i32_193 = arith.constant 240 : i32
    %1083 = tpu.dynamic_rotate %791 by %c240_i32_193 dim 1 : vector<1x256xf32>, i32 -> vector<1x256xf32>
    %c240_i32_194 = arith.constant 240 : i32
    %1084 = tpu.dynamic_rotate %789 by %c240_i32_194 dim 1 : vector<1x256xf32>, i32 -> vector<1x256xf32>
    %1085 = vector.broadcast %31 : f32 to vector<1x256xf32>
    %1086 = arith.mulf %1085, %1083 : vector<1x256xf32>
    %1087 = vector.broadcast %80 : f32 to vector<1x256xf32>
    %1088 = arith.mulf %1087, %1084 : vector<1x256xf32>
    %1089 = arith.addf %1086, %1088 : vector<1x256xf32>
    %1090 = arith.mulf %235, %1089 : vector<1x256xf32>
    %1091 = arith.addf %1082, %1090 : vector<1x256xf32>
    %c239_i32_195 = arith.constant 239 : i32
    %1092 = tpu.dynamic_rotate %791 by %c239_i32_195 dim 1 : vector<1x256xf32>, i32 -> vector<1x256xf32>
    %c239_i32_196 = arith.constant 239 : i32
    %1093 = tpu.dynamic_rotate %789 by %c239_i32_196 dim 1 : vector<1x256xf32>, i32 -> vector<1x256xf32>
    %1094 = vector.broadcast %32 : f32 to vector<1x256xf32>
    %1095 = arith.mulf %1094, %1092 : vector<1x256xf32>
    %1096 = vector.broadcast %81 : f32 to vector<1x256xf32>
    %1097 = arith.mulf %1096, %1093 : vector<1x256xf32>
    %1098 = arith.addf %1095, %1097 : vector<1x256xf32>
    %1099 = arith.mulf %253, %1098 : vector<1x256xf32>
    %1100 = arith.addf %1091, %1099 : vector<1x256xf32>
    %c238_i32_197 = arith.constant 238 : i32
    %1101 = tpu.dynamic_rotate %791 by %c238_i32_197 dim 1 : vector<1x256xf32>, i32 -> vector<1x256xf32>
    %c238_i32_198 = arith.constant 238 : i32
    %1102 = tpu.dynamic_rotate %789 by %c238_i32_198 dim 1 : vector<1x256xf32>, i32 -> vector<1x256xf32>
    %1103 = vector.broadcast %33 : f32 to vector<1x256xf32>
    %1104 = arith.mulf %1103, %1101 : vector<1x256xf32>
    %1105 = vector.broadcast %82 : f32 to vector<1x256xf32>
    %1106 = arith.mulf %1105, %1102 : vector<1x256xf32>
    %1107 = arith.addf %1104, %1106 : vector<1x256xf32>
    %1108 = arith.mulf %271, %1107 : vector<1x256xf32>
    %1109 = arith.addf %1100, %1108 : vector<1x256xf32>
    %c237_i32_199 = arith.constant 237 : i32
    %1110 = tpu.dynamic_rotate %791 by %c237_i32_199 dim 1 : vector<1x256xf32>, i32 -> vector<1x256xf32>
    %c237_i32_200 = arith.constant 237 : i32
    %1111 = tpu.dynamic_rotate %789 by %c237_i32_200 dim 1 : vector<1x256xf32>, i32 -> vector<1x256xf32>
    %1112 = vector.broadcast %34 : f32 to vector<1x256xf32>
    %1113 = arith.mulf %1112, %1110 : vector<1x256xf32>
    %1114 = vector.broadcast %83 : f32 to vector<1x256xf32>
    %1115 = arith.mulf %1114, %1111 : vector<1x256xf32>
    %1116 = arith.addf %1113, %1115 : vector<1x256xf32>
    %1117 = arith.mulf %289, %1116 : vector<1x256xf32>
    %1118 = arith.addf %1109, %1117 : vector<1x256xf32>
    %1119 = arith.mulf %242, %1118 : vector<1x256xf32>
    %1120 = arith.addf %1054, %1119 : vector<1x256xf32>
    %cst_201 = arith.constant 0.000000e+00 : f32
    %1121 = vector.broadcast %cst_201 : f32 to vector<1x256xf32>
    %c227_i32_202 = arith.constant 227 : i32
    %1122 = tpu.dynamic_rotate %791 by %c227_i32_202 dim 1 : vector<1x256xf32>, i32 -> vector<1x256xf32>
    %c227_i32_203 = arith.constant 227 : i32
    %1123 = tpu.dynamic_rotate %789 by %c227_i32_203 dim 1 : vector<1x256xf32>, i32 -> vector<1x256xf32>
    %1124 = vector.broadcast %35 : f32 to vector<1x256xf32>
    %1125 = arith.mulf %1124, %1122 : vector<1x256xf32>
    %1126 = vector.broadcast %84 : f32 to vector<1x256xf32>
    %1127 = arith.mulf %1126, %1123 : vector<1x256xf32>
    %1128 = arith.addf %1125, %1127 : vector<1x256xf32>
    %1129 = arith.mulf %181, %1128 : vector<1x256xf32>
    %1130 = arith.addf %1121, %1129 : vector<1x256xf32>
    %c226_i32_204 = arith.constant 226 : i32
    %1131 = tpu.dynamic_rotate %791 by %c226_i32_204 dim 1 : vector<1x256xf32>, i32 -> vector<1x256xf32>
    %c226_i32_205 = arith.constant 226 : i32
    %1132 = tpu.dynamic_rotate %789 by %c226_i32_205 dim 1 : vector<1x256xf32>, i32 -> vector<1x256xf32>
    %1133 = vector.broadcast %36 : f32 to vector<1x256xf32>
    %1134 = arith.mulf %1133, %1131 : vector<1x256xf32>
    %1135 = vector.broadcast %85 : f32 to vector<1x256xf32>
    %1136 = arith.mulf %1135, %1132 : vector<1x256xf32>
    %1137 = arith.addf %1134, %1136 : vector<1x256xf32>
    %1138 = arith.mulf %199, %1137 : vector<1x256xf32>
    %1139 = arith.addf %1130, %1138 : vector<1x256xf32>
    %c225_i32_206 = arith.constant 225 : i32
    %1140 = tpu.dynamic_rotate %791 by %c225_i32_206 dim 1 : vector<1x256xf32>, i32 -> vector<1x256xf32>
    %c225_i32_207 = arith.constant 225 : i32
    %1141 = tpu.dynamic_rotate %789 by %c225_i32_207 dim 1 : vector<1x256xf32>, i32 -> vector<1x256xf32>
    %1142 = vector.broadcast %37 : f32 to vector<1x256xf32>
    %1143 = arith.mulf %1142, %1140 : vector<1x256xf32>
    %1144 = vector.broadcast %86 : f32 to vector<1x256xf32>
    %1145 = arith.mulf %1144, %1141 : vector<1x256xf32>
    %1146 = arith.addf %1143, %1145 : vector<1x256xf32>
    %1147 = arith.mulf %217, %1146 : vector<1x256xf32>
    %1148 = arith.addf %1139, %1147 : vector<1x256xf32>
    %c224_i32_208 = arith.constant 224 : i32
    %1149 = tpu.dynamic_rotate %791 by %c224_i32_208 dim 1 : vector<1x256xf32>, i32 -> vector<1x256xf32>
    %c224_i32_209 = arith.constant 224 : i32
    %1150 = tpu.dynamic_rotate %789 by %c224_i32_209 dim 1 : vector<1x256xf32>, i32 -> vector<1x256xf32>
    %1151 = vector.broadcast %38 : f32 to vector<1x256xf32>
    %1152 = arith.mulf %1151, %1149 : vector<1x256xf32>
    %1153 = vector.broadcast %87 : f32 to vector<1x256xf32>
    %1154 = arith.mulf %1153, %1150 : vector<1x256xf32>
    %1155 = arith.addf %1152, %1154 : vector<1x256xf32>
    %1156 = arith.mulf %235, %1155 : vector<1x256xf32>
    %1157 = arith.addf %1148, %1156 : vector<1x256xf32>
    %c223_i32_210 = arith.constant 223 : i32
    %1158 = tpu.dynamic_rotate %791 by %c223_i32_210 dim 1 : vector<1x256xf32>, i32 -> vector<1x256xf32>
    %c223_i32_211 = arith.constant 223 : i32
    %1159 = tpu.dynamic_rotate %789 by %c223_i32_211 dim 1 : vector<1x256xf32>, i32 -> vector<1x256xf32>
    %1160 = vector.broadcast %39 : f32 to vector<1x256xf32>
    %1161 = arith.mulf %1160, %1158 : vector<1x256xf32>
    %1162 = vector.broadcast %88 : f32 to vector<1x256xf32>
    %1163 = arith.mulf %1162, %1159 : vector<1x256xf32>
    %1164 = arith.addf %1161, %1163 : vector<1x256xf32>
    %1165 = arith.mulf %253, %1164 : vector<1x256xf32>
    %1166 = arith.addf %1157, %1165 : vector<1x256xf32>
    %c222_i32_212 = arith.constant 222 : i32
    %1167 = tpu.dynamic_rotate %791 by %c222_i32_212 dim 1 : vector<1x256xf32>, i32 -> vector<1x256xf32>
    %c222_i32_213 = arith.constant 222 : i32
    %1168 = tpu.dynamic_rotate %789 by %c222_i32_213 dim 1 : vector<1x256xf32>, i32 -> vector<1x256xf32>
    %1169 = vector.broadcast %40 : f32 to vector<1x256xf32>
    %1170 = arith.mulf %1169, %1167 : vector<1x256xf32>
    %1171 = vector.broadcast %89 : f32 to vector<1x256xf32>
    %1172 = arith.mulf %1171, %1168 : vector<1x256xf32>
    %1173 = arith.addf %1170, %1172 : vector<1x256xf32>
    %1174 = arith.mulf %271, %1173 : vector<1x256xf32>
    %1175 = arith.addf %1166, %1174 : vector<1x256xf32>
    %c221_i32_214 = arith.constant 221 : i32
    %1176 = tpu.dynamic_rotate %791 by %c221_i32_214 dim 1 : vector<1x256xf32>, i32 -> vector<1x256xf32>
    %c221_i32_215 = arith.constant 221 : i32
    %1177 = tpu.dynamic_rotate %789 by %c221_i32_215 dim 1 : vector<1x256xf32>, i32 -> vector<1x256xf32>
    %1178 = vector.broadcast %41 : f32 to vector<1x256xf32>
    %1179 = arith.mulf %1178, %1176 : vector<1x256xf32>
    %1180 = vector.broadcast %90 : f32 to vector<1x256xf32>
    %1181 = arith.mulf %1180, %1177 : vector<1x256xf32>
    %1182 = arith.addf %1179, %1181 : vector<1x256xf32>
    %1183 = arith.mulf %289, %1182 : vector<1x256xf32>
    %1184 = arith.addf %1175, %1183 : vector<1x256xf32>
    %1185 = arith.mulf %260, %1184 : vector<1x256xf32>
    %1186 = arith.addf %1120, %1185 : vector<1x256xf32>
    %cst_216 = arith.constant 0.000000e+00 : f32
    %1187 = vector.broadcast %cst_216 : f32 to vector<1x256xf32>
    %c211_i32_217 = arith.constant 211 : i32
    %1188 = tpu.dynamic_rotate %791 by %c211_i32_217 dim 1 : vector<1x256xf32>, i32 -> vector<1x256xf32>
    %c211_i32_218 = arith.constant 211 : i32
    %1189 = tpu.dynamic_rotate %789 by %c211_i32_218 dim 1 : vector<1x256xf32>, i32 -> vector<1x256xf32>
    %1190 = vector.broadcast %42 : f32 to vector<1x256xf32>
    %1191 = arith.mulf %1190, %1188 : vector<1x256xf32>
    %1192 = vector.broadcast %91 : f32 to vector<1x256xf32>
    %1193 = arith.mulf %1192, %1189 : vector<1x256xf32>
    %1194 = arith.addf %1191, %1193 : vector<1x256xf32>
    %1195 = arith.mulf %181, %1194 : vector<1x256xf32>
    %1196 = arith.addf %1187, %1195 : vector<1x256xf32>
    %c210_i32_219 = arith.constant 210 : i32
    %1197 = tpu.dynamic_rotate %791 by %c210_i32_219 dim 1 : vector<1x256xf32>, i32 -> vector<1x256xf32>
    %c210_i32_220 = arith.constant 210 : i32
    %1198 = tpu.dynamic_rotate %789 by %c210_i32_220 dim 1 : vector<1x256xf32>, i32 -> vector<1x256xf32>
    %1199 = vector.broadcast %43 : f32 to vector<1x256xf32>
    %1200 = arith.mulf %1199, %1197 : vector<1x256xf32>
    %1201 = vector.broadcast %92 : f32 to vector<1x256xf32>
    %1202 = arith.mulf %1201, %1198 : vector<1x256xf32>
    %1203 = arith.addf %1200, %1202 : vector<1x256xf32>
    %1204 = arith.mulf %199, %1203 : vector<1x256xf32>
    %1205 = arith.addf %1196, %1204 : vector<1x256xf32>
    %c209_i32_221 = arith.constant 209 : i32
    %1206 = tpu.dynamic_rotate %791 by %c209_i32_221 dim 1 : vector<1x256xf32>, i32 -> vector<1x256xf32>
    %c209_i32_222 = arith.constant 209 : i32
    %1207 = tpu.dynamic_rotate %789 by %c209_i32_222 dim 1 : vector<1x256xf32>, i32 -> vector<1x256xf32>
    %1208 = vector.broadcast %44 : f32 to vector<1x256xf32>
    %1209 = arith.mulf %1208, %1206 : vector<1x256xf32>
    %1210 = vector.broadcast %93 : f32 to vector<1x256xf32>
    %1211 = arith.mulf %1210, %1207 : vector<1x256xf32>
    %1212 = arith.addf %1209, %1211 : vector<1x256xf32>
    %1213 = arith.mulf %217, %1212 : vector<1x256xf32>
    %1214 = arith.addf %1205, %1213 : vector<1x256xf32>
    %c208_i32_223 = arith.constant 208 : i32
    %1215 = tpu.dynamic_rotate %791 by %c208_i32_223 dim 1 : vector<1x256xf32>, i32 -> vector<1x256xf32>
    %c208_i32_224 = arith.constant 208 : i32
    %1216 = tpu.dynamic_rotate %789 by %c208_i32_224 dim 1 : vector<1x256xf32>, i32 -> vector<1x256xf32>
    %1217 = vector.broadcast %45 : f32 to vector<1x256xf32>
    %1218 = arith.mulf %1217, %1215 : vector<1x256xf32>
    %1219 = vector.broadcast %94 : f32 to vector<1x256xf32>
    %1220 = arith.mulf %1219, %1216 : vector<1x256xf32>
    %1221 = arith.addf %1218, %1220 : vector<1x256xf32>
    %1222 = arith.mulf %235, %1221 : vector<1x256xf32>
    %1223 = arith.addf %1214, %1222 : vector<1x256xf32>
    %c207_i32_225 = arith.constant 207 : i32
    %1224 = tpu.dynamic_rotate %791 by %c207_i32_225 dim 1 : vector<1x256xf32>, i32 -> vector<1x256xf32>
    %c207_i32_226 = arith.constant 207 : i32
    %1225 = tpu.dynamic_rotate %789 by %c207_i32_226 dim 1 : vector<1x256xf32>, i32 -> vector<1x256xf32>
    %1226 = vector.broadcast %46 : f32 to vector<1x256xf32>
    %1227 = arith.mulf %1226, %1224 : vector<1x256xf32>
    %1228 = vector.broadcast %95 : f32 to vector<1x256xf32>
    %1229 = arith.mulf %1228, %1225 : vector<1x256xf32>
    %1230 = arith.addf %1227, %1229 : vector<1x256xf32>
    %1231 = arith.mulf %253, %1230 : vector<1x256xf32>
    %1232 = arith.addf %1223, %1231 : vector<1x256xf32>
    %c206_i32_227 = arith.constant 206 : i32
    %1233 = tpu.dynamic_rotate %791 by %c206_i32_227 dim 1 : vector<1x256xf32>, i32 -> vector<1x256xf32>
    %c206_i32_228 = arith.constant 206 : i32
    %1234 = tpu.dynamic_rotate %789 by %c206_i32_228 dim 1 : vector<1x256xf32>, i32 -> vector<1x256xf32>
    %1235 = vector.broadcast %47 : f32 to vector<1x256xf32>
    %1236 = arith.mulf %1235, %1233 : vector<1x256xf32>
    %1237 = vector.broadcast %96 : f32 to vector<1x256xf32>
    %1238 = arith.mulf %1237, %1234 : vector<1x256xf32>
    %1239 = arith.addf %1236, %1238 : vector<1x256xf32>
    %1240 = arith.mulf %271, %1239 : vector<1x256xf32>
    %1241 = arith.addf %1232, %1240 : vector<1x256xf32>
    %c205_i32_229 = arith.constant 205 : i32
    %1242 = tpu.dynamic_rotate %791 by %c205_i32_229 dim 1 : vector<1x256xf32>, i32 -> vector<1x256xf32>
    %c205_i32_230 = arith.constant 205 : i32
    %1243 = tpu.dynamic_rotate %789 by %c205_i32_230 dim 1 : vector<1x256xf32>, i32 -> vector<1x256xf32>
    %1244 = vector.broadcast %48 : f32 to vector<1x256xf32>
    %1245 = arith.mulf %1244, %1242 : vector<1x256xf32>
    %1246 = vector.broadcast %97 : f32 to vector<1x256xf32>
    %1247 = arith.mulf %1246, %1243 : vector<1x256xf32>
    %1248 = arith.addf %1245, %1247 : vector<1x256xf32>
    %1249 = arith.mulf %289, %1248 : vector<1x256xf32>
    %1250 = arith.addf %1241, %1249 : vector<1x256xf32>
    %1251 = arith.mulf %278, %1250 : vector<1x256xf32>
    %1252 = arith.addf %1186, %1251 : vector<1x256xf32>
    %1253 = vector.broadcast %98 : f32 to vector<1x256xf32>
    %1254 = arith.addf %1252, %1253 : vector<1x256xf32>
    %cst_231 = arith.constant 0.166666672 : f32
    %1255 = vector.broadcast %cst_231 : f32 to vector<1x256xf32>
    %1256 = arith.mulf %1254, %1255 : vector<1x256xf32>
    %cst_232 = arith.constant 5.000000e-01 : f32
    %1257 = vector.broadcast %cst_232 : f32 to vector<1x256xf32>
    %1258 = arith.addf %1256, %1257 : vector<1x256xf32>
    %cst_233 = arith.constant 0.000000e+00 : f32
    %cst_234 = arith.constant 1.000000e+00 : f32
    %1259 = vector.broadcast %cst_233 : f32 to vector<1x256xf32>
    %1260 = arith.maximumf %1259, %1258 : vector<1x256xf32>
    %1261 = vector.broadcast %cst_234 : f32 to vector<1x256xf32>
    %1262 = arith.minimumf %1261, %1260 : vector<1x256xf32>
    %c1_235 = arith.constant 1 : index
    %c0_236 = arith.constant 0 : index
    %c0_237 = arith.constant 0 : index
    %1263 = vector.load %arg3[%c1_235, %c0_236, %c0_237] : memref<2x4x256xf32, #tpu.memory_space<vmem>>, vector<1x4x256xf32>
    %1264 = vector.shape_cast %1263 : vector<1x4x256xf32> to vector<4x256xf32>
    %1265 = vector.broadcast %1262 : vector<1x256xf32> to vector<4x256xf32>
    %1266 = arith.mulf %1264, %1265 : vector<4x256xf32>
    %c1_238 = arith.constant 1 : index
    %c0_239 = arith.constant 0 : index
    %c0_240 = arith.constant 0 : index
    %1267 = vector.load %arg4[%c1_238, %c0_239, %c0_240] : memref<2x4x256xf32, #tpu.memory_space<vmem>>, vector<1x4x256xf32>
    %1268 = vector.shape_cast %1267 : vector<1x4x256xf32> to vector<4x256xf32>
    %1269 = vector.shape_cast %1266 : vector<4x256xf32> to vector<1x4x256xf32>
    tpu.vector_store %arg4[%c1_238, %c0_239, %c0_240], %1269 {strides = array<i32>} : memref<2x4x256xf32, #tpu.memory_space<vmem>>, vector<1x4x256xf32>,
    return
  }
  func.func @transform_0(%arg0: i32, %arg1: memref<98xf32, #tpu.memory_space<smem>>, %arg2: memref<1xf32, #tpu.memory_space<smem>>) -> (i32, i32, i32) {
    %c0_i32 = arith.constant 0 : i32
    %c0_i32_0 = arith.constant 0 : i32
    %c0_i32_1 = arith.constant 0 : i32
    return %arg0, %c0_i32, %c0_i32_0 : i32, i32, i32
  }
  func.func @transform_1(%arg0: i32, %arg1: memref<98xf32, #tpu.memory_space<smem>>, %arg2: memref<1xf32, #tpu.memory_space<smem>>) -> (i32, i32, i32) {
    %c0_i32 = arith.constant 0 : i32
    %c0_i32_0 = arith.constant 0 : i32
    %c0_i32_1 = arith.constant 0 : i32
    return %arg0, %c0_i32, %c0_i32_0 : i32, i32, i32
  }
}

</mosaic_0001>

<bundles_post_ra>
// kernel: tpu_custom_call.1
= control target key start
LH: loop header
LB: loop body
LE: loop exit
PB: predicated region body
PF: predicated region fallthrough
CT: control target
= control target key end

     0   :  { %s3085_s15 = smov [#allocation3]   ;;  %s7227_s0 = inlined_call_operand.vmem [shape: f32[98], index: 0, kind: input, shape index: {}]   ;;  %s7228_s1 = inlined_call_operand.<no memory space> [shape: f32[1], index: 1, kind: input, shape index: {}]   ;;  %s7229_s2 = inlined_call_operand.hbm [shape: f32[2,4,256], index: 2, kind: input, shape index: {}]   ;;  %s7230_s3 = inlined_call_operand.hbm [shape: f32[2,4,256], index: 3, kind: output, shape index: {}]  }
   0x1   :  { %s9_s14 = sshll.u32 %s7227_s0, 4  ;;  %s10_s14 = int_to_ptr.vmem [resolvable:$true] %s9_s14 }
   0x2   :  { %12 = dma.vmem_to_smem %s10_s14, 16, %s3085_s15, [#allocation2] }
   0x3   :  { %3079 = dma.done.wait [#allocation2], 16 }
   0x4   :  { %3080 = vsyncadd [#allocation2], 4294967280 }
   0x5   :  { %16 = sfence }
   0x6   :  { %17 = vsyncpa [#allocation6], 0 }
   0x7   :  { %18 = vsyncpa [#allocation7], 0  ;;  %s23_s18 = sshll.u32 %s7229_s2, 4  ;;  %s3086_s19 = smov [#allocation5]   ;;  %s24_s18 = int_to_ptr.hbm [resolvable:$true] %s23_s18 }
   0x8   :  { %s25_s20 = sshll.u32 %s3086_s19, 4  ;;  %s7243_s21 = smov 128   ;;  %s26_s20 = int_to_ptr.vmem [resolvable:$true] %s25_s20 }
   0x9   :  { %s7247_s22 = smov 8  }
   0xa   :  { %31 = dma.hbm_to_vmem [thread:$0]  %s24_s18, 256, %s26_s20, [#allocation6], %s7243_s21, %s7243_s21, %s7247_s22  }
   0xb   :  { %3081 = dma.done.wait [#allocation6], 256  }
   0xc   :  { %3082 = vsyncadd [#allocation6], 4294967040  ;;  %v3169_v0 = vld [vmem:[#allocation5] sm:$0xff]  ;;  %vm7338_vm0 = vcmask 1043456   ;;  %v3175_v11 = vld [vmem:[#allocation5 + $0x8] sm:$0xff]  ;;  %s3089_s0 = smov 48  }
   0xd   :  { %7689 = vst [vmem:[#allocation12_spill] sm:$0xff] %v3169_v0  ;;  %s3090_s2 = smov 51   ;;  %s3091_s23 = smov 50  }
   0xe   :  { %366 = vst [vmem:[#allocation1] ss:$2 sm:$0xff] %v3169_v0  ;;  %s3092_s24 = smov 49   ;;  %s3093_s25 = smov 47  }
   0xf   :  { %7690 = vst [vmem:[#allocation13_spill] sm:$0xff] %v3175_v11  ;;  %s3094_s26 = smov 46   ;;  %s3095_s27 = smov 45  }
  0x10   :  { %s3096_s28 = smov 35   ;;  %s3097_s29 = smov 34  }
  0x11   :  { %s3098_s30 = smov 33   ;;  %s3099_s4 = smov 32  }
  0x12   :  { %s3100_s5 = smov 31   ;;  %s3101_s6 = smov 30  }
  0x13   :  { %s3102_s7 = smov 29   ;;  %s3103_s8 = smov 19  }
  0x14   :  { %s3104_s9 = smov 18   ;;  %s3105_s10 = smov 17  }
  0x15   :  { %v368_v1 = vld.sshfl [vmem:[#allocation1 + $0x8] sm:$0xff pattern:$0x75316420]  ;;  %v367_v2 = vld.sshfl [vmem:[#allocation1] sm:$0xff pattern:$0x75316420] }
  0x16   :  { %v379_v3 = vsel %vm7338_vm0, %v368_v1, 0.0  ;;  %v372_v4 = vsel %vm7338_vm0, %v367_v2, 0.0  ;;  %388 = vst [vmem:[#allocation1] ss:$2 sm:$0xff] %v3169_v0  ;;  %s3106_s11 = smov 16   ;;  %s3107_s12 = smov 15  }
  0x17   :  { %v380_v5 = vrot.slane %v379_v3, 4  ;;  %v373_v6 = vrot.slane %v372_v4, 4  ;;  %s7486_s13 = smov 14   ;;  %s7336_s14 = smov 13  }
  0x18   :  { %s7329_s15 = smov 3   ;;  %s7320_s16 = smov 2  }
  0x19   :  { %v381_v7 = vadd.f32 %v380_v5, %v379_v3  ;;  %v374_v8 = vadd.f32 %v373_v6, %v372_v4  ;;  %s7318_s17 = smov 1   ;;  %s7316_s18 = smov 127  }
  0x1a   :  { %s7314_s19 = smov 126   ;;  %s7251_s20 = smov 125  }
  0x1b   :  { %v382_v9 = vrot.slane %v381_v7, 2  ;;  %v375_v10 = vrot.slane %v374_v8, 2  ;;  %s7269_s21 = smov 115   ;;  %s7259_s22 = smov 114  }
  0x1d   :  { %v383_v12 = vadd.f32 %v382_v9, %v381_v7  ;;  %v376_v13 = vadd.f32 %v375_v10, %v374_v8  ;;  %v389_v14 = vld.sshfl [vmem:[#allocation1] sm:$0xff pattern:$0x75316420]  ;;  %v390_v15 = vld.sshfl [vmem:[#allocation1 + $0x8] sm:$0xff pattern:$0x75316420] }
  0x1e   :  { %v393_v16 = vsel %vm7338_vm0, %v389_v14, -inf  ;;  %v400_v17 = vsel %vm7338_vm0, %v390_v15, -inf  ;;  %1672 = vst [vmem:[#allocation1] ss:$2 sm:$0xff] %v3175_v11 }
  0x1f   :  { %v384_v18 = vrot.slane %v383_v12, 1  ;;  %v377_v19 = vrot.slane %v376_v13, 1  ;;  %v394_v20 = vrot.slane %v393_v16, 4  ;;  %v401_v21 = vrot.slane %v400_v17, 4 }
  0x21   :  { %v385_v22 = vadd.f32 %v384_v18, %v383_v12  ;;  %v378_v23 = vadd.f32 %v377_v19, %v376_v13  ;;  %v395_v24 = vmax.f32 %v393_v16, %v394_v20  ;;  %v402_v25 = vmax.f32 %v400_v17, %v401_v21 }
  0x23   :  { %v3180_v26 = vmul.f32 0.25, %v385_v22  ;;  %v3182_v27 = vmul.f32 0.25, %v378_v23  ;;  %v396_v28 = vrot.slane %v395_v24, 2  ;;  %v403_v30 = vrot.slane %v402_v25, 2 }
  0x25   :  { %486 = vrot.lane.b32.xlu1 %v3180_v26, %s3089_s0  ;;  %409 = vrot.lane.b32.xlu0 %v3182_v27, %s3090_s2  ;;  %v397_v29 = vmax.f32 %v395_v24, %v396_v28  ;;  %v404_v33 = vmax.f32 %v402_v25, %v403_v30 }
  0x26   :  { %434 = vrot.lane.b32.xlu2 %v3182_v27, %s3091_s23 }
  0x27   :  { %v398_v31 = vrot.slane %v397_v29, 1  ;;  %v405_v34 = vrot.slane %v404_v33, 1 }
  0x29   :  { %v3190_v32 = vmax.f32 %v397_v29, %v398_v31  ;;  %v3198_v35 = vmax.f32 %v404_v33, %v405_v34 }
  0x2d   :  { %416 = vrot.lane.b32.xlu1 %v3190_v32, %s3090_s2  ;;  %411 = vrot.lane.b32.xlu0 %v3180_v26, %s3090_s2 }
  0x2e   :  { %436 = vrot.lane.b32.xlu2 %v3180_v26, %s3091_s23 }
  0x35   :  { %418 = vrot.lane.b32.xlu1 %v3198_v35, %s3090_s2  ;;  %461 = vrot.lane.b32.xlu0 %v3180_v26, %s3092_s24 }
  0x36   :  { %459 = vrot.lane.b32.xlu2 %v3182_v27, %s3092_s24 }
  0x3d   :  { %443 = vrot.lane.b32.xlu1 %v3198_v35, %s3091_s23  ;;  %484 = vrot.lane.b32.xlu0 %v3182_v27, %s3089_s0 }
  0x3e   :  { %468 = vrot.lane.b32.xlu2 %v3198_v35, %s3092_s24 }
  0x45   :  { %466 = vrot.lane.b32.xlu1 %v3190_v32, %s3092_s24  ;;  %441 = vrot.lane.b32.xlu0 %v3190_v32, %s3091_s23 }
  0x46   :  { %491 = vrot.lane.b32.xlu2 %v3190_v32, %s3089_s0 }
  0x4d   :  { %509 = vrot.lane.b32.xlu1 %v3182_v27, %s3093_s25  ;;  %493 = vrot.lane.b32.xlu0 %v3198_v35, %s3089_s0 }
  0x4e   :  { %511 = vrot.lane.b32.xlu2 %v3180_v26, %s3093_s25 }
  0x55   :  { %518 = vrot.lane.b32.xlu1 %v3198_v35, %s3093_s25  ;;  %516 = vrot.lane.b32.xlu0 %v3190_v32, %s3093_s25 }
  0x56   :  { %534 = vrot.lane.b32.xlu2 %v3182_v27, %s3094_s26 }
  0x5d   :  { %541 = vrot.lane.b32.xlu1 %v3190_v32, %s3094_s26  ;;  %536 = vrot.lane.b32.xlu0 %v3180_v26, %s3094_s26 }
  0x5e   :  { %543 = vrot.lane.b32.xlu2 %v3198_v35, %s3094_s26 }
  0x65   :  { %561 = vrot.lane.b32.xlu1 %v3180_v26, %s3095_s27  ;;  %559 = vrot.lane.b32.xlu0 %v3182_v27, %s3095_s27 }
  0x66   :  { %566 = vrot.lane.b32.xlu2 %v3190_v32, %s3095_s27 }
  0x6d   :  { %588 = vrot.lane.b32.xlu1 %v3182_v27, %s3096_s28  ;;  %568 = vrot.lane.b32.xlu0 %v3198_v35, %s3095_s27 }
  0x6e   :  { %590 = vrot.lane.b32.xlu2 %v3180_v26, %s3096_s28 }
  0x75   :  { %597 = vrot.lane.b32.xlu1 %v3198_v35, %s3096_s28  ;;  %595 = vrot.lane.b32.xlu0 %v3190_v32, %s3096_s28 }
  0x76   :  { %613 = vrot.lane.b32.xlu2 %v3182_v27, %s3097_s29 }
  0x7d   :  { %620 = vrot.lane.b32.xlu1 %v3190_v32, %s3097_s29  ;;  %615 = vrot.lane.b32.xlu0 %v3180_v26, %s3097_s29 }
  0x7e   :  { %622 = vrot.lane.b32.xlu2 %v3198_v35, %s3097_s29 }
  0x80   :  { %v3260_v36 = vpop.permute.xlu2 %434 }
  0x85   :  { %640 = vrot.lane.b32.xlu1 %v3180_v26, %s3098_s30  ;;  %638 = vrot.lane.b32.xlu0 %v3182_v27, %s3098_s30 }
  0x86   :  { %645 = vrot.lane.b32.xlu2 %v3190_v32, %s3098_s30 }
  0x88   :  { %v3268_v37 = vpop.permute.xlu2 %436 }
  0x8d   :  { %663 = vrot.lane.b32.xlu1 %v3182_v27, %s3099_s4  ;;  %647 = vrot.lane.b32.xlu0 %v3198_v35, %s3098_s30 }
  0x8e   :  { %665 = vrot.lane.b32.xlu2 %v3180_v26, %s3099_s4 }
  0x90   :  { %v3276_v38 = vpop.permute.xlu2 %459 }
  0x95   :  { %672 = vrot.lane.b32.xlu1 %v3198_v35, %s3099_s4  ;;  %670 = vrot.lane.b32.xlu0 %v3190_v32, %s3099_s4 }
  0x96   :  { %688 = vrot.lane.b32.xlu2 %v3182_v27, %s3100_s5 }
  0x97   :  { %v3284_v39 = vpop.permute.xlu1 %486  ;;  %v3286_v40 = vpop.permute.xlu0 %409 }
  0x98   :  { %v3288_v41 = vpop.permute.xlu2 %468 }
  0x9d   :  { %695 = vrot.lane.b32.xlu1 %v3190_v32, %s3100_s5  ;;  %690 = vrot.lane.b32.xlu0 %v3180_v26, %s3100_s5 }
  0x9e   :  { %697 = vrot.lane.b32.xlu2 %v3198_v35, %s3100_s5 }
  0x9f   :  { %v3296_v42 = vpop.permute.xlu1 %416  ;;  %v3298_v43 = vpop.permute.xlu0 %411 }
  0xa0   :  { %v3300_v44 = vpop.permute.xlu2 %491 }
  0xa5   :  { %715 = vrot.lane.b32.xlu1 %v3180_v26, %s3101_s6  ;;  %713 = vrot.lane.b32.xlu0 %v3182_v27, %s3101_s6 }
  0xa6   :  { %720 = vrot.lane.b32.xlu2 %v3190_v32, %s3101_s6 }
  0xa7   :  { %v3308_v45 = vpop.permute.xlu1 %418  ;;  %v3310_v46 = vpop.permute.xlu0 %461 }
  0xa8   :  { %v3312_v47 = vpop.permute.xlu2 %511 }
  0xad   :  { %738 = vrot.lane.b32.xlu1 %v3182_v27, %s3102_s7  ;;  %722 = vrot.lane.b32.xlu0 %v3198_v35, %s3101_s6 }
  0xae   :  { %740 = vrot.lane.b32.xlu2 %v3180_v26, %s3102_s7 }
  0xaf   :  { %v3320_v48 = vpop.permute.xlu1 %443  ;;  %v3322_v49 = vpop.permute.xlu0 %484 }
  0xb0   :  { %v3324_v50 = vpop.permute.xlu2 %534 }
  0xb5   :  { %747 = vrot.lane.b32.xlu1 %v3198_v35, %s3102_s7  ;;  %745 = vrot.lane.b32.xlu0 %v3190_v32, %s3102_s7 }
  0xb6   :  { %767 = vrot.lane.b32.xlu2 %v3182_v27, %s3103_s8 }
  0xb7   :  { %v3332_v51 = vpop.permute.xlu1 %466  ;;  %v3334_v52 = vpop.permute.xlu0 %441 }
  0xb8   :  { %v3336_v53 = vpop.permute.xlu2 %543 }
  0xbd   :  { %774 = vrot.lane.b32.xlu1 %v3190_v32, %s3103_s8  ;;  %769 = vrot.lane.b32.xlu0 %v3180_v26, %s3103_s8 }
  0xbe   :  { %776 = vrot.lane.b32.xlu2 %v3198_v35, %s3103_s8 }
  0xbf   :  { %v3344_v54 = vpop.permute.xlu1 %509  ;;  %v3346_v55 = vpop.permute.xlu0 %493 }
  0xc0   :  { %v3348_v56 = vpop.permute.xlu2 %566 }
  0xc5   :  { %794 = vrot.lane.b32.xlu1 %v3180_v26, %s3104_s9  ;;  %792 = vrot.lane.b32.xlu0 %v3182_v27, %s3104_s9 }
  0xc6   :  { %799 = vrot.lane.b32.xlu2 %v3190_v32, %s3104_s9 }
  0xc7   :  { %v3356_v57 = vpop.permute.xlu1 %518  ;;  %v3358_v58 = vpop.permute.xlu0 %516 }
  0xc8   :  { %v3360_v59 = vpop.permute.xlu2 %590 }
  0xc9   :  { %7691 = vst [vmem:[#allocation14_spill] sm:$0xff] %v3360_v59 }
  0xcd   :  { %817 = vrot.lane.b32.xlu1 %v3182_v27, %s3105_s10  ;;  %801 = vrot.lane.b32.xlu0 %v3198_v35, %s3104_s9 }
  0xce   :  { %819 = vrot.lane.b32.xlu2 %v3180_v26, %s3105_s10 }
  0xcf   :  { %v3368_v60 = vpop.permute.xlu1 %541  ;;  %v3370_v61 = vpop.permute.xlu0 %536 }
  0xd0   :  { %v3372_v62 = vpop.permute.xlu2 %613 }
  0xd1   :  { %7692 = vst [vmem:[#allocation15_spill] sm:$0xff] %v3372_v62 }
  0xd5   :  { %826 = vrot.lane.b32.xlu1 %v3198_v35, %s3105_s10  ;;  %824 = vrot.lane.b32.xlu0 %v3190_v32, %s3105_s10 }
  0xd6   :  { %842 = vrot.lane.b32.xlu2 %v3182_v27, %s3106_s11 }
  0xd7   :  { %v3380_v63 = vpop.permute.xlu1 %561  ;;  %v3382_v1 = vpop.permute.xlu0 %559 }
  0xd8   :  { %v3384_v2 = vpop.permute.xlu2 %622 }
  0xd9   :  { %7693 = vst [vmem:[#allocation16_spill] sm:$0xff] %v3384_v2 }
  0xdd   :  { %849 = vrot.lane.b32.xlu1 %v3190_v32, %s3106_s11  ;;  %844 = vrot.lane.b32.xlu0 %v3180_v26, %s3106_s11 }
  0xde   :  { %851 = vrot.lane.b32.xlu2 %v3198_v35, %s3106_s11 }
  0xdf   :  { %v3392_v3 = vpop.permute.xlu1 %588  ;;  %v3394_v4 = vpop.permute.xlu0 %568 }
  0xe0   :  { %v3396_v5 = vpop.permute.xlu2 %645 }
  0xe1   :  { %7694 = vst [vmem:[#allocation17_spill] sm:$0xff] %v3396_v5 }
  0xe5   :  { %869 = vrot.lane.b32.xlu1 %v3180_v26, %s3107_s12  ;;  %867 = vrot.lane.b32.xlu0 %v3182_v27, %s3107_s12 }
  0xe6   :  { %874 = vrot.lane.b32.xlu2 %v3190_v32, %s3107_s12 }
  0xe7   :  { %v3404_v6 = vpop.permute.xlu1 %597  ;;  %v3406_v7 = vpop.permute.xlu0 %595 }
  0xe8   :  { %v3408_v8 = vpop.permute.xlu2 %665 }
  0xe9   :  { %7695 = vst [vmem:[#allocation18_spill] sm:$0xff] %v3408_v8  ;;  %v7348_v8 = vmov 0.0  }
  0xed   :  { %892 = vrot.lane.b32.xlu1 %v3182_v27, %s7486_s13  ;;  %876 = vrot.lane.b32.xlu0 %v3198_v35, %s3107_s12 }
  0xee   :  { %894 = vrot.lane.b32.xlu2 %v3180_v26, %s7486_s13 }
  0xef   :  { %v3416_v9 = vpop.permute.xlu1 %620  ;;  %v3418_v10 = vpop.permute.xlu0 %615 }
  0xf0   :  { %7696 = vst [vmem:[#allocation19_spill] sm:$0xff] %v3416_v9  ;;  %v3420_v12 = vpop.permute.xlu2 %688 }
  0xf1   :  { %7697 = vst [vmem:[#allocation20_spill] sm:$0xff] %v3418_v10 }
  0xf2   :  { %7698 = vst [vmem:[#allocation21_spill] sm:$0xff] %v3420_v12 }
  0xf5   :  { %901 = vrot.lane.b32.xlu1 %v3198_v35, %s7486_s13  ;;  %899 = vrot.lane.b32.xlu0 %v3190_v32, %s7486_s13  ;;  %s3138_s13 = smov 77  }
  0xf6   :  { %917 = vrot.lane.b32.xlu2 %v3182_v27, %s7336_s14 }
  0xf7   :  { %v3428_v13 = vpop.permute.xlu1 %640  ;;  %v3430_v14 = vpop.permute.xlu0 %638 }
  0xf8   :  { %7699 = vst [vmem:[#allocation22_spill] sm:$0xff] %v3428_v13  ;;  %v3432_v15 = vpop.permute.xlu2 %697 }
  0xf9   :  { %7700 = vst [vmem:[#allocation23_spill] sm:$0xff] %v3430_v14 }
  0xfa   :  { %7701 = vst [vmem:[#allocation24_spill] sm:$0xff] %v3432_v15 }
  0xfd   :  { %924 = vrot.lane.b32.xlu1 %v3190_v32, %s7336_s14  ;;  %919 = vrot.lane.b32.xlu0 %v3180_v26, %s7336_s14 }
  0xfe   :  { %926 = vrot.lane.b32.xlu2 %v3198_v35, %s7336_s14  ;;  %s7388_s14 = smov 95  }
  0xff   :  { %v3440_v16 = vpop.permute.xlu1 %663  ;;  %v3442_v17 = vpop.permute.xlu0 %647 }
 0x100   :  { %7702 = vst [vmem:[#allocation25_spill] sm:$0xff] %v3440_v16  ;;  %v3444_v18 = vpop.permute.xlu2 %720 }
 0x101   :  { %7703 = vst [vmem:[#allocation26_spill] sm:$0xff] %v3442_v17 }
 0x102   :  { %7704 = vst [vmem:[#allocation27_spill] sm:$0xff] %v3444_v18 }
 0x105   :  { %948 = vrot.lane.b32.xlu1 %v3180_v26, %s7329_s15  ;;  %946 = vrot.lane.b32.xlu0 %v3182_v27, %s7329_s15 }
 0x106   :  { %953 = vrot.lane.b32.xlu2 %v3190_v32, %s7329_s15 }
 0x107   :  { %v3452_v19 = vpop.permute.xlu1 %672  ;;  %v3454_v20 = vpop.permute.xlu0 %670 }
 0x108   :  { %7705 = vst [vmem:[#allocation28_spill] sm:$0xff] %v3452_v19  ;;  %v3456_v21 = vpop.permute.xlu2 %740 }
 0x109   :  { %7706 = vst [vmem:[#allocation29_spill] sm:$0xff] %v3454_v20 }
 0x10a   :  { %7707 = vst [vmem:[#allocation30_spill] sm:$0xff] %v3456_v21 }
 0x10d   :  { %971 = vrot.lane.b32.xlu1 %v3182_v27, %s7320_s16  ;;  %955 = vrot.lane.b32.xlu0 %v3198_v35, %s7329_s15  ;;  %s3760_s15 = sld [smem:[#allocation3 + $0x32]] }
 0x10e   :  { %973 = vrot.lane.b32.xlu2 %v3180_v26, %s7320_s16 }
 0x10f   :  { %v3464_v22 = vpop.permute.xlu1 %695  ;;  %v3466_v23 = vpop.permute.xlu0 %690 }
 0x110   :  { %7708 = vst [vmem:[#allocation31_spill] sm:$0xff] %v3464_v22  ;;  %v3468_v24 = vpop.permute.xlu2 %767 }
 0x111   :  { %7709 = vst [vmem:[#allocation32_spill] sm:$0xff] %v3466_v23 }
 0x112   :  { %7710 = vst [vmem:[#allocation33_spill] sm:$0xff] %v3468_v24 }
 0x113   :  { %v3880_v13 = vstv %s3760_s15  ;;  %s3963_s15 = sld [smem:[#allocation3 + $0x36]] }
 0x114   :  { %7793 = vst [vmem:[#allocation105_spill] sm:$0xff] %v3880_v13 }
 0x115   :  { %980 = vrot.lane.b32.xlu1 %v3198_v35, %s7320_s16  ;;  %978 = vrot.lane.b32.xlu0 %v3190_v32, %s7320_s16  ;;  %s3750_s16 = sld [smem:[#allocation3 + $0x3]] }
 0x116   :  { %996 = vrot.lane.b32.xlu2 %v3182_v27, %s7318_s17 }
 0x117   :  { %v3476_v25 = vpop.permute.xlu1 %715  ;;  %v3478_v28 = vpop.permute.xlu0 %713 }
 0x118   :  { %7711 = vst [vmem:[#allocation34_spill] sm:$0xff] %v3476_v25  ;;  %v3480_v29 = vpop.permute.xlu2 %776 }
 0x119   :  { %7712 = vst [vmem:[#allocation35_spill] sm:$0xff] %v3478_v28 }
 0x11a   :  { %7713 = vst [vmem:[#allocation36_spill] sm:$0xff] %v3480_v29 }
 0x11d   :  { %1003 = vrot.lane.b32.xlu1 %v3190_v32, %s7318_s17  ;;  %998 = vrot.lane.b32.xlu0 %v3180_v26, %s7318_s17 }
 0x11e   :  { %1005 = vrot.lane.b32.xlu2 %v3198_v35, %s7318_s17  ;;  %s3743_s17 = sld [smem:[#allocation3 + $0x2]] }
 0x11f   :  { %v3488_v30 = vpop.permute.xlu1 %738  ;;  %v3490_v31 = vpop.permute.xlu0 %722 }
 0x120   :  { %7714 = vst [vmem:[#allocation37_spill] sm:$0xff] %v3488_v30  ;;  %v3492_v33 = vpop.permute.xlu2 %799 }
 0x121   :  { %7715 = vst [vmem:[#allocation38_spill] sm:$0xff] %v3490_v31 }
 0x122   :  { %7716 = vst [vmem:[#allocation39_spill] sm:$0xff] %v3492_v33 }
 0x124   :  { %v3815_v16 = vstv %s3743_s17  ;;  %s3849_s17 = sld [smem:[#allocation3 + $0x34]] }
 0x125   :  { %1035 = vrot.lane.b32.xlu1 %v3180_v26, %s7316_s18  ;;  %1033 = vrot.lane.b32.xlu0 %v3182_v27, %s7316_s18  ;;  %7783 = vst [vmem:[#allocation100_spill] sm:$0xff] %v3815_v16 }
 0x126   :  { %1040 = vrot.lane.b32.xlu2 %v3190_v32, %s7316_s18 }
 0x127   :  { %v3500_v34 = vpop.permute.xlu1 %747  ;;  %v3502_v0 = vpop.permute.xlu0 %745 }
 0x128   :  { %7717 = vst [vmem:[#allocation40_spill] sm:$0xff] %v3500_v34  ;;  %v3504_v24 = vpop.permute.xlu2 %819 }
 0x129   :  { %7718 = vst [vmem:[#allocation41_spill] sm:$0xff] %v3502_v0 }
 0x12a   :  { %7719 = vst [vmem:[#allocation42_spill] sm:$0xff] %v3504_v24 }
 0x12d   :  { %1058 = vrot.lane.b32.xlu1 %v3182_v27, %s7314_s19  ;;  %1042 = vrot.lane.b32.xlu0 %v3198_v35, %s7316_s18  ;;  %s3739_s18 = sld [smem:[#allocation3 + $0x31]] }
 0x12e   :  { %1060 = vrot.lane.b32.xlu2 %v3180_v26, %s7314_s19 }
 0x12f   :  { %v3512_v33 = vpop.permute.xlu1 %774  ;;  %v3514_v29 = vpop.permute.xlu0 %769 }
 0x130   :  { %7720 = vst [vmem:[#allocation43_spill] sm:$0xff] %v3512_v33  ;;  %v3516_v11 = vpop.permute.xlu2 %842 }
 0x131   :  { %7721 = vst [vmem:[#allocation44_spill] sm:$0xff] %v3514_v29 }
 0x132   :  { %7722 = vst [vmem:[#allocation45_spill] sm:$0xff] %v3516_v11 }
 0x135   :  { %1067 = vrot.lane.b32.xlu1 %v3198_v35, %s7314_s19  ;;  %1065 = vrot.lane.b32.xlu0 %v3190_v32, %s7314_s19  ;;  %s3731_s19 = sld [smem:[#allocation3]] }
 0x136   :  { %1083 = vrot.lane.b32.xlu2 %v3182_v27, %s7251_s20 }
 0x137   :  { %v3524_v24 = vpop.permute.xlu1 %794  ;;  %v3526_v21 = vpop.permute.xlu0 %792 }
 0x138   :  { %7723 = vst [vmem:[#allocation46_spill] sm:$0xff] %v3524_v24  ;;  %v3528_v30 = vpop.permute.xlu2 %851 }
 0x139   :  { %7724 = vst [vmem:[#allocation47_spill] sm:$0xff] %v3526_v21 }
 0x13a   :  { %7725 = vst [vmem:[#allocation48_spill] sm:$0xff] %v3528_v30 }
 0x13d   :  { %1090 = vrot.lane.b32.xlu1 %v3190_v32, %s7251_s20  ;;  %1085 = vrot.lane.b32.xlu0 %v3180_v26, %s7251_s20 }
 0x13e   :  { %1092 = vrot.lane.b32.xlu2 %v3198_v35, %s7251_s20  ;;  %s7264_s20 = smov 113  }
 0x13f   :  { %v3536_v11 = vpop.permute.xlu1 %817  ;;  %v3538_v29 = vpop.permute.xlu0 %801 }
 0x140   :  { %7726 = vst [vmem:[#allocation49_spill] sm:$0xff] %v3536_v11  ;;  %v3540_v33 = vpop.permute.xlu2 %874 }
 0x141   :  { %7727 = vst [vmem:[#allocation50_spill] sm:$0xff] %v3538_v29 }
 0x142   :  { %7728 = vst [vmem:[#allocation51_spill] sm:$0xff] %v3540_v33 }
 0x145   :  { %1114 = vrot.lane.b32.xlu1 %v3180_v26, %s7269_s21  ;;  %1112 = vrot.lane.b32.xlu0 %v3182_v27, %s7269_s21 }
 0x146   :  { %1119 = vrot.lane.b32.xlu2 %v3190_v32, %s7269_s21 }
 0x147   :  { %v3548_v30 = vpop.permute.xlu1 %826  ;;  %v3550_v24 = vpop.permute.xlu0 %824 }
 0x148   :  { %7729 = vst [vmem:[#allocation52_spill] sm:$0xff] %v3548_v30  ;;  %v3552_v21 = vpop.permute.xlu2 %894 }
 0x149   :  { %7730 = vst [vmem:[#allocation53_spill] sm:$0xff] %v3550_v24 }
 0x14a   :  { %7731 = vst [vmem:[#allocation54_spill] sm:$0xff] %v3552_v21 }
 0x14d   :  { %1137 = vrot.lane.b32.xlu1 %v3182_v27, %s7259_s22  ;;  %1121 = vrot.lane.b32.xlu0 %v3198_v35, %s7269_s21  ;;  %s7290_s21 = smov 110  }
 0x14e   :  { %1139 = vrot.lane.b32.xlu2 %v3180_v26, %s7259_s22 }
 0x14f   :  { %v3560_v33 = vpop.permute.xlu1 %849  ;;  %v3562_v11 = vpop.permute.xlu0 %844 }
 0x150   :  { %7732 = vst [vmem:[#allocation55_spill] sm:$0xff] %v3560_v33  ;;  %v3564_v29 = vpop.permute.xlu2 %917 }
 0x151   :  { %7733 = vst [vmem:[#allocation56_spill] sm:$0xff] %v3562_v11 }
 0x152   :  { %7734 = vst [vmem:[#allocation57_spill] sm:$0xff] %v3564_v29 }
 0x155   :  { %1146 = vrot.lane.b32.xlu1 %v3198_v35, %s7259_s22  ;;  %1144 = vrot.lane.b32.xlu0 %v3190_v32, %s7259_s22  ;;  %s7312_s22 = smov 112  }
 0x156   :  { %1162 = vrot.lane.b32.xlu2 %v3182_v27, %s7264_s20 }
 0x157   :  { %v3572_v21 = vpop.permute.xlu1 %869  ;;  %v3574_v30 = vpop.permute.xlu0 %867 }
 0x158   :  { %7735 = vst [vmem:[#allocation58_spill] sm:$0xff] %v3572_v21  ;;  %v3576_v24 = vpop.permute.xlu2 %926 }
 0x159   :  { %7736 = vst [vmem:[#allocation59_spill] sm:$0xff] %v3574_v30 }
 0x15a   :  { %7737 = vst [vmem:[#allocation60_spill] sm:$0xff] %v3576_v24 }
 0x15d   :  { %1169 = vrot.lane.b32.xlu1 %v3190_v32, %s7264_s20  ;;  %1164 = vrot.lane.b32.xlu0 %v3180_v26, %s7264_s20 }
 0x15e   :  { %1171 = vrot.lane.b32.xlu2 %v3198_v35, %s7264_s20  ;;  %s7280_s20 = smov 111  }
 0x15f   :  { %v3584_v29 = vpop.permute.xlu1 %892  ;;  %v3586_v11 = vpop.permute.xlu0 %876 }
 0x160   :  { %7738 = vst [vmem:[#allocation61_spill] sm:$0xff] %v3584_v29  ;;  %v3588_v33 = vpop.permute.xlu2 %953 }
 0x161   :  { %7739 = vst [vmem:[#allocation62_spill] sm:$0xff] %v3586_v11 }
 0x162   :  { %7740 = vst [vmem:[#allocation63_spill] sm:$0xff] %v3588_v33 }
 0x165   :  { %1189 = vrot.lane.b32.xlu1 %v3180_v26, %s7312_s22  ;;  %1187 = vrot.lane.b32.xlu0 %v3182_v27, %s7312_s22 }
 0x166   :  { %1194 = vrot.lane.b32.xlu2 %v3190_v32, %s7312_s22 }
 0x167   :  { %v3596_v24 = vpop.permute.xlu1 %901  ;;  %v3598_v21 = vpop.permute.xlu0 %899 }
 0x168   :  { %7741 = vst [vmem:[#allocation64_spill] sm:$0xff] %v3596_v24  ;;  %v3600_v30 = vpop.permute.xlu2 %973 }
 0x169   :  { %7742 = vst [vmem:[#allocation65_spill] sm:$0xff] %v3598_v21 }
 0x16a   :  { %7743 = vst [vmem:[#allocation66_spill] sm:$0xff] %v3600_v30 }
 0x16d   :  { %1212 = vrot.lane.b32.xlu1 %v3182_v27, %s7280_s20  ;;  %1196 = vrot.lane.b32.xlu0 %v3198_v35, %s7312_s22  ;;  %s7484_s22 = smov 96  }
 0x16e   :  { %1214 = vrot.lane.b32.xlu2 %v3180_v26, %s7280_s20 }
 0x16f   :  { %v3608_v33 = vpop.permute.xlu1 %924  ;;  %v3610_v29 = vpop.permute.xlu0 %919 }
 0x170   :  { %7744 = vst [vmem:[#allocation67_spill] sm:$0xff] %v3608_v33  ;;  %v3612_v11 = vpop.permute.xlu2 %996  ;;  %v135_v33 = vlaneseq }
 0x171   :  { %7745 = vst [vmem:[#allocation68_spill] sm:$0xff] %v3610_v29 }
 0x172   :  { %7746 = vst [vmem:[#allocation69_spill] sm:$0xff] %v3612_v11  ;;  %v3626_v29 = vand.u32 127, %v135_v33 }
 0x174   :  { %vm7335_vm2 = vcmp.ge.s32.totalorder %v3626_v29, 16  ;;  %vm142_vm3 = vcmp.ge.s32.totalorder %v3626_v29, 32  ;;  %vm148_vm5 = vcmp.ge.s32.totalorder %v3626_v29, 48  ;;  %vm154_vm7 = vcmp.ge.s32.totalorder %v3626_v29, 64 }
 0x175   :  { %1221 = vrot.lane.b32.xlu1 %v3198_v35, %s7280_s20  ;;  %1219 = vrot.lane.b32.xlu0 %v3190_v32, %s7280_s20  ;;  %s7300_s20 = smov 109   ;;  %vm160_vm9 = vcmp.ge.s32.totalorder %v3626_v29, 80  ;;  %vm166_vm11 = vcmp.ge.s32.totalorder %v3626_v29, 96  ;;  %vm172_vm13 = vcmp.ge.s32.totalorder %v3626_v29, 112  ;;  %vm438_vm15 = vcmp.lt.s32.totalorder %v3626_v29, 50 }
 0x176   :  { %1237 = vrot.lane.b32.xlu2 %v3182_v27, %s7290_s21 }
 0x177   :  { %v3620_v30 = vpop.permute.xlu1 %948  ;;  %v3622_v24 = vpop.permute.xlu0 %946 }
 0x178   :  { %7747 = vst [vmem:[#allocation70_spill] sm:$0xff] %v3620_v30  ;;  %v3624_v21 = vpop.permute.xlu2 %1005 }
 0x179   :  { %7748 = vst [vmem:[#allocation71_spill] sm:$0xff] %v3622_v24 }
 0x17a   :  { %7749 = vst [vmem:[#allocation72_spill] sm:$0xff] %v3624_v21  ;;  %v3641_v21 = vadd.s32 128, %v3626_v29 }
 0x17c   :  { %7753 = vst [vmem:[#allocation76_spill] sm:$0xff] %v3641_v21  ;;  %vm185_vm1 = vcmp.ge.s32.totalorder %v3641_v21, 144  ;;  %vm191_vm4 = vcmp.ge.s32.totalorder %v3641_v21, 160  ;;  %vm197_vm6 = vcmp.ge.s32.totalorder %v3641_v21, 176  ;;  %vm203_vm8 = vcmp.ge.s32.totalorder %v3641_v21, 192 }
 0x17d   :  { %1244 = vrot.lane.b32.xlu1 %v3190_v32, %s7290_s21  ;;  %1239 = vrot.lane.b32.xlu0 %v3180_v26, %s7290_s21  ;;  %vm209_vm10 = vcmp.ge.s32.totalorder %v3641_v21, 208  ;;  %vm215_vm12 = vcmp.ge.s32.totalorder %v3641_v21, 224  ;;  %vm221_vm14 = vcmp.ge.s32.totalorder %v3641_v21, 240 }
 0x17e   :  { %1246 = vrot.lane.b32.xlu2 %v3198_v35, %s7290_s21  ;;  %s7308_s21 = smov 99  }
 0x17f   :  { %v3634_v11 = vpop.permute.xlu1 %971  ;;  %v3636_v34 = vpop.permute.xlu0 %955 }
 0x180   :  { %7750 = vst [vmem:[#allocation73_spill] sm:$0xff] %v3634_v11  ;;  %v3638_v30 = vpop.permute.xlu2 %1040 }
 0x181   :  { %7751 = vst [vmem:[#allocation74_spill] sm:$0xff] %v3636_v34 }
 0x182   :  { %7752 = vst [vmem:[#allocation75_spill] sm:$0xff] %v3638_v30  ;;  %v3123_v30 = vmov 0  }
 0x183   :  { %v187_v24 = vsel %vm185_vm1, 1, %v3123_v30  ;;  %v140_v0 = vsel %vm7335_vm2, 1, %v3123_v30  ;;  %v144_v25 = vsel %vm142_vm3, 1, %v3123_v30  ;;  %v199_v18 = vsel %vm197_vm6, 1, %v3123_v30 }
 0x184   :  { %v189_v28 = vadd.s32 8, %v187_v24  ;;  %v205_v15 = vsel %vm203_vm8, 1, %v3123_v30 }
 0x185   :  { %1264 = vrot.lane.b32.xlu1 %v3180_v26, %s7300_s20  ;;  %1262 = vrot.lane.b32.xlu0 %v3182_v27, %s7300_s20 }
 0x186   :  { %1269 = vrot.lane.b32.xlu2 %v3190_v32, %s7300_s20 }
 0x187   :  { %v3650_v33 = vpop.permute.xlu1 %980  ;;  %v3654_v34 = vpop.permute.xlu0 %978 }
 0x188   :  { %7754 = vst [vmem:[#allocation77_spill] sm:$0xff] %v3650_v33  ;;  %v3656_v11 = vpop.permute.xlu2 %1060  ;;  %v193_v33 = vsel %vm191_vm4, 1, %v3123_v30 }
 0x189   :  { %7755 = vst [vmem:[#allocation78_spill] sm:$0xff] %v3654_v34  ;;  %v146_v34 = vadd.s32 %v144_v25, %v140_v0  ;;  %v195_v24 = vadd.s32 %v193_v33, %v189_v28  ;;  %v156_v25 = vsel %vm154_vm7, 1, %v3123_v30  ;;  %v162_v33 = vsel %vm160_vm9, 1, %v3123_v30 }
 0x18a   :  { %7756 = vst [vmem:[#allocation79_spill] sm:$0xff] %v3656_v11  ;;  %v150_v11 = vsel %vm148_vm5, 1, %v3123_v30 }
 0x18b   :  { %v152_v0 = vadd.s32 %v150_v11, %v146_v34  ;;  %v201_v22 = vadd.s32 %v199_v18, %v195_v24  ;;  %v211_v18 = vsel %vm209_vm10, 1, %v3123_v30 }
 0x18d   :  { %1291 = vrot.lane.b32.xlu1 %v3182_v27, %s7308_s21  ;;  %1271 = vrot.lane.b32.xlu0 %v3198_v35, %s7300_s20  ;;  %v158_v28 = vadd.s32 %v156_v25, %v152_v0  ;;  %s7310_s20 = smov 98   ;;  %v207_v11 = vadd.s32 %v205_v15, %v201_v22  ;;  %v168_v25 = vsel %vm166_vm11, 1, %v3123_v30  ;;  %v174_v22 = vsel %vm172_vm13, 1, %v3123_v30 }
 0x18e   :  { %1293 = vrot.lane.b32.xlu2 %v3180_v26, %s7308_s21  ;;  %vm413_vm13 = vcmp.lt.s32.totalorder %v3626_v29, 51 }
 0x18f   :  { %v3673_v31 = vpop.permute.xlu1 %1003  ;;  %v3676_v23 = vpop.permute.xlu0 %998  ;;  %v164_v0 = vadd.s32 %v162_v33, %v158_v28  ;;  %v223_v33 = vsel %vm221_vm14, 1, %v3123_v30 }
 0x190   :  { %7757 = vst [vmem:[#allocation80_spill] sm:$0xff] %v3673_v31  ;;  %v3678_v12 = vpop.permute.xlu2 %1083  ;;  %v217_v31 = vsel %vm215_vm12, 1, %v3123_v30 }
 0x191   :  { %7758 = vst [vmem:[#allocation81_spill] sm:$0xff] %v3676_v23  ;;  %v213_v23 = vadd.s32 %v211_v18, %v207_v11  ;;  %v170_v15 = vadd.s32 %v168_v25, %v164_v0 }
 0x192   :  { %7759 = vst [vmem:[#allocation82_spill] sm:$0xff] %v3678_v12 }
 0x195   :  { %1300 = vrot.lane.b32.xlu1 %v3198_v35, %s7308_s21  ;;  %1298 = vrot.lane.b32.xlu0 %v3190_v32, %s7308_s21  ;;  %s7324_s21 = smov 97  }
 0x196   :  { %1316 = vrot.lane.b32.xlu2 %v3182_v27, %s7310_s20 }
 0x197   :  { %v3689_v34 = vpop.permute.xlu1 %1035  ;;  %v3692_v24 = vpop.permute.xlu0 %1033 }
 0x198   :  { %7760 = vst [vmem:[#allocation83_spill] sm:$0xff] %v3689_v34  ;;  %v3694_v12 = vpop.permute.xlu2 %1092 }
 0x199   :  { %7761 = vst [vmem:[#allocation84_spill] sm:$0xff] %v3692_v24  ;;  %v176_v24 = vadd.s32 %v174_v22, %v170_v15 }
 0x19a   :  { %7762 = vst [vmem:[#allocation85_spill] sm:$0xff] %v3694_v12  ;;  %v219_v12 = vadd.s32 %v217_v31, %v213_v23 }
 0x19b   :  { %v226_v0 = vmul.u32 16, %v176_v24 }
 0x19c   :  { %v225_v34 = vadd.s32 %v223_v33, %v219_v12 }
 0x19d   :  { %1323 = vrot.lane.b32.xlu1 %v3190_v32, %s7310_s20  ;;  %1318 = vrot.lane.b32.xlu0 %v3180_v26, %s7310_s20  ;;  %v3724_v12 = vsub.s32 %v3626_v29, %v226_v0 }
 0x19e   :  { %1325 = vrot.lane.b32.xlu2 %v3198_v35, %s7310_s20  ;;  %v227_v23 = vmul.u32 16, %v225_v34  ;;  %s2847_s20 = sld [smem:[#allocation3 + $0x1]] }
 0x19f   :  { %v3705_v28 = vpop.permute.xlu1 %1058  ;;  %v3707_v11 = vpop.permute.xlu0 %1042  ;;  %v238_v34 = vadd.s32 4294967293, %v3724_v12  ;;  %v274_v33 = vadd.s32 4294967295, %v3724_v12 }
 0x1a0   :  { %7763 = vst [vmem:[#allocation86_spill] sm:$0xff] %v3705_v28  ;;  %v3709_v18 = vpop.permute.xlu2 %1119  ;;  %v3727_v15 = vsub.s32 %v3641_v21, %v227_v23  ;;  %v3778_v28 = vstv %s3731_s19  ;;  %s4029_s19 = sld [smem:[#allocation3 + $0x6]] }
 0x1a1   :  { %7764 = vst [vmem:[#allocation87_spill] sm:$0xff] %v3707_v11  ;;  %vm240_vm1 = vcmp.ge.s32.totalorder %v238_v34, 0  ;;  %vm242_vm4 = vcmp.lt.s32.totalorder %v238_v34, 16  ;;  %vm276_vm8 = vcmp.ge.s32.totalorder %v274_v33, 0  ;;  %vm278_vm9 = vcmp.lt.s32.totalorder %v274_v33, 16 }
 0x1a2   :  { %7765 = vst [vmem:[#allocation88_spill] sm:$0xff] %v3709_v18  ;;  %v239_v24 = vadd.s32 4294967293, %v3727_v15  ;;  %v275_v21 = vadd.s32 4294967295, %v3727_v15  ;;  %v256_v18 = vadd.s32 4294967294, %v3724_v12  ;;  %v439_v34 = vsel %vm438_vm15, %v3260_v36, %v3268_v37  ;;  %vm3770_vm10 = vmand %vm240_vm1, %vm242_vm4 }
 0x1a3   :  { %7775 = vst [vmem:[#allocation96_spill] sm:$0xff] %v3778_v28  ;;  %vm7615_vm4 = vcmp.lt.s32.totalorder %v3626_v29, 49  ;;  %v3812_v33 = vsel %vm3770_vm10, 1.0, %v7348_v8  ;;  %vm7453_vm10 = vcmp.lt.s32.totalorder %v3626_v29, 48  ;;  %v313_v17 = vadd.s32 1, %v3727_v15 }
 0x1a4   :  { %vm241_vm6 = vcmp.ge.s32.totalorder %v239_v24, 0  ;;  %vm243_vm7 = vcmp.lt.s32.totalorder %v239_v24, 16  ;;  %vm277_vm11 = vcmp.ge.s32.totalorder %v275_v21, 0  ;;  %vm279_vm12 = vcmp.lt.s32.totalorder %v275_v21, 16  ;;  %7782 = vst [vmem:[#allocation99_spill] sm:$0xff] %v3812_v33 }
 0x1a5   :  { %1343 = vrot.lane.b32.xlu1 %v3180_v26, %s7324_s21  ;;  %1341 = vrot.lane.b32.xlu0 %v3182_v27, %s7324_s21  ;;  %vm3781_vm14 = vmand %vm241_vm6, %vm243_vm7  ;;  %vm258_vm2 = vcmp.ge.s32.totalorder %v256_v18, 0  ;;  %vm260_vm1 = vcmp.lt.s32.totalorder %v256_v18, 16  ;;  %v421_v21 = vsel %vm413_vm13, %v3308_v45, %v3296_v42  ;;  %v464_v62 = vsel %vm7615_vm4, %v3276_v38, %v3310_v46 }
 0x1a6   :  { %1348 = vrot.lane.b32.xlu2 %v3190_v32, %s7324_s21  ;;  %vm3797_vm6 = vmand %vm276_vm8, %vm278_vm9  ;;  %v471_v14 = vsel %vm7615_vm4, %v3288_v41, %v3332_v51 }
 0x1a7   :  { %v3717_v31 = vpop.permute.xlu1 %1067  ;;  %v3719_v30 = vpop.permute.xlu0 %1065  ;;  %vm3819_vm8 = vmand %vm277_vm11, %vm279_vm12  ;;  %vm296_vm12 = vcmp.lt.s32.totalorder %v3724_v12, 16 }
 0x1a8   :  { %7766 = vst [vmem:[#allocation89_spill] sm:$0xff] %v3717_v31  ;;  %v3721_v25 = vpop.permute.xlu2 %1139  ;;  %vm3845_vm9 = vmand %vm258_vm2, %vm260_vm1  ;;  %vm294_vm2 = vcmp.ge.s32.totalorder %v3724_v12, 0  ;;  %vm297_vm1 = vcmp.lt.s32.totalorder %v3727_v15, 16 }
 0x1a9   :  { %7767 = vst [vmem:[#allocation90_spill] sm:$0xff] %v3719_v30  ;;  %v414_v30 = vsel %vm413_vm13, %v3286_v40, %v3298_v43 }
 0x1aa   :  { %7768 = vst [vmem:[#allocation91_spill] sm:$0xff] %v3721_v25  ;;  %v257_v25 = vadd.s32 4294967294, %v3727_v15 }
 0x1ac   :  { %vm259_vm7 = vcmp.ge.s32.totalorder %v257_v25, 0  ;;  %vm261_vm0 = vcmp.lt.s32.totalorder %v257_v25, 16 }
 0x1ad   :  { %1366 = vrot.lane.b32.xlu1 %v3182_v27, %s7484_s22  ;;  %1350 = vrot.lane.b32.xlu0 %v3198_v35, %s7324_s21  ;;  %s3754_s21 = sld [smem:[#allocation3 + $0x33]]  ;;  %vm263_vm11 = vmand %vm259_vm7, %vm261_vm0 }
 0x1ae   :  { %1368 = vrot.lane.b32.xlu2 %v3180_v26, %s7484_s22  ;;  %vm3901_vm0 = vmand %vm294_vm2, %vm296_vm12  ;;  %vm317_vm2 = vcmp.lt.s32.totalorder %v313_v17, 16 }
 0x1af   :  { %v3741_v22 = vpop.permute.xlu1 %1090  ;;  %v3746_v0 = vpop.permute.xlu0 %1085 }
 0x1b0   :  { %7769 = vst [vmem:[#allocation92_spill] sm:$0xff] %v3741_v22  ;;  %v3748_v23 = vpop.permute.xlu2 %1162  ;;  %v420_v22 = vsel %vm413_vm13, %v3296_v42, %v3308_v45  ;;  %v415_v42 = vsel %vm413_vm13, %v3298_v43, %v3286_v40  ;;  %v312_v45 = vadd.s32 1, %v3724_v12 }
 0x1b1   :  { %7770 = vst [vmem:[#allocation93_spill] sm:$0xff] %v3746_v0  ;;  %v3758_v0 = vstv %s2847_s20  ;;  %s3785_s20 = sld [smem:[#allocation3 + $0x4]]  ;;  %v423_v19 = vmul.f32 %v3778_v28, %v415_v42  ;;  %v445_v42 = vsel %vm438_vm15, %v3334_v52, %v3320_v48 }
 0x1b2   :  { %7771 = vst [vmem:[#allocation94_spill] sm:$0xff] %v3748_v23  ;;  %v440_v23 = vsel %vm438_vm15, %v3268_v37, %v3260_v36  ;;  %v3792_v36 = vstv %s3739_s18  ;;  %v3807_v11 = vmul.f32 %v3758_v0, %v439_v34  ;;  %v3830_v34 = vsel %vm3781_vm14, 1.0, %v7348_v8  ;;  %s7374_s18 = smov 94  }
 0x1b3   :  { %7772 = vst [vmem:[#allocation95_spill] sm:$0xff] %v3758_v0  ;;  %v3804_v31 = vmul.f32 %v3758_v0, %v440_v23  ;;  %v3841_v0 = vstv %s3750_s16  ;;  %v3857_v8 = vstv %s3754_s21  ;;  %vm295_vm14 = vcmp.ge.s32.totalorder %v3727_v15, 0  ;;  %s3870_s21 = sld [smem:[#allocation3 + $0x35]] }
 0x1b4   :  { %7778 = vst [vmem:[#allocation97_spill] sm:$0xff] %v3792_v36  ;;  %v426_v18 = vmul.f32 %v3792_v36, %v421_v21  ;;  %v427_v25 = vmul.f32 %v3792_v36, %v420_v22  ;;  %v446_v37 = vsel %vm438_vm15, %v3320_v48, %v3334_v52  ;;  %vm3917_vm7 = vmand %vm295_vm14, %vm297_vm1  ;;  %s3974_s16 = sld [smem:[#allocation3 + $0x5]] }
 0x1b5   :  { %1375 = vrot.lane.b32.xlu1 %v3198_v35, %s7484_s22  ;;  %1373 = vrot.lane.b32.xlu0 %v3190_v32, %s7484_s22  ;;  %7788 = vst [vmem:[#allocation103_spill] sm:$0xff] %v3841_v0  ;;  %v451_v2 = vmul.f32 %v3880_v13, %v446_v37  ;;  %v474_v37 = vmul.f32 %v3815_v16, %v464_v62  ;;  %s4786_s22 = sld [smem:[#allocation3 + $0x17]] }
 0x1b6   :  { %1391 = vrot.lane.b32.xlu2 %v3182_v27, %s7388_s14  ;;  %7791 = vst [vmem:[#allocation104_spill] sm:$0xff] %v3857_v8  ;;  %v428_v5 = vadd.f32 %v426_v18, %v423_v19  ;;  %v3956_v18 = vstv %s3849_s17  ;;  %v333_v19 = vadd.s32 2, %v3727_v15  ;;  %v496_v62 = vsel %vm7453_vm10, %v3346_v55, %v3300_v44  ;;  %s4058_s17 = sld [smem:[#allocation3 + $0x37]] }
 0x1b7   :  { %v3801_v24 = vpop.permute.xlu1 %1114  ;;  %v3823_v23 = vpop.permute.xlu0 %1112  ;;  %v3911_v36 = vstv %s3785_s20  ;;  %7802 = vst [vmem:[#allocation110_spill] sm:$0xff] %v3956_v18  ;;  %s4048_s20 = sld [smem:[#allocation3 + $0x7]] }
 0x1b8   :  { %7781 = vst [vmem:[#allocation98_spill] sm:$0xff] %v3801_v24  ;;  %v3825_v24 = vpop.permute.xlu2 %1171 }
 0x1b9   :  { %7786 = vst [vmem:[#allocation101_spill] sm:$0xff] %v3823_v23  ;;  %v7792_v23 = vmov 0.0   ;;  %v3971_v22 = vstv %s3870_s21  ;;  %s4081_s21 = sld [smem:[#allocation3 + $0x38]] }
 0x1ba   :  { %7787 = vst [vmem:[#allocation102_spill] sm:$0xff] %v3825_v24  ;;  %v3877_v20 = vsel %vm3797_vm6, 1.0, %v7792_v23  ;;  %v3885_v40 = vsel %vm3819_vm8, 1.0, %v7792_v23  ;;  %v3890_v43 = vsel %vm3845_vm9, 1.0, %v7792_v23  ;;  %v3893_v21 = vsel %vm263_vm11, 1.0, %v7792_v23 }
 0x1bb   :  { %7794 = vst [vmem:[#allocation106_spill] sm:$0xff] %v3890_v43  ;;  %v424_v24 = vmul.f32 %v3778_v28, %v414_v30  ;;  %vm7452_vm6 = vcmp.lt.s32.totalorder %v3626_v29, 47  ;;  %v465_v30 = vsel %vm7615_vm4, %v3310_v46, %v3276_v38  ;;  %vm314_vm8 = vcmp.ge.s32.totalorder %v312_v45, 0 }
 0x1bc   :  { %7797 = vst [vmem:[#allocation107_spill] sm:$0xff] %v3911_v36  ;;  %vm316_vm9 = vcmp.lt.s32.totalorder %v312_v45, 16  ;;  %v3948_v48 = vsel %vm3901_vm0, 1.0, %v7792_v23  ;;  %v3953_v52 = vsel %vm3917_vm7, 1.0, %v7792_v23  ;;  %v332_v38 = vadd.s32 2, %v3724_v12 }
 0x1bd   :  { %1398 = vrot.lane.b32.xlu1 %v3190_v32, %s7388_s14  ;;  %1393 = vrot.lane.b32.xlu0 %v3180_v26, %s7388_s14  ;;  %v429_v10 = vadd.f32 %v427_v25, %v424_v24  ;;  %v473_v46 = vmul.f32 %v3815_v16, %v465_v30  ;;  %v452_v25 = vmul.f32 %v3880_v13, %v445_v42  ;;  %vm315_vm11 = vcmp.ge.s32.totalorder %v313_v17, 0  ;;  %vm318_vm12 = vmand %vm314_vm8, %vm316_vm9 }
 0x1be   :  { %1400 = vrot.lane.b32.xlu2 %v3198_v35, %s7388_s14  ;;  %7803 = vst [vmem:[#allocation111_spill] sm:$0xff] %v3971_v22  ;;  %v430_v24 = vmul.f32 %v3812_v33, %v428_v5  ;;  %v453_v30 = vadd.f32 %v451_v2, %v3804_v31  ;;  %v490_v42 = vsel %vm7453_vm10, %v3284_v39, %v3322_v49  ;;  %vm3992_vm14 = vmand %vm315_vm11, %vm317_vm2  ;;  %v3997_v2 = vsel %vm318_vm12, 1.0, %v7792_v23  ;;  %s4271_s14 = sld [smem:[#allocation3 + $0xc]] }
 0x1bf   :  { %v3934_v28 = vpop.permute.xlu1 %1137  ;;  %v3941_v9 = vpop.permute.xlu0 %1121  ;;  %v431_v45 = vmul.f32 %v3830_v34, %v429_v10  ;;  %v470_v16 = vsel %vm7615_vm4, %v3332_v51, %v3288_v41  ;;  %vm334_vm1 = vcmp.ge.s32.totalorder %v332_v38, 0  ;;  %v476_v10 = vmul.f32 %v3857_v8, %v471_v14 }
 0x1c0   :  { %7800 = vst [vmem:[#allocation108_spill] sm:$0xff] %v3941_v9  ;;  %v3943_v59 = vpop.permute.xlu2 %1194  ;;  %v454_v31 = vadd.f32 %v452_v25, %v3807_v11  ;;  %v495_v41 = vsel %vm7453_vm10, %v3300_v44, %v3346_v55  ;;  %vm336_vm0 = vcmp.lt.s32.totalorder %v332_v38, 16  ;;  %v501_v51 = vmul.f32 %v3956_v18, %v496_v62 }
 0x1c1   :  { %7801 = vst [vmem:[#allocation109_spill] sm:$0xff] %v3943_v59  ;;  %v521_v17 = vsel %vm7452_vm6, %v3356_v57, %v3358_v58  ;;  %vm335_vm7 = vcmp.ge.s32.totalorder %v333_v19, 0  ;;  %vm337_vm8 = vcmp.lt.s32.totalorder %v333_v19, 16  ;;  %v489_v44 = vsel %vm7453_vm10, %v3322_v49, %v3284_v39  ;;  %vm4044_vm11 = vmand %vm334_vm1, %vm336_vm0 }
 0x1c2   :  { %v477_v55 = vmul.f32 %v3857_v8, %v470_v16  ;;  %v455_v25 = vmul.f32 %v3890_v43, %v453_v30  ;;  %v4027_v14 = vsel %vm3992_vm14, 1.0, %v7792_v23  ;;  %v498_v59 = vmul.f32 %v3841_v0, %v490_v42  ;;  %vm339_vm2 = vmand %vm335_vm7, %vm337_vm8 }
 0x1c3   :  { %v515_v39 = vsel %vm7452_vm6, %v3312_v47, %v3344_v54  ;;  %v502_v49 = vmul.f32 %v3956_v18, %v495_v41  ;;  %vm7435_vm9 = vcmp.lt.s32.totalorder %v3626_v29, 46  ;;  %v478_v30 = vadd.f32 %v476_v10, %v473_v46 }
 0x1c4   :  { %v456_v42 = vmul.f32 %v3893_v21, %v454_v31  ;;  %v520_v5 = vsel %vm7452_vm6, %v3358_v58, %v3356_v57  ;;  %v526_v41 = vmul.f32 %v3971_v22, %v521_v17  ;;  %v499_v38 = vmul.f32 %v3841_v0, %v489_v44  ;;  %v7844_v0 = vld [vmem:[#allocation28_spill] sm:$0xff] }
 0x1c5   :  { %1418 = vrot.lane.b32.xlu1 %v3180_v26, %s7374_s18  ;;  %1416 = vrot.lane.b32.xlu0 %v3182_v27, %s7374_s18  ;;  %v503_v18 = vadd.f32 %v501_v51, %v498_v59  ;;  %v4062_v8 = vstv %s3963_s15  ;;  %v4065_v46 = vstv %s3974_s16  ;;  %v479_v10 = vadd.f32 %v477_v55, %v474_v37  ;;  %s7386_s15 = smov 93   ;;  %s4097_s16 = sld [smem:[#allocation3 + $0x39]] }
 0x1c6   :  { %1423 = vrot.lane.b32.xlu2 %v3190_v32, %s7374_s18  ;;  %7809 = vst [vmem:[#allocation113_spill] sm:$0xff] %v4062_v8  ;;  %v457_v31 = vadd.f32 %v455_v25, %v430_v24  ;;  %v514_v57 = vsel %vm7452_vm6, %v3344_v54, %v3312_v47  ;;  %v523_v58 = vmul.f32 %v3911_v36, %v515_v39  ;;  %v4076_v59 = vsel %vm4044_vm11, 1.0, %v7792_v23 }
 0x1c7   :  { %v4016_v11 = vpop.permute.xlu1 %1146  ;;  %v4031_v62 = vpop.permute.xlu0 %1144  ;;  %7810 = vst [vmem:[#allocation114_spill] sm:$0xff] %v4065_v46  ;;  %v504_v19 = vadd.f32 %v502_v49, %v499_v38  ;;  %v527_v17 = vmul.f32 %v3971_v22, %v520_v5  ;;  %v4079_v51 = vsel %vm339_vm2, 1.0, %v7792_v23  ;;  %v480_v47 = vmul.f32 %v3877_v20, %v478_v30 }
 0x1c8   :  { %v4033_v13 = vpop.permute.xlu2 %1214  ;;  %v458_v54 = vadd.f32 %v456_v42, %v431_v45  ;;  %v528_v37 = vadd.f32 %v526_v41, %v523_v58  ;;  %vm7432_vm12 = vcmp.lt.s32.totalorder %v3626_v29, 45  ;;  %v524_v24 = vmul.f32 %v3911_v36, %v514_v57 }
 0x1c9   :  { %7806 = vst [vmem:[#allocation112_spill] sm:$0xff] %v4033_v13  ;;  %v505_v44 = vmul.f32 %v3948_v48, %v503_v18  ;;  %v352_v55 = vadd.s32 3, %v3724_v12  ;;  %v4095_v25 = vadd.s32 3, %v3727_v15  ;;  %v481_v39 = vmul.f32 %v3885_v40, %v479_v10 }
 0x1ca   :  { %v482_v49 = vadd.f32 %v480_v47, %v457_v31  ;;  %v4103_v16 = vstv %s4029_s19  ;;  %vm592_vm14 = vcmp.lt.s32.totalorder %v3626_v29, 35  ;;  %v506_v15 = vmul.f32 %v3953_v52, %v504_v19  ;;  %s7390_s19 = smov 83  }
 0x1cb   :  { %7812 = vst [vmem:[#allocation116_spill] sm:$0xff] %v4103_v16  ;;  %v529_v30 = vadd.f32 %v527_v17, %v524_v24  ;;  %v546_v42 = vsel %vm7435_vm9, %v3336_v53, %v3368_v60  ;;  %v540_v5 = vsel %vm7435_vm9, %v3370_v61, %v3324_v50  ;;  %v483_v41 = vadd.f32 %v481_v39, %v458_v54 }
 0x1cc   :  { %v530_v38 = vmul.f32 %v3997_v2, %v528_v37  ;;  %v4123_v10 = vstv %s4048_s20  ;;  %v4126_v31 = vstv %s4058_s17  ;;  %v507_v57 = vadd.f32 %v505_v44, %v482_v49  ;;  %s4185_s20 = sld [smem:[#allocation3 + $0x9]] }
 0x1cd   :  { %1441 = vrot.lane.b32.xlu1 %v3182_v27, %s7386_s15  ;;  %1425 = vrot.lane.b32.xlu0 %v3198_v35, %s7374_s18  ;;  %s4106_s18 = sld [smem:[#allocation3 + $0x8]]  ;;  %7815 = vst [vmem:[#allocation119_spill] sm:$0xff] %v4123_v10  ;;  %vm354_vm1 = vcmp.ge.s32.totalorder %v352_v55, 0  ;;  %vm355_vm0 = vcmp.ge.s32.totalorder %v4095_v25, 0  ;;  %vm356_vm7 = vcmp.lt.s32.totalorder %v352_v55, 16  ;;  %v545_v58 = vsel %vm7435_vm9, %v3368_v60, %v3336_v53 }
 0x1ce   :  { %1443 = vrot.lane.b32.xlu2 %v3180_v26, %s7386_s15  ;;  %7816 = vst [vmem:[#allocation120_spill] sm:$0xff] %v4126_v31  ;;  %v551_v19 = vmul.f32 %v4062_v8, %v546_v42  ;;  %v539_v17 = vsel %vm7435_vm9, %v3324_v50, %v3370_v61  ;;  %v548_v47 = vmul.f32 %v4065_v46, %v540_v5  ;;  %vm357_vm8 = vcmp.lt.s32.totalorder %v4095_v25, 16  ;;  %s4216_s17 = sld [smem:[#allocation3 + $0x3a]]  ;;  %vm4220_vm2 = vmand %vm354_vm1, %vm356_vm7 }
 0x1cf   :  { %v4099_v45 = vpop.permute.xlu1 %1169  ;;  %v4108_v18 = vpop.permute.xlu0 %1164  ;;  %v4139_v54 = vadd.f32 %v506_v15, %v483_v41  ;;  %v4142_v37 = vmul.f32 %v4027_v14, %v529_v30  ;;  %v4146_v24 = vstv %s4081_s21  ;;  %v532_v53 = vadd.f32 %v530_v38, %v507_v57  ;;  %s4234_s21 = sld [smem:[#allocation3 + $0x3b]]  ;;  %vm359_vm1 = vmand %vm355_vm0, %vm357_vm8 }
 0x1d0   :  { %7811 = vst [vmem:[#allocation115_spill] sm:$0xff] %v4099_v45  ;;  %v4110_v12 = vpop.permute.xlu2 %1237  ;;  %v565_v50 = vsel %vm7432_vm12, %v3380_v63, %v3382_v1  ;;  %v571_v60 = vsel %vm7432_vm12, %v3394_v4, %v3348_v56  ;;  %vm617_vm11 = vcmp.lt.s32.totalorder %v3626_v29, 34  ;;  %v552_v61 = vmul.f32 %v4062_v8, %v545_v58  ;;  %v7823_v58 = vld [vmem:[#allocation14_spill] sm:$0xff] }
 0x1d1   :  { %7813 = vst [vmem:[#allocation117_spill] sm:$0xff] %v4108_v18  ;;  %v549_v44 = vmul.f32 %v4065_v46, %v539_v17  ;;  %v570_v39 = vsel %vm7432_vm12, %v3348_v56, %v3394_v4  ;;  %v4170_v49 = vstv %s4097_s16  ;;  %v553_v30 = vadd.f32 %v551_v19, %v548_v47  ;;  %v7824_v47 = vld [vmem:[#allocation19_spill] sm:$0xff]  ;;  %v7827_v46 = vld [vmem:[#allocation20_spill] sm:$0xff]  ;;  %s4243_s16 = sld [smem:[#allocation3 + $0x3c]] }
 0x1d2   :  { %7814 = vst [vmem:[#allocation118_spill] sm:$0xff] %v4110_v12  ;;  %v599_v42 = vsel %vm592_vm14, %v3406_v7, %v3404_v6  ;;  %v600_v5 = vsel %vm592_vm14, %v3404_v6, %v3406_v7  ;;  %v564_v38 = vsel %vm7432_vm12, %v3382_v1, %v3380_v63  ;;  %v573_v57 = vmul.f32 %v4103_v16, %v565_v50  ;;  %v7825_v63 = vld [vmem:[#allocation16_spill] sm:$0xff]  ;;  %v7826_v50 = vld [vmem:[#allocation15_spill] sm:$0xff] }
 0x1d3   :  { %7817 = vst [vmem:[#allocation121_spill] sm:$0xff] %v4146_v24  ;;  %v4183_v41 = vstv %s4106_s18  ;;  %v594_v6 = vsel %vm592_vm14, %v7823_v58, %v3392_v3  ;;  %v576_v7 = vmul.f32 %v4126_v31, %v571_v60  ;;  %s4201_s18 = sld [smem:[#allocation3 + $0xa]]  ;;  %v593_v19 = vsel %vm592_vm14, %v3392_v3, %v7823_v58 }
 0x1d4   :  { %7818 = vst [vmem:[#allocation122_spill] sm:$0xff] %v4170_v49  ;;  %v577_v17 = vmul.f32 %v4126_v31, %v570_v39  ;;  %v625_v1 = vsel %vm617_vm11, %v7825_v63, %v7824_v47  ;;  %v619_v8 = vsel %vm617_vm11, %v7827_v46, %v7826_v50  ;;  %v605_v3 = vmul.f32 %v4146_v24, %v600_v5 }
 0x1d5   :  { %1450 = vrot.lane.b32.xlu1 %v3198_v35, %s7386_s15  ;;  %1448 = vrot.lane.b32.xlu0 %v3190_v32, %s7386_s15  ;;  %7820 = vst [vmem:[#allocation124_spill] sm:$0xff] %v4183_v41  ;;  %v606_v39 = vmul.f32 %v4146_v24, %v599_v42  ;;  %v624_v58 = vsel %vm617_vm11, %v7824_v47, %v7825_v63  ;;  %s4248_s15 = sld [smem:[#allocation3 + $0xb]]  ;;  %v4290_v60 = vstv %s4185_s20  ;;  %vm667_vm0 = vcmp.lt.s32.totalorder %v3626_v29, 32 }
 0x1d6   :  { %1470 = vrot.lane.b32.xlu2 %v3182_v27, %s7390_s19  ;;  %v618_v31 = vsel %vm617_vm11, %v7826_v50, %v7827_v46  ;;  %v554_v55 = vadd.f32 %v552_v61, %v549_v44  ;;  %v555_v36 = vmul.f32 %v4076_v59, %v553_v30  ;;  %v574_v22 = vmul.f32 %v4103_v16, %v564_v38  ;;  %s4318_s20 = sld [smem:[#allocation3 + $0x3e]]  ;;  %v7843_v16 = vld [vmem:[#allocation29_spill] sm:$0xff] }
 0x1d7   :  { %v4172_v15 = vpop.permute.xlu1 %1189  ;;  %v4187_v56 = vpop.permute.xlu0 %1187  ;;  %v602_v5 = vmul.f32 %v4123_v10, %v594_v6  ;;  %v603_v42 = vmul.f32 %v4123_v10, %v593_v19  ;;  %v578_v47 = vadd.f32 %v576_v7, %v573_v57  ;;  %v630_v46 = vmul.f32 %v4170_v49, %v625_v1  ;;  %7834 = vst [vmem:[#allocation20_spill] sm:$0xff] %v4290_v60 }
 0x1d8   :  { %7819 = vst [vmem:[#allocation123_spill] sm:$0xff] %v4172_v15  ;;  %v4189_v4 = vpop.permute.xlu2 %1246  ;;  %v627_v61 = vmul.f32 %v4183_v41, %v619_v8  ;;  %v4255_v44 = vsel %vm148_vm5, 1.0, %v7792_v23  ;;  %v579_v25 = vadd.f32 %v577_v17, %v574_v22  ;;  %v631_v30 = vmul.f32 %v4170_v49, %v624_v58 }
 0x1d9   :  { %7821 = vst [vmem:[#allocation125_spill] sm:$0xff] %v4187_v56  ;;  %v628_v38 = vmul.f32 %v4183_v41, %v618_v31  ;;  %v4266_v8 = vsel %vm4220_vm2, 1.0, %v7792_v23  ;;  %v4269_v57 = vsel %vm359_vm1, 1.0, %v7792_v23  ;;  %v607_v22 = vadd.f32 %v605_v3, %v602_v5  ;;  %v7838_v5 = vld [vmem:[#allocation26_spill] sm:$0xff] }
 0x1da   :  { %7822 = vst [vmem:[#allocation126_spill] sm:$0xff] %v4189_v4  ;;  %v608_v6 = vadd.f32 %v606_v39, %v603_v42  ;;  %v4277_v7 = vadd.f32 %v4142_v37, %v4139_v54  ;;  %v4280_v19 = vmul.f32 %v4079_v51, %v554_v55  ;;  %v4282_v17 = vadd.f32 %v555_v36, %v532_v53  ;;  %v7837_v55 = vld [vmem:[#allocation17_spill] sm:$0xff] }
 0x1db   :  { %7830 = vst [vmem:[#allocation14_spill] sm:$0xff] %v4255_v44  ;;  %vm642_vm5 = vcmp.lt.s32.totalorder %v3626_v29, 33  ;;  %v632_v50 = vadd.f32 %v630_v46, %v627_v61  ;;  %v4294_v54 = vstv %s4201_s18  ;;  %v4297_v37 = vmul.f32 %v4266_v8, %v578_v47  ;;  %v7840_v46 = vld [vmem:[#allocation23_spill] sm:$0xff]  ;;  %v7841_v61 = vld [vmem:[#allocation22_spill] sm:$0xff]  ;;  %s7430_s18 = smov 82  }
 0x1dc   :  { %7835 = vst [vmem:[#allocation127_spill] sm:$0xff] %v4294_v54  ;;  %v4300_v36 = vmul.f32 %v4269_v57, %v579_v25  ;;  %v633_v53 = vadd.f32 %v631_v30, %v628_v38  ;;  %v4303_v3 = vstv %s4216_s17  ;;  %v609_v39 = vmul.f32 %v3812_v33, %v607_v22  ;;  %s4355_s17 = sld [smem:[#allocation3 + $0xd]] }
 0x1dd   :  { %1477 = vrot.lane.b32.xlu1 %v3190_v32, %s7390_s19  ;;  %1472 = vrot.lane.b32.xlu0 %v3180_v26, %s7390_s19  ;;  %7836 = vst [vmem:[#allocation128_spill] sm:$0xff] %v4303_v3  ;;  %v4309_v58 = vmul.f32 %v3830_v34, %v608_v6  ;;  %v650_v42 = vsel %vm642_vm5, %v7838_v5, %v7837_v55  ;;  %v4316_v47 = vstv %s4234_s21  ;;  %vm692_vm7 = vcmp.lt.s32.totalorder %v3626_v29, 31  ;;  %s4473_s21 = sld [smem:[#allocation3 + $0xf]] }
 0x1de   :  { %1479 = vrot.lane.b32.xlu2 %v3198_v35, %s7390_s19  ;;  %s4305_s19 = sld [smem:[#allocation3 + $0x3d]]  ;;  %7839 = vst [vmem:[#allocation17_spill] sm:$0xff] %v4316_v47  ;;  %v644_v25 = vsel %vm642_vm5, %v7841_v61, %v7840_v46  ;;  %v649_v30 = vsel %vm642_vm5, %v7837_v55, %v7838_v5  ;;  %v4330_v38 = vstv %s4243_s16  ;;  %v634_v22 = vmul.f32 %v3890_v43, %v632_v50  ;;  %v7846_v50 = vld [vmem:[#allocation25_spill] sm:$0xff]  ;;  %v7847_v5 = vld [vmem:[#allocation18_spill] sm:$0xff] }
 0x1df   :  { %v4273_v31 = vpop.permute.xlu1 %1212  ;;  %v4285_v63 = vpop.permute.xlu0 %1196  ;;  %7842 = vst [vmem:[#allocation26_spill] sm:$0xff] %v4330_v38  ;;  %v643_v6 = vsel %vm642_vm5, %v7840_v46, %v7841_v61  ;;  %v675_v24 = vsel %vm667_vm0, %v7844_v0, %v7843_v16  ;;  %v4342_v41 = vstv %s4248_s15  ;;  %v4347_v55 = vmul.f32 %v3893_v21, %v633_v53  ;;  %s4456_s15 = sld [smem:[#allocation3 + $0x3f]] }
 0x1e0   :  { %7831 = vst [vmem:[#allocation19_spill] sm:$0xff] %v4273_v31  ;;  %v4287_v1 = vpop.permute.xlu2 %1269  ;;  %v669_v49 = vsel %vm667_vm0, %v7847_v5, %v7846_v50  ;;  %v655_v46 = vmul.f32 %v4303_v3, %v650_v42  ;;  %vm717_vm8 = vcmp.lt.s32.totalorder %v3626_v29, 30  ;;  %v652_v53 = vmul.f32 %v4290_v60, %v644_v25  ;;  %v7853_v31 = vld [vmem:[#allocation31_spill] sm:$0xff]  ;;  %s4480_s16 = sld [smem:[#allocation3 + $0x40]] }
 0x1e1   :  { %7832 = vst [vmem:[#allocation16_spill] sm:$0xff] %v4285_v63  ;;  %v668_v61 = vsel %vm667_vm0, %v7846_v50, %v7847_v5  ;;  %v656_v10 = vmul.f32 %v4303_v3, %v649_v30  ;;  %v4368_v42 = vstv %s4271_s14  ;;  %v653_v12 = vmul.f32 %v4290_v60, %v643_v6  ;;  %v7852_v3 = vld [vmem:[#allocation24_spill] sm:$0xff]  ;;  %s7433_s14 = smov 81  }
 0x1e2   :  { %7833 = vst [vmem:[#allocation15_spill] sm:$0xff] %v4287_v1  ;;  %v674_v4 = vsel %vm667_vm0, %v7843_v16, %v7844_v0  ;;  %v680_v25 = vmul.f32 %v4316_v47, %v675_v24  ;;  %vm742_vm2 = vcmp.lt.s32.totalorder %v3626_v29, 29  ;;  %v677_v5 = vmul.f32 %v4294_v54, %v669_v49  ;;  %v7854_v16 = vld [vmem:[#allocation21_spill] sm:$0xff]  ;;  %v7855_v24 = vld [vmem:[#allocation32_spill] sm:$0xff] }
 0x1e3   :  { %7845 = vst [vmem:[#allocation23_spill] sm:$0xff] %v4342_v41  ;;  %v699_v6 = vsel %vm692_vm7, %v7853_v31, %v7852_v3  ;;  %v700_v0 = vsel %vm692_vm7, %v7852_v3, %v7853_v31  ;;  %v694_v60 = vsel %vm692_vm7, %v7855_v24, %v7854_v16  ;;  %v678_v13 = vmul.f32 %v4294_v54, %v668_v61  ;;  %v7857_v31 = vld [vmem:[#allocation27_spill] sm:$0xff]  ;;  %v7858_v3 = vld [vmem:[#allocation38_spill] sm:$0xff] }
 0x1e4   :  { %7848 = vst [vmem:[#allocation22_spill] sm:$0xff] %v4368_v42  ;;  %v693_v49 = vsel %vm692_vm7, %v7854_v16, %v7855_v24  ;;  %v681_v56 = vmul.f32 %v4316_v47, %v674_v4  ;;  %v725_v15 = vsel %vm717_vm8, %v7858_v3, %v7857_v31  ;;  %v4410_v63 = vstv %s4318_s20  ;;  %v7862_v47 = vld [vmem:[#allocation41_spill] sm:$0xff]  ;;  %s4487_s20 = sld [smem:[#allocation3 + $0x10]] }
 0x1e5   :  { %1497 = vrot.lane.b32.xlu1 %v3180_v26, %s7430_s18  ;;  %1495 = vrot.lane.b32.xlu0 %v3182_v27, %s7430_s18  ;;  %7859 = vst [vmem:[#allocation24_spill] sm:$0xff] %v4410_v63  ;;  %v682_v61 = vadd.f32 %v680_v25, %v677_v5  ;;  %v702_v16 = vmul.f32 %v4342_v41, %v694_v60  ;;  %v7863_v25 = vld [vmem:[#allocation40_spill] sm:$0xff]  ;;  %vm771_vm1 = vcmp.lt.s32.totalorder %v3626_v29, 19  ;;  %vm796_vm12 = vcmp.lt.s32.totalorder %v3626_v29, 18 }
 0x1e6   :  { %1502 = vrot.lane.b32.xlu2 %v3190_v32, %s7430_s18  ;;  %v703_v24 = vmul.f32 %v4342_v41, %v693_v49  ;;  %v724_v54 = vsel %vm717_vm8, %v7857_v31, %v7858_v3  ;;  %v750_v5 = vsel %vm742_vm2, %v7863_v25, %v7862_v47  ;;  %v636_v60 = vadd.f32 %v634_v22, %v609_v39  ;;  %v7865_v41 = vld [vmem:[#allocation37_spill] sm:$0xff]  ;;  %v7866_v39 = vld [vmem:[#allocation30_spill] sm:$0xff] }
 0x1e7   :  { %v4370_v1 = vpop.permute.xlu1 %1221  ;;  %v4379_v50 = vpop.permute.xlu0 %1219  ;;  %v683_v31 = vadd.f32 %v681_v56, %v678_v13  ;;  %v744_v22 = vsel %vm742_vm2, %v7866_v39, %v7865_v41  ;;  %v755_v18 = vmul.f32 %v4410_v63, %v750_v5  ;;  %v684_v9 = vmul.f32 %v3948_v48, %v682_v61 }
 0x1e8   :  { %7849 = vst [vmem:[#allocation29_spill] sm:$0xff] %v4370_v1  ;;  %v4381_v30 = vpop.permute.xlu2 %1293  ;;  %v658_v1 = vadd.f32 %v656_v10, %v653_v12  ;;  %v7860_v12 = vld [vmem:[#allocation35_spill] sm:$0xff]  ;;  %v7861_v10 = vld [vmem:[#allocation34_spill] sm:$0xff]  ;;  %v637_v61 = vadd.f32 %v4347_v55, %v4309_v58  ;;  %vm821_vm9 = vcmp.lt.s32.totalorder %v3626_v29, 17  ;;  %vm7899_vm6 = vcmask 1043456  }
 0x1e9   :  { %7850 = vst [vmem:[#allocation28_spill] sm:$0xff] %v4379_v50  ;;  %v4402_v50 = vstv %s4305_s19  ;;  %v719_v4 = vsel %vm717_vm8, %v7861_v10, %v7860_v12  ;;  %v718_v3 = vsel %vm717_vm8, %v7860_v12, %v7861_v10  ;;  %s4468_s19 = sld [smem:[#allocation3 + $0xe]]  ;;  %v4509_v55 = vld.sshfl [vmem:[#allocation1] sm:$0xff pattern:$0x75316420]  ;;  %vm7901_vm10 = vmmov %vm7899_vm6  ;;  %vm7623_vm4 = vcmp.lt.s32.totalorder %v3626_v29, 83 }
 0x1ea   :  { %7851 = vst [vmem:[#allocation25_spill] sm:$0xff] %v4381_v30  ;;  %v657_v30 = vadd.f32 %v655_v46, %v652_v53  ;;  %v705_v46 = vmul.f32 %v4330_v38, %v700_v0  ;;  %v706_v53 = vmul.f32 %v4330_v38, %v699_v6  ;;  %v4432_v0 = vstv %s4355_s17  ;;  %s4493_s17 = sld [smem:[#allocation3 + $0x41]] }
 0x1eb   :  { %7856 = vst [vmem:[#allocation18_spill] sm:$0xff] %v4402_v50  ;;  %v730_v49 = vmul.f32 %v4402_v50, %v725_v15  ;;  %v749_v15 = vsel %vm742_vm2, %v7862_v47, %v7863_v25  ;;  %v727_v13 = vmul.f32 %v4368_v42, %v719_v4  ;;  %v731_v56 = vmul.f32 %v4402_v50, %v724_v54 }
 0x1ec   :  { %v659_v6 = vmul.f32 %v3877_v20, %v657_v30  ;;  %7864 = vst [vmem:[#allocation31_spill] sm:$0xff] %v4432_v0  ;;  %v707_v38 = vadd.f32 %v705_v46, %v702_v16  ;;  %v660_v45 = vmul.f32 %v3885_v40, %v658_v1  ;;  %v708_v47 = vadd.f32 %v706_v53, %v703_v24 }
 0x1ed   :  { %1520 = vrot.lane.b32.xlu1 %v3182_v27, %s7433_s14  ;;  %1504 = vrot.lane.b32.xlu0 %v3198_v35, %s7430_s18  ;;  %v743_v46 = vsel %vm742_vm2, %v7865_v41, %v7866_v39  ;;  %v728_v54 = vmul.f32 %v4368_v42, %v718_v3  ;;  %v752_v16 = vmul.f32 %v4432_v0, %v744_v22  ;;  %s7474_s18 = smov 80  }
 0x1ee   :  { %1522 = vrot.lane.b32.xlu2 %v3180_v26, %s7433_s14  ;;  %v732_v4 = vadd.f32 %v730_v49, %v727_v13  ;;  %v756_v25 = vmul.f32 %v4410_v63, %v749_v15  ;;  %v582_v1 = vadd.f32 %v4297_v37, %v4282_v17  ;;  %v661_v53 = vadd.f32 %v659_v6, %v636_v60 }
 0x1ef   :  { %v4451_v30 = vpop.permute.xlu1 %1244  ;;  %v4458_v12 = vpop.permute.xlu0 %1239  ;;  %v685_v41 = vmul.f32 %v3953_v52, %v683_v31  ;;  %v709_v24 = vmul.f32 %v3997_v2, %v707_v38  ;;  %v753_v5 = vmul.f32 %v4432_v0, %v743_v46  ;;  %v733_v49 = vadd.f32 %v731_v56, %v728_v54  ;;  %v7872_v56 = vld [vmem:[#allocation13_spill] sm:$0xff] }
 0x1f0   :  { %v4460_v10 = vpop.permute.xlu2 %1316  ;;  %v757_v3 = vadd.f32 %v755_v18, %v752_v16  ;;  %v558_v39 = vadd.f32 %v4280_v19, %v4277_v7  ;;  %v662_v22 = vadd.f32 %v660_v45, %v637_v61  ;;  %v710_v17 = vmul.f32 %v4027_v14, %v708_v47  ;;  %v4507_v19 = vld.sshfl [vmem:[#allocation1 + $0x8] sm:$0xff pattern:$0x75316420] }
 0x1f1   :  { %7867 = vst [vmem:[#allocation21_spill] sm:$0xff] %v4460_v10  ;;  %v686_v37 = vadd.f32 %v684_v9, %v661_v53  ;;  %v734_v58 = vmul.f32 %v4076_v59, %v732_v4  ;;  %v758_v38 = vadd.f32 %v756_v25, %v753_v5  ;;  %v4503_v9 = vmul.f32 %v4255_v44, %v582_v1  ;;  %v7875_v25 = vld [vmem:[#allocation36_spill] sm:$0xff]  ;;  %v7876_v1 = vld [vmem:[#allocation43_spill] sm:$0xff]  ;;  %v7884_v44 = vld [vmem:[#allocation46_spill] sm:$0xff] }
 0x1f2   :  { %v4500_v45 = vadd.f32 %v4300_v36, %v558_v39  ;;  %v687_v18 = vadd.f32 %v685_v41, %v662_v22  ;;  %v735_v6 = vmul.f32 %v4079_v51, %v733_v49  ;;  %v759_v31 = vmul.f32 %v4266_v8, %v757_v3  ;;  %1693 = vst [vmem:[#allocation1] ss:$2 sm:$0xff] %v7872_v56  ;;  %v7877_v53 = vld [vmem:[#allocation44_spill] sm:$0xff]  ;;  %v7878_v41 = vld [vmem:[#allocation33_spill] sm:$0xff]  ;;  %v7880_v49 = vld [vmem:[#allocation39_spill] sm:$0xff] }
 0x1f3   :  { %v711_v60 = vadd.f32 %v709_v24, %v686_v37  ;;  %v4514_v15 = vstv %s4456_s15  ;;  %v4522_v46 = vstv %s4468_s19  ;;  %v4530_v54 = vsel %vm142_vm3, 1.0, %v7792_v23  ;;  %v7881_v3 = vld [vmem:[#allocation50_spill] sm:$0xff]  ;;  %s4552_s15 = sld [smem:[#allocation3 + $0x11]]  ;;  %v7883_v56 = vld [vmem:[#allocation47_spill] sm:$0xff] }
 0x1f4   :  { %7869 = vst [vmem:[#allocation27_spill] sm:$0xff] %v4514_v15  ;;  %v712_v47 = vadd.f32 %v710_v17, %v687_v18  ;;  %v760_v4 = vmul.f32 %v4269_v57, %v758_v38  ;;  %v778_v61 = vsel %vm771_vm1, %v7876_v1, %v7875_v25  ;;  %v772_v24 = vsel %vm771_vm1, %v7878_v41, %v7877_v53  ;;  %s4615_s19 = sld [smem:[#allocation3 + $0x12]] }
 0x1f5   :  { %1529 = vrot.lane.b32.xlu1 %v3198_v35, %s7433_s14  ;;  %1527 = vrot.lane.b32.xlu0 %v3190_v32, %s7433_s14  ;;  %7873 = vst [vmem:[#allocation34_spill] sm:$0xff] %v4522_v46  ;;  %s4525_s14 = sld [smem:[#allocation3 + $0x42]]  ;;  %v736_v16 = vadd.f32 %v734_v58, %v711_v60  ;;  %v4542_v5 = vstv %s4473_s21  ;;  %v804_v39 = vsel %vm796_vm12, %v7881_v3, %v7880_v49  ;;  %v4550_v22 = vstv %s4480_s16  ;;  %s7472_s16 = smov 79  }
 0x1f6   :  { %1545 = vrot.lane.b32.xlu2 %v3182_v27, %s7474_s18  ;;  %7874 = vst [vmem:[#allocation41_spill] sm:$0xff] %v4530_v54  ;;  %v737_v17 = vadd.f32 %v735_v6, %v712_v47  ;;  %v779_v58 = vsel %vm771_vm1, %v7875_v25, %v7876_v1  ;;  %v773_v38 = vsel %vm771_vm1, %v7877_v53, %v7878_v41  ;;  %v4579_v1 = vstv %s4493_s17  ;;  %v7887_v41 = vld [vmem:[#allocation53_spill] sm:$0xff]  ;;  %s4624_s21 = sld [smem:[#allocation3 + $0x43]] }
 0x1f7   :  { %v4505_v7 = vpop.permute.xlu1 %1264  ;;  %v4516_v36 = vpop.permute.xlu0 %1262  ;;  %7879 = vst [vmem:[#allocation40_spill] sm:$0xff] %v4542_v5  ;;  %v761_v37 = vadd.f32 %v759_v31, %v736_v16  ;;  %v785_v18 = vmul.f32 %v4514_v15, %v778_v61  ;;  %v782_v60 = vmul.f32 %v4522_v46, %v772_v24  ;;  %v798_v6 = vsel %vm796_vm12, %v7884_v44, %v7883_v56  ;;  %v7888_v24 = vld [vmem:[#allocation52_spill] sm:$0xff]  ;;  %s4678_s17 = sld [smem:[#allocation3 + $0x45]] }
 0x1f8   :  { %7868 = vst [vmem:[#allocation32_spill] sm:$0xff] %v4505_v7  ;;  %v4518_v13 = vpop.permute.xlu2 %1325  ;;  %v803_v31 = vsel %vm796_vm12, %v7880_v49, %v7881_v3  ;;  %v762_v47 = vadd.f32 %v760_v4, %v737_v17  ;;  %v4575_v16 = vstv %s4487_s20  ;;  %v809_v25 = vmul.f32 %v4550_v22, %v804_v39  ;;  %s4660_s20 = sld [smem:[#allocation3 + $0x44]] }
 0x1f9   :  { %7870 = vst [vmem:[#allocation38_spill] sm:$0xff] %v4516_v36  ;;  %v784_v61 = vmul.f32 %v4514_v15, %v779_v58  ;;  %v781_v53 = vmul.f32 %v4522_v46, %v773_v38  ;;  %v797_v4 = vsel %vm796_vm12, %v7883_v56, %v7884_v44  ;;  %v829_v49 = vsel %vm821_vm9, %v7888_v24, %v7887_v41  ;;  %v7891_v46 = vld [vmem:[#allocation49_spill] sm:$0xff]  ;;  %v7892_v15 = vld [vmem:[#allocation42_spill] sm:$0xff] }
 0x1fa   :  { %7871 = vst [vmem:[#allocation35_spill] sm:$0xff] %v4518_v13  ;;  %v806_v39 = vmul.f32 %v4542_v5, %v798_v6  ;;  %v810_v17 = vmul.f32 %v4550_v22, %v803_v31  ;;  %v828_v58 = vsel %vm821_vm9, %v7887_v41, %v7888_v24  ;;  %vm7467_vm3 = vcmp.lt.s32.totalorder %v3626_v29, 16 }
 0x1fb   :  { %7882 = vst [vmem:[#allocation37_spill] sm:$0xff] %v4550_v22  ;;  %v787_v38 = vadd.f32 %v785_v18, %v782_v60  ;;  %v823_v6 = vsel %vm821_vm9, %v7892_v15, %v7891_v46  ;;  %v4613_v63 = vstv %s4525_s14  ;;  %v763_v31 = vmul.f32 %v4530_v54, %v761_v37  ;;  %s4633_s14 = sld [smem:[#allocation3 + $0x13]]  ;;  %v7895_v54 = vld [vmem:[#allocation55_spill] sm:$0xff] }
 0x1fc   :  { %7885 = vst [vmem:[#allocation30_spill] sm:$0xff] %v4575_v16  ;;  %v807_v41 = vmul.f32 %v4542_v5, %v797_v4  ;;  %v822_v24 = vsel %vm821_vm9, %v7891_v46, %v7892_v15  ;;  %v811_v22 = vadd.f32 %v809_v25, %v806_v39  ;;  %v834_v18 = vmul.f32 %v4579_v1, %v829_v49  ;;  %v7896_v15 = vld [vmem:[#allocation48_spill] sm:$0xff]  ;;  %v7897_v25 = vld [vmem:[#allocation45_spill] sm:$0xff] }
 0x1fd   :  { %1552 = vrot.lane.b32.xlu1 %v3190_v32, %s7474_s18  ;;  %7886 = vst [vmem:[#allocation36_spill] sm:$0xff] %v4579_v1  ;;  %1547 = vrot.lane.b32.xlu0 %v3180_v26, %s7474_s18  ;;  %v4627_v60 = vadd.f32 %v762_v47, %v4500_v45  ;;  %v786_v0 = vadd.f32 %v784_v61, %v781_v53  ;;  %v4631_v42 = vstv %s4552_s15  ;;  %v7898_v49 = vld [vmem:[#allocation56_spill] sm:$0xff]  ;;  %s4689_s15 = sld [smem:[#allocation3 + $0x14]] }
 0x1fe   :  { %1554 = vrot.lane.b32.xlu2 %v3198_v35, %s7474_s18  ;;  %7893 = vst [vmem:[#allocation33_spill] sm:$0xff] %v4613_v63  ;;  %v835_v50 = vmul.f32 %v4579_v1, %v828_v58  ;;  %v831_v37 = vmul.f32 %v4575_v16, %v823_v6  ;;  %v812_v4 = vadd.f32 %v810_v17, %v807_v41  ;;  %s4770_s18 = sld [smem:[#allocation3 + $0x18]] }
 0x1ff   :  { %v4595_v3 = vpop.permute.xlu1 %1291  ;;  %v4604_v44 = vpop.permute.xlu0 %1271  ;;  %7894 = vst [vmem:[#allocation39_spill] sm:$0xff] %v4631_v42  ;;  %v854_v46 = vsel %vm7467_vm3, %v7896_v15, %v7895_v54  ;;  %v848_v45 = vsel %vm7467_vm3, %v7898_v49, %v7897_v25  ;;  %v832_v47 = vmul.f32 %v4575_v16, %v822_v24  ;;  %v853_v61 = vsel %vm7467_vm3, %v7895_v54, %v7896_v15 }
 0x200   :  { %7889 = vst [vmem:[#allocation43_spill] sm:$0xff] %v4595_v3  ;;  %v4606_v56 = vpop.permute.xlu2 %1348  ;;  %v847_v53 = vsel %vm7467_vm3, %v7897_v25, %v7898_v49  ;;  %v4656_v39 = vadd.f32 %v763_v31, %v4503_v9  ;;  %v789_v17 = vmul.f32 %v3830_v34, %v787_v38  ;;  %v813_v58 = vmul.f32 %v3890_v43, %v811_v22  ;;  %v7906_v25 = vld [vmem:[#allocation62_spill] sm:$0xff] }
 0x201   :  { %7890 = vst [vmem:[#allocation44_spill] sm:$0xff] %v4606_v56  ;;  %v836_v6 = vadd.f32 %v834_v18, %v831_v37  ;;  %v1684_v54 = vsel %vm7899_vm6, %v4507_v19, 0.0  ;;  %v837_v41 = vadd.f32 %v835_v50, %v832_v47  ;;  %v859_v9 = vmul.f32 %v4613_v63, %v854_v46 }
 0x202   :  { %v856_v38 = vmul.f32 %v4631_v42, %v848_v45  ;;  %v1677_v22 = vsel %vm7901_vm10, %v4509_v55, 0.0  ;;  %v788_v24 = vmul.f32 %v3812_v33, %v786_v0  ;;  %v814_v18 = vmul.f32 %v3893_v21, %v812_v4  ;;  %v7905_v4 = vld [vmem:[#allocation51_spill] sm:$0xff] }
 0x203   :  { %v860_v37 = vmul.f32 %v4613_v63, %v853_v61  ;;  %v857_v15 = vmul.f32 %v4631_v42, %v847_v53  ;;  %vm7476_vm6 = vcmp.lt.s32.totalorder %v3626_v29, 15  ;;  %v4686_v46 = vstv %s4615_s19  ;;  %v1694_v61 = vld.sshfl [vmem:[#allocation1] sm:$0xff pattern:$0x75316420]  ;;  %s4716_s19 = sld [smem:[#allocation3 + $0x15]] }
 0x204   :  { %7904 = vst [vmem:[#allocation53_spill] sm:$0xff] %v4686_v46  ;;  %vm7488_vm10 = vcmp.lt.s32.totalorder %v3626_v29, 14  ;;  %v1685_v0 = vrot.slane %v1684_v54, 4  ;;  %v838_v55 = vmul.f32 %v3877_v20, %v836_v6  ;;  %v879_v49 = vsel %vm7476_vm6, %v7906_v25, %v7905_v4  ;;  %v7910_v6 = vld [vmem:[#allocation58_spill] sm:$0xff] }
 0x205   :  { %1572 = vrot.lane.b32.xlu1 %v3180_v26, %s7472_s16  ;;  %1570 = vrot.lane.b32.xlu0 %v3182_v27, %s7472_s16  ;;  %v4697_v45 = vstv %s4624_s21  ;;  %v1678_v47 = vrot.slane %v1677_v22, 4  ;;  %v815_v53 = vadd.f32 %v813_v58, %v788_v24  ;;  %v839_v42 = vmul.f32 %v3885_v40, %v837_v41  ;;  %s3137_s21 = smov 78   ;;  %v7912_v24 = vld [vmem:[#allocation65_spill] sm:$0xff] }
 0x206   :  { %1577 = vrot.lane.b32.xlu2 %v3190_v32, %s7472_s16  ;;  %7907 = vst [vmem:[#allocation52_spill] sm:$0xff] %v4697_v45  ;;  %v861_v63 = vadd.f32 %v859_v9, %v856_v38  ;;  %v4701_v1 = vstv %s4633_s14  ;;  %v816_v16 = vadd.f32 %v814_v18, %v789_v17  ;;  %v862_v5 = vadd.f32 %v860_v37, %v857_v15  ;;  %v7913_v18 = vld [vmem:[#allocation64_spill] sm:$0xff]  ;;  %s4735_s14 = sld [smem:[#allocation3 + $0x16]] }
 0x207   :  { %v4670_v31 = vpop.permute.xlu1 %1300  ;;  %v4680_v50 = vpop.permute.xlu0 %1298  ;;  %7908 = vst [vmem:[#allocation49_spill] sm:$0xff] %v4701_v1  ;;  %v878_v3 = vsel %vm7476_vm6, %v7905_v4, %v7906_v25  ;;  %v884_v41 = vmul.f32 %v4697_v45, %v879_v49  ;;  %v1686_v17 = vadd.f32 %v1685_v0, %v1684_v54  ;;  %vm7911_vm3 = vcmask 1043456  }
 0x208   :  { %7900 = vst [vmem:[#allocation50_spill] sm:$0xff] %v4670_v31  ;;  %v4682_v19 = vpop.permute.xlu2 %1368  ;;  %v1698_v9 = vsel %vm7911_vm3, %v1694_v61, -inf  ;;  %v840_v38 = vadd.f32 %v838_v55, %v815_v53  ;;  %v904_v37 = vsel %vm7488_vm10, %v7913_v18, %v7912_v24  ;;  %v4726_v15 = vstv %s4660_s20  ;;  %v7916_v53 = vld [vmem:[#allocation61_spill] sm:$0xff]  ;;  %s4754_s20 = sld [smem:[#allocation3 + $0x46]] }
 0x209   :  { %7902 = vst [vmem:[#allocation47_spill] sm:$0xff] %v4680_v50  ;;  %v841_v4 = vadd.f32 %v839_v42, %v816_v16  ;;  %v863_v54 = vmul.f32 %v3948_v48, %v861_v63  ;;  %v885_v55 = vmul.f32 %v4697_v45, %v878_v3  ;;  %v864_v49 = vmul.f32 %v3953_v52, %v862_v5  ;;  %v1695_v3 = vld.sshfl [vmem:[#allocation1 + $0x8] sm:$0xff pattern:$0x75316420] }
 0x20a   :  { %7903 = vst [vmem:[#allocation46_spill] sm:$0xff] %v4682_v19  ;;  %v7909_v19 = vld [vmem:[#allocation59_spill] sm:$0xff]  ;;  %v909_v5 = vmul.f32 %v4726_v15, %v904_v37  ;;  %vm7495_vm3 = vcmp.lt.s32.totalorder %v3626_v29, 13  ;;  %v4758_v45 = vstv %s4678_s17  ;;  %s4774_s17 = sld [smem:[#allocation3 + $0x49]]  ;;  %v4778_v31 = vstv %s4716_s19 }
 0x20b   :  { %v873_v56 = vsel %vm7476_vm6, %v7910_v6, %v7909_v19  ;;  %v872_v58 = vsel %vm7476_vm6, %v7909_v19, %v7910_v6  ;;  %7914 = vst [vmem:[#allocation42_spill] sm:$0xff] %v4726_v15  ;;  %v1679_v19 = vadd.f32 %v1678_v47, %v1677_v22  ;;  %v7917_v6 = vld [vmem:[#allocation54_spill] sm:$0xff]  ;;  %v903_v47 = vsel %vm7488_vm10, %v7912_v24, %v7913_v18  ;;  %s4936_s19 = sld [smem:[#allocation3 + $0x4b]] }
 0x20c   :  { %v881_v0 = vmul.f32 %v4686_v46, %v873_v56  ;;  %v882_v61 = vmul.f32 %v4686_v46, %v872_v58  ;;  %v898_v42 = vsel %vm7488_vm10, %v7917_v6, %v7916_v53  ;;  %v1699_v56 = vrot.slane %v1698_v9, 4  ;;  %7920 = vst [vmem:[#allocation56_spill] sm:$0xff] %v4758_v45 }
 0x20d   :  { %1595 = vrot.lane.b32.xlu1 %v3182_v27, %s3137_s21  ;;  %1579 = vrot.lane.b32.xlu0 %v3198_v35, %s7472_s16  ;;  %v1687_v58 = vrot.slane %v1686_v17, 2  ;;  %v4761_v46 = vstv %s4689_s15  ;;  %s4763_s16 = sld [smem:[#allocation3 + $0x47]]  ;;  %v897_v24 = vsel %vm7488_vm10, %v7916_v53, %v7917_v6  ;;  %v906_v18 = vmul.f32 %v4701_v1, %v898_v42  ;;  %7923 = vst [vmem:[#allocation62_spill] sm:$0xff] %v4778_v31  ;;  %v7926_v53 = vld [vmem:[#allocation57_spill] sm:$0xff]  ;;  %v7927_v6 = vld [vmem:[#allocation68_spill] sm:$0xff] }
 0x20e   :  { %1597 = vrot.lane.b32.xlu2 %v3180_v26, %s3137_s21  ;;  %v886_v22 = vadd.f32 %v884_v41, %v881_v0  ;;  %7921 = vst [vmem:[#allocation51_spill] sm:$0xff] %v4761_v46  ;;  %v1680_v41 = vrot.slane %v1679_v19, 2  ;;  %v887_v37 = vadd.f32 %v885_v55, %v882_v61  ;;  %vm7922_vm6 = vcmask 1043456   ;;  %s4780_s15 = sld [smem:[#allocation3 + $0x48]] }
 0x20f   :  { %v4737_v25 = vpop.permute.xlu1 %1323  ;;  %v4745_v63 = vpop.permute.xlu0 %1318  ;;  %v1705_v0 = vsel %vm7922_vm6, %v1695_v3, -inf  ;;  %v866_v10 = vadd.f32 %v864_v49, %v841_v4  ;;  %v911_v50 = vadd.f32 %v909_v5, %v906_v18  ;;  %v1688_v55 = vadd.f32 %v1687_v58, %v1686_v17  ;;  %v7924_v49 = vld [vmem:[#allocation67_spill] sm:$0xff]  ;;  %v7925_v17 = vld [vmem:[#allocation60_spill] sm:$0xff] }
 0x210   :  { %7915 = vst [vmem:[#allocation55_spill] sm:$0xff] %v4737_v25  ;;  %v4747_v16 = vpop.permute.xlu2 %1391  ;;  %v1700_v25 = vmax.f32 %v1698_v9, %v1699_v56  ;;  %v888_v13 = vmul.f32 %v3997_v2, %v886_v22  ;;  %vm7517_vm6 = vcmp.lt.s32.totalorder %v3626_v29, 2  ;;  %v1681_v9 = vadd.f32 %v1680_v41, %v1679_v19 }
 0x211   :  { %7918 = vst [vmem:[#allocation48_spill] sm:$0xff] %v4745_v63  ;;  %v910_v63 = vmul.f32 %v4726_v15, %v903_v47  ;;  %v1706_v4 = vrot.slane %v1705_v0, 4  ;;  %v929_v61 = vsel %vm7495_vm3, %v7925_v17, %v7924_v49  ;;  %v923_v42 = vsel %vm7495_vm3, %v7927_v6, %v7926_v53 }
 0x212   :  { %7919 = vst [vmem:[#allocation45_spill] sm:$0xff] %v4747_v16  ;;  %v865_v16 = vadd.f32 %v863_v54, %v840_v38  ;;  %v907_v38 = vmul.f32 %v4701_v1, %v897_v24  ;;  %v889_v54 = vmul.f32 %v4027_v14, %v887_v37  ;;  %vm7518_vm10 = vcmp.lt.s32.totalorder %v3626_v29, 3 }
 0x213   :  { %v4803_v19 = vstv %s4735_s14  ;;  %v928_v22 = vsel %vm7495_vm3, %v7924_v49, %v7925_v17  ;;  %v922_v47 = vsel %vm7495_vm3, %v7926_v53, %v7927_v6  ;;  %v1701_v41 = vrot.slane %v1700_v25, 2  ;;  %s4954_s14 = sld [smem:[#allocation3 + $0x4c]] }
 0x214   :  { %7928 = vst [vmem:[#allocation59_spill] sm:$0xff] %v4803_v19  ;;  %v912_v56 = vadd.f32 %v910_v63, %v907_v38  ;;  %v890_v24 = vadd.f32 %v888_v13, %v865_v16  ;;  %v913_v63 = vmul.f32 %v4076_v59, %v911_v50  ;;  %v4821_v18 = vstv %s4754_s20  ;;  %s4957_s20 = sld [smem:[#allocation3 + $0x1b]] }
 0x215   :  { %1604 = vrot.lane.b32.xlu1 %v3198_v35, %s3137_s21  ;;  %1602 = vrot.lane.b32.xlu0 %v3190_v32, %s3137_s21  ;;  %7932 = vst [vmem:[#allocation61_spill] sm:$0xff] %v4821_v18  ;;  %v1689_v37 = vrot.slane %v1688_v55, 1  ;;  %v934_v38 = vmul.f32 %v4758_v45, %v929_v61  ;;  %v931_v49 = vmul.f32 %v4761_v46, %v923_v42  ;;  %v1682_v17 = vrot.slane %v1681_v9, 1 }
 0x216   :  { %1620 = vrot.lane.b32.xlu2 %v3182_v27, %s3138_s13  ;;  %v1707_v53 = vmax.f32 %v1705_v0, %v1706_v4  ;;  %v891_v6 = vadd.f32 %v889_v54, %v866_v10  ;;  %v935_v15 = vmul.f32 %v4758_v45, %v928_v22  ;;  %v932_v1 = vmul.f32 %v4761_v46, %v922_v47  ;;  %v7947_v45 = vld [vmem:[#allocation70_spill] sm:$0xff] }
 0x217   :  { %v4805_v3 = vpop.permute.xlu1 %1343  ;;  %v4815_v5 = vpop.permute.xlu0 %1341  ;;  %v914_v13 = vmul.f32 %v4079_v51, %v912_v56  ;;  %v4832_v50 = vstv %s4770_s18  ;;  %v4835_v16 = vstv %s4774_s17  ;;  %v4837_v61 = vadd.f32 %v913_v63, %v890_v24  ;;  %v7939_v24 = vld [vmem:[#allocation73_spill] sm:$0xff]  ;;  %v7940_v63 = vld [vmem:[#allocation66_spill] sm:$0xff]  ;;  %s4910_s18 = sld [smem:[#allocation3 + $0x4a]] }
 0x218   :  { %7929 = vst [vmem:[#allocation58_spill] sm:$0xff] %v4805_v3  ;;  %v4817_v58 = vpop.permute.xlu2 %1400  ;;  %vm7516_vm3 = vcmp.lt.s32.totalorder %v3626_v29, 1  ;;  %v4841_v42 = vstv %s4780_s15  ;;  %v1690_v10 = vadd.f32 %v1689_v37, %v1688_v55  ;;  %v936_v0 = vadd.f32 %v934_v38, %v931_v49  ;;  %v7941_v37 = vld [vmem:[#allocation77_spill] sm:$0xff]  ;;  %v7942_v38 = vld [vmem:[#allocation78_spill] sm:$0xff]  ;;  %s5005_s17 = sld [smem:[#allocation3 + $0x1c]] }
 0x219   :  { %7930 = vst [vmem:[#allocation65_spill] sm:$0xff] %v4815_v5  ;;  %v1702_v5 = vmax.f32 %v1700_v25, %v1701_v41  ;;  %v4846_v4 = vstv %s4786_s22  ;;  %v1683_v54 = vadd.f32 %v1682_v17, %v1681_v9  ;;  %v1708_v56 = vrot.slane %v1707_v53, 2  ;;  %v7945_v17 = vld [vmem:[#allocation74_spill] sm:$0xff]  ;;  %s4905_s22 = sld [smem:[#allocation3 + $0x19]] }
 0x21a   :  { %7931 = vst [vmem:[#allocation64_spill] sm:$0xff] %v4817_v58  ;;  %v4828_v58 = vstv %s4763_s16  ;;  %v937_v25 = vadd.f32 %v935_v15, %v932_v1  ;;  %v1022_v22 = vmul.f32 %v4832_v50, %v3182_v27  ;;  %v1023_v47 = vmul.f32 %v4832_v50, %v3180_v26  ;;  %s4930_s16 = sld [smem:[#allocation3 + $0x1a]] }
 0x21b   :  { %7933 = vst [vmem:[#allocation54_spill] sm:$0xff] %v4828_v58  ;;  %v1025_v55 = vmul.f32 %v4835_v16, %v3190_v32  ;;  %v977_v9 = vsel %vm7517_vm6, %v7940_v63, %v7939_v24  ;;  %v982_v1 = vsel %vm7517_vm6, %v7942_v38, %v7941_v37  ;;  %v976_v49 = vsel %vm7517_vm6, %v7939_v24, %v7940_v63  ;;  %s5034_s15 = sld [smem:[#allocation3 + $0x4e]] }
 0x21c   :  { %7934 = vst [vmem:[#allocation67_spill] sm:$0xff] %v4832_v50  ;;  %v7946_v50 = vld [vmem:[#allocation63_spill] sm:$0xff]  ;;  %v1026_v24 = vmul.f32 %v4835_v16, %v3198_v35  ;;  %v4896_v63 = vmul.f32 0.25, %v1683_v54  ;;  %v1709_v3 = vmax.f32 %v1707_v53, %v1708_v56  ;;  %v986_v36 = vmul.f32 %v4803_v19, %v976_v49  ;;  %v7949_v56 = vld [vmem:[#allocation72_spill] sm:$0xff] }
 0x21d   :  { %7935 = vst [vmem:[#allocation60_spill] sm:$0xff] %v4835_v16  ;;  %1627 = vrot.lane.b32.xlu1 %v3190_v32, %s3138_s13  ;;  %1622 = vrot.lane.b32.xlu0 %v3180_v26, %s3138_s13  ;;  %v983_v26 = vsel %vm7517_vm6, %v7941_v37, %v7942_v38  ;;  %v1703_v32 = vrot.slane %v1702_v5, 1  ;;  %v957_v46 = vsel %vm7518_vm10, %v7946_v50, %v7945_v17  ;;  %v4888_v38 = vmul.f32 0.25, %v1690_v10 }
 0x21e   :  { %7936 = vst [vmem:[#allocation57_spill] sm:$0xff] %v4841_v42  ;;  %1629 = vrot.lane.b32.xlu2 %v3198_v35, %s3138_s13  ;;  %v958_v37 = vsel %vm7518_vm10, %v7945_v17, %v7946_v50  ;;  %v985_v50 = vmul.f32 %v4803_v19, %v977_v9  ;;  %v988_v10 = vmul.f32 %v4828_v58, %v983_v26  ;;  %v7952_v26 = vld [vmem:[#allocation69_spill] sm:$0xff]  ;;  %vm7533_vm6 = vcmp.lt.s32.totalorder %v3626_v29, 127 }
 0x21f   :  { %7937 = vst [vmem:[#allocation68_spill] sm:$0xff] %v4846_v4  ;;  %v4858_v41 = vpop.permute.xlu1 %1366  ;;  %v4872_v27 = vpop.permute.xlu0 %1350  ;;  %v989_v17 = vmul.f32 %v4828_v58, %v982_v1  ;;  %v963_v35 = vmul.f32 %v4821_v18, %v958_v37  ;;  %v964_v54 = vmul.f32 %v4821_v18, %v957_v46  ;;  %v4912_v53 = vmax.f32 %v1702_v5, %v1703_v32  ;;  %v7951_v1 = vld [vmem:[#allocation81_spill] sm:$0xff] }
 0x220   :  { %7938 = vst [vmem:[#allocation129_spill] sm:$0xff] %v4858_v41  ;;  %v4874_v15 = vpop.permute.xlu2 %1423  ;;  %v7948_v41 = vld [vmem:[#allocation71_spill] sm:$0xff]  ;;  %v1001_v49 = vsel %vm7516_vm3, %v7952_v26, %v7951_v1  ;;  %v1002_v46 = vsel %vm7516_vm3, %v7951_v1, %v7952_v26  ;;  %v916_v5 = vadd.f32 %v914_v13, %v891_v6  ;;  %v938_v32 = vmul.f32 %v4266_v8, %v936_v0 }
 0x221   :  { %7943 = vst [vmem:[#allocation73_spill] sm:$0xff] %v4872_v27  ;;  %v952_v27 = vsel %vm7518_vm10, %v7947_v45, %v7948_v41  ;;  %v939_v37 = vmul.f32 %v4269_v57, %v937_v25  ;;  %v990_v26 = vadd.f32 %v988_v10, %v985_v50  ;;  %v991_v16 = vadd.f32 %v989_v17, %v986_v36 }
 0x222   :  { %7944 = vst [vmem:[#allocation66_spill] sm:$0xff] %v4874_v15  ;;  %v951_v15 = vsel %vm7518_vm10, %v7948_v41, %v7947_v45  ;;  %v7950_v45 = vld [vmem:[#allocation80_spill] sm:$0xff]  ;;  %v1010_v25 = vmul.f32 %v4846_v4, %v1002_v46  ;;  %v1011_v58 = vmul.f32 %v4846_v4, %v1001_v49  ;;  %v1028_v36 = vadd.f32 %v1026_v24, %v1023_v47  ;;  %v7957_v24 = vld [vmem:[#allocation87_spill] sm:$0xff] }
 0x223   :  { %v1007_v41 = vsel %vm7516_vm3, %v7950_v45, %v7949_v56  ;;  %v1008_v9 = vsel %vm7516_vm3, %v7949_v56, %v7950_v45  ;;  %v1710_v56 = vrot.slane %v1709_v3, 1  ;;  %v960_v45 = vmul.f32 %v4778_v31, %v952_v27 }
 0x224   :  { %v961_v1 = vmul.f32 %v4778_v31, %v951_v15  ;;  %v1013_v13 = vmul.f32 %v4841_v42, %v1008_v9  ;;  %v1014_v0 = vmul.f32 %v4841_v42, %v1007_v41  ;;  %v1027_v15 = vadd.f32 %v1025_v55, %v1022_v22  ;;  %v7974_v31 = vld [vmem:[#allocation92_spill] sm:$0xff] }
 0x225   :  { %1716 = vrot.lane.b32.xlu1 %v4888_v38, %s3090_s2  ;;  %1714 = vrot.lane.b32.xlu0 %v4896_v63, %s3090_s2  ;;  %v965_v27 = vadd.f32 %v963_v35, %v960_v45  ;;  %v940_v50 = vadd.f32 %v938_v32, %v4837_v61  ;;  %v941_v10 = vadd.f32 %v939_v37, %v916_v5  ;;  %vm7954_vm3 = vcmp.ge.s32.totalorder %v3626_v29, 16  ;;  %v7960_v32 = vld [vmem:[#allocation83_spill] sm:$0xff] }
 0x226   :  { %1720 = vrot.lane.b32.xlu2 %v4912_v53, %s3090_s2  ;;  %v966_v7 = vadd.f32 %v964_v54, %v961_v1  ;;  %v4959_v17 = vmax.f32 %v1709_v3, %v1710_v56  ;;  %v4964_v41 = vsel %vm7954_vm3, 1.0, %v7792_v23  ;;  %v992_v35 = vmul.f32 %v3890_v43, %v990_v26  ;;  %v7958_v3 = vld [vmem:[#allocation75_spill] sm:$0xff] }
 0x227   :  { %v4944_v6 = vpop.permute.xlu1 %1375  ;;  %v4950_v19 = vpop.permute.xlu0 %1373  ;;  %7955 = vst [vmem:[#allocation78_spill] sm:$0xff] %v4964_v41  ;;  %v993_v22 = vmul.f32 %v3893_v21, %v991_v16  ;;  %v4970_v47 = vstv %s4905_s22  ;;  %v1015_v61 = vadd.f32 %v1013_v13, %v1010_v25  ;;  %v1016_v55 = vadd.f32 %v1014_v0, %v1011_v58  ;;  %v7961_v58 = vld [vmem:[#allocation84_spill] sm:$0xff]  ;;  %s5057_s22 = sld [smem:[#allocation3 + $0x4d]] }
 0x228   :  { %v4952_v18 = vpop.permute.xlu2 %1443  ;;  %7956 = vst [vmem:[#allocation74_spill] sm:$0xff] %v4970_v47  ;;  %v1044_v54 = vsel %vm7533_vm6, %v7958_v3, %v7957_v24  ;;  %v4977_v9 = vstv %s4910_s18  ;;  %v967_v49 = vmul.f32 %v3812_v33, %v965_v27  ;;  %v968_v46 = vmul.f32 %v3830_v34, %v966_v7  ;;  %s5066_s18 = sld [smem:[#allocation3 + $0x4f]] }
 0x229   :  { %7953 = vst [vmem:[#allocation77_spill] sm:$0xff] %v4952_v18  ;;  %v1029_v5 = vmul.f32 %v3948_v48, %v1027_v15  ;;  %v1030_v16 = vmul.f32 %v3953_v52, %v1028_v36  ;;  %v1038_v37 = vsel %vm7533_vm6, %v7961_v58, %v7960_v32  ;;  %vm7532_vm3 = vcmp.lt.s32.totalorder %v3626_v29, 126  ;;  %v7965_v15 = vld [vmem:[#allocation89_spill] sm:$0xff]  ;;  %v7966_v36 = vld [vmem:[#allocation90_spill] sm:$0xff] }
 0x22a   :  { %7959 = vst [vmem:[#allocation63_spill] sm:$0xff] %v4977_v9  ;;  %v4991_v56 = vstv %s4930_s16  ;;  %v4994_v45 = vstv %s4936_s19  ;;  %v994_v7 = vadd.f32 %v992_v35, %v967_v49  ;;  %v995_v1 = vadd.f32 %v993_v22, %v968_v46  ;;  %v7970_v49 = vld [vmem:[#allocation79_spill] sm:$0xff]  ;;  %v7971_v46 = vld [vmem:[#allocation86_spill] sm:$0xff]  ;;  %s5075_s16 = sld [smem:[#allocation3 + $0x1e]] }
 0x22b   :  { %7962 = vst [vmem:[#allocation70_spill] sm:$0xff] %v4991_v56  ;;  %v1045_v26 = vsel %vm7533_vm6, %v7957_v24, %v7958_v3  ;;  %v1050_v13 = vmul.f32 %v4977_v9, %v1044_v54  ;;  %v1017_v25 = vmul.f32 %v3877_v20, %v1015_v61  ;;  %v1018_v27 = vmul.f32 %v3885_v40, %v1016_v55  ;;  %v7976_v18 = vld [vmem:[#allocation82_spill] sm:$0xff]  ;;  %s5128_s19 = sld [smem:[#allocation3 + $0x20]] }
 0x22c   :  { %7963 = vst [vmem:[#allocation71_spill] sm:$0xff] %v4994_v45  ;;  %v1069_v35 = vsel %vm7532_vm3, %v7966_v36, %v7965_v15  ;;  %vm7534_vm10 = vcmp.lt.s32.totalorder %v3626_v29, 125  ;;  %v1039_v61 = vsel %vm7533_vm6, %v7960_v32, %v7961_v58  ;;  %v1047_v55 = vmul.f32 %v4970_v47, %v1038_v37 }
 0x22d   :  { %1736 = vrot.lane.b32.xlu1 %v4896_v63, %s3091_s23  ;;  %1722 = vrot.lane.b32.xlu0 %v4959_v17, %s3090_s2  ;;  %s5016_s2 = sld [smem:[#allocation3 + $0x1d]]  ;;  %v1070_v3 = vsel %vm7532_vm3, %v7965_v15, %v7966_v36  ;;  %v5032_v54 = vstv %s4954_s14  ;;  %v1063_v4 = vsel %vm7532_vm3, %v7971_v46, %v7970_v49  ;;  %v1064_v32 = vsel %vm7532_vm3, %v7970_v49, %v7971_v46  ;;  %v7973_v36 = vld [vmem:[#allocation85_spill] sm:$0xff] }
 0x22e   :  { %1738 = vrot.lane.b32.xlu2 %v4888_v38, %s3091_s23  ;;  %7969 = vst [vmem:[#allocation69_spill] sm:$0xff] %v5032_v54  ;;  %v1051_v58 = vmul.f32 %v4977_v9, %v1045_v26  ;;  %v5046_v37 = vstv %s4957_s20  ;;  %v1052_v42 = vadd.f32 %v1050_v13, %v1047_v55  ;;  %v1075_v15 = vmul.f32 %v4994_v45, %v1069_v35  ;;  %s5142_s14 = sld [smem:[#allocation3 + $0x50]] }
 0x22f   :  { %v5007_v0 = vpop.permute.xlu1 %1398  ;;  %v5018_v22 = vpop.permute.xlu0 %1393  ;;  %7972 = vst [vmem:[#allocation87_spill] sm:$0xff] %v5046_v37  ;;  %v1094_v23 = vsel %vm7534_vm10, %v7974_v31, %v7973_v36  ;;  %v1019_v49 = vadd.f32 %v1017_v25, %v994_v7  ;;  %v1020_v46 = vadd.f32 %v1018_v27, %v995_v1  ;;  %v1048_v26 = vmul.f32 %v4970_v47, %v1039_v61  ;;  %s5156_s20 = sld [smem:[#allocation3 + $0x51]] }
 0x230   :  { %7964 = vst [vmem:[#allocation72_spill] sm:$0xff] %v5007_v0  ;;  %v5020_v24 = vpop.permute.xlu2 %1470  ;;  %v1076_v13 = vmul.f32 %v4994_v45, %v1070_v3  ;;  %v5062_v35 = vadd.f32 %v941_v10, %v4627_v60  ;;  %v1072_v55 = vmul.f32 %v4991_v56, %v1063_v4  ;;  %v1073_v9 = vmul.f32 %v4991_v56, %v1064_v32  ;;  %v7993_v45 = vld [vmem:[#allocation102_spill] sm:$0xff]  ;;  %v7994_v56 = vld [vmem:[#allocation115_spill] sm:$0xff] }
 0x231   :  { %7967 = vst [vmem:[#allocation80_spill] sm:$0xff] %v5018_v22  ;;  %v5071_v0 = vmul.f32 %v4964_v41, %v940_v50  ;;  %v1053_v7 = vadd.f32 %v1051_v58, %v1048_v26  ;;  %v1100_v1 = vmul.f32 %v5032_v54, %v1094_v23  ;;  %v1054_v60 = vmul.f32 %v3997_v2, %v1052_v42  ;;  %v7985_v26 = vld [vmem:[#allocation91_spill] sm:$0xff] }
 0x232   :  { %7968 = vst [vmem:[#allocation81_spill] sm:$0xff] %v5020_v24  ;;  %v7975_v24 = vld [vmem:[#allocation93_spill] sm:$0xff]  ;;  %v1077_v4 = vadd.f32 %v1075_v15, %v1072_v55  ;;  %v1095_v23 = vsel %vm7534_vm10, %v7973_v36, %v7974_v31  ;;  %v1031_v27 = vadd.f32 %v1029_v5, %v1019_v49  ;;  %v1078_v61 = vadd.f32 %v1076_v13, %v1073_v9  ;;  %v7986_v55 = vld [vmem:[#allocation108_spill] sm:$0xff] }
 0x233   :  { %v1088_v22 = vsel %vm7534_vm10, %v7976_v18, %v7975_v24  ;;  %7977 = vst [vmem:[#allocation75_spill] sm:$0xff] %v5062_v35  ;;  %v1089_v50 = vsel %vm7534_vm10, %v7975_v24, %v7976_v18  ;;  %vm7551_vm3 = vcmp.lt.s32.totalorder %v3626_v29, 115  ;;  %v5100_v32 = vstv %s5005_s17  ;;  %s5172_s17 = sld [smem:[#allocation3 + $0x52]] }
 0x234   :  { %v1097_v25 = vmul.f32 %v5046_v37, %v1088_v22  ;;  %v5092_v22 = vadd.f32 %v1030_v16, %v1020_v46  ;;  %7981 = vst [vmem:[#allocation90_spill] sm:$0xff] %v5100_v32  ;;  %vm7545_vm6 = vcmp.lt.s32.totalorder %v3626_v29, 114  ;;  %v5104_v31 = vstv %s5016_s2  ;;  %s5188_s2 = sld [smem:[#allocation3 + $0x21]] }
 0x235   :  { %1744 = vrot.lane.b32.xlu1 %v4959_v17, %s3091_s23  ;;  %1742 = vrot.lane.b32.xlu0 %v4912_v53, %s3091_s23  ;;  %7982 = vst [vmem:[#allocation79_spill] sm:$0xff] %v5104_v31  ;;  %v5107_v18 = vstv %s5034_s15  ;;  %s5109_s23 = sld [smem:[#allocation3 + $0x1f]]  ;;  %v1101_v5 = vmul.f32 %v5032_v54, %v1095_v23  ;;  %v1098_v9 = vmul.f32 %v5046_v37, %v1089_v50  ;;  %v5126_v49 = vstv %s5057_s22 }
 0x236   :  { %1758 = vrot.lane.b32.xlu2 %v4896_v63, %s3092_s24  ;;  %7983 = vst [vmem:[#allocation86_spill] sm:$0xff] %v5107_v18  ;;  %v1102_v16 = vadd.f32 %v1100_v1, %v1097_v25  ;;  %v1148_v24 = vsel %vm7545_vm6, %v4031_v62, %v4016_v11  ;;  %v5118_v58 = vmul.f32 %v4027_v14, %v1053_v7  ;;  %v7987_v7 = vld [vmem:[#allocation88_spill] sm:$0xff]  ;;  %vm7557_vm10 = vcmp.lt.s32.totalorder %v3626_v29, 113  ;;  %s5314_s15 = sld [smem:[#allocation3 + $0x53]] }
 0x237   :  { %v5090_v10 = vpop.permute.xlu1 %1418  ;;  %v5095_v42 = vpop.permute.xlu0 %1416  ;;  %v5120_v15 = vadd.f32 %v1054_v60, %v1031_v27  ;;  %v5123_v36 = vmul.f32 %v4076_v59, %v1077_v4  ;;  %7984 = vst [vmem:[#allocation85_spill] sm:$0xff] %v5126_v49  ;;  %v5131_v46 = vmul.f32 %v4079_v51, %v1078_v61  ;;  %v1142_v13 = vsel %vm7545_vm6, %v3934_v28, %v7985_v26  ;;  %v7989_v61 = vld [vmem:[#allocation98_spill] sm:$0xff]  ;;  %s5320_s22 = sld [smem:[#allocation3 + $0x23]] }
 0x238   :  { %7978 = vst [vmem:[#allocation83_spill] sm:$0xff] %v5090_v10  ;;  %v5097_v3 = vpop.permute.xlu2 %1479  ;;  %v1123_v1 = vsel %vm7551_vm3, %v7987_v7, %v7986_v55  ;;  %v1124_v25 = vsel %vm7551_vm3, %v7986_v55, %v7987_v7  ;;  %v1149_v60 = vsel %vm7545_vm6, %v4016_v11, %v4031_v62  ;;  %v1154_v4 = vmul.f32 %v5107_v18, %v1148_v24  ;;  %v7990_v55 = vld [vmem:[#allocation101_spill] sm:$0xff] }
 0x239   :  { %7979 = vst [vmem:[#allocation84_spill] sm:$0xff] %v5095_v42  ;;  %v5154_v23 = vstv %s5066_s18  ;;  %v5160_v50 = vadd.f32 %v1101_v5, %v1098_v9  ;;  %v5163_v27 = vmul.f32 %v4266_v8, %v1102_v16  ;;  %v1117_v7 = vsel %vm7551_vm3, %v7990_v55, %v7989_v61  ;;  %v8016_v42 = vld [vmem:[#allocation126_spill] sm:$0xff]  ;;  %s5327_s18 = sld [smem:[#allocation3 + $0x54]] }
 0x23a   :  { %7980 = vst [vmem:[#allocation89_spill] sm:$0xff] %v5097_v3  ;;  %v5170_v11 = vstv %s5075_s16  ;;  %v1118_v62 = vsel %vm7551_vm3, %v7989_v61, %v7990_v55  ;;  %v1143_v5 = vsel %vm7545_vm6, %v7985_v26, %v3934_v28  ;;  %v1151_v9 = vmul.f32 %v5104_v31, %v1142_v13  ;;  %v7995_v55 = vld [vmem:[#allocation117_spill] sm:$0xff]  ;;  %v7996_v28 = vld [vmem:[#allocation94_spill] sm:$0xff]  ;;  %s5336_s16 = sld [smem:[#allocation3 + $0x55]] }
 0x23b   :  { %7988 = vst [vmem:[#allocation92_spill] sm:$0xff] %v5154_v23  ;;  %v1129_v16 = vmul.f32 %v5126_v49, %v1123_v1  ;;  %v1130_v37 = vmul.f32 %v5126_v49, %v1124_v25  ;;  %v1155_v54 = vmul.f32 %v5107_v18, %v1149_v60  ;;  %v1173_v61 = vsel %vm7557_vm10, %v7994_v56, %v7993_v45 }
 0x23c   :  { %7991 = vst [vmem:[#allocation93_spill] sm:$0xff] %v5170_v11  ;;  %v1167_v26 = vsel %vm7557_vm10, %v7996_v28, %v7995_v55  ;;  %v1126_v25 = vmul.f32 %v5100_v32, %v1117_v7  ;;  %v1156_v49 = vadd.f32 %v1154_v4, %v1151_v9  ;;  %vm7578_vm6 = vcmp.lt.s32.totalorder %v3626_v29, 112 }
 0x23d   :  { %1764 = vrot.lane.b32.xlu1 %v4912_v53, %s3092_s24  ;;  %1760 = vrot.lane.b32.xlu0 %v4888_v38, %s3092_s24  ;;  %v5209_v60 = vstv %s5109_s23  ;;  %v1127_v18 = vmul.f32 %v5100_v32, %v1118_v62  ;;  %v1152_v47 = vmul.f32 %v5104_v31, %v1143_v5  ;;  %v1174_v41 = vsel %vm7557_vm10, %v7993_v45, %v7994_v56  ;;  %v8002_v32 = vld [vmem:[#allocation16_spill] sm:$0xff]  ;;  %s5363_s23 = sld [smem:[#allocation3 + $0x25]] }
 0x23e   :  { %1766 = vrot.lane.b32.xlu2 %v4959_v17, %s3092_s24  ;;  %7999 = vst [vmem:[#allocation88_spill] sm:$0xff] %v5209_v60  ;;  %vm7577_vm3 = vcmp.lt.s32.totalorder %v3626_v29, 111  ;;  %v1179_v35 = vmul.f32 %v5154_v23, %v1173_v61  ;;  %v1168_v4 = vsel %vm7557_vm10, %v7995_v55, %v7996_v28  ;;  %v1176_v7 = vmul.f32 %v5170_v11, %v1167_v26  ;;  %s5310_s24 = sld [smem:[#allocation3 + $0x22]] }
 0x23f   :  { %v5190_v24 = vpop.permute.xlu1 %1441  ;;  %v5202_v13 = vpop.permute.xlu0 %1425  ;;  %v5225_v62 = vstv %s5128_s19  ;;  %v1131_v5 = vadd.f32 %v1129_v16, %v1126_v25  ;;  %v1132_v9 = vadd.f32 %v1130_v37, %v1127_v18  ;;  %v1157_v31 = vadd.f32 %v1155_v54, %v1152_v47  ;;  %v8004_v54 = vld [vmem:[#allocation123_spill] sm:$0xff]  ;;  %v8005_v37 = vld [vmem:[#allocation125_spill] sm:$0xff]  ;;  %s5377_s19 = sld [smem:[#allocation3 + $0x56]] }
 0x240   :  { %7992 = vst [vmem:[#allocation82_spill] sm:$0xff] %v5190_v24  ;;  %v5204_v1 = vpop.permute.xlu2 %1502  ;;  %v5228_v56 = vstv %s5142_s14  ;;  %v1158_v45 = vmul.f32 %v3890_v43, %v1156_v49  ;;  %v1180_v61 = vmul.f32 %v5154_v23, %v1174_v41  ;;  %v1177_v47 = vmul.f32 %v5170_v11, %v1168_v4  ;;  %v8014_v24 = vld [vmem:[#allocation112_spill] sm:$0xff]  ;;  %s5401_s14 = sld [smem:[#allocation3 + $0x57]] }
 0x241   :  { %7997 = vst [vmem:[#allocation91_spill] sm:$0xff] %v5202_v13  ;;  %v1192_v41 = vsel %vm7578_vm6, %v8005_v37, %v8004_v54  ;;  %v1193_v18 = vsel %vm7578_vm6, %v8004_v54, %v8005_v37  ;;  %v5252_v49 = vstv %s5156_s20  ;;  %vm7576_vm10 = vcmp.lt.s32.totalorder %v3626_v29, 110  ;;  %v8010_v54 = vld [vmem:[#allocation29_spill] sm:$0xff]  ;;  %v8011_v37 = vld [vmem:[#allocation28_spill] sm:$0xff]  ;;  %s5492_s20 = sld [smem:[#allocation3 + $0x58]] }
 0x242   :  { %7998 = vst [vmem:[#allocation108_spill] sm:$0xff] %v5204_v1  ;;  %v8003_v1 = vld [vmem:[#allocation109_spill] sm:$0xff]  ;;  %v5260_v28 = vstv %s5172_s17  ;;  %v5263_v26 = vstv %s5188_s2  ;;  %v1223_v11 = vsel %vm7577_vm3, %v8011_v37, %v8010_v54  ;;  %v1201_v3 = vmul.f32 %v5209_v60, %v1192_v41  ;;  %s5533_s17 = sld [smem:[#allocation3 + $0x59]] }
 0x243   :  { %8000 = vst [vmem:[#allocation98_spill] sm:$0xff] %v5225_v62  ;;  %v1198_v55 = vsel %vm7578_vm6, %v8003_v1, %v8002_v32  ;;  %v1199_v16 = vsel %vm7578_vm6, %v8002_v32, %v8003_v1  ;;  %v1181_v32 = vadd.f32 %v1179_v35, %v1176_v7  ;;  %v1224_v35 = vsel %vm7577_vm3, %v8010_v54, %v8011_v37  ;;  %s5545_s2 = sld [smem:[#allocation3 + $0x28]] }
 0x244   :  { %8001 = vst [vmem:[#allocation101_spill] sm:$0xff] %v5228_v56  ;;  %v1204_v25 = vmul.f32 %v5228_v56, %v1198_v55  ;;  %v1205_v4 = vmul.f32 %v5228_v56, %v1199_v16  ;;  %v1202_v55 = vmul.f32 %v5209_v60, %v1193_v18  ;;  %v8015_v16 = vld [vmem:[#allocation19_spill] sm:$0xff]  ;;  %v1248_v54 = vsel %vm7576_vm10, %v4451_v30, %v8016_v42  ;;  %v8017_v18 = vld [vmem:[#allocation118_spill] sm:$0xff] }
 0x245   :  { %1782 = vrot.lane.b32.xlu1 %v4888_v38, %s3089_s0  ;;  %8006 = vst [vmem:[#allocation102_spill] sm:$0xff] %v5252_v49  ;;  %1780 = vrot.lane.b32.xlu0 %v4896_v63, %s3089_s0  ;;  %v1217_v56 = vsel %vm7577_vm3, %v8015_v16, %v8014_v24  ;;  %v1249_v41 = vsel %vm7576_vm10, %v8016_v42, %v4451_v30  ;;  %vm7580_vm6 = vcmp.lt.s32.totalorder %v3626_v29, 98 }
 0x246   :  { %1786 = vrot.lane.b32.xlu2 %v4912_v53, %s3089_s0  ;;  %8007 = vst [vmem:[#allocation115_spill] sm:$0xff] %v5260_v28  ;;  %v1242_v37 = vsel %vm7576_vm10, %v8017_v18, %v4458_v12  ;;  %v1182_v60 = vadd.f32 %v1180_v61, %v1177_v47  ;;  %v1226_v30 = vmul.f32 %v5225_v62, %v1217_v56 }
 0x247   :  { %8008 = vst [vmem:[#allocation117_spill] sm:$0xff] %v5263_v26  ;;  %v5265_v1 = vpop.permute.xlu1 %1450  ;;  %v5277_v7 = vpop.permute.xlu0 %1448  ;;  %v1206_v10 = vadd.f32 %v1204_v25, %v1201_v3  ;;  %v1207_v13 = vadd.f32 %v1205_v4, %v1202_v55  ;;  %v1254_v43 = vmul.f32 %v5260_v28, %v1248_v54  ;;  %v1133_v56 = vmul.f32 %v3812_v33, %v1131_v5 }
 0x248   :  { %8009 = vst [vmem:[#allocation94_spill] sm:$0xff] %v5265_v1  ;;  %v5279_v23 = vpop.permute.xlu2 %1522  ;;  %v1218_v1 = vsel %vm7577_vm3, %v8014_v24, %v8015_v16  ;;  %v1243_v24 = vsel %vm7576_vm10, %v4458_v12, %v8017_v18  ;;  %v1159_v16 = vmul.f32 %v3893_v21, %v1157_v31  ;;  %v1255_v12 = vmul.f32 %v5260_v28, %v1249_v41 }
 0x249   :  { %8012 = vst [vmem:[#allocation16_spill] sm:$0xff] %v5277_v7  ;;  %v1230_v7 = vmul.f32 %v5252_v49, %v1224_v35  ;;  %v1227_v42 = vmul.f32 %v5225_v62, %v1218_v1  ;;  %v1251_v31 = vmul.f32 %v5263_v26, %v1242_v37  ;;  %v1134_v3 = vmul.f32 %v3830_v34, %v1132_v9 }
 0x24a   :  { %8013 = vst [vmem:[#allocation109_spill] sm:$0xff] %v5279_v23  ;;  %v1229_v23 = vmul.f32 %v5252_v49, %v1223_v11  ;;  %v1252_v11 = vmul.f32 %v5263_v26, %v1243_v24  ;;  %v1183_v61 = vmul.f32 %v3877_v20, %v1181_v32  ;;  %v1057_v47 = vadd.f32 %v5118_v58, %v5092_v22  ;;  %v8046_v49 = vld [vmem:[#allocation129_spill] sm:$0xff] }
 0x24b   :  { %v1184_v1 = vmul.f32 %v3885_v40, %v1182_v60  ;;  %v1232_v4 = vadd.f32 %v1230_v7, %v1227_v42  ;;  %v1081_v9 = vadd.f32 %v5123_v36, %v5120_v15  ;;  %v1105_v32 = vmul.f32 %v4269_v57, %v5160_v50  ;;  %v8024_v42 = vld [vmem:[#allocation38_spill] sm:$0xff] }
 0x24c   :  { %v1231_v25 = vadd.f32 %v1229_v23, %v1226_v30  ;;  %v1160_v35 = vadd.f32 %v1158_v45, %v1133_v56  ;;  %v1161_v55 = vadd.f32 %v1159_v16, %v1134_v3  ;;  %v1208_v58 = vmul.f32 %v3948_v48, %v1206_v10  ;;  %v8023_v30 = vld [vmem:[#allocation32_spill] sm:$0xff] }
 0x24d   :  { %1802 = vrot.lane.b32.xlu1 %v4896_v63, %s3093_s25  ;;  %1788 = vrot.lane.b32.xlu0 %v4959_v17, %s3089_s0  ;;  %s5344_s0 = sld [smem:[#allocation3 + $0x24]]  ;;  %v1209_v23 = vmul.f32 %v3953_v52, %v1207_v13  ;;  %v1256_v60 = vadd.f32 %v1254_v43, %v1251_v31  ;;  %v1257_v7 = vadd.f32 %v1255_v12, %v1252_v11  ;;  %vm7579_vm10 = vcmp.lt.s32.totalorder %v3626_v29, 109 }
 0x24e   :  { %1804 = vrot.lane.b32.xlu2 %v4888_v38, %s3093_s25  ;;  %v1082_v15 = vadd.f32 %v5131_v46, %v1057_v47  ;;  %v5354_v36 = vadd.f32 %v5163_v27, %v1081_v9  ;;  %v1185_v50 = vadd.f32 %v1183_v61, %v1160_v35  ;;  %v5358_v45 = vadd.f32 %v5071_v0, %v4656_v39  ;;  %v8021_v27 = vld [vmem:[#allocation15_spill] sm:$0xff] }
 0x24f   :  { %v5338_v5 = vpop.permute.xlu1 %1477  ;;  %v5346_v54 = vpop.permute.xlu0 %1472  ;;  %v1186_v41 = vadd.f32 %v1184_v1, %v1161_v55  ;;  %v1233_v18 = vmul.f32 %v3997_v2, %v1231_v25  ;;  %v1234_v10 = vmul.f32 %v4027_v14, %v1232_v4  ;;  %v5368_v46 = vstv %s5310_s24  ;;  %s5551_s24 = sld [smem:[#allocation3 + $0x29]] }
 0x250   :  { %v5348_v22 = vpop.permute.xlu2 %1545  ;;  %8018 = vst [vmem:[#allocation123_spill] sm:$0xff] %v5354_v36  ;;  %v5365_v43 = vadd.f32 %v1105_v32, %v1082_v15  ;;  %v1273_v39 = vsel %vm7579_vm10, %v8021_v27, %v4604_v44  ;;  %v5375_v0 = vstv %s5314_s15  ;;  %v1210_v13 = vadd.f32 %v1208_v58, %v1185_v50  ;;  %v8031_v50 = vld [vmem:[#allocation35_spill] sm:$0xff]  ;;  %s5561_s15 = sld [smem:[#allocation3 + $0x5a]] }
 0x251   :  { %8020 = vst [vmem:[#allocation29_spill] sm:$0xff] %v5368_v46  ;;  %v1211_v37 = vadd.f32 %v1209_v23, %v1186_v41  ;;  %v1258_v24 = vmul.f32 %v4076_v59, %v1256_v60  ;;  %v1259_v16 = vmul.f32 %v4079_v51, %v1257_v7  ;;  %v1267_v12 = vsel %vm7579_vm10, %v8024_v42, %v8023_v30  ;;  %v8029_v23 = vld [vmem:[#allocation50_spill] sm:$0xff]  ;;  %v8030_v60 = vld [vmem:[#allocation47_spill] sm:$0xff] }
 0x252   :  { %8019 = vst [vmem:[#allocation125_spill] sm:$0xff] %v5365_v43  ;;  %vm7608_vm3 = vcmp.lt.s32.totalorder %v3626_v29, 99  ;;  %v5389_v31 = vstv %s5320_s22  ;;  %v1235_v11 = vadd.f32 %v1233_v18, %v1210_v13  ;;  %v1274_v3 = vsel %vm7579_vm10, %v4604_v44, %v8021_v27  ;;  %v8032_v41 = vld [vmem:[#allocation55_spill] sm:$0xff]  ;;  %v8034_v27 = vld [vmem:[#allocation21_spill] sm:$0xff]  ;;  %s5590_s22 = sld [smem:[#allocation3 + $0x5b]] }
 0x253   :  { %8022 = vst [vmem:[#allocation28_spill] sm:$0xff] %v5375_v0  ;;  %v1236_v56 = vadd.f32 %v1234_v10, %v1211_v37  ;;  %v1279_v61 = vmul.f32 %v5375_v0, %v1273_v39  ;;  %v1268_v1 = vsel %vm7579_vm10, %v8023_v30, %v8024_v42  ;;  %v5410_v25 = vstv %s5327_s18  ;;  %v8033_v10 = vld [vmem:[#allocation48_spill] sm:$0xff]  ;;  %v8035_v37 = vld [vmem:[#allocation25_spill] sm:$0xff]  ;;  %s5597_s18 = sld [smem:[#allocation3 + $0x2a]] }
 0x254   :  { %8025 = vst [vmem:[#allocation112_spill] sm:$0xff] %v5389_v31  ;;  %v5413_v4 = vstv %s5336_s16  ;;  %v5416_v9 = vstv %s5344_s0  ;;  %v1260_v35 = vadd.f32 %v1258_v24, %v1235_v11  ;;  %v1276_v58 = vmul.f32 %v5368_v46, %v1267_v12  ;;  %v8036_v24 = vld [vmem:[#allocation43_spill] sm:$0xff]  ;;  %s5658_s16 = sld [smem:[#allocation3 + $0x2c]] }
 0x255   :  { %1810 = vrot.lane.b32.xlu1 %v4959_v17, %s3093_s25  ;;  %1808 = vrot.lane.b32.xlu0 %v4912_v53, %s3093_s25  ;;  %8026 = vst [vmem:[#allocation19_spill] sm:$0xff] %v5410_v25  ;;  %v5422_v55 = vadd.f32 %v1259_v16, %v1236_v56  ;;  %v1302_v7 = vsel %vm7608_vm3, %v8030_v60, %v8029_v23  ;;  %s5429_s25 = sld [smem:[#allocation3 + $0x26]]  ;;  %vm7599_vm10 = vcmp.lt.s32.totalorder %v3626_v29, 97  ;;  %v5447_v42 = vstv %s5363_s23 }
 0x256   :  { %1824 = vrot.lane.b32.xlu2 %v4896_v63, %s3094_s26  ;;  %8027 = vst [vmem:[#allocation126_spill] sm:$0xff] %v5413_v4  ;;  %v1280_v15 = vmul.f32 %v5375_v0, %v1274_v3  ;;  %v1327_v18 = vsel %vm7580_vm6, %v8032_v41, %v8031_v50  ;;  %v1321_v39 = vsel %vm7580_vm6, %v8034_v27, %v8033_v10  ;;  %v5459_v3 = vstv %s5377_s19  ;;  %s5670_s0 = sld [smem:[#allocation3 + $0x5c]] }
 0x257   :  { %v5403_v47 = vpop.permute.xlu1 %1497  ;;  %8028 = vst [vmem:[#allocation118_spill] sm:$0xff] %v5416_v9  ;;  %v5418_v32 = vpop.permute.xlu0 %1495  ;;  %v1277_v13 = vmul.f32 %v5368_v46, %v1268_v1  ;;  %v1296_v16 = vsel %vm7608_vm3, %v8036_v24, %v8035_v37  ;;  %v1281_v30 = vadd.f32 %v1279_v61, %v1276_v58  ;;  %v1297_v12 = vsel %vm7608_vm3, %v8035_v37, %v8036_v24  ;;  %v8039_v37 = vld [vmem:[#allocation73_spill] sm:$0xff]  ;;  %v8040_v24 = vld [vmem:[#allocation44_spill] sm:$0xff]  ;;  %s5682_s23 = sld [smem:[#allocation3 + $0x5d]] }
 0x258   :  { %v5420_v44 = vpop.permute.xlu2 %1554  ;;  %8037 = vst [vmem:[#allocation15_spill] sm:$0xff] %v5447_v42  ;;  %v1308_v11 = vmul.f32 %v5410_v25, %v1302_v7  ;;  %v1328_v56 = vsel %vm7580_vm6, %v8031_v50, %v8032_v41  ;;  %v1333_v1 = vmul.f32 %v5413_v4, %v1327_v18  ;;  %v1322_v61 = vsel %vm7580_vm6, %v8033_v10, %v8034_v27  ;;  %s5691_s19 = sld [smem:[#allocation3 + $0x5e]] }
 0x259   :  { %8038 = vst [vmem:[#allocation32_spill] sm:$0xff] %v5459_v3  ;;  %v1330_v58 = vmul.f32 %v5416_v9, %v1321_v39  ;;  %v1352_v7 = vsel %vm7599_vm10, %v8040_v24, %v8039_v37  ;;  %v1305_v50 = vmul.f32 %v5389_v31, %v1296_v16  ;;  %v1282_v41 = vadd.f32 %v1280_v15, %v1277_v13  ;;  %v8041_v39 = vld [vmem:[#allocation58_spill] sm:$0xff]  ;;  %v8042_v15 = vld [vmem:[#allocation65_spill] sm:$0xff] }
 0x25a   :  { %v1303_v18 = vsel %vm7608_vm3, %v8029_v23, %v8030_v60  ;;  %vm7600_vm6 = vcmp.lt.s32.totalorder %v3626_v29, 96  ;;  %v1283_v10 = vmul.f32 %v4266_v8, %v1281_v30  ;;  %v1334_v27 = vmul.f32 %v5413_v4, %v1328_v56 }
 0x25b   :  { %v1346_v13 = vsel %vm7599_vm10, %v8042_v15, %v8041_v39  ;;  %v5490_v16 = vstv %s5401_s14  ;;  %v1331_v60 = vmul.f32 %v5416_v9, %v1322_v61  ;;  %v1353_v30 = vsel %vm7599_vm10, %v8039_v37, %v8040_v24  ;;  %s5702_s14 = sld [smem:[#allocation3 + $0x2d]] }
 0x25c   :  { %8043 = vst [vmem:[#allocation38_spill] sm:$0xff] %v5490_v16  ;;  %v1358_v56 = vmul.f32 %v5459_v3, %v1352_v7  ;;  %v1377_v4 = vsel %vm7600_vm6, %v4950_v19, %v4944_v6  ;;  %v1309_v61 = vmul.f32 %v5410_v25, %v1303_v18  ;;  %v1310_v9 = vadd.f32 %v1308_v11, %v1305_v50  ;;  %v8045_v7 = vld [vmem:[#allocation46_spill] sm:$0xff] }
 0x25d   :  { %1830 = vrot.lane.b32.xlu1 %v4912_v53, %s3094_s26  ;;  %1826 = vrot.lane.b32.xlu0 %v4888_v38, %s3094_s26  ;;  %v1335_v26 = vadd.f32 %v1333_v1, %v1330_v58  ;;  %v5514_v28 = vstv %s5429_s25  ;;  %v1347_v37 = vsel %vm7599_vm10, %v8041_v39, %v8042_v15  ;;  %v1355_v24 = vmul.f32 %v5447_v42, %v1346_v13  ;;  %s5777_s25 = sld [smem:[#allocation3 + $0x2e]] }
 0x25e   :  { %1832 = vrot.lane.b32.xlu2 %v4959_v17, %s3094_s26  ;;  %s5506_s26 = sld [smem:[#allocation3 + $0x27]]  ;;  %8044 = vst [vmem:[#allocation50_spill] sm:$0xff] %v5514_v28  ;;  %v1371_v62 = vsel %vm7600_vm6, %v8046_v49, %v8045_v7  ;;  %v1378_v11 = vsel %vm7600_vm6, %v4944_v6, %v4950_v19  ;;  %v1306_v1 = vmul.f32 %v5389_v31, %v1297_v12  ;;  %vm7601_vm10 = vcmp.lt.s32.totalorder %v3626_v29, 95 }
 0x25f   :  { %v5494_v23 = vpop.permute.xlu1 %1520  ;;  %v5508_v0 = vpop.permute.xlu0 %1504  ;;  %v1284_v58 = vmul.f32 %v4269_v57, %v1282_v41  ;;  %v1359_v50 = vmul.f32 %v5459_v3, %v1353_v30  ;;  %v1383_v18 = vmul.f32 %v5490_v16, %v1377_v4  ;;  %v5535_v39 = vadd.f32 %v1283_v10, %v1260_v35 }
 0x260   :  { %v5510_v46 = vpop.permute.xlu2 %1577  ;;  %v1336_v15 = vadd.f32 %v1334_v27, %v1331_v60  ;;  %v1372_v13 = vsel %vm7600_vm6, %v8045_v7, %v8046_v49  ;;  %v1360_v25 = vadd.f32 %v1358_v56, %v1355_v24  ;;  %v1356_v19 = vmul.f32 %v5447_v42, %v1347_v37  ;;  %v8048_v49 = vld [vmem:[#allocation106_spill] sm:$0xff]  ;;  %v8050_v56 = vld [vmem:[#allocation64_spill] sm:$0xff] }
 0x261   :  { %8047 = vst [vmem:[#allocation47_spill] sm:$0xff] %v5535_v39  ;;  %v1380_v6 = vmul.f32 %v5514_v28, %v1371_v62  ;;  %v1384_v12 = vmul.f32 %v5490_v16, %v1378_v11  ;;  %v1311_v4 = vadd.f32 %v1309_v61, %v1306_v1  ;;  %v1312_v35 = vmul.f32 %v3812_v33, %v1310_v9  ;;  %v8051_v61 = vld [vmem:[#allocation72_spill] sm:$0xff] }
 0x262   :  { %v1337_v41 = vmul.f32 %v8048_v49, %v1335_v26  ;;  %v1381_v62 = vmul.f32 %v5514_v28, %v1372_v13  ;;  %v1361_v10 = vadd.f32 %v1359_v50, %v1356_v19  ;;  %v5559_v60 = vstv %s5492_s20  ;;  %s5792_s20 = sld [smem:[#allocation3 + $0x2f]] }
 0x263   :  { %v1385_v27 = vadd.f32 %v1383_v18, %v1380_v6  ;;  %8049 = vst [vmem:[#allocation35_spill] sm:$0xff] %v5559_v60  ;;  %v1338_v26 = vmul.f32 %v3893_v21, %v1336_v15  ;;  %v1362_v9 = vmul.f32 %v3877_v20, %v1360_v25  ;;  %v1402_v37 = vsel %vm7601_vm10, %v8051_v61, %v8050_v56  ;;  %v8053_v18 = vld [vmem:[#allocation80_spill] sm:$0xff]  ;;  %v8054_v25 = vld [vmem:[#allocation45_spill] sm:$0xff] }
 0x264   :  { %v5572_v24 = vstv %s5506_s26  ;;  %v1386_v1 = vadd.f32 %v1384_v12, %v1381_v62  ;;  %v1403_v50 = vsel %vm7601_vm10, %v8050_v56, %v8051_v61  ;;  %v1396_v15 = vsel %vm7601_vm10, %v8054_v25, %v8053_v18  ;;  %s5805_s26 = sld [smem:[#allocation3 + $0x60]] }
 0x265   :  { %1848 = vrot.lane.b32.xlu1 %v4888_v38, %s3095_s27  ;;  %1846 = vrot.lane.b32.xlu0 %v4896_v63, %s3095_s27  ;;  %8052 = vst [vmem:[#allocation55_spill] sm:$0xff] %v5572_v24  ;;  %v1397_v13 = vsel %vm7601_vm10, %v8053_v18, %v8054_v25  ;;  %v5593_v19 = vadd.f32 %v1284_v58, %v5422_v55  ;;  %vm7618_vm6 = vcmp.lt.s32.totalorder %v3626_v29, 94  ;;  %v5603_v18 = vstv %s5533_s17  ;;  %v8057_v25 = vld [vmem:[#allocation76_spill] sm:$0xff]  ;;  %s5891_s17 = sld [smem:[#allocation3 + $0x30]] }
 0x266   :  { %1852 = vrot.lane.b32.xlu2 %v4912_v53, %s3095_s27  ;;  %v1313_v6 = vmul.f32 %v3830_v34, %v1311_v4  ;;  %v1339_v12 = vadd.f32 %v1337_v41, %v1312_v35  ;;  %v1363_v62 = vmul.f32 %v3885_v40, %v1361_v10  ;;  %v1387_v56 = vmul.f32 %v3948_v48, %v1385_v27  ;;  %v8058_v35 = vld [vmem:[#allocation91_spill] sm:$0xff]  ;;  %v8059_v41 = vld [vmem:[#allocation66_spill] sm:$0xff] }
 0x267   :  { %v5563_v30 = vpop.permute.xlu1 %1529  ;;  %v5574_v7 = vpop.permute.xlu0 %1527  ;;  %8055 = vst [vmem:[#allocation48_spill] sm:$0xff] %v5593_v19  ;;  %v1408_v61 = vmul.f32 %v5559_v60, %v1402_v37  ;;  %vm305_vm10 = vcmp.lt.s32.totalorder %v8057_v25, 240  ;;  %v1409_v55 = vmul.f32 %v5559_v60, %v1403_v50  ;;  %v1405_v58 = vmul.f32 %v5572_v24, %v1396_v15  ;;  %v8061_v50 = vld [vmem:[#allocation83_spill] sm:$0xff]  ;;  %v8062_v60 = vld [vmem:[#allocation84_spill] sm:$0xff] }
 0x268   :  { %v5576_v11 = vpop.permute.xlu2 %1597  ;;  %8056 = vst [vmem:[#allocation21_spill] sm:$0xff] %v5603_v18  ;;  %v1406_v4 = vmul.f32 %v5572_v24, %v1397_v13  ;;  %v1427_v10 = vsel %vm7618_vm6, %v8059_v41, %v8058_v35  ;;  %v1340_v16 = vadd.f32 %v1338_v26, %v1313_v6  ;;  %v1364_v27 = vadd.f32 %v1362_v9, %v1339_v12 }
 0x269   :  { %v1388_v37 = vmul.f32 %v3953_v52, %v1386_v1  ;;  %v5615_v28 = vstv %s5545_s2  ;;  %v1421_v15 = vsel %vm7618_vm6, %v8062_v60, %v8061_v50  ;;  %vm7626_vm3 = vcmp.lt.s32.totalorder %v3626_v29, 93 }
 0x26a   :  { %8060 = vst [vmem:[#allocation25_spill] sm:$0xff] %v5615_v28  ;;  %v5625_v13 = vstv %s5551_s24  ;;  %v1428_v26 = vsel %vm7618_vm6, %v8058_v35, %v8059_v41  ;;  %v1365_v9 = vadd.f32 %v1363_v62, %v1340_v16  ;;  %v1389_v1 = vadd.f32 %v1387_v56, %v1364_v27  ;;  %s8179_s24 = smov 113  }
 0x26b   :  { %8063 = vst [vmem:[#allocation43_spill] sm:$0xff] %v5625_v13  ;;  %v1433_v6 = vmul.f32 %v5603_v18, %v1427_v10  ;;  %v5637_v12 = vstv %s5561_s15  ;;  %v1410_v3 = vadd.f32 %v1408_v61, %v1405_v58  ;;  %v1411_v42 = vadd.f32 %v1409_v55, %v1406_v4  ;;  %v8065_v61 = vld [vmem:[#allocation16_spill] sm:$0xff]  ;;  %v8066_v55 = vld [vmem:[#allocation94_spill] sm:$0xff]  ;;  %v8068_v4 = vld [vmem:[#allocation77_spill] sm:$0xff]  ;;  %s8219_s15 = smov 112  }
 0x26c   :  { %8064 = vst [vmem:[#allocation73_spill] sm:$0xff] %v5637_v12  ;;  %v1422_v35 = vsel %vm7618_vm6, %v8061_v50, %v8062_v60  ;;  %v1390_v56 = vadd.f32 %v1388_v37, %v1365_v9  ;;  %v1430_v41 = vmul.f32 %v5615_v28, %v1421_v15  ;;  %v1434_v10 = vmul.f32 %v5603_v18, %v1428_v26  ;;  %v8067_v60 = vld [vmem:[#allocation82_spill] sm:$0xff]  ;;  %v8071_v26 = vld [vmem:[#allocation89_spill] sm:$0xff] }
 0x26d   :  { %1872 = vrot.lane.b32.xlu1 %v4896_v63, %s3096_s28  ;;  %1854 = vrot.lane.b32.xlu0 %v4959_v17, %s3095_s27  ;;  %s5646_s27 = sld [smem:[#allocation3 + $0x2b]]  ;;  %v1453_v58 = vsel %vm7626_vm3, %v8066_v55, %v8065_v61  ;;  %v1447_v27 = vsel %vm7626_vm3, %v8068_v4, %v8067_v60  ;;  %v5665_v50 = vstv %s5590_s22  ;;  %v5668_v31 = vstv %s5597_s18  ;;  %v8072_v18 = vld [vmem:[#allocation81_spill] sm:$0xff]  ;;  %s8227_s22 = smov 111  }
 0x26e   :  { %1874 = vrot.lane.b32.xlu2 %v4888_v38, %s3096_s28  ;;  %8069 = vst [vmem:[#allocation44_spill] sm:$0xff] %v5665_v50  ;;  %vm325_vm6 = vcmp.lt.s32.totalorder %v8057_v25, 224  ;;  %v1431_v37 = vmul.f32 %v5615_v28, %v1422_v35  ;;  %v1435_v15 = vadd.f32 %v1433_v6, %v1430_v41  ;;  %v1481_v9 = vsel %vm7623_vm4, %v5338_v5, %v8071_v26  ;;  %s8235_s18 = smov 110  }
 0x26f   :  { %v5639_v24 = vpop.permute.xlu1 %1552  ;;  %v5648_v16 = vpop.permute.xlu0 %1547  ;;  %8070 = vst [vmem:[#allocation58_spill] sm:$0xff] %v5668_v31  ;;  %v1475_v39 = vsel %vm7623_vm4, %v8072_v18, %v5346_v54  ;;  %v1412_v43 = vmul.f32 %v3997_v2, %v1410_v3  ;;  %v1413_v19 = vmul.f32 %v4027_v14, %v1411_v42  ;;  %v1452_v6 = vsel %vm7626_vm3, %v8065_v61, %v8066_v55 }
 0x270   :  { %v5650_v62 = vpop.permute.xlu2 %1620  ;;  %v1459_v35 = vmul.f32 %v5637_v12, %v1453_v58  ;;  %v1446_v41 = vsel %vm7626_vm3, %v8067_v60, %v8068_v4  ;;  %v1456_v28 = vmul.f32 %v5625_v13, %v1447_v27  ;;  %v1436_v36 = vadd.f32 %v1434_v10, %v1431_v37 }
 0x271   :  { %v1482_v42 = vsel %vm7623_vm4, %v8071_v26, %v5338_v5  ;;  %v1487_v3 = vmul.f32 %v5665_v50, %v1481_v9  ;;  %v1476_v61 = vsel %vm7623_vm4, %v5346_v54, %v8072_v18  ;;  %v1484_v10 = vmul.f32 %v5668_v31, %v1475_v39 }
 0x272   :  { %v8073_v5 = vmov 0.0   ;;  %v1437_v58 = vmul.f32 %v4076_v59, %v1435_v15  ;;  %v1458_v60 = vmul.f32 %v5637_v12, %v1452_v6  ;;  %vm1499_vm4 = vcmp.lt.s32.totalorder %v3626_v29, 82 }
 0x273   :  { %v5719_v55 = vsel %vm305_vm10, 1.0, %v8073_v5  ;;  %v5729_v39 = vsel %vm325_vm6, 1.0, %v8073_v5  ;;  %v1414_v18 = vadd.f32 %v1412_v43, %v1389_v1  ;;  %v5731_v4 = vadd.f32 %v1413_v19, %v1390_v56 }
 0x274   :  { %8074 = vst [vmem:[#allocation65_spill] sm:$0xff] %v5719_v55  ;;  %v1461_v27 = vadd.f32 %v1459_v35, %v1456_v28  ;;  %v5734_v37 = vstv %s5646_s27  ;;  %v1455_v9 = vmul.f32 %v5625_v13, %v1446_v41  ;;  %v1488_v6 = vmul.f32 %v5665_v50, %v1482_v42  ;;  %v8079_v41 = vld [vmem:[#allocation108_spill] sm:$0xff]  ;;  %s8246_s27 = smov 109  }
 0x275   :  { %1880 = vrot.lane.b32.xlu1 %v4959_v17, %s3096_s28  ;;  %1878 = vrot.lane.b32.xlu0 %v4912_v53, %s3096_s28  ;;  %8075 = vst [vmem:[#allocation46_spill] sm:$0xff] %v5729_v39  ;;  %v1485_v12 = vmul.f32 %v5668_v31, %v1476_v61  ;;  %vm7633_vm10 = vcmp.lt.s32.totalorder %v3626_v29, 81  ;;  %v5745_v43 = vmul.f32 %v4079_v51, %v1436_v36  ;;  %v5748_v28 = vstv %s5658_s16  ;;  %s5764_s28 = sld [smem:[#allocation3 + $0x5f]]  ;;  %s8251_s16 = smov 99  }
 0x276   :  { %1894 = vrot.lane.b32.xlu2 %v4896_v63, %s3097_s29  ;;  %8076 = vst [vmem:[#allocation129_spill] sm:$0xff] %v5734_v37  ;;  %v1489_v19 = vadd.f32 %v1487_v3, %v1484_v10  ;;  %v5751_v1 = vstv %s5670_s0  ;;  %v5753_v56 = vadd.f32 %v1437_v58, %v1414_v18  ;;  %v5755_v35 = vadd.f32 %v1458_v60, %v1455_v9  ;;  %s8258_s0 = smov 98  }
 0x277   :  { %v5724_v54 = vpop.permute.xlu1 %1572  ;;  %v5736_v15 = vpop.permute.xlu0 %1570  ;;  %8077 = vst [vmem:[#allocation106_spill] sm:$0xff] %v5748_v28  ;;  %v1506_v42 = vsel %vm1499_vm4, %v8079_v41, %v5508_v0  ;;  %v5762_v61 = vstv %s5682_s23  ;;  %v5767_v36 = vmul.f32 %v4269_v57, %v1461_v27  ;;  %v1507_v3 = vsel %vm1499_vm4, %v5508_v0, %v8079_v41  ;;  %s8269_s23 = smov 97  }
 0x278   :  { %v5738_v26 = vpop.permute.xlu2 %1629  ;;  %8078 = vst [vmem:[#allocation64_spill] sm:$0xff] %v5751_v1  ;;  %vm1549_vm6 = vcmp.lt.s32.totalorder %v3626_v29, 80  ;;  %v5775_v10 = vstv %s5691_s19  ;;  %v1490_v58 = vadd.f32 %v1488_v6, %v1485_v12  ;;  %v1500_v60 = vsel %vm1499_vm4, %v5418_v32, %v5403_v47  ;;  %v8083_v6 = vld [vmem:[#allocation109_spill] sm:$0xff]  ;;  %s8274_s19 = smov 96  }
 0x279   :  { %8080 = vst [vmem:[#allocation72_spill] sm:$0xff] %v5762_v61  ;;  %v1531_v18 = vsel %vm7633_vm10, %v5574_v7, %v5563_v30  ;;  %v5788_v27 = vstv %s5702_s14  ;;  %v5795_v0 = vmul.f32 %v3812_v33, %v1489_v19  ;;  %v1501_v12 = vsel %vm1499_vm4, %v5403_v47, %v5418_v32  ;;  %s8281_s14 = smov 95  }
 0x27a   :  { %8081 = vst [vmem:[#allocation80_spill] sm:$0xff] %v5775_v10  ;;  %v1512_v9 = vmul.f32 %v5751_v1, %v1506_v42  ;;  %vm1574_vm3 = vcmp.lt.s32.totalorder %v3626_v29, 79  ;;  %v1525_v19 = vsel %vm7633_vm10, %v5494_v23, %v8083_v6  ;;  %v1526_v47 = vsel %vm7633_vm10, %v8083_v6, %v5494_v23 }
 0x27b   :  { %8082 = vst [vmem:[#allocation45_spill] sm:$0xff] %v5788_v27  ;;  %v1513_v32 = vmul.f32 %v5751_v1, %v1507_v3  ;;  %v1532_v41 = vsel %vm7633_vm10, %v5563_v30, %v5574_v7  ;;  %v1509_v31 = vmul.f32 %v5734_v37, %v1500_v60  ;;  %v1537_v50 = vmul.f32 %v5762_v61, %v1531_v18 }
 0x27c   :  { %v1556_v13 = vsel %vm1549_vm6, %v5639_v24, %v5420_v44  ;;  %v1550_v23 = vsel %vm1549_vm6, %v5348_v22, %v5648_v16  ;;  %v1510_v30 = vmul.f32 %v5734_v37, %v1501_v12  ;;  %v1557_v7 = vsel %vm1549_vm6, %v5420_v44, %v5639_v24 }
 0x27d   :  { %1900 = vrot.lane.b32.xlu1 %v4912_v53, %s3097_s29  ;;  %1896 = vrot.lane.b32.xlu0 %v4888_v38, %s3097_s29  ;;  %v1551_v60 = vsel %vm1549_vm6, %v5648_v16, %v5348_v22  ;;  %vm7644_vm10 = vcmp.lt.s32.totalorder %v3626_v29, 78  ;;  %v1534_v18 = vmul.f32 %v5748_v28, %v1525_v19  ;;  %v1535_v1 = vmul.f32 %v5748_v28, %v1526_v47 }
 0x27e   :  { %1902 = vrot.lane.b32.xlu2 %v4959_v17, %s3097_s29  ;;  %v1538_v12 = vmul.f32 %v5762_v61, %v1532_v41  ;;  %v1515_v37 = vadd.f32 %v1513_v32, %v1510_v30  ;;  %v1562_v33 = vmul.f32 %v5775_v10, %v1556_v13  ;;  %v1559_v44 = vmul.f32 %v5788_v27, %v1550_v23  ;;  %s5879_s29 = sld [smem:[#allocation3 + $0x61]] }
 0x27f   :  { %v1596_v42 = vpop.permute.xlu1 %1595  ;;  %v1580_v3 = vpop.permute.xlu0 %1579  ;;  %v5850_v24 = vstv %s5764_s28  ;;  %v1539_v5 = vadd.f32 %v1537_v50, %v1534_v18  ;;  %v1563_v22 = vmul.f32 %v5775_v10, %v1557_v7  ;;  %v1560_v16 = vmul.f32 %v5788_v27, %v1551_v60  ;;  %s8290_s28 = smov 94  }
 0x280   :  { %v5832_v6 = vpop.permute.xlu2 %1720  ;;  %8085 = vst [vmem:[#allocation91_spill] sm:$0xff] %v5850_v24  ;;  %v1581_v19 = vsel %vm1574_vm3, %v5510_v46, %v1580_v3  ;;  %v5862_v47 = vstv %s5792_s20  ;;  %v1582_v13 = vsel %vm1574_vm3, %v1580_v3, %v5510_v46  ;;  %v1540_v32 = vadd.f32 %v1538_v12, %v1535_v1  ;;  %s8302_s20 = smov 83  }
 0x281   :  { %8084 = vst [vmem:[#allocation76_spill] sm:$0xff] %v5832_v6  ;;  %v1514_v6 = vadd.f32 %v1512_v9, %v1509_v31  ;;  %v1492_v31 = vmul.f32 %v3830_v34, %v1490_v58  ;;  %v5859_v9 = vstv %s5777_s25  ;;  %v1575_v41 = vsel %vm1574_vm3, %v5736_v15, %v5724_v54  ;;  %s8295_s25 = smov 93  }
 0x282   :  { %8086 = vst [vmem:[#allocation66_spill] sm:$0xff] %v5859_v9  ;;  %v5877_v58 = vstv %s5805_s26  ;;  %v1564_v46 = vadd.f32 %v1562_v33, %v1559_v44  ;;  %v1576_v1 = vsel %vm1574_vm3, %v5724_v54, %v5736_v15  ;;  %v1600_v23 = vsel %vm7644_vm10, %v1596_v42, %v5576_v11  ;;  %s8311_s26 = smov 82  }
 0x283   :  { %8087 = vst [vmem:[#allocation83_spill] sm:$0xff] %v5862_v47  ;;  %v1516_v50 = vmul.f32 %v8048_v49, %v1514_v6  ;;  %v1587_v3 = vmul.f32 %v5850_v24, %v1581_v19  ;;  %v1517_v30 = vmul.f32 %v3893_v21, %v1515_v37  ;;  %v1541_v7 = vmul.f32 %v3877_v20, %v1539_v5 }
 0x284   :  { %8088 = vst [vmem:[#allocation84_spill] sm:$0xff] %v5877_v58  ;;  %v1565_v60 = vadd.f32 %v1563_v22, %v1560_v16  ;;  %v1588_v33 = vmul.f32 %v5850_v24, %v1582_v13  ;;  %v1584_v54 = vmul.f32 %v5859_v9, %v1575_v41  ;;  %v1601_v15 = vsel %vm7644_vm10, %v5576_v11, %v1596_v42 }
 0x285   :  { %1918 = vrot.lane.b32.xlu1 %v4888_v38, %s3098_s30  ;;  %1916 = vrot.lane.b32.xlu0 %v4896_v63, %s3098_s30  ;;  %v1585_v5 = vmul.f32 %v5859_v9, %v1576_v1  ;;  %v1609_v22 = vmul.f32 %v5862_v47, %v1600_v23  ;;  %v1518_v13 = vadd.f32 %v1516_v50, %v5795_v0 }
 0x286   :  { %1922 = vrot.lane.b32.xlu2 %v4912_v53, %s3098_s30  ;;  %v1542_v41 = vmul.f32 %v3885_v40, %v1540_v32  ;;  %v1566_v11 = vmul.f32 %v3948_v48, %v1564_v46  ;;  %v1589_v42 = vadd.f32 %v1587_v3, %v1584_v54  ;;  %v1440_v24 = vadd.f32 %v5745_v43, %v5731_v4 }
 0x287   :  { %v1605_v6 = vpop.permute.xlu1 %1604  ;;  %v1603_v18 = vpop.permute.xlu0 %1602  ;;  %v1590_v1 = vadd.f32 %v1588_v33, %v1585_v5  ;;  %v1462_v23 = vmul.f32 %v4266_v8, %v5755_v35  ;;  %v1567_v50 = vmul.f32 %v3953_v52, %v1565_v60  ;;  %v5926_v43 = vstv %s5879_s29  ;;  %s8316_s29 = smov 81  }
 0x288   :  { %v5896_v12 = vpop.permute.xlu2 %1738  ;;  %v1606_v44 = vsel %vm7644_vm10, %v1603_v18, %v1605_v6  ;;  %v1607_v37 = vsel %vm7644_vm10, %v1605_v6, %v1603_v18  ;;  %v1610_v6 = vmul.f32 %v5862_v47, %v1601_v15  ;;  %vm7645_vm10 = vcmp.lt.s32.totalorder %v3626_v29, 77  ;;  %8089 = vst [vmem:[#allocation16_spill] sm:$0xff] %v5926_v43 }
 0x289   :  { %v1612_v16 = vmul.f32 %v5877_v58, %v1606_v44  ;;  %v1613_v19 = vmul.f32 %v5877_v58, %v1607_v37  ;;  %v1519_v44 = vadd.f32 %v1517_v30, %v1492_v31  ;;  %v1543_v37 = vadd.f32 %v1541_v7, %v1518_v13 }
 0x28a   :  { %v1465_v0 = vadd.f32 %v5767_v36, %v1440_v24  ;;  %v1591_v32 = vmul.f32 %v3997_v2, %v1589_v42  ;;  %v5932_v3 = vstv %s5891_s17  ;;  %v1592_v36 = vmul.f32 %v4027_v14, %v1590_v1  ;;  %v8092_v42 = vld [vmem:[#allocation123_spill] sm:$0xff]  ;;  %v8093_v1 = vld [vmem:[#allocation48_spill] sm:$0xff]  ;;  %s8323_s17 = smov 80  }
 0x28b   :  { %v1614_v18 = vadd.f32 %v1612_v16, %v1609_v22  ;;  %v1615_v4 = vadd.f32 %v1613_v19, %v1610_v6  ;;  %v1544_v35 = vadd.f32 %v1542_v41, %v1519_v44  ;;  %v1568_v31 = vadd.f32 %v1566_v11, %v1543_v37  ;;  %8090 = vst [vmem:[#allocation94_spill] sm:$0xff] %v5932_v3 }
 0x28c   :  { %v1464_v41 = vadd.f32 %v1462_v23, %v5753_v56  ;;  %v1110_v6 = vadd.f32 %v8092_v42, %v5358_v45  ;;  %v8096_v56 = vld [vmem:[#allocation47_spill] sm:$0xff] }
 0x28d   :  { %1938 = vrot.lane.b32.xlu1 %v4896_v63, %s3099_s4  ;;  %1924 = vrot.lane.b32.xlu0 %v4959_v17, %s3098_s30  ;;  %v1616_v24 = vmul.f32 %v4076_v59, %v1614_v18  ;;  %v1569_v16 = vadd.f32 %v1567_v50, %v1544_v35  ;;  %v1617_v19 = vmul.f32 %v4079_v51, %v1615_v4  ;;  %v8095_v50 = vld [vmem:[#allocation125_spill] sm:$0xff]  ;;  %s8332_s30 = smov 79  }
 0x28e   :  { %1940 = vrot.lane.b32.xlu2 %v4888_v38, %s3099_s4  ;;  %v1593_v11 = vadd.f32 %v1591_v32, %v1568_v31  ;;  %v1288_v18 = vmul.f32 %v5719_v55, %v8093_v1  ;;  %v1289_v23 = vadd.f32 %v8096_v56, %v1110_v6  ;;  %v1467_v31 = vmul.f32 %v5729_v39, %v1465_v0 }
 0x28f   :  { %v1628_v46 = vpop.permute.xlu1 %1627  ;;  %v1623_v60 = vpop.permute.xlu0 %1622  ;;  %v1594_v44 = vadd.f32 %v1592_v36, %v1569_v16 }
 0x290   :  { %v1631_v30 = vsel %vm7645_vm10, %v1628_v46, %v5738_v26  ;;  %v1632_v7 = vsel %vm7645_vm10, %v5738_v26, %v1628_v46  ;;  %v5942_v33 = vpop.permute.xlu2 %1758  ;;  %v1625_v5 = vsel %vm7645_vm10, %v5650_v62, %v1623_v60  ;;  %v1626_v22 = vsel %vm7645_vm10, %v1623_v60, %v5650_v62  ;;  %v8094_v62 = vld [vmem:[#allocation75_spill] sm:$0xff] }
 0x291   :  { %8091 = vst [vmem:[#allocation82_spill] sm:$0xff] %v5942_v33  ;;  %v1637_v54 = vmul.f32 %v5926_v43, %v1631_v30  ;;  %v1638_v15 = vmul.f32 %v5926_v43, %v1632_v7  ;;  %v1634_v26 = vmul.f32 %v5932_v3, %v1625_v5  ;;  %v1635_v13 = vmul.f32 %v5932_v3, %v1626_v22  ;;  %v8130_v33 = vld [vmem:[#allocation121_spill] sm:$0xff] }
 0x292   :  { %vm345_vm10 = vcmp.lt.s32.totalorder %v8057_v25, 208  ;;  %v1111_v4 = vadd.f32 %v8095_v50, %v8094_v62  ;;  %v1618_v35 = vadd.f32 %v1616_v24, %v1593_v11  ;;  %v1619_v45 = vadd.f32 %v1617_v19, %v1594_v44 }
 0x293   :  { %v1639_v37 = vadd.f32 %v1637_v54, %v1634_v26  ;;  %v1640_v46 = vadd.f32 %v1638_v15, %v1635_v13  ;;  %v8097_v24 = vmov 0.0   ;;  %v1468_v5 = vadd.f32 %v1464_v41, %v1289_v23 }
 0x294   :  { %v5976_v30 = vsel %vm345_vm10, 1.0, %v8097_v24  ;;  %v1290_v15 = vadd.f32 %v1288_v18, %v1111_v4  ;;  %v5985_v22 = vstv %s7228_s1  ;;  %vm8103_vm10 = vcmask 1043456   ;;  %s8121_s1 = smov 14  }
 0x295   :  { %1946 = vrot.lane.b32.xlu1 %v4959_v17, %s3099_s4  ;;  %v1641_v32 = vmul.f32 %v4266_v8, %v1639_v37  ;;  %v1642_v36 = vmul.f32 %v4269_v57, %v1640_v46  ;;  %1944 = vrot.lane.b32.xlu0 %v4912_v53, %s3099_s4  ;;  %8098 = vst [vmem:[#allocation77_spill] sm:$0xff] %v5976_v30  ;;  %s8122_s4 = smov 13  }
 0x296   :  { %1960 = vrot.lane.b32.xlu2 %v4896_v63, %s3100_s5  ;;  %8100 = vst [vmem:[#allocation81_spill] sm:$0xff] %v5985_v22  ;;  %v1469_v16 = vadd.f32 %v1467_v31, %v1290_v15 }
 0x297   :  { %v5973_v25 = vpop.permute.xlu1 %1716  ;;  %v1643_v7 = vadd.f32 %v1641_v32, %v1618_v35  ;;  %v1644_v60 = vadd.f32 %v1642_v36, %v1619_v45  ;;  %v5978_v54 = vpop.permute.xlu0 %1714 }
 0x298   :  { %v5980_v0 = vpop.permute.xlu2 %1766 }
 0x299   :  { %8099 = vst [vmem:[#allocation89_spill] sm:$0xff] %v5980_v0  ;;  %v1646_v19 = vmul.f32 %v5976_v30, %v1644_v60  ;;  %v1647_v26 = vadd.f32 %v1643_v7, %v1468_v5  ;;  %v8104_v7 = vld [vmem:[#allocation12_spill] sm:$0xff] }
 0x29b   :  { %v1648_v13 = vadd.f32 %v1646_v19, %v1469_v16  ;;  %v1650_v11 = vadd.f32 %v5985_v22, %v1647_v26 }
 0x29d   :  { %1966 = vrot.lane.b32.xlu1 %v4912_v53, %s3100_s5  ;;  %1962 = vrot.lane.b32.xlu0 %v4888_v38, %s3100_s5  ;;  %v1651_v41 = vadd.f32 %v5985_v22, %v1648_v13  ;;  %v1652_v42 = vmul.f32 0.16666667, %v1650_v11 }
 0x29e   :  { %1968 = vrot.lane.b32.xlu2 %v4959_v17, %s3100_s5  ;;  %s8123_s5 = smov 3  }
 0x29f   :  { %v5996_v6 = vpop.permute.xlu1 %1736  ;;  %v5998_v1 = vpop.permute.xlu0 %1722  ;;  %v1653_v44 = vmul.f32 0.16666667, %v1651_v41  ;;  %v1654_v37 = vadd.f32 0.5, %v1652_v42 }
 0x2a0   :  { %v6000_v18 = vpop.permute.xlu2 %1786 }
 0x2a1   :  { %8101 = vst [vmem:[#allocation108_spill] sm:$0xff] %v6000_v18  ;;  %v1655_v46 = vadd.f32 0.5, %v1653_v44  ;;  %v1656_v62 = vmax.f32 %v1654_v37, 0.0  ;;  %v8129_v18 = vld [vmem:[#allocation23_spill] sm:$0xff] }
 0x2a3   :  { %v1657_v50 = vmax.f32 %v1655_v46, 0.0  ;;  %v1658_v4 = vmin.f32 %v1656_v62, 1.0 }
 0x2a5   :  { %1984 = vrot.lane.b32.xlu1 %v4888_v38, %s3101_s6  ;;  %1982 = vrot.lane.b32.xlu0 %v4896_v63, %s3101_s6  ;;  %v1659_v35 = vmin.f32 %v1657_v50, 1.0  ;;  %v1660_v32 = vperm.slane %v1658_v4, 0 }
 0x2a6   :  { %1988 = vrot.lane.b32.xlu2 %v4912_v53, %s3101_s6 }
 0x2a7   :  { %v6008_v56 = vpop.permute.xlu1 %1744  ;;  %v6010_v23 = vpop.permute.xlu0 %1742  ;;  %v1661_v45 = vperm.slane %v1659_v35, 0 }
 0x2a8   :  { %v6012_v31 = vpop.permute.xlu2 %1804 }
 0x2a9   :  { %8102 = vst [vmem:[#allocation109_spill] sm:$0xff] %v6012_v31  ;;  %v1664_v36 = vrot.slane %v1661_v45, 4 }
 0x2ab   :  { %v1665_v24 = vsel %vm8103_vm10, %v1660_v32, %v1664_v36 }
 0x2ac   :  { %v1667_v60 = vmul.f32 %v1665_v24, %v8104_v7 }
 0x2ad   :  { %2004 = vrot.lane.b32.xlu1 %v4896_v63, %s3102_s7  ;;  %1990 = vrot.lane.b32.xlu0 %v4959_v17, %s3101_s6  ;;  %s8124_s6 = smov 2  }
 0x2ae   :  { %2006 = vrot.lane.b32.xlu2 %v4888_v38, %s3102_s7  ;;  %1668 = vst [vmem:[#allocation8] sm:$0xff] %v1667_v60 }
 0x2af   :  { %v6022_v15 = vpop.permute.xlu1 %1764  ;;  %v6024_v5 = vpop.permute.xlu0 %1760 }
 0x2b0   :  { %8105 = vst [vmem:[#allocation123_spill] sm:$0xff] %v6022_v15  ;;  %v6026_v16 = vpop.permute.xlu2 %1824 }
 0x2b1   :  { %8106 = vst [vmem:[#allocation48_spill] sm:$0xff] %v6024_v5 }
 0x2b2   :  { %8107 = vst [vmem:[#allocation75_spill] sm:$0xff] %v6026_v16 }
 0x2b5   :  { %2012 = vrot.lane.b32.xlu1 %v4959_v17, %s3102_s7  ;;  %2010 = vrot.lane.b32.xlu0 %v4912_v53, %s3102_s7  ;;  %s8133_s7 = smov 1  }
 0x2b6   :  { %2030 = vrot.lane.b32.xlu2 %v4896_v63, %s3103_s8 }
 0x2b7   :  { %v6034_v19 = vpop.permute.xlu1 %1782  ;;  %v6036_v26 = vpop.permute.xlu0 %1780 }
 0x2b8   :  { %8108 = vst [vmem:[#allocation125_spill] sm:$0xff] %v6034_v19  ;;  %v6038_v13 = vpop.permute.xlu2 %1832 }
 0x2b9   :  { %8109 = vst [vmem:[#allocation47_spill] sm:$0xff] %v6036_v26 }
 0x2ba   :  { %8110 = vst [vmem:[#allocation12_spill] sm:$0xff] %v6038_v13  ;;  %v8125_v13 = vld [vmem:[#allocation119_spill] sm:$0xff] }
 0x2bd   :  { %2036 = vrot.lane.b32.xlu1 %v4912_v53, %s3103_s8  ;;  %2032 = vrot.lane.b32.xlu0 %v4888_v38, %s3103_s8 }
 0x2be   :  { %2038 = vrot.lane.b32.xlu2 %v4959_v17, %s3103_s8  ;;  %s8139_s8 = smov 127  }
 0x2bf   :  { %v6046_v11 = vpop.permute.xlu1 %1802  ;;  %v6048_v41 = vpop.permute.xlu0 %1788 }
 0x2c0   :  { %8111 = vst [vmem:[#allocation130_spill] sm:$0xff] %v6046_v11  ;;  %v6050_v42 = vpop.permute.xlu2 %1852 }
 0x2c1   :  { %8112 = vst [vmem:[#allocation131_spill] sm:$0xff] %v6048_v41 }
 0x2c2   :  { %8113 = vst [vmem:[#allocation132_spill] sm:$0xff] %v6050_v42 }
 0x2c5   :  { %2054 = vrot.lane.b32.xlu1 %v4888_v38, %s3104_s9  ;;  %2052 = vrot.lane.b32.xlu0 %v4896_v63, %s3104_s9 }
 0x2c6   :  { %2058 = vrot.lane.b32.xlu2 %v4912_v53, %s3104_s9 }
 0x2c7   :  { %v6058_v44 = vpop.permute.xlu1 %1810  ;;  %v6060_v37 = vpop.permute.xlu0 %1808 }
 0x2c8   :  { %8114 = vst [vmem:[#allocation133_spill] sm:$0xff] %v6058_v44  ;;  %v1875_v46 = vpop.permute.xlu2 %1874 }
 0x2c9   :  { %8115 = vst [vmem:[#allocation134_spill] sm:$0xff] %v6060_v37 }
 0x2cd   :  { %2074 = vrot.lane.b32.xlu1 %v4896_v63, %s3105_s10  ;;  %2060 = vrot.lane.b32.xlu0 %v4959_v17, %s3104_s9  ;;  %s8142_s9 = smov 126  }
 0x2ce   :  { %2076 = vrot.lane.b32.xlu2 %v4888_v38, %s3105_s10 }
 0x2cf   :  { %v6068_v62 = vpop.permute.xlu1 %1830  ;;  %v6070_v50 = vpop.permute.xlu0 %1826 }
 0x2d0   :  { %8116 = vst [vmem:[#allocation135_spill] sm:$0xff] %v6068_v62  ;;  %v1895_v4 = vpop.permute.xlu2 %1894 }
 0x2d1   :  { %8117 = vst [vmem:[#allocation136_spill] sm:$0xff] %v6070_v50 }
 0x2d5   :  { %2082 = vrot.lane.b32.xlu1 %v4959_v17, %s3105_s10  ;;  %2080 = vrot.lane.b32.xlu0 %v4912_v53, %s3105_s10  ;;  %s8145_s10 = smov 125  }
 0x2d6   :  { %2096 = vrot.lane.b32.xlu2 %v4896_v63, %s3106_s11 }
 0x2d7   :  { %v6078_v35 = vpop.permute.xlu1 %1848  ;;  %v6080_v45 = vpop.permute.xlu0 %1846 }
 0x2d8   :  { %8118 = vst [vmem:[#allocation137_spill] sm:$0xff] %v6078_v35  ;;  %v1903_v32 = vpop.permute.xlu2 %1902 }
 0x2d9   :  { %8119 = vst [vmem:[#allocation138_spill] sm:$0xff] %v6080_v45 }
 0x2dd   :  { %2102 = vrot.lane.b32.xlu1 %v4912_v53, %s3106_s11  ;;  %2098 = vrot.lane.b32.xlu0 %v4888_v38, %s3106_s11 }
 0x2de   :  { %2104 = vrot.lane.b32.xlu2 %v4959_v17, %s3106_s11  ;;  %s8148_s11 = smov 115  }
 0x2df   :  { %v1873_v36 = vpop.permute.xlu1 %1872  ;;  %v6088_v24 = vpop.permute.xlu0 %1854 }
 0x2e0   :  { %8120 = vst [vmem:[#allocation139_spill] sm:$0xff] %v6088_v24  ;;  %v1923_v7 = vpop.permute.xlu2 %1922  ;;  %v1877_v35 = vsel %vm592_vm14, %v1875_v46, %v1873_v36  ;;  %v1876_v16 = vsel %vm592_vm14, %v1873_v36, %v1875_v46 }
 0x2e1   :  { %v1884_v62 = vmul.f32 %v1877_v35, %v8125_v13  ;;  %v8127_v35 = vld [vmem:[#allocation124_spill] sm:$0xff] }
 0x2e5   :  { %2120 = vrot.lane.b32.xlu1 %v4888_v38, %s3107_s12  ;;  %2118 = vrot.lane.b32.xlu0 %v4896_v63, %s3107_s12 }
 0x2e6   :  { %2124 = vrot.lane.b32.xlu2 %v4912_v53, %s3107_s12 }
 0x2e7   :  { %v1881_v60 = vpop.permute.xlu1 %1880  ;;  %v1879_v22 = vpop.permute.xlu0 %1878 }
 0x2e8   :  { %v6096_v30 = vpop.permute.xlu2 %1940  ;;  %v1882_v11 = vsel %vm592_vm14, %v1879_v22, %v1881_v60  ;;  %v1883_v31 = vsel %vm592_vm14, %v1881_v60, %v1879_v22 }
 0x2e9   :  { %v1886_v5 = vmul.f32 %v1883_v31, %v8130_v33 }
 0x2ed   :  { %2140 = vrot.lane.b32.xlu1 %v4896_v63, %s8121_s1  ;;  %2126 = vrot.lane.b32.xlu0 %v4959_v17, %s3107_s12  ;;  %s8164_s12 = smov 114  }
 0x2ee   :  { %2142 = vrot.lane.b32.xlu2 %v4888_v38, %s8121_s1 }
 0x2ef   :  { %v1901_v3 = vpop.permute.xlu1 %1900  ;;  %v1897_v43 = vpop.permute.xlu0 %1896 }
 0x2f0   :  { %v1961_v47 = vpop.permute.xlu2 %1960  ;;  %v1904_v42 = vsel %vm617_vm11, %v1901_v3, %v1903_v32  ;;  %v1905_v24 = vsel %vm617_vm11, %v1903_v32, %v1901_v3  ;;  %v1899_v50 = vsel %vm617_vm11, %v1897_v43, %v1895_v4  ;;  %v8126_v3 = vld [vmem:[#allocation122_spill] sm:$0xff]  ;;  %v1898_v36 = vsel %vm617_vm11, %v1895_v4, %v1897_v43 }
 0x2f1   :  { %v1908_v32 = vmul.f32 %v1905_v24, %v8126_v3  ;;  %v1909_v46 = vmul.f32 %v1904_v42, %v8126_v3  ;;  %v1906_v44 = vmul.f32 %v1899_v50, %v8127_v35  ;;  %v8128_v3 = vld [vmem:[#allocation26_spill] sm:$0xff] }
 0x2f3   :  { %v1910_v0 = vadd.f32 %v1908_v32, %v1906_v44 }
 0x2f5   :  { %2148 = vrot.lane.b32.xlu1 %v4959_v17, %s8121_s1  ;;  %2146 = vrot.lane.b32.xlu0 %v4912_v53, %s8121_s1 }
 0x2f6   :  { %2162 = vrot.lane.b32.xlu2 %v4896_v63, %s8122_s4 }
 0x2f7   :  { %v1919_v58 = vpop.permute.xlu1 %1918  ;;  %v1917_v9 = vpop.permute.xlu0 %1916 }
 0x2f8   :  { %v1969_v27 = vpop.permute.xlu2 %1968 }
 0x2fd   :  { %2168 = vrot.lane.b32.xlu1 %v4912_v53, %s8122_s4  ;;  %2164 = vrot.lane.b32.xlu0 %v4888_v38, %s8122_s4 }
 0x2fe   :  { %2170 = vrot.lane.b32.xlu2 %v4959_v17, %s8122_s4  ;;  %s2834_s4 = sshll.u32 %s7230_s3, 4  ;;  %s2835_s4 = int_to_ptr.hbm [resolvable:$true] %s2834_s4 }
 0x2ff   :  { %v1939_v10 = vpop.permute.xlu1 %1938  ;;  %v1925_v28 = vpop.permute.xlu0 %1924 }
 0x300   :  { %v6116_v61 = vpop.permute.xlu2 %1988  ;;  %v1926_v19 = vsel %vm642_vm5, %v1923_v7, %v1925_v28  ;;  %v1927_v22 = vsel %vm642_vm5, %v1925_v28, %v1923_v7  ;;  %v1907_v28 = vmul.f32 %v1898_v36, %v8127_v35  ;;  %v1921_v7 = vsel %vm642_vm5, %v1919_v58, %v1917_v9 }
 0x301   :  { %v1943_v31 = vsel %vm667_vm0, %v6096_v30, %v1939_v10 }
 0x305   :  { %2190 = vrot.lane.b32.xlu1 %v4888_v38, %s8123_s5  ;;  %2188 = vrot.lane.b32.xlu0 %v4896_v63, %s8123_s5 }
 0x306   :  { %2194 = vrot.lane.b32.xlu2 %v4912_v53, %s8123_s5 }
 0x307   :  { %v1947_v39 = vpop.permute.xlu1 %1946  ;;  %v1945_v55 = vpop.permute.xlu0 %1944 }
 0x308   :  { %v6124_v45 = vpop.permute.xlu2 %2006 }
 0x30d   :  { %2210 = vrot.lane.b32.xlu1 %v4896_v63, %s8124_s6  ;;  %2196 = vrot.lane.b32.xlu0 %v4959_v17, %s8123_s5  ;;  %s8409_s5 = smov 8  }
 0x30e   :  { %2212 = vrot.lane.b32.xlu2 %v4888_v38, %s8124_s6 }
 0x30f   :  { %v1967_v37 = vpop.permute.xlu1 %1966  ;;  %v1963_v26 = vpop.permute.xlu0 %1962 }
 0x310   :  { %v1970_v60 = vsel %vm692_vm7, %v1967_v37, %v1969_v27  ;;  %v1971_v24 = vsel %vm692_vm7, %v1969_v27, %v1967_v37  ;;  %v6160_v42 = vpop.permute.xlu2 %2030  ;;  %v1964_v4 = vsel %vm692_vm7, %v1961_v47, %v1963_v26  ;;  %v1965_v41 = vsel %vm692_vm7, %v1963_v26, %v1961_v47 }
 0x311   :  { %v1974_v43 = vmul.f32 %v1971_v24, %v8128_v3  ;;  %v1975_v50 = vmul.f32 %v1970_v60, %v8128_v3  ;;  %v1972_v27 = vmul.f32 %v1965_v41, %v8129_v18  ;;  %v1973_v37 = vmul.f32 %v1964_v4, %v8129_v18  ;;  %v8131_v3 = vld [vmem:[#allocation128_spill] sm:$0xff] }
 0x312   :  { %v1887_v24 = vmul.f32 %v1882_v11, %v8130_v33  ;;  %v1920_v60 = vsel %vm642_vm5, %v1917_v9, %v1919_v58  ;;  %v1930_v15 = vmul.f32 %v1927_v22, %v8131_v3  ;;  %v1931_v47 = vmul.f32 %v1926_v19, %v8131_v3  ;;  %v8132_v18 = vld [vmem:[#allocation20_spill] sm:$0xff]  ;;  %v8134_v19 = vld [vmem:[#allocation17_spill] sm:$0xff] }
 0x313   :  { %v1949_v26 = vsel %vm667_vm0, %v1947_v39, %v1945_v55  ;;  %v1976_v36 = vadd.f32 %v1974_v43, %v1972_v27  ;;  %v1977_v35 = vadd.f32 %v1975_v50, %v1973_v37  ;;  %v1885_v41 = vmul.f32 %v1876_v16, %v8125_v13 }
 0x314   :  { %v1928_v4 = vmul.f32 %v1921_v7, %v8132_v18  ;;  %v1948_v33 = vsel %vm667_vm0, %v1945_v55, %v1947_v39  ;;  %v1911_v9 = vadd.f32 %v1909_v46, %v1907_v28  ;;  %v1929_v58 = vmul.f32 %v1920_v60, %v8132_v18  ;;  %v8135_v28 = vld [vmem:[#allocation127_spill] sm:$0xff] }
 0x315   :  { %2218 = vrot.lane.b32.xlu1 %v4959_v17, %s8124_s6  ;;  %2216 = vrot.lane.b32.xlu0 %v4912_v53, %s8124_s6  ;;  %v1888_v16 = vadd.f32 %v1886_v5, %v1884_v62  ;;  %v1942_v55 = vsel %vm667_vm0, %v1939_v10, %v6096_v30  ;;  %v1952_v13 = vmul.f32 %v1949_v26, %v8134_v19  ;;  %v8136_v62 = vld [vmem:[#allocation99_spill] sm:$0xff]  ;;  %vm8175_vm7 = vcmp.lt.s32.totalorder %v3626_v29, 48  ;;  %s8410_s6 = smov 128  }
 0x316   :  { %2232 = vrot.lane.b32.xlu2 %v4896_v63, %s8133_s7  ;;  %v1932_v39 = vadd.f32 %v1930_v15, %v1928_v4  ;;  %v1889_v44 = vadd.f32 %v1887_v24, %v1885_v41  ;;  %v1933_v32 = vadd.f32 %v1931_v47, %v1929_v58  ;;  %v1953_v46 = vmul.f32 %v1948_v33, %v8134_v19 }
 0x317   :  { %v1985_v11 = vpop.permute.xlu1 %1984  ;;  %v1983_v22 = vpop.permute.xlu0 %1982  ;;  %v1912_v50 = vmul.f32 %v8048_v49, %v1910_v0  ;;  %v1950_v7 = vmul.f32 %v1943_v31, %v8135_v28  ;;  %v1913_v30 = vmul.f32 %v3893_v21, %v1911_v9  ;;  %v1951_v15 = vmul.f32 %v1942_v55, %v8135_v28 }
 0x318   :  { %v6200_v43 = vpop.permute.xlu2 %2038  ;;  %v1986_v5 = vsel %vm717_vm8, %v1983_v22, %v1985_v11  ;;  %v1987_v10 = vsel %vm717_vm8, %v1985_v11, %v1983_v22  ;;  %v1890_v27 = vmul.f32 %v8136_v62, %v1888_v16  ;;  %v1934_v37 = vmul.f32 %v3877_v20, %v1932_v39 }
 0x319   :  { %v1954_v24 = vadd.f32 %v1952_v13, %v1950_v7  ;;  %v1891_v60 = vmul.f32 %v3830_v34, %v1889_v44  ;;  %v1935_v0 = vmul.f32 %v3885_v40, %v1933_v32  ;;  %v1955_v3 = vadd.f32 %v1953_v46, %v1951_v15  ;;  %v8137_v44 = vld [vmem:[#allocation22_spill] sm:$0xff] }
 0x31a   :  { %v1914_v47 = vadd.f32 %v1912_v50, %v1890_v27  ;;  %v1978_v39 = vmul.f32 %v3997_v2, %v1976_v36  ;;  %v1979_v19 = vmul.f32 %v4027_v14, %v1977_v35  ;;  %v1994_v32 = vmul.f32 %v1987_v10, %v8137_v44 }
 0x31b   :  { %v1915_v26 = vadd.f32 %v1913_v30, %v1891_v60  ;;  %v1956_v18 = vmul.f32 %v3948_v48, %v1954_v24  ;;  %v1957_v9 = vmul.f32 %v3953_v52, %v1955_v3  ;;  %v1995_v46 = vmul.f32 %v1986_v5, %v8137_v44 }
 0x31c   :  { %v1936_v41 = vadd.f32 %v1934_v37, %v1914_v47  ;;  %v8140_v47 = vld [vmem:[#allocation31_spill] sm:$0xff] }
 0x31d   :  { %2238 = vrot.lane.b32.xlu1 %v4912_v53, %s8133_s7  ;;  %2234 = vrot.lane.b32.xlu0 %v4888_v38, %s8133_s7  ;;  %v1937_v33 = vadd.f32 %v1935_v0, %v1915_v26 }
 0x31e   :  { %2240 = vrot.lane.b32.xlu2 %v4959_v17, %s8133_s7  ;;  %v1958_v28 = vadd.f32 %v1956_v18, %v1936_v41  ;;  %v8141_v18 = vld [vmem:[#allocation24_spill] sm:$0xff] }
 0x31f   :  { %v2005_v4 = vpop.permute.xlu1 %2004  ;;  %v1991_v16 = vpop.permute.xlu0 %1990  ;;  %v1959_v36 = vadd.f32 %v1957_v9, %v1937_v33 }
 0x320   :  { %v2008_v58 = vsel %vm742_vm2, %v2005_v4, %v6124_v45  ;;  %v2009_v31 = vsel %vm742_vm2, %v6124_v45, %v2005_v4  ;;  %v6228_v55 = vpop.permute.xlu2 %2058  ;;  %v1992_v13 = vsel %vm717_vm8, %v6116_v61, %v1991_v16  ;;  %v1993_v11 = vsel %vm717_vm8, %v1991_v16, %v6116_v61  ;;  %v8138_v45 = vld [vmem:[#allocation18_spill] sm:$0xff]  ;;  %vm8178_vm8 = vmmov %vm8175_vm7 }
 0x321   :  { %v1996_v22 = vmul.f32 %v1993_v11, %v8138_v45  ;;  %v1997_v50 = vmul.f32 %v1992_v13, %v8138_v45  ;;  %v1980_v30 = vadd.f32 %v1978_v39, %v1958_v28  ;;  %v1981_v15 = vadd.f32 %v1979_v19, %v1959_v36  ;;  %v8143_v45 = vld [vmem:[#allocation27_spill] sm:$0xff] }
 0x322   :  { %v2016_v26 = vmul.f32 %v2009_v31, %v8140_v47  ;;  %v2017_v41 = vmul.f32 %v2008_v58, %v8140_v47 }
 0x323   :  { %v1998_v7 = vadd.f32 %v1996_v22, %v1994_v32  ;;  %v1999_v35 = vadd.f32 %v1997_v50, %v1995_v46 }
 0x325   :  { %2266 = vrot.lane.b32.xlu1 %v4888_v38, %s8139_s8  ;;  %v2000_v27 = vmul.f32 %v4076_v59, %v1998_v7  ;;  %v2001_v61 = vmul.f32 %v4079_v51, %v1999_v35  ;;  %2264 = vrot.lane.b32.xlu0 %v4896_v63, %s8139_s8  ;;  %v8144_v7 = vld [vmem:[#allocation34_spill] sm:$0xff] }
 0x326   :  { %2270 = vrot.lane.b32.xlu2 %v4912_v53, %s8139_s8 }
 0x327   :  { %v2013_v5 = vpop.permute.xlu1 %2012  ;;  %v2002_v10 = vadd.f32 %v2000_v27, %v1980_v30  ;;  %v2003_v37 = vadd.f32 %v2001_v61, %v1981_v15  ;;  %v2011_v24 = vpop.permute.xlu0 %2010 }
 0x328   :  { %v2077_v60 = vpop.permute.xlu2 %2076  ;;  %v2014_v0 = vsel %vm742_vm2, %v2011_v24, %v2013_v5  ;;  %v2015_v3 = vsel %vm742_vm2, %v2013_v5, %v2011_v24  ;;  %vm8181_vm2 = vmmov %vm8175_vm7 }
 0x329   :  { %v2018_v4 = vmul.f32 %v2015_v3, %v8141_v18  ;;  %v2019_v33 = vmul.f32 %v2014_v0, %v8141_v18  ;;  %v8146_v18 = vld [vmem:[#allocation40_spill] sm:$0xff] }
 0x32b   :  { %v2020_v9 = vadd.f32 %v2018_v4, %v2016_v26  ;;  %v2021_v16 = vadd.f32 %v2019_v33, %v2017_v41 }
 0x32d   :  { %2286 = vrot.lane.b32.xlu1 %v4896_v63, %s8142_s9  ;;  %v2022_v39 = vmul.f32 %v4266_v8, %v2020_v9  ;;  %v2023_v19 = vmul.f32 %v4269_v57, %v2021_v16  ;;  %2272 = vrot.lane.b32.xlu0 %v4959_v17, %s8139_s8  ;;  %v8147_v9 = vld [vmem:[#allocation37_spill] sm:$0xff] }
 0x32e   :  { %2288 = vrot.lane.b32.xlu2 %v4888_v38, %s8142_s9 }
 0x32f   :  { %v2037_v58 = vpop.permute.xlu1 %2036  ;;  %v6266_v31 = vadd.f32 %v2022_v39, %v2002_v10  ;;  %v6268_v13 = vadd.f32 %v2023_v19, %v2003_v37  ;;  %v2033_v32 = vpop.permute.xlu0 %2032 }
 0x330   :  { %v2040_v11 = vsel %vm771_vm1, %v2037_v58, %v6200_v43  ;;  %v2041_v44 = vsel %vm771_vm1, %v6200_v43, %v2037_v58  ;;  %v6276_v46 = vpop.permute.xlu2 %2096  ;;  %v2034_v28 = vsel %vm771_vm1, %v6160_v42, %v2033_v32  ;;  %v2035_v36 = vsel %vm771_vm1, %v2033_v32, %v6160_v42 }
 0x331   :  { %v2044_v22 = vmul.f32 %v2041_v44, %v8143_v45  ;;  %v2045_v50 = vmul.f32 %v2040_v11, %v8143_v45  ;;  %v2042_v35 = vmul.f32 %v2035_v36, %v8144_v7  ;;  %v2043_v30 = vmul.f32 %v2034_v28, %v8144_v7  ;;  %v8150_v7 = vld [vmem:[#allocation76_spill] sm:$0xff] }
 0x332   :  { %v1718_v45 = vsel %vm413_vm13, %v5978_v54, %v5973_v25  ;;  %v1741_v36 = vsel %vm438_vm15, %v5896_v12, %v5996_v6  ;;  %vm8183_vm1 = vcmp.lt.s32.totalorder %v3626_v29, 15 }
 0x333   :  { %v2046_v43 = vadd.f32 %v2044_v22, %v2042_v35  ;;  %v2047_v15 = vadd.f32 %v2045_v50, %v2043_v30  ;;  %v8149_v22 = vld [vmem:[#allocation96_spill] sm:$0xff]  ;;  %v1724_v35 = vsel %vm413_vm13, %v8150_v7, %v5998_v1  ;;  %vm8184_vm10 = vmmov %vm8183_vm1 }
 0x335   :  { %2294 = vrot.lane.b32.xlu1 %v4959_v17, %s8142_s9  ;;  %2292 = vrot.lane.b32.xlu0 %v4912_v53, %s8142_s9  ;;  %v2048_v11 = vmul.f32 %v8136_v62, %v2046_v43 }
 0x336   :  { %2308 = vrot.lane.b32.xlu2 %v4896_v63, %s8145_s10 }
 0x337   :  { %v2055_v27 = vpop.permute.xlu1 %2054  ;;  %v2053_v61 = vpop.permute.xlu0 %2052 }
 0x338   :  { %v6294_v5 = vpop.permute.xlu2 %2104  ;;  %v2056_v42 = vsel %vm796_vm12, %v2053_v61, %v2055_v27  ;;  %v2057_v10 = vsel %vm796_vm12, %v2055_v27, %v2053_v61 }
 0x339   :  { %v2064_v4 = vmul.f32 %v2057_v10, %v8146_v18  ;;  %v2065_v33 = vmul.f32 %v2056_v42, %v8146_v18  ;;  %v8151_v10 = vld [vmem:[#allocation30_spill] sm:$0xff] }
 0x33d   :  { %2314 = vrot.lane.b32.xlu1 %v4912_v53, %s8145_s10  ;;  %2310 = vrot.lane.b32.xlu0 %v4888_v38, %s8145_s10 }
 0x33e   :  { %2316 = vrot.lane.b32.xlu2 %v4959_v17, %s8145_s10 }
 0x33f   :  { %v2075_v37 = vpop.permute.xlu1 %2074  ;;  %v2061_v3 = vpop.permute.xlu0 %2060 }
 0x340   :  { %v2078_v24 = vsel %vm821_vm9, %v2075_v37, %v2077_v60  ;;  %v2079_v0 = vsel %vm821_vm9, %v2077_v60, %v2075_v37  ;;  %v6310_v47 = vpop.permute.xlu2 %2124  ;;  %v2062_v26 = vsel %vm796_vm12, %v6228_v55, %v2061_v3  ;;  %v2063_v41 = vsel %vm796_vm12, %v2061_v3, %v6228_v55 }
 0x341   :  { %v2066_v16 = vmul.f32 %v2063_v41, %v8147_v9  ;;  %v2067_v39 = vmul.f32 %v2062_v26, %v8147_v9  ;;  %v1719_v60 = vsel %vm413_vm13, %v5973_v25, %v5978_v54  ;;  %v2049_v55 = vmul.f32 %v3830_v34, %v2047_v15  ;;  %v8152_v26 = vld [vmem:[#allocation36_spill] sm:$0xff]  ;;  %v8154_v9 = vld [vmem:[#allocation123_spill] sm:$0xff] }
 0x342   :  { %v1726_v50 = vmul.f32 %v1719_v60, %v8149_v22  ;;  %v1725_v25 = vsel %vm413_vm13, %v5998_v1, %v8150_v7  ;;  %v1747_v54 = vsel %vm438_vm15, %v6008_v56, %v6010_v23  ;;  %v2086_v37 = vmul.f32 %v2079_v0, %v8151_v10  ;;  %v8161_v60 = vld [vmem:[#allocation95_spill] sm:$0xff] }
 0x343   :  { %v2068_v19 = vadd.f32 %v2066_v16, %v2064_v4  ;;  %v2069_v58 = vadd.f32 %v2067_v39, %v2065_v33  ;;  %v2087_v3 = vmul.f32 %v2078_v24, %v8151_v10  ;;  %v1740_v1 = vsel %vm438_vm15, %v5996_v6, %v5896_v12  ;;  %v8153_v33 = vld [vmem:[#allocation89_spill] sm:$0xff]  ;;  %v8157_v16 = vld [vmem:[#allocation48_spill] sm:$0xff]  ;;  %v8158_v39 = vld [vmem:[#allocation82_spill] sm:$0xff] }
 0x344   :  { %v1746_v4 = vsel %vm438_vm15, %v6010_v23, %v6008_v56  ;;  %vm8155_vm13 = vcmp.lt.s32.totalorder %v3626_v29, 49  ;;  %vm8167_vm15 = vcmp.lt.s32.totalorder %v3626_v29, 16 }
 0x345   :  { %2336 = vrot.lane.b32.xlu1 %v4888_v38, %s8148_s11  ;;  %v2070_v44 = vmul.f32 %v8048_v49, %v2068_v19  ;;  %v2071_v32 = vmul.f32 %v3893_v21, %v2069_v58  ;;  %2334 = vrot.lane.b32.xlu0 %v4896_v63, %s8148_s11  ;;  %v1768_v0 = vsel %vm8155_vm13, %v8154_v9, %v8153_v33  ;;  %v8162_v58 = vld [vmem:[#allocation97_spill] sm:$0xff]  ;;  %vm8168_vm11 = vmmov %vm8167_vm15 }
 0x346   :  { %2340 = vrot.lane.b32.xlu2 %v4912_v53, %s8148_s11  ;;  %v1748_v19 = vmul.f32 %v1741_v36, %v8161_v60  ;;  %v8165_v36 = vld [vmem:[#allocation104_spill] sm:$0xff]  ;;  %vm8170_vm5 = vmmov %vm8168_vm11 }
 0x347   :  { %v2083_v28 = vpop.permute.xlu1 %2082  ;;  %v2072_v30 = vadd.f32 %v2070_v44, %v2048_v11  ;;  %v2073_v43 = vadd.f32 %v2071_v32, %v2049_v55  ;;  %v2081_v15 = vpop.permute.xlu0 %2080  ;;  %v1728_v11 = vmul.f32 %v1725_v25, %v8162_v58  ;;  %v1729_v55 = vmul.f32 %v1724_v35, %v8162_v58  ;;  %v8163_v44 = vld [vmem:[#allocation105_spill] sm:$0xff]  ;;  %vm8171_vm0 = vmmov %vm8170_vm5  ;;  %v8173_v58 = vld [vmem:[#allocation108_spill] sm:$0xff] }
 0x348   :  { %v6349_v27 = vpop.permute.xlu2 %2142  ;;  %v2084_v61 = vsel %vm821_vm9, %v2081_v15, %v2083_v28  ;;  %v2085_v42 = vsel %vm821_vm9, %v2083_v28, %v2081_v15  ;;  %vm8156_vm9 = vmmov %vm8155_vm13  ;;  %v1750_v32 = vmul.f32 %v1747_v54, %v8163_v44  ;;  %v1751_v28 = vmul.f32 %v1746_v4, %v8163_v44  ;;  %v8166_v54 = vld [vmem:[#allocation100_spill] sm:$0xff]  ;;  %v8174_v44 = vld [vmem:[#allocation131_spill] sm:$0xff] }
 0x349   :  { %v2088_v41 = vmul.f32 %v2085_v42, %v8152_v26  ;;  %v2089_v18 = vmul.f32 %v2084_v61, %v8152_v26  ;;  %v1769_v24 = vsel %vm8156_vm9, %v8153_v33, %v8154_v9  ;;  %vm8159_vm12 = vmmov %vm8156_vm9  ;;  %v1773_v35 = vmul.f32 %v1768_v0, %v8165_v36  ;;  %v8169_v33 = vld [vmem:[#allocation33_spill] sm:$0xff] }
 0x34a   :  { %v1762_v12 = vsel %vm8159_vm12, %v8158_v39, %v8157_v16  ;;  %vm8160_vm14 = vmmov %vm8156_vm9  ;;  %v1772_v25 = vmul.f32 %v1769_v24, %v8165_v36  ;;  %v1749_v24 = vmul.f32 %v1740_v1, %v8161_v60  ;;  %v8176_v1 = vld [vmem:[#allocation47_spill] sm:$0xff]  ;;  %v8177_v60 = vld [vmem:[#allocation125_spill] sm:$0xff]  ;;  %vm8188_vm9 = vcmp.lt.s32.totalorder %v3626_v29, 47 }
 0x34b   :  { %v1763_v6 = vsel %vm8160_vm14, %v8157_v16, %v8158_v39  ;;  %v2090_v56 = vadd.f32 %v2088_v41, %v2086_v37  ;;  %v2091_v23 = vadd.f32 %v2089_v18, %v2087_v3  ;;  %v1771_v42 = vmul.f32 %v1762_v12, %v8166_v54  ;;  %v8172_v16 = vld [vmem:[#allocation39_spill] sm:$0xff]  ;;  %vm8185_vm13 = vmmov %vm8181_vm2 }
 0x34c   :  { %v1770_v61 = vmul.f32 %v1763_v6, %v8166_v54  ;;  %v1727_v12 = vmul.f32 %v1718_v45, %v8149_v22  ;;  %v1730_v6 = vadd.f32 %v1728_v11, %v1726_v50  ;;  %v1785_v45 = vsel %vm8178_vm8, %v8177_v60, %v8176_v1  ;;  %vm8191_vm12 = vmmov %vm8188_vm9 }
 0x34d   :  { %2356 = vrot.lane.b32.xlu1 %v4896_v63, %s8164_s12  ;;  %v2092_v7 = vmul.f32 %v3877_v20, %v2090_v56  ;;  %v2093_v15 = vmul.f32 %v3885_v40, %v2091_v23  ;;  %2342 = vrot.lane.b32.xlu0 %v4959_v17, %s8148_s11  ;;  %v1752_v56 = vadd.f32 %v1750_v32, %v1748_v19  ;;  %vm8192_vm14 = vmmov %vm8188_vm9 }
 0x34e   :  { %2358 = vrot.lane.b32.xlu2 %v4888_v38, %s8164_s12  ;;  %v1753_v23 = vadd.f32 %v1751_v28, %v1749_v24  ;;  %v1731_v54 = vadd.f32 %v1729_v55, %v1727_v12  ;;  %v1732_v19 = vmul.f32 %v8136_v62, %v1730_v6  ;;  %v8180_v55 = vld [vmem:[#allocation110_spill] sm:$0xff]  ;;  %vm8204_vm8 = vmmov %vm8183_vm1 }
 0x34f   :  { %v2103_v10 = vpop.permute.xlu1 %2102  ;;  %v2094_v37 = vadd.f32 %v2092_v7, %v2072_v30  ;;  %v2095_v3 = vadd.f32 %v2093_v15, %v2073_v43  ;;  %v2099_v18 = vpop.permute.xlu0 %2098  ;;  %v1791_v7 = vsel %vm8175_vm7, %v8174_v44, %v8173_v58  ;;  %v1754_v11 = vmul.f32 %v8048_v49, %v1752_v56  ;;  %v8186_v24 = vld [vmem:[#allocation134_spill] sm:$0xff] }
 0x350   :  { %v2106_v26 = vsel %vm8167_vm15, %v2103_v10, %v6294_v5  ;;  %v2107_v41 = vsel %vm8168_vm11, %v6294_v5, %v2103_v10  ;;  %v6414_v4 = vpop.permute.xlu2 %2162  ;;  %v2100_v30 = vsel %vm8170_vm5, %v6276_v46, %v2099_v18  ;;  %v2101_v43 = vsel %vm8171_vm0, %v2099_v18, %v6276_v46  ;;  %vm8194_vm15 = vmmov %vm8188_vm9 }
 0x351   :  { %v2110_v9 = vmul.f32 %v2107_v41, %v8169_v33  ;;  %v2111_v0 = vmul.f32 %v2106_v26, %v8169_v33  ;;  %v2108_v39 = vmul.f32 %v2101_v43, %v8172_v16  ;;  %v2109_v5 = vmul.f32 %v2100_v30, %v8172_v16  ;;  %v8182_v33 = vld [vmem:[#allocation103_spill] sm:$0xff]  ;;  %v8187_v16 = vld [vmem:[#allocation133_spill] sm:$0xff] }
 0x352   :  { %v1774_v46 = vadd.f32 %v1772_v25, %v1770_v61  ;;  %v1775_v10 = vadd.f32 %v1773_v35, %v1771_v42  ;;  %v1794_v32 = vmul.f32 %v1791_v7, %v8180_v55  ;;  %v1755_v25 = vmul.f32 %v3893_v21, %v1753_v23  ;;  %v8189_v23 = vld [vmem:[#allocation109_spill] sm:$0xff] }
 0x353   :  { %v2112_v15 = vadd.f32 %v2110_v9, %v2108_v39  ;;  %v2113_v36 = vadd.f32 %v2111_v0, %v2109_v5  ;;  %v1790_v35 = vsel %vm8181_vm2, %v8173_v58, %v8174_v44  ;;  %v1733_v18 = vmul.f32 %v3830_v34, %v1731_v54  ;;  %v8190_v58 = vld [vmem:[#allocation130_spill] sm:$0xff]  ;;  %vm8205_vm2 = vmmov %vm8183_vm1 }
 0x354   :  { %v1792_v9 = vmul.f32 %v1785_v45, %v8182_v33  ;;  %v1776_v43 = vmul.f32 %v3877_v20, %v1774_v46  ;;  %v1813_v39 = vsel %vm8188_vm9, %v8187_v16, %v8186_v24  ;;  %v1795_v5 = vmul.f32 %v1790_v35, %v8180_v55  ;;  %v8196_v55 = vld [vmem:[#allocation135_spill] sm:$0xff]  ;;  %v8200_v35 = vld [vmem:[#allocation136_spill] sm:$0xff] }
 0x355   :  { %2364 = vrot.lane.b32.xlu1 %v4959_v17, %s8164_s12  ;;  %v2114_v22 = vmul.f32 %v3948_v48, %v2112_v15  ;;  %v2115_v50 = vmul.f32 %v3953_v52, %v2113_v36  ;;  %2362 = vrot.lane.b32.xlu0 %v4912_v53, %s8164_s12  ;;  %v1756_v6 = vadd.f32 %v1754_v11, %v1732_v19  ;;  %v8193_v36 = vld [vmem:[#allocation111_spill] sm:$0xff]  ;;  %vm8198_vm11 = vcmp.lt.s32.totalorder %v3626_v29, 46 }
 0x356   :  { %2378 = vrot.lane.b32.xlu2 %v4896_v63, %s8179_s24  ;;  %v1796_v12 = vadd.f32 %v1794_v32, %v1792_v9  ;;  %v1757_v56 = vadd.f32 %v1755_v25, %v1733_v18  ;;  %v1806_v44 = vsel %vm8191_vm12, %v8190_v58, %v8189_v23  ;;  %v1807_v7 = vsel %vm8192_vm14, %v8189_v23, %v8190_v58  ;;  %v8197_v32 = vld [vmem:[#allocation12_spill] sm:$0xff]  ;;  %v8199_v25 = vld [vmem:[#allocation75_spill] sm:$0xff]  ;;  %vm8201_vm5 = vmmov %vm8198_vm11 }
 0x357   :  { %v2121_v28 = vpop.permute.xlu1 %2120  ;;  %v6452_v61 = vadd.f32 %v2114_v22, %v2094_v37  ;;  %v6454_v42 = vadd.f32 %v2115_v50, %v2095_v3  ;;  %v2119_v26 = vpop.permute.xlu0 %2118  ;;  %v1777_v37 = vmul.f32 %v3885_v40, %v1775_v10  ;;  %v1784_v3 = vsel %vm8185_vm13, %v8176_v1, %v8177_v60  ;;  %v8195_v60 = vld [vmem:[#allocation107_spill] sm:$0xff]  ;;  %v8209_v58 = vld [vmem:[#allocation113_spill] sm:$0xff] }
 0x358   :  { %v6456_v41 = vpop.permute.xlu2 %2170  ;;  %v2122_v0 = vsel %vm8183_vm1, %v2119_v26, %v2121_v28  ;;  %v2123_v30 = vsel %vm8184_vm10, %v2121_v28, %v2119_v26  ;;  %v1793_v15 = vmul.f32 %v1784_v3, %v8182_v33  ;;  %v1816_v54 = vmul.f32 %v1813_v39, %v8193_v36  ;;  %v8206_v39 = vld [vmem:[#allocation53_spill] sm:$0xff]  ;;  %vm8208_vm1 = vmmov %vm8201_vm5 }
 0x359   :  { %v1778_v46 = vadd.f32 %v1776_v43, %v1756_v6  ;;  %v6487_v10 = vadd.f32 %v1777_v37, %v1757_v56  ;;  %v1812_v1 = vsel %vm8194_vm15, %v8186_v24, %v8187_v16  ;;  %v1814_v45 = vmul.f32 %v1807_v7, %v8195_v60  ;;  %v8207_v6 = vld [vmem:[#allocation52_spill] sm:$0xff]  ;;  %vm8210_vm10 = vmmov %vm8208_vm1  ;;  %v8211_v7 = vld [vmem:[#allocation114_spill] sm:$0xff] }
 0x35a   :  { %v1815_v22 = vmul.f32 %v1806_v44, %v8195_v60  ;;  %v1797_v50 = vadd.f32 %v1795_v5, %v1793_v15  ;;  %v1798_v19 = vmul.f32 %v3948_v48, %v1796_v12  ;;  %v1835_v28 = vsel %vm8198_vm11, %v8197_v32, %v8196_v55  ;;  %v8212_v15 = vld [vmem:[#allocation139_spill] sm:$0xff] }
 0x35b   :  { %v1829_v26 = vsel %vm8201_vm5, %v8200_v35, %v8199_v25  ;;  %vm8202_vm0 = vcmp.lt.s32.totalorder %v3626_v29, 14  ;;  %v1817_v37 = vmul.f32 %v1812_v1, %v8193_v36  ;;  %v1818_v3 = vadd.f32 %v1816_v54, %v1814_v45 }
 0x35c   :  { %vm8203_vm7 = vmmov %vm8202_vm0  ;;  %v2130_v5 = vmul.f32 %v2123_v30, %v8206_v39  ;;  %v2131_v12 = vmul.f32 %v2122_v0, %v8206_v39  ;;  %v1834_v23 = vsel %vm8208_vm1, %v8196_v55, %v8197_v32  ;;  %v1838_v44 = vmul.f32 %v1835_v28, %v8209_v58  ;;  %v8213_v0 = vld [vmem:[#allocation132_spill] sm:$0xff]  ;;  %v8216_v32 = vld [vmem:[#allocation137_spill] sm:$0xff] }
 0x35d   :  { %2384 = vrot.lane.b32.xlu1 %v4912_v53, %s8179_s24  ;;  %2380 = vrot.lane.b32.xlu0 %v4888_v38, %s8179_s24  ;;  %v1836_v30 = vmul.f32 %v1829_v26, %v8211_v7  ;;  %vm8214_vm13 = vcmp.lt.s32.totalorder %v3626_v29, 45  ;;  %v1799_v45 = vmul.f32 %v3953_v52, %v1797_v50  ;;  %v1819_v55 = vadd.f32 %v1817_v37, %v1815_v22  ;;  %v8217_v28 = vld [vmem:[#allocation138_spill] sm:$0xff]  ;;  %v8221_v50 = vld [vmem:[#allocation120_spill] sm:$0xff]  ;;  %vm8223_vm15 = vmmov %vm8202_vm0 }
 0x35e   :  { %2386 = vrot.lane.b32.xlu2 %v4959_v17, %s8179_s24  ;;  %v1856_v36 = vsel %vm8214_vm13, %v8213_v0, %v8212_v15  ;;  %vm8215_vm9 = vmmov %vm8214_vm13  ;;  %vm8228_vm5 = vcmp.lt.s32.totalorder %v3626_v29, 13 }
 0x35f   :  { %v2141_v11 = vpop.permute.xlu1 %2140  ;;  %v2127_v9 = vpop.permute.xlu0 %2126  ;;  %v1857_v54 = vsel %vm8215_vm9, %v8212_v15, %v8213_v0  ;;  %vm8218_vm12 = vmmov %vm8215_vm9  ;;  %v1861_v37 = vmul.f32 %v1856_v36, %v8221_v50  ;;  %v1840_v39 = vadd.f32 %v1838_v44, %v1836_v30  ;;  %v1821_v0 = vmul.f32 %v4027_v14, %v1819_v55 }
 0x360   :  { %v2144_v18 = vsel %vm8202_vm0, %v2141_v11, %v6349_v27  ;;  %v2145_v33 = vsel %vm8203_vm7, %v6349_v27, %v2141_v11  ;;  %v6514_v43 = vpop.permute.xlu2 %2194  ;;  %v2128_v24 = vsel %vm8204_vm8, %v6310_v47, %v2127_v9  ;;  %v2129_v16 = vsel %vm8205_vm2, %v2127_v9, %v6310_v47  ;;  %vm8220_vm14 = vmmov %vm8215_vm9 }
 0x361   :  { %v2132_v27 = vmul.f32 %v2129_v16, %v8207_v6  ;;  %v2133_v56 = vmul.f32 %v2128_v24, %v8207_v6  ;;  %v1828_v47 = vsel %vm8210_vm10, %v8199_v25, %v8200_v35  ;;  %v1800_v11 = vadd.f32 %v1798_v19, %v1778_v46  ;;  %vm8224_vm11 = vmmov %vm8202_vm0 }
 0x362   :  { %v1850_v25 = vsel %vm8218_vm12, %v8217_v28, %v8216_v32  ;;  %v1851_v35 = vsel %vm8220_vm14, %v8216_v32, %v8217_v28  ;;  %v1839_v46 = vmul.f32 %v1834_v23, %v8209_v58  ;;  %v1837_v22 = vmul.f32 %v1828_v47, %v8211_v7  ;;  %v8225_v7 = vld [vmem:[#allocation49_spill] sm:$0xff]  ;;  %vm8229_vm0 = vmmov %vm8228_vm5 }
 0x363   :  { %v2134_v1 = vadd.f32 %v2132_v27, %v2130_v5  ;;  %v2135_v60 = vadd.f32 %v2133_v56, %v2131_v12  ;;  %v1860_v19 = vmul.f32 %v1857_v54, %v8221_v50  ;;  %v1820_v16 = vmul.f32 %v3997_v2, %v1818_v3  ;;  %v8222_v56 = vld [vmem:[#allocation116_spill] sm:$0xff]  ;;  %vm8231_vm7 = vmmov %vm8229_vm0 }
 0x364   :  { %v1858_v15 = vmul.f32 %v1851_v35, %v8222_v56  ;;  %v1859_v23 = vmul.f32 %v1850_v25, %v8222_v56  ;;  %v2152_v3 = vmul.f32 %v2145_v33, %v8225_v7  ;;  %v2153_v44 = vmul.f32 %v2144_v18, %v8225_v7  ;;  %vm8232_vm8 = vmmov %vm8229_vm0  ;;  %v8233_v56 = vld [vmem:[#allocation51_spill] sm:$0xff] }
 0x365   :  { %2402 = vrot.lane.b32.xlu1 %v4888_v38, %s8219_s15  ;;  %v2136_v26 = vmul.f32 %v3997_v2, %v2134_v1  ;;  %v2137_v9 = vmul.f32 %v4027_v14, %v2135_v60  ;;  %2400 = vrot.lane.b32.xlu0 %v4896_v63, %s8219_s15  ;;  %v1841_v36 = vadd.f32 %v1839_v46, %v1837_v22  ;;  %vm8237_vm2 = vcmp.lt.s32.totalorder %v3626_v29, 3 }
 0x366   :  { %2406 = vrot.lane.b32.xlu2 %v4912_v53, %s8219_s15  ;;  %v1862_v54 = vadd.f32 %v1860_v19, %v1858_v15  ;;  %v1863_v1 = vadd.f32 %v1861_v37, %v1859_v23  ;;  %v1801_v28 = vadd.f32 %v1799_v45, %v6487_v10  ;;  %v1822_v25 = vadd.f32 %v1820_v16, %v1800_v11  ;;  %vm8238_vm1 = vmmov %vm8237_vm2 }
 0x367   :  { %v2149_v24 = vpop.permute.xlu1 %2148  ;;  %v2138_v5 = vadd.f32 %v2136_v26, %v6452_v61  ;;  %v2139_v12 = vadd.f32 %v2137_v9, %v6454_v42  ;;  %v2147_v6 = vpop.permute.xlu0 %2146  ;;  %v8226_v61 = vld [vmem:[#allocation42_spill] sm:$0xff]  ;;  %v1842_v33 = vmul.f32 %v4076_v59, %v1840_v39  ;;  %v1843_v26 = vmul.f32 %v4079_v51, %v1841_v36  ;;  %vm8242_vm9 = vmmov %vm8238_vm1 }
 0x368   :  { %v6569_v27 = vpop.permute.xlu2 %2212  ;;  %v2150_v58 = vsel %vm8223_vm15, %v2147_v6, %v2149_v24  ;;  %v2151_v47 = vsel %vm8224_vm11, %v2149_v24, %v2147_v6  ;;  %v1823_v55 = vadd.f32 %v1821_v0, %v1801_v28  ;;  %v1864_v10 = vmul.f32 %v4266_v8, %v1862_v54  ;;  %v8230_v24 = vld [vmem:[#allocation56_spill] sm:$0xff]  ;;  %v8236_v0 = vld [vmem:[#allocation14_spill] sm:$0xff]  ;;  %vm8243_vm12 = vmmov %vm8238_vm1 }
 0x369   :  { %v2154_v30 = vmul.f32 %v2151_v47, %v8226_v61  ;;  %v2155_v42 = vmul.f32 %v2150_v58, %v8226_v61  ;;  %v1865_v45 = vmul.f32 %v4269_v57, %v1863_v1  ;;  %v1844_v6 = vadd.f32 %v1842_v33, %v1822_v25 }
 0x36a   :  { %v1845_v23 = vadd.f32 %v1843_v26, %v1823_v55  ;;  %vm8240_vm10 = vcmp.lt.s32.totalorder %v3626_v29, 2  ;;  %vm8252_vm11 = vcmp.lt.s32.totalorder %v3626_v29, 1 }
 0x36b   :  { %v2156_v60 = vadd.f32 %v2154_v30, %v2152_v3  ;;  %v2157_v32 = vadd.f32 %v2155_v42, %v2153_v44  ;;  %v1866_v58 = vadd.f32 %v1864_v10, %v1844_v6  ;;  %v8234_v44 = vld [vmem:[#allocation41_spill] sm:$0xff]  ;;  %vm8241_vm13 = vmmov %vm8240_vm10 }
 0x36c   :  { %v1867_v3 = vadd.f32 %v1865_v45, %v1845_v23  ;;  %v2026_v61 = vmul.f32 %v8234_v44, %v6266_v31  ;;  %vm8247_vm14 = vmmov %vm8240_vm10  ;;  %v8249_v23 = vld [vmem:[#allocation59_spill] sm:$0xff] }
 0x36d   :  { %2422 = vrot.lane.b32.xlu1 %v4896_v63, %s8227_s22  ;;  %v2158_v18 = vmul.f32 %v4076_v59, %v2156_v60  ;;  %v2159_v35 = vmul.f32 %v4079_v51, %v2157_v32  ;;  %2408 = vrot.lane.b32.xlu0 %v4959_v17, %s8219_s15  ;;  %v1868_v36 = vmul.f32 %v8236_v0, %v1866_v58  ;;  %vm8248_vm15 = vmmov %vm8240_vm10 }
 0x36e   :  { %2424 = vrot.lane.b32.xlu2 %v4888_v38, %s8227_s22  ;;  %v2029_v54 = vadd.f32 %v6268_v13, %v1867_v3 }
 0x36f   :  { %v2169_v11 = vpop.permute.xlu1 %2168  ;;  %v2160_v9 = vadd.f32 %v2158_v18, %v2138_v5  ;;  %v2161_v46 = vadd.f32 %v2159_v35, %v2139_v12  ;;  %v2165_v19 = vpop.permute.xlu0 %2164  ;;  %v2028_v33 = vadd.f32 %v2026_v61, %v1868_v36  ;;  %v8239_v18 = vld [vmem:[#allocation78_spill] sm:$0xff] }
 0x370   :  { %v2172_v22 = vsel %vm8228_vm5, %v2169_v11, %v6456_v41  ;;  %v2173_v50 = vsel %vm8229_vm0, %v6456_v41, %v2169_v11  ;;  %v6601_v37 = vpop.permute.xlu2 %2232  ;;  %v2166_v5 = vsel %vm8231_vm7, %v6414_v4, %v2165_v19  ;;  %v2167_v12 = vsel %vm8232_vm8, %v2165_v19, %v6414_v4  ;;  %vm8253_vm5 = vmmov %vm8252_vm11 }
 0x371   :  { %v2176_v16 = vmul.f32 %v2173_v50, %v8230_v24  ;;  %v2177_v39 = vmul.f32 %v2172_v22, %v8230_v24  ;;  %v2174_v15 = vmul.f32 %v2167_v12, %v8233_v56  ;;  %v2175_v41 = vmul.f32 %v2166_v5, %v8233_v56  ;;  %v8244_v50 = vld [vmem:[#allocation62_spill] sm:$0xff]  ;;  %vm8255_vm0 = vmmov %vm8253_vm5 }
 0x372   :  { %vm8256_vm7 = vmmov %vm8255_vm0  ;;  %vm8260_vm8 = vcmp.lt.s32.totalorder %v3626_v29, 127 }
 0x373   :  { %v2178_v47 = vadd.f32 %v2176_v16, %v2174_v15  ;;  %v2179_v7 = vadd.f32 %v2177_v39, %v2175_v41  ;;  %v8245_v16 = vld [vmem:[#allocation61_spill] sm:$0xff] }
 0x375   :  { %2430 = vrot.lane.b32.xlu1 %v4959_v17, %s8227_s22  ;;  %v2180_v30 = vmul.f32 %v4266_v8, %v2178_v47  ;;  %v2181_v4 = vmul.f32 %v4269_v57, %v2179_v7  ;;  %2428 = vrot.lane.b32.xlu0 %v4912_v53, %s8227_s22  ;;  %v8250_v7 = vld [vmem:[#allocation54_spill] sm:$0xff] }
 0x376   :  { %2444 = vrot.lane.b32.xlu2 %v4896_v63, %s8235_s18 }
 0x377   :  { %v2191_v42 = vpop.permute.xlu1 %2190  ;;  %v2182_v1 = vadd.f32 %v2180_v30, %v2160_v9  ;;  %v2183_v60 = vadd.f32 %v2181_v4, %v2161_v46  ;;  %v2189_v32 = vpop.permute.xlu0 %2188 }
 0x378   :  { %v2241_v28 = vpop.permute.xlu2 %2240  ;;  %v2192_v31 = vsel %vm8237_vm2, %v2189_v32, %v2191_v42  ;;  %v2193_v25 = vsel %vm8238_vm1, %v2191_v42, %v2189_v32  ;;  %vm8261_vm2 = vmmov %vm8260_vm8  ;;  %vm8263_vm1 = vcmp.lt.s32.totalorder %v3626_v29, 126 }
 0x379   :  { %v2184_v35 = vmul.f32 %v8239_v18, %v2182_v1  ;;  %v6630_v55 = vadd.f32 %v2183_v60, %v2029_v54  ;;  %v2200_v19 = vmul.f32 %v2193_v25, %v8244_v50  ;;  %v2201_v24 = vmul.f32 %v2192_v31, %v8244_v50  ;;  %v8254_v18 = vld [vmem:[#allocation57_spill] sm:$0xff] }
 0x37b   :  { %v6632_v26 = vadd.f32 %v2184_v35, %v2028_v33 }
 0x37d   :  { %2450 = vrot.lane.b32.xlu1 %v4912_v53, %s8235_s18  ;;  %2446 = vrot.lane.b32.xlu0 %v4888_v38, %s8235_s18 }
 0x37e   :  { %2452 = vrot.lane.b32.xlu2 %v4959_v17, %s8235_s18 }
 0x37f   :  { %v2211_v13 = vpop.permute.xlu1 %2210  ;;  %v2197_v11 = vpop.permute.xlu0 %2196 }
 0x380   :  { %v2214_v10 = vsel %vm8240_vm10, %v2211_v13, %v6569_v27  ;;  %v2215_v45 = vsel %vm8241_vm13, %v6569_v27, %v2211_v13  ;;  %v6646_v9 = vpop.permute.xlu2 %2270  ;;  %v2198_v46 = vsel %vm8242_vm9, %v6514_v43, %v2197_v11  ;;  %v2199_v22 = vsel %vm8243_vm12, %v2197_v11, %v6514_v43  ;;  %v8257_v11 = vld [vmem:[#allocation68_spill] sm:$0xff]  ;;  %vm8264_vm10 = vmmov %vm8263_vm1 }
 0x381   :  { %v2202_v39 = vmul.f32 %v2199_v22, %v8245_v16  ;;  %v2203_v5 = vmul.f32 %v2198_v46, %v8245_v16  ;;  %v2222_v58 = vmul.f32 %v2215_v45, %v8249_v23  ;;  %v2223_v47 = vmul.f32 %v2214_v10, %v8249_v23  ;;  %v8262_v23 = vld [vmem:[#allocation60_spill] sm:$0xff]  ;;  %vm8265_vm13 = vmmov %vm8261_vm2 }
 0x382   :  { %vm8266_vm9 = vmmov %vm8261_vm2 }
 0x383   :  { %v2204_v27 = vadd.f32 %v2202_v39, %v2200_v19  ;;  %v2205_v12 = vadd.f32 %v2203_v5, %v2201_v24  ;;  %vm8270_vm12 = vmmov %vm8263_vm1 }
 0x385   :  { %2468 = vrot.lane.b32.xlu1 %v4888_v38, %s8246_s27  ;;  %2466 = vrot.lane.b32.xlu0 %v4896_v63, %s8246_s27  ;;  %v2206_v4 = vmul.f32 %v8136_v62, %v2204_v27  ;;  %v2207_v42 = vmul.f32 %v3830_v34, %v2205_v12  ;;  %v8259_v27 = vld [vmem:[#allocation67_spill] sm:$0xff] }
 0x386   :  { %2472 = vrot.lane.b32.xlu2 %v4912_v53, %s8246_s27  ;;  %v2254_v12 = vmul.f32 %v4896_v63, %v8259_v27 }
 0x387   :  { %v2219_v43 = vpop.permute.xlu1 %2218  ;;  %v2217_v6 = vpop.permute.xlu0 %2216 }
 0x388   :  { %v2289_v56 = vpop.permute.xlu2 %2288  ;;  %v2220_v15 = vsel %vm8247_vm14, %v2217_v6, %v2219_v43  ;;  %v2221_v41 = vsel %vm8248_vm15, %v2219_v43, %v2217_v6  ;;  %v2255_v43 = vmul.f32 %v4888_v38, %v8259_v27  ;;  %vm8271_vm14 = vmmov %vm8263_vm1  ;;  %v8273_v27 = vld [vmem:[#allocation71_spill] sm:$0xff]  ;;  %vm8275_vm15 = vcmp.lt.s32.totalorder %v3626_v29, 125 }
 0x389   :  { %v2224_v3 = vmul.f32 %v2221_v41, %v8250_v7  ;;  %v2225_v44 = vmul.f32 %v2220_v15, %v8250_v7 }
 0x38b   :  { %v2226_v61 = vadd.f32 %v2224_v3, %v2222_v58  ;;  %v2227_v30 = vadd.f32 %v2225_v44, %v2223_v47  ;;  %v2256_v58 = vmul.f32 %v4912_v53, %v8262_v23  ;;  %v2257_v47 = vmul.f32 %v4959_v17, %v8262_v23 }
 0x38d   :  { %2492 = vrot.lane.b32.xlu1 %v4896_v63, %s8251_s16  ;;  %v2228_v0 = vmul.f32 %v8048_v49, %v2226_v61  ;;  %v2229_v36 = vmul.f32 %v3893_v21, %v2227_v30  ;;  %2474 = vrot.lane.b32.xlu0 %v4959_v17, %s8246_s27  ;;  %v2258_v7 = vadd.f32 %v2256_v58, %v2254_v12 }
 0x38e   :  { %2494 = vrot.lane.b32.xlu2 %v4888_v38, %s8251_s16  ;;  %v2259_v3 = vadd.f32 %v2257_v47, %v2255_v43 }
 0x38f   :  { %v2239_v54 = vpop.permute.xlu1 %2238  ;;  %v2230_v1 = vadd.f32 %v2228_v0, %v2206_v4  ;;  %v2231_v60 = vadd.f32 %v2229_v36, %v2207_v42  ;;  %v2235_v25 = vpop.permute.xlu0 %2234  ;;  %v2260_v0 = vmul.f32 %v3948_v48, %v2258_v7 }
 0x390   :  { %v2242_v32 = vsel %vm8252_vm11, %v2239_v54, %v2241_v28  ;;  %v2243_v31 = vsel %vm8253_vm5, %v2241_v28, %v2239_v54  ;;  %v6686_v33 = vpop.permute.xlu2 %2308  ;;  %v2236_v10 = vsel %vm8255_vm0, %v6601_v37, %v2235_v25  ;;  %v2237_v45 = vsel %vm8256_vm7, %v2235_v25, %v6601_v37  ;;  %vm8276_vm11 = vmmov %vm8275_vm15 }
 0x391   :  { %v2246_v35 = vmul.f32 %v2243_v31, %v8254_v18  ;;  %v2247_v13 = vmul.f32 %v2242_v32, %v8254_v18  ;;  %v2244_v46 = vmul.f32 %v2237_v45, %v8257_v11  ;;  %v2245_v22 = vmul.f32 %v2236_v10, %v8257_v11  ;;  %vm8278_vm5 = vmmov %vm8276_vm11 }
 0x392   :  { %v2261_v36 = vmul.f32 %v3953_v52, %v2259_v3  ;;  %vm8279_vm0 = vmmov %vm8278_vm5  ;;  %vm8282_vm7 = vcmp.lt.s32.totalorder %v3626_v29, 115 }
 0x393   :  { %v2248_v28 = vadd.f32 %v2246_v35, %v2244_v46  ;;  %v2249_v50 = vadd.f32 %v2247_v13, %v2245_v22 }
 0x395   :  { %2500 = vrot.lane.b32.xlu1 %v4959_v17, %s8251_s16  ;;  %v2250_v19 = vmul.f32 %v3877_v20, %v2248_v28  ;;  %v2251_v24 = vmul.f32 %v3885_v40, %v2249_v50  ;;  %2498 = vrot.lane.b32.xlu0 %v4912_v53, %s8251_s16 }
 0x396   :  { %2514 = vrot.lane.b32.xlu2 %v4896_v63, %s8258_s0 }
 0x397   :  { %v2267_v37 = vpop.permute.xlu1 %2266  ;;  %v2252_v16 = vadd.f32 %v2250_v19, %v2230_v1  ;;  %v2253_v39 = vadd.f32 %v2251_v24, %v2231_v60  ;;  %v2265_v5 = vpop.permute.xlu0 %2264  ;;  %v8267_v60 = vld [vmem:[#allocation74_spill] sm:$0xff] }
 0x398   :  { %v2317_v6 = vpop.permute.xlu2 %2316  ;;  %v2268_v15 = vsel %vm8260_vm8, %v2265_v5, %v2267_v37  ;;  %v2269_v41 = vsel %vm8261_vm2, %v2267_v37, %v2265_v5  ;;  %vm8283_vm8 = vmmov %vm8282_vm7  ;;  %vm8284_vm2 = vcmp.lt.s32.totalorder %v3626_v29, 114 }
 0x399   :  { %v2276_v32 = vmul.f32 %v2268_v15, %v8267_v60  ;;  %v2277_v31 = vmul.f32 %v2269_v41, %v8267_v60  ;;  %v2262_v10 = vadd.f32 %v2260_v0, %v2252_v16  ;;  %v2263_v45 = vadd.f32 %v2261_v36, %v2253_v39  ;;  %v8272_v16 = vld [vmem:[#allocation70_spill] sm:$0xff]  ;;  %v8277_v0 = vld [vmem:[#allocation69_spill] sm:$0xff] }
 0x39d   :  { %2520 = vrot.lane.b32.xlu1 %v4912_v53, %s8258_s0  ;;  %2516 = vrot.lane.b32.xlu0 %v4888_v38, %s8258_s0 }
 0x39e   :  { %2522 = vrot.lane.b32.xlu2 %v4959_v17, %s8258_s0 }
 0x39f   :  { %v2287_v44 = vpop.permute.xlu1 %2286  ;;  %v2273_v4 = vpop.permute.xlu0 %2272 }
 0x3a0   :  { %v2290_v61 = vsel %vm8263_vm1, %v2287_v44, %v2289_v56  ;;  %v2291_v30 = vsel %vm8264_vm10, %v2289_v56, %v2287_v44  ;;  %v6728_v42 = vpop.permute.xlu2 %2340  ;;  %v2274_v54 = vsel %vm8265_vm13, %v6646_v9, %v2273_v4  ;;  %v2275_v1 = vsel %vm8266_vm9, %v2273_v4, %v6646_v9  ;;  %v8268_v56 = vld [vmem:[#allocation63_spill] sm:$0xff]  ;;  %vm8285_vm1 = vmmov %vm8284_vm2 }
 0x3a1   :  { %v2278_v25 = vmul.f32 %v2274_v54, %v8268_v56  ;;  %v2279_v18 = vmul.f32 %v2275_v1, %v8268_v56  ;;  %v2298_v39 = vmul.f32 %v2290_v61, %v8272_v16  ;;  %v2299_v5 = vmul.f32 %v2291_v30, %v8272_v16  ;;  %vm8286_vm10 = vmmov %vm8282_vm7 }
 0x3a2   :  { %vm8287_vm13 = vmmov %vm8282_vm7 }
 0x3a3   :  { %v2280_v35 = vadd.f32 %v2278_v25, %v2276_v32  ;;  %v2281_v13 = vadd.f32 %v2279_v18, %v2277_v31  ;;  %v8280_v32 = vld [vmem:[#allocation87_spill] sm:$0xff]  ;;  %vm8291_vm9 = vmmov %vm8285_vm1 }
 0x3a5   :  { %2538 = vrot.lane.b32.xlu1 %v4888_v38, %s8269_s23  ;;  %v2282_v11 = vmul.f32 %v3997_v2, %v2280_v35  ;;  %v2283_v46 = vmul.f32 %v4027_v14, %v2281_v13  ;;  %2536 = vrot.lane.b32.xlu0 %v4896_v63, %s8269_s23 }
 0x3a6   :  { %2542 = vrot.lane.b32.xlu2 %v4912_v53, %s8269_s23 }
 0x3a7   :  { %v2295_v9 = vpop.permute.xlu1 %2294  ;;  %v2284_v22 = vadd.f32 %v2282_v11, %v2262_v10  ;;  %v2285_v28 = vadd.f32 %v2283_v46, %v2263_v45  ;;  %v2293_v50 = vpop.permute.xlu0 %2292 }
 0x3a8   :  { %v2359_v19 = vpop.permute.xlu2 %2358  ;;  %v2296_v24 = vsel %vm8270_vm12, %v2293_v50, %v2295_v9  ;;  %v2297_v37 = vsel %vm8271_vm14, %v2295_v9, %v2293_v50  ;;  %vm8292_vm12 = vmmov %vm8285_vm1  ;;  %vm8296_vm14 = vcmp.lt.s32.totalorder %v3626_v29, 113 }
 0x3a9   :  { %v2300_v12 = vmul.f32 %v2296_v24, %v8273_v27  ;;  %v2301_v43 = vmul.f32 %v2297_v37, %v8273_v27 }
 0x3ab   :  { %v2302_v15 = vadd.f32 %v2300_v12, %v2298_v39  ;;  %v2303_v41 = vadd.f32 %v2301_v43, %v2299_v5  ;;  %v8288_v5 = vld [vmem:[#allocation90_spill] sm:$0xff]  ;;  %v8289_v43 = vld [vmem:[#allocation85_spill] sm:$0xff] }
 0x3ad   :  { %2558 = vrot.lane.b32.xlu1 %v4896_v63, %s8274_s19  ;;  %v2304_v23 = vmul.f32 %v4076_v59, %v2302_v15  ;;  %v2305_v58 = vmul.f32 %v4079_v51, %v2303_v41  ;;  %2544 = vrot.lane.b32.xlu0 %v4959_v17, %s8269_s23 }
 0x3ae   :  { %2560 = vrot.lane.b32.xlu2 %v4888_v38, %s8274_s19 }
 0x3af   :  { %v2315_v47 = vpop.permute.xlu1 %2314  ;;  %v2306_v7 = vadd.f32 %v2304_v23, %v2284_v22  ;;  %v2307_v3 = vadd.f32 %v2305_v58, %v2285_v28  ;;  %v2311_v30 = vpop.permute.xlu0 %2310 }
 0x3b0   :  { %v2318_v44 = vsel %vm8275_vm15, %v2315_v47, %v2317_v6  ;;  %v2319_v61 = vsel %vm8276_vm11, %v2317_v6, %v2315_v47  ;;  %v6770_v4 = vpop.permute.xlu2 %2378  ;;  %v2312_v1 = vsel %vm8278_vm5, %v6686_v33, %v2311_v30  ;;  %v2313_v60 = vsel %vm8279_vm0, %v2311_v30, %v6686_v33  ;;  %vm8297_vm15 = vmmov %vm8296_vm14 }
 0x3b1   :  { %v2322_v36 = vmul.f32 %v2318_v44, %v8277_v0  ;;  %v2323_v54 = vmul.f32 %v2319_v61, %v8277_v0  ;;  %v2320_v31 = vmul.f32 %v2312_v1, %v8280_v32  ;;  %v2321_v56 = vmul.f32 %v2313_v60, %v8280_v32  ;;  %v8293_v44 = vld [vmem:[#allocation79_spill] sm:$0xff]  ;;  %v8294_v0 = vld [vmem:[#allocation86_spill] sm:$0xff]  ;;  %vm8299_vm11 = vmmov %vm8296_vm14 }
 0x3b2   :  { %vm8300_vm5 = vmmov %vm8299_vm11  ;;  %vm8303_vm0 = vcmp.lt.s32.totalorder %v3626_v29, 112 }
 0x3b3   :  { %v2324_v6 = vadd.f32 %v2322_v36, %v2320_v31  ;;  %v2325_v25 = vadd.f32 %v2323_v54, %v2321_v56 }
 0x3b5   :  { %2566 = vrot.lane.b32.xlu1 %v4959_v17, %s8274_s19  ;;  %v2326_v18 = vmul.f32 %v4266_v8, %v2324_v6  ;;  %v2327_v35 = vmul.f32 %v4269_v57, %v2325_v25  ;;  %2564 = vrot.lane.b32.xlu0 %v4912_v53, %s8274_s19 }
 0x3b6   :  { %2580 = vrot.lane.b32.xlu2 %v4896_v63, %s8281_s14 }
 0x3b7   :  { %v2337_v33 = vpop.permute.xlu1 %2336  ;;  %v2328_v13 = vadd.f32 %v2326_v18, %v2306_v7  ;;  %v2329_v10 = vadd.f32 %v2327_v35, %v2307_v3  ;;  %v2335_v45 = vpop.permute.xlu0 %2334 }
 0x3b8   :  { %v2387_v11 = vpop.permute.xlu2 %2386  ;;  %v2338_v46 = vsel %vm8282_vm7, %v2335_v45, %v2337_v33  ;;  %v2339_v9 = vsel %vm8283_vm8, %v2337_v33, %v2335_v45  ;;  %vm8304_vm7 = vmmov %vm8303_vm0  ;;  %vm8305_vm8 = vcmp.lt.s32.totalorder %v3626_v29, 111 }
 0x3b9   :  { %v6795_v22 = vadd.f32 %v2328_v13, %v6632_v26  ;;  %v6798_v28 = vadd.f32 %v2329_v10, %v6630_v55  ;;  %v2346_v27 = vmul.f32 %v2338_v46, %v8288_v5  ;;  %v2347_v12 = vmul.f32 %v2339_v9, %v8288_v5  ;;  %v8298_v46 = vld [vmem:[#allocation92_spill] sm:$0xff] }
 0x3bd   :  { %2586 = vrot.lane.b32.xlu1 %v4912_v53, %s8281_s14  ;;  %2582 = vrot.lane.b32.xlu0 %v4888_v38, %s8281_s14 }
 0x3be   :  { %2588 = vrot.lane.b32.xlu2 %v4959_v17, %s8281_s14 }
 0x3bf   :  { %v2357_v50 = vpop.permute.xlu1 %2356  ;;  %v2343_v37 = vpop.permute.xlu0 %2342 }
 0x3c0   :  { %v2360_v24 = vsel %vm8284_vm2, %v2357_v50, %v2359_v19  ;;  %v2361_v26 = vsel %vm8285_vm1, %v2359_v19, %v2357_v50  ;;  %v6810_v16 = vpop.permute.xlu2 %2406  ;;  %v2344_v55 = vsel %vm8286_vm10, %v6728_v42, %v2343_v37  ;;  %v2345_v39 = vsel %vm8287_vm13, %v2343_v37, %v6728_v42  ;;  %v8301_v37 = vld [vmem:[#allocation93_spill] sm:$0xff]  ;;  %vm8306_vm2 = vmmov %vm8305_vm8 }
 0x3c1   :  { %v2348_v15 = vmul.f32 %v2344_v55, %v8289_v43  ;;  %v2349_v41 = vmul.f32 %v2345_v39, %v8289_v43  ;;  %v2368_v61 = vmul.f32 %v2360_v24, %v8293_v44  ;;  %v2369_v30 = vmul.f32 %v2361_v26, %v8293_v44  ;;  %vm8307_vm1 = vmmov %vm8303_vm0 }
 0x3c2   :  { %vm8308_vm10 = vmmov %vm8303_vm0 }
 0x3c3   :  { %v2350_v19 = vadd.f32 %v2348_v15, %v2346_v27  ;;  %v2351_v23 = vadd.f32 %v2349_v41, %v2347_v12  ;;  %vm8312_vm13 = vmmov %vm8306_vm2 }
 0x3c5   :  { %2604 = vrot.lane.b32.xlu1 %v4888_v38, %s8290_s28  ;;  %2602 = vrot.lane.b32.xlu0 %v4896_v63, %s8290_s28  ;;  %v2352_v32 = vmul.f32 %v8136_v62, %v2350_v19  ;;  %v2353_v31 = vmul.f32 %v3830_v34, %v2351_v23 }
 0x3c6   :  { %2608 = vrot.lane.b32.xlu2 %v4912_v53, %s8290_s28 }
 0x3c7   :  { %v2365_v42 = vpop.permute.xlu1 %2364  ;;  %v2363_v58 = vpop.permute.xlu0 %2362 }
 0x3c8   :  { %v2425_v47 = vpop.permute.xlu2 %2424  ;;  %v2366_v7 = vsel %vm8291_vm9, %v2363_v58, %v2365_v42  ;;  %v2367_v3 = vsel %vm8292_vm12, %v2365_v42, %v2363_v58  ;;  %vm8313_vm9 = vmmov %vm8306_vm2  ;;  %vm8317_vm12 = vcmp.lt.s32.totalorder %v3626_v29, 110 }
 0x3c9   :  { %v2370_v36 = vmul.f32 %v2366_v7, %v8294_v0  ;;  %v2371_v54 = vmul.f32 %v2367_v3, %v8294_v0 }
 0x3cb   :  { %v2372_v1 = vadd.f32 %v2370_v36, %v2368_v61  ;;  %v2373_v60 = vadd.f32 %v2371_v54, %v2369_v30  ;;  %v8309_v36 = vld [vmem:[#allocation88_spill] sm:$0xff] }
 0x3cd   :  { %2624 = vrot.lane.b32.xlu1 %v4896_v63, %s8295_s25  ;;  %v2374_v56 = vmul.f32 %v8048_v49, %v2372_v1  ;;  %v2375_v6 = vmul.f32 %v3893_v21, %v2373_v60  ;;  %2610 = vrot.lane.b32.xlu0 %v4959_v17, %s8290_s28  ;;  %v8310_v60 = vld [vmem:[#allocation101_spill] sm:$0xff] }
 0x3ce   :  { %2626 = vrot.lane.b32.xlu2 %v4888_v38, %s8295_s25 }
 0x3cf   :  { %v2385_v25 = vpop.permute.xlu1 %2384  ;;  %v2376_v18 = vadd.f32 %v2374_v56, %v2352_v32  ;;  %v2377_v35 = vadd.f32 %v2375_v6, %v2353_v31  ;;  %v2381_v10 = vpop.permute.xlu0 %2380 }
 0x3d0   :  { %v2388_v33 = vsel %vm8296_vm14, %v2385_v25, %v2387_v11  ;;  %v2389_v13 = vsel %vm8297_vm15, %v2387_v11, %v2385_v25  ;;  %v6850_v45 = vpop.permute.xlu2 %2444  ;;  %v2382_v24 = vsel %vm8299_vm11, %v6770_v4, %v2381_v10  ;;  %v2383_v26 = vsel %vm8300_vm5, %v2381_v10, %v6770_v4  ;;  %vm8318_vm14 = vmmov %vm8317_vm12 }
 0x3d1   :  { %v2392_v9 = vmul.f32 %v2388_v33, %v8298_v46  ;;  %v2393_v50 = vmul.f32 %v2389_v13, %v8298_v46  ;;  %v2390_v55 = vmul.f32 %v2382_v24, %v8301_v37  ;;  %v2391_v39 = vmul.f32 %v2383_v26, %v8301_v37  ;;  %v8315_v26 = vld [vmem:[#allocation102_spill] sm:$0xff]  ;;  %vm8320_vm15 = vmmov %vm8317_vm12 }
 0x3d2   :  { %vm8321_vm11 = vmmov %vm8317_vm12  ;;  %vm8324_vm5 = vcmp.lt.s32.totalorder %v3626_v29, 109 }
 0x3d3   :  { %v2394_v11 = vadd.f32 %v2392_v9, %v2390_v55  ;;  %v2395_v5 = vadd.f32 %v2393_v50, %v2391_v39  ;;  %v8314_v9 = vld [vmem:[#allocation98_spill] sm:$0xff] }
 0x3d5   :  { %2632 = vrot.lane.b32.xlu1 %v4959_v17, %s8295_s25  ;;  %v2396_v27 = vmul.f32 %v3877_v20, %v2394_v11  ;;  %v2397_v12 = vmul.f32 %v3885_v40, %v2395_v5  ;;  %2630 = vrot.lane.b32.xlu0 %v4912_v53, %s8295_s25 }
 0x3d6   :  { %2650 = vrot.lane.b32.xlu2 %v4896_v63, %s8302_s20 }
 0x3d7   :  { %v2403_v4 = vpop.permute.xlu1 %2402  ;;  %v2398_v43 = vadd.f32 %v2396_v27, %v2376_v18  ;;  %v2399_v15 = vadd.f32 %v2397_v12, %v2377_v35  ;;  %v2401_v41 = vpop.permute.xlu0 %2400 }
 0x3d8   :  { %v2453_v19 = vpop.permute.xlu2 %2452  ;;  %v2404_v23 = vsel %vm8303_vm0, %v2401_v41, %v2403_v4  ;;  %v2405_v42 = vsel %vm8304_vm7, %v2403_v4, %v2401_v41  ;;  %vm8325_vm0 = vmmov %vm8324_vm5  ;;  %vm8326_vm7 = vcmp.lt.s32.totalorder %v3626_v29, 99 }
 0x3d9   :  { %v2412_v54 = vmul.f32 %v2404_v23, %v8309_v36  ;;  %v2413_v1 = vmul.f32 %v2405_v42, %v8309_v36 }
 0x3dd   :  { %2656 = vrot.lane.b32.xlu1 %v4912_v53, %s8302_s20  ;;  %2652 = vrot.lane.b32.xlu0 %v4888_v38, %s8302_s20 }
 0x3de   :  { %2658 = vrot.lane.b32.xlu2 %v4959_v17, %s8302_s20 }
 0x3df   :  { %v2423_v58 = vpop.permute.xlu1 %2422  ;;  %v2409_v44 = vpop.permute.xlu0 %2408 }
 0x3e0   :  { %v2426_v7 = vsel %vm8305_vm8, %v2423_v58, %v2425_v47  ;;  %v2427_v3 = vsel %vm8306_vm2, %v2425_v47, %v2423_v58  ;;  %v6884_v61 = vpop.permute.xlu2 %2472  ;;  %v2410_v30 = vsel %vm8307_vm1, %v6810_v16, %v2409_v44  ;;  %v2411_v0 = vsel %vm8308_vm10, %v2409_v44, %v6810_v16  ;;  %v8319_v58 = vld [vmem:[#allocation115_spill] sm:$0xff]  ;;  %vm8327_vm8 = vmmov %vm8326_vm7 }
 0x3e1   :  { %v2414_v32 = vmul.f32 %v2410_v30, %v8310_v60  ;;  %v2415_v31 = vmul.f32 %v2411_v0, %v8310_v60  ;;  %v2434_v50 = vmul.f32 %v2426_v7, %v8314_v9  ;;  %v2435_v24 = vmul.f32 %v2427_v3, %v8314_v9  ;;  %v8322_v0 = vld [vmem:[#allocation117_spill] sm:$0xff]  ;;  %vm8328_vm2 = vmmov %vm8325_vm0 }
 0x3e2   :  { %vm8329_vm1 = vmmov %vm8325_vm0 }
 0x3e3   :  { %v2416_v47 = vadd.f32 %v2414_v32, %v2412_v54  ;;  %v2417_v56 = vadd.f32 %v2415_v31, %v2413_v1  ;;  %vm8334_vm10 = vmmov %vm8326_vm7 }
 0x3e5   :  { %2674 = vrot.lane.b32.xlu1 %v4888_v38, %s8311_s26  ;;  %v2418_v6 = vmul.f32 %v3948_v48, %v2416_v47  ;;  %v2419_v25 = vmul.f32 %v3953_v52, %v2417_v56  ;;  %2672 = vrot.lane.b32.xlu0 %v4896_v63, %s8311_s26 }
 0x3e6   :  { %2678 = vrot.lane.b32.xlu2 %v4912_v53, %s8311_s26 }
 0x3e7   :  { %v2431_v16 = vpop.permute.xlu1 %2430  ;;  %v2420_v18 = vadd.f32 %v2418_v6, %v2398_v43  ;;  %v2421_v35 = vadd.f32 %v2419_v25, %v2399_v15  ;;  %v2429_v33 = vpop.permute.xlu0 %2428 }
 0x3e8   :  { %v2495_v13 = vpop.permute.xlu2 %2494  ;;  %v2432_v10 = vsel %vm8312_vm13, %v2429_v33, %v2431_v16  ;;  %v2433_v46 = vsel %vm8313_vm9, %v2431_v16, %v2429_v33  ;;  %vm8335_vm13 = vmmov %vm8326_vm7  ;;  %vm8338_vm9 = vcmp.lt.s32.totalorder %v3626_v29, 98 }
 0x3e9   :  { %v2436_v37 = vmul.f32 %v2432_v10, %v8315_v26  ;;  %v2437_v55 = vmul.f32 %v2433_v46, %v8315_v26 }
 0x3eb   :  { %v2438_v39 = vadd.f32 %v2436_v37, %v2434_v50  ;;  %v2439_v11 = vadd.f32 %v2437_v55, %v2435_v24  ;;  %v8330_v24 = vld [vmem:[#allocation29_spill] sm:$0xff]  ;;  %v8331_v55 = vld [vmem:[#allocation28_spill] sm:$0xff] }
 0x3ed   :  { %2694 = vrot.lane.b32.xlu1 %v4896_v63, %s8316_s29  ;;  %v2440_v5 = vmul.f32 %v3997_v2, %v2438_v39  ;;  %v2441_v27 = vmul.f32 %v4027_v14, %v2439_v11  ;;  %2680 = vrot.lane.b32.xlu0 %v4959_v17, %s8311_s26 }
 0x3ee   :  { %2696 = vrot.lane.b32.xlu2 %v4888_v38, %s8316_s29 }
 0x3ef   :  { %v2451_v12 = vpop.permute.xlu1 %2450  ;;  %v2442_v4 = vadd.f32 %v2440_v5, %v2420_v18  ;;  %v2443_v43 = vadd.f32 %v2441_v27, %v2421_v35  ;;  %v2447_v23 = vpop.permute.xlu0 %2446 }
 0x3f0   :  { %v2454_v15 = vsel %vm8317_vm12, %v2451_v12, %v2453_v19  ;;  %v2455_v41 = vsel %vm8318_vm14, %v2453_v19, %v2451_v12  ;;  %v6924_v42 = vpop.permute.xlu2 %2514  ;;  %v2448_v44 = vsel %vm8320_vm15, %v6850_v45, %v2447_v23  ;;  %v2449_v30 = vsel %vm8321_vm11, %v2447_v23, %v6850_v45  ;;  %v8333_v23 = vld [vmem:[#allocation112_spill] sm:$0xff]  ;;  %vm8339_vm12 = vmmov %vm8338_vm9 }
 0x3f1   :  { %v2458_v7 = vmul.f32 %v2454_v15, %v8319_v58  ;;  %v2459_v3 = vmul.f32 %v2455_v41, %v8319_v58  ;;  %v2456_v36 = vmul.f32 %v2448_v44, %v8322_v0  ;;  %v2457_v54 = vmul.f32 %v2449_v30, %v8322_v0  ;;  %v8336_v30 = vld [vmem:[#allocation65_spill] sm:$0xff]  ;;  %vm8341_vm14 = vmmov %vm8338_vm9 }
 0x3f2   :  { %vm8342_vm15 = vmmov %vm8338_vm9  ;;  %vm8344_vm11 = vcmp.lt.s32.totalorder %v3626_v29, 97 }
 0x3f3   :  { %v2460_v19 = vadd.f32 %v2458_v7, %v2456_v36  ;;  %v2461_v1 = vadd.f32 %v2459_v3, %v2457_v54  ;;  %v8337_v54 = vld [vmem:[#allocation19_spill] sm:$0xff] }
 0x3f5   :  { %2702 = vrot.lane.b32.xlu1 %v4959_v17, %s8316_s29  ;;  %v2462_v60 = vmul.f32 %v4076_v59, %v2460_v19  ;;  %v2463_v32 = vmul.f32 %v4079_v51, %v2461_v1  ;;  %2700 = vrot.lane.b32.xlu0 %v4912_v53, %s8316_s29 }
 0x3f6   :  { %2716 = vrot.lane.b32.xlu2 %v4896_v63, %s8323_s17 }
 0x3f7   :  { %v2469_v45 = vpop.permute.xlu1 %2468  ;;  %v2464_v31 = vadd.f32 %v2462_v60, %v2442_v4  ;;  %v2465_v47 = vadd.f32 %v2463_v32, %v2443_v43  ;;  %v2467_v56 = vpop.permute.xlu0 %2466 }
 0x3f8   :  { %v2523_v6 = vpop.permute.xlu2 %2522  ;;  %v2470_v25 = vsel %vm8324_vm5, %v2467_v56, %v2469_v45  ;;  %v2471_v16 = vsel %vm8325_vm0, %v2469_v45, %v2467_v56  ;;  %vm8345_vm5 = vmmov %vm8344_vm11  ;;  %vm8346_vm0 = vcmp.lt.s32.totalorder %v3626_v29, 96 }
 0x3f9   :  { %v2478_v26 = vmul.f32 %v2470_v25, %v8330_v24  ;;  %v2479_v37 = vmul.f32 %v2471_v16, %v8330_v24  ;;  %v8340_v25 = vld [vmem:[#allocation126_spill] sm:$0xff] }
 0x3fd   :  { %2722 = vrot.lane.b32.xlu1 %v4912_v53, %s8323_s17  ;;  %2718 = vrot.lane.b32.xlu0 %v4888_v38, %s8323_s17 }
 0x3fe   :  { %2724 = vrot.lane.b32.xlu2 %v4959_v17, %s8323_s17 }
 0x3ff   :  { %v2493_v18 = vpop.permute.xlu1 %2492  ;;  %v2475_v10 = vpop.permute.xlu0 %2474 }
 0x400   :  { %v2496_v35 = vsel %vm8326_vm7, %v2493_v18, %v2495_v13  ;;  %v2497_v33 = vsel %vm8327_vm8, %v2495_v13, %v2493_v18  ;;  %v6958_v46 = vpop.permute.xlu2 %2542  ;;  %v2476_v9 = vsel %vm8328_vm2, %v6884_v61, %v2475_v10  ;;  %v2477_v50 = vsel %vm8329_vm1, %v2475_v10, %v6884_v61  ;;  %v8343_v10 = vld [vmem:[#allocation118_spill] sm:$0xff]  ;;  %vm8347_vm7 = vmmov %vm8346_vm0 }
 0x401   :  { %v2480_v39 = vmul.f32 %v2476_v9, %v8331_v55  ;;  %v2481_v11 = vmul.f32 %v2477_v50, %v8331_v55  ;;  %v2504_v58 = vmul.f32 %v2496_v35, %v8333_v23  ;;  %v2505_v7 = vmul.f32 %v2497_v33, %v8333_v23  ;;  %vm8348_vm8 = vmmov %vm8345_vm5 }
 0x402   :  { %vm8349_vm2 = vmmov %vm8345_vm5 }
 0x403   :  { %v2482_v13 = vadd.f32 %v2480_v39, %v2478_v26  ;;  %v2483_v5 = vadd.f32 %v2481_v11, %v2479_v37  ;;  %vm8352_vm1 = vmmov %vm8346_vm0 }
 0x405   :  { %2740 = vrot.lane.b32.xlu1 %v4888_v38, %s8332_s30  ;;  %v2484_v27 = vmul.f32 %v4266_v8, %v2482_v13  ;;  %v2485_v12 = vmul.f32 %v4269_v57, %v2483_v5  ;;  %2738 = vrot.lane.b32.xlu0 %v4896_v63, %s8332_s30 }
 0x406   :  { %2744 = vrot.lane.b32.xlu2 %v4912_v53, %s8332_s30 }
 0x407   :  { %v2501_v61 = vpop.permute.xlu1 %2500  ;;  %v2486_v4 = vadd.f32 %v2484_v27, %v2464_v31  ;;  %v2487_v43 = vadd.f32 %v2485_v12, %v2465_v47  ;;  %v2499_v15 = vpop.permute.xlu0 %2498 }
 0x408   :  { %v2561_v41 = vpop.permute.xlu2 %2560  ;;  %v2502_v3 = vsel %vm8334_vm10, %v2499_v15, %v2501_v61  ;;  %v2503_v44 = vsel %vm8335_vm13, %v2501_v61, %v2499_v15  ;;  %vm8353_vm10 = vmmov %vm8346_vm0  ;;  %vm8356_vm13 = vcmp.lt.s32.totalorder %v3626_v29, 95 }
 0x409   :  { %v2489_v0 = vmul.f32 %v8336_v30, %v2487_v43  ;;  %v6986_v36 = vadd.f32 %v2486_v4, %v6795_v22  ;;  %v2506_v19 = vmul.f32 %v2502_v3, %v8337_v54  ;;  %v2507_v1 = vmul.f32 %v2503_v44, %v8337_v54  ;;  %v8351_v3 = vld [vmem:[#allocation32_spill] sm:$0xff] }
 0x40b   :  { %v6991_v60 = vadd.f32 %v2489_v0, %v6798_v28  ;;  %v2508_v32 = vadd.f32 %v2506_v19, %v2504_v58  ;;  %v2509_v45 = vadd.f32 %v2507_v1, %v2505_v7 }
 0x40d   :  { %2760 = vrot.lane.b32.xlu1 %v4896_v63, %s3137_s21  ;;  %2746 = vrot.lane.b32.xlu0 %v4959_v17, %s8332_s30  ;;  %v2510_v26 = vmul.f32 %v8136_v62, %v2508_v32  ;;  %v2511_v37 = vmul.f32 %v3830_v34, %v2509_v45 }
 0x40e   :  { %2762 = vrot.lane.b32.xlu2 %v4888_v38, %s3137_s21 }
 0x40f   :  { %v2521_v22 = vpop.permute.xlu1 %2520  ;;  %v2517_v28 = vpop.permute.xlu0 %2516 }
 0x410   :  { %v2524_v31 = vsel %vm8338_vm9, %v2521_v22, %v2523_v6  ;;  %v2525_v47 = vsel %vm8339_vm12, %v2523_v6, %v2521_v22  ;;  %v7003_v56 = vpop.permute.xlu2 %2580  ;;  %v2518_v35 = vsel %vm8341_vm14, %v6924_v42, %v2517_v28  ;;  %v2519_v33 = vsel %vm8342_vm15, %v2517_v28, %v6924_v42  ;;  %v8354_v28 = vld [vmem:[#allocation50_spill] sm:$0xff]  ;;  %vm8357_vm9 = vmmov %vm8356_vm13 }
 0x411   :  { %v2528_v16 = vmul.f32 %v2524_v31, %v8340_v25  ;;  %v2529_v18 = vmul.f32 %v2525_v47, %v8340_v25  ;;  %v2526_v9 = vmul.f32 %v2518_v35, %v8343_v10  ;;  %v2527_v50 = vmul.f32 %v2519_v33, %v8343_v10  ;;  %vm8359_vm12 = vmmov %vm8357_vm9 }
 0x412   :  { %vm8360_vm14 = vmmov %vm8357_vm9  ;;  %vm8362_vm15 = vcmp.lt.s32.totalorder %v3626_v29, 94 }
 0x413   :  { %v2530_v6 = vadd.f32 %v2528_v16, %v2526_v9  ;;  %v2531_v24 = vadd.f32 %v2529_v18, %v2527_v50  ;;  %v8355_v18 = vld [vmem:[#allocation38_spill] sm:$0xff] }
 0x415   :  { %2768 = vrot.lane.b32.xlu1 %v4959_v17, %s3137_s21  ;;  %v2532_v55 = vmul.f32 %v8048_v49, %v2530_v6  ;;  %v2533_v39 = vmul.f32 %v3893_v21, %v2531_v24  ;;  %2766 = vrot.lane.b32.xlu0 %v4912_v53, %s3137_s21 }
 0x416   :  { %2782 = vrot.lane.b32.xlu2 %v4896_v63, %s3138_s13 }
 0x417   :  { %v2539_v42 = vpop.permute.xlu1 %2538  ;;  %v2534_v11 = vadd.f32 %v2532_v55, %v2510_v26  ;;  %v2535_v13 = vadd.f32 %v2533_v39, %v2511_v37  ;;  %v2537_v5 = vpop.permute.xlu0 %2536 }
 0x418   :  { %v2589_v27 = vpop.permute.xlu2 %2588  ;;  %v2540_v12 = vsel %vm8344_vm11, %v2537_v5, %v2539_v42  ;;  %v2541_v61 = vsel %vm8345_vm5, %v2539_v42, %v2537_v5  ;;  %vm8363_vm11 = vmmov %vm8362_vm15  ;;  %vm8364_vm5 = vcmp.lt.s32.totalorder %v3626_v29, 93 }
 0x41d   :  { %2788 = vrot.lane.b32.xlu1 %v4912_v53, %s3138_s13  ;;  %2784 = vrot.lane.b32.xlu0 %v4888_v38, %s3138_s13  ;;  %v8350_v53 = vld [vmem:[#allocation15_spill] sm:$0xff] }
 0x41e   :  { %2790 = vrot.lane.b32.xlu2 %v4959_v17, %s3138_s13  ;;  %v2548_v7 = vmul.f32 %v2540_v12, %v8350_v53  ;;  %v2549_v17 = vmul.f32 %v2541_v61, %v8350_v53  ;;  %s3139_s13 = smov [#allocation8]  }
 0x41f   :  { %v2559_v63 = vpop.permute.xlu1 %2558  ;;  %v2545_v15 = vpop.permute.xlu0 %2544  ;;  %s2832_s21 = sshll.u32 %s3139_s13, 4  ;;  %s2833_s21 = int_to_ptr.vmem [resolvable:$true] %s2832_s21 }
 0x420   :  { %v2562_v4 = vsel %vm8346_vm0, %v2559_v63, %v2561_v41  ;;  %v2563_v43 = vsel %vm8347_vm7, %v2561_v41, %v2559_v63  ;;  %v2609_v23 = vpop.permute.xlu2 %2608  ;;  %v2546_v58 = vsel %vm8348_vm8, %v6958_v46, %v2545_v15  ;;  %v2547_v38 = vsel %vm8349_vm2, %v2545_v15, %v6958_v46  ;;  %v8361_v63 = vld [vmem:[#allocation55_spill] sm:$0xff]  ;;  %vm8365_vm0 = vmmov %vm8364_vm5 }
 0x421   :  { %v2550_v44 = vmul.f32 %v2546_v58, %v8351_v3  ;;  %v2551_v30 = vmul.f32 %v2547_v38, %v8351_v3  ;;  %v2570_v25 = vmul.f32 %v2562_v4, %v8354_v28  ;;  %v2571_v16 = vmul.f32 %v2563_v43, %v8354_v28  ;;  %vm8366_vm7 = vmmov %vm8363_vm11  ;;  %v8369_v28 = vld [vmem:[#allocation21_spill] sm:$0xff] }
 0x422   :  { %vm8367_vm8 = vmmov %vm8366_vm7 }
 0x423   :  { %v2552_v0 = vadd.f32 %v2550_v44, %v2548_v7  ;;  %v2553_v41 = vadd.f32 %v2551_v30, %v2549_v17  ;;  %vm8370_vm2 = vmmov %vm8365_vm0 }
 0x425   :  { %v2554_v54 = vmul.f32 %v3877_v20, %v2552_v0  ;;  %v2555_v19 = vmul.f32 %v3885_v40, %v2553_v41 }
 0x427   :  { %v2567_v1 = vpop.permute.xlu1 %2566  ;;  %v2556_v32 = vadd.f32 %v2554_v54, %v2534_v11  ;;  %v2557_v45 = vadd.f32 %v2555_v19, %v2535_v13  ;;  %v2565_v22 = vpop.permute.xlu0 %2564  ;;  %v8358_v11 = vld [vmem:[#allocation35_spill] sm:$0xff] }
 0x428   :  { %v2568_v46 = vsel %vm8352_vm1, %v2565_v22, %v2567_v1  ;;  %v2569_v31 = vsel %vm8353_vm10, %v2567_v1, %v2565_v22  ;;  %v2627_v47 = vpop.permute.xlu2 %2626  ;;  %v8368_v22 = vld [vmem:[#allocation25_spill] sm:$0xff]  ;;  %vm8371_vm1 = vmmov %vm8365_vm0  ;;  %vm8375_vm10 = vcmp.lt.s32.totalorder %v3626_v29, 83 }
 0x429   :  { %v2572_v35 = vmul.f32 %v2568_v46, %v8355_v18  ;;  %v2573_v33 = vmul.f32 %v2569_v31, %v8355_v18 }
 0x42b   :  { %v2574_v10 = vadd.f32 %v2572_v35, %v2570_v25  ;;  %v2575_v9 = vadd.f32 %v2573_v33, %v2571_v16 }
 0x42d   :  { %v2576_v50 = vmul.f32 %v3948_v48, %v2574_v10  ;;  %v2577_v6 = vmul.f32 %v3953_v52, %v2575_v9 }
 0x42f   :  { %v2587_v24 = vpop.permute.xlu1 %2586  ;;  %v2578_v26 = vadd.f32 %v2576_v50, %v2556_v32  ;;  %v2579_v37 = vadd.f32 %v2577_v6, %v2557_v45  ;;  %v2583_v42 = vpop.permute.xlu0 %2582 }
 0x430   :  { %v2590_v55 = vsel %vm8356_vm13, %v2587_v24, %v2589_v27  ;;  %v2591_v39 = vsel %vm8357_vm9, %v2589_v27, %v2587_v24  ;;  %v2584_v12 = vsel %vm8359_vm12, %v7003_v56, %v2583_v42  ;;  %v2585_v61 = vsel %vm8360_vm14, %v2583_v42, %v7003_v56  ;;  %v7075_v15 = vpop.permute.xlu2 %2650  ;;  %v8373_v42 = vld [vmem:[#allocation73_spill] sm:$0xff]  ;;  %vm8376_vm13 = vmmov %vm8375_vm10 }
 0x431   :  { %v2594_v13 = vmul.f32 %v2590_v55, %v8358_v11  ;;  %v2595_v5 = vmul.f32 %v2591_v39, %v8358_v11  ;;  %v2592_v4 = vmul.f32 %v2584_v12, %v8361_v63  ;;  %v2593_v43 = vmul.f32 %v2585_v61, %v8361_v63  ;;  %vm8377_vm9 = vmmov %vm8375_vm10 }
 0x432   :  { %vm8378_vm12 = vmmov %vm8377_vm9  ;;  %vm8379_vm14 = vcmp.lt.s32.totalorder %v3626_v29, 81 }
 0x433   :  { %v2596_v27 = vadd.f32 %v2594_v13, %v2592_v4  ;;  %v2597_v58 = vadd.f32 %v2595_v5, %v2593_v43 }
 0x435   :  { %v2598_v38 = vmul.f32 %v3997_v2, %v2596_v27  ;;  %v2599_v53 = vmul.f32 %v4027_v14, %v2597_v58 }
 0x437   :  { %v2605_v7 = vpop.permute.xlu1 %2604  ;;  %v2600_v17 = vadd.f32 %v2598_v38, %v2578_v26  ;;  %v2601_v3 = vadd.f32 %v2599_v53, %v2579_v37  ;;  %v2603_v44 = vpop.permute.xlu0 %2602  ;;  %v8372_v37 = vld [vmem:[#allocation43_spill] sm:$0xff]  ;;  %v8374_v53 = vld [vmem:[#allocation46_spill] sm:$0xff] }
 0x438   :  { %v2606_v30 = vsel %vm8362_vm15, %v2603_v44, %v2605_v7  ;;  %v2607_v56 = vsel %vm8363_vm11, %v2605_v7, %v2603_v44  ;;  %v2659_v0 = vpop.permute.xlu2 %2658  ;;  %vm8380_vm15 = vmmov %vm8379_vm14 }
 0x439   :  { %v2614_v46 = vmul.f32 %v2606_v30, %v8368_v22  ;;  %v2615_v31 = vmul.f32 %v2607_v56, %v8368_v22 }
 0x43f   :  { %v2625_v41 = vpop.permute.xlu1 %2624  ;;  %v2611_v1 = vpop.permute.xlu0 %2610 }
 0x440   :  { %v2628_v54 = vsel %vm8364_vm5, %v2625_v41, %v2627_v47  ;;  %v2629_v19 = vsel %vm8365_vm0, %v2627_v47, %v2625_v41  ;;  %v2612_v32 = vsel %vm8366_vm7, %v2609_v23, %v2611_v1  ;;  %v2613_v45 = vsel %vm8367_vm8, %v2611_v1, %v2609_v23  ;;  %v2679_v9 = vpop.permute.xlu2 %2678 }
 0x441   :  { %v2616_v25 = vmul.f32 %v2612_v32, %v8369_v28  ;;  %v2617_v16 = vmul.f32 %v2613_v45, %v8369_v28  ;;  %v2636_v55 = vmul.f32 %v2628_v54, %v8372_v37  ;;  %v2637_v39 = vmul.f32 %v2629_v19, %v8372_v37 }
 0x442   :  { %vm8399_vm7 = vcmp.lt.s32.totalorder %v3626_v29, 77 }
 0x443   :  { %v2618_v18 = vadd.f32 %v2616_v25, %v2614_v46  ;;  %v2619_v35 = vadd.f32 %v2617_v16, %v2615_v31  ;;  %vm8400_vm8 = vmmov %vm8399_vm7 }
 0x445   :  { %v2620_v33 = vmul.f32 %v4076_v59, %v2618_v18  ;;  %v2621_v47 = vmul.f32 %v4079_v51, %v2619_v35 }
 0x447   :  { %v2633_v10 = vpop.permute.xlu1 %2632  ;;  %v2622_v50 = vadd.f32 %v2620_v33, %v2600_v17  ;;  %v2623_v6 = vadd.f32 %v2621_v47, %v2601_v3  ;;  %v2631_v24 = vpop.permute.xlu0 %2630 }
 0x448   :  { %v2634_v23 = vsel %vm8370_vm2, %v2631_v24, %v2633_v10  ;;  %v2635_v26 = vsel %vm8371_vm1, %v2633_v10, %v2631_v24  ;;  %v2697_v38 = vpop.permute.xlu2 %2696  ;;  %vm8402_vm2 = vmmov %vm8399_vm7 }
 0x449   :  { %v2638_v11 = vmul.f32 %v2634_v23, %v8373_v42  ;;  %v2639_v13 = vmul.f32 %v2635_v26, %v8373_v42  ;;  %v8382_v23 = vld [vmem:[#allocation58_spill] sm:$0xff]  ;;  %vm8403_vm1 = vmmov %vm8402_vm2 }
 0x44b   :  { %v2640_v5 = vadd.f32 %v2638_v11, %v2636_v55  ;;  %v2641_v12 = vadd.f32 %v2639_v13, %v2637_v39  ;;  %v8383_v55 = vld [vmem:[#allocation129_spill] sm:$0xff]  ;;  %v8384_v11 = vld [vmem:[#allocation64_spill] sm:$0xff] }
 0x44d   :  { %v2642_v61 = vmul.f32 %v4266_v8, %v2640_v5  ;;  %v2643_v63 = vmul.f32 %v4269_v57, %v2641_v12 }
 0x44f   :  { %v2657_v4 = vpop.permute.xlu1 %2656  ;;  %v2644_v43 = vadd.f32 %v2642_v61, %v2622_v50  ;;  %v2645_v27 = vadd.f32 %v2643_v63, %v2623_v6  ;;  %v2653_v58 = vpop.permute.xlu0 %2652  ;;  %v8381_v6 = vld [vmem:[#allocation44_spill] sm:$0xff] }
 0x450   :  { %v2717_v56 = vpop.permute.xlu2 %2716  ;;  %v2654_v16 = vsel %vm8377_vm9, %v7075_v15, %v2653_v58  ;;  %v2655_v18 = vsel %vm8378_vm12, %v2653_v58, %v7075_v15  ;;  %v8387_v61 = vld [vmem:[#allocation72_spill] sm:$0xff] }
 0x451   :  { %v2647_v7 = vmul.f32 %v8374_v53, %v2645_v27  ;;  %v7109_v17 = vadd.f32 %v2644_v43, %v6986_v36  ;;  %v2660_v36 = vsel %vm8375_vm10, %v2657_v4, %v2659_v0  ;;  %v2662_v26 = vmul.f32 %v2654_v16, %v8382_v23 }
 0x452   :  { %v2664_v15 = vmul.f32 %v2660_v36, %v8381_v6  ;;  %v2663_v37 = vmul.f32 %v2655_v18, %v8382_v23  ;;  %vm8407_vm10 = vcmask 1043456  }
 0x453   :  { %v7112_v3 = vadd.f32 %v2647_v7, %v6991_v60  ;;  %v2661_v60 = vsel %vm8376_vm13, %v2659_v0, %v2657_v4 }
 0x454   :  { %v2665_v24 = vmul.f32 %v2661_v60, %v8381_v6  ;;  %v8389_v60 = vld [vmem:[#allocation80_spill] sm:$0xff] }
 0x457   :  { %v2675_v44 = vpop.permute.xlu1 %2674  ;;  %v2673_v30 = vpop.permute.xlu0 %2672 }
 0x458   :  { %v2725_v19 = vpop.permute.xlu2 %2724  ;;  %v2676_v35 = vsel %vm1499_vm4, %v2673_v30, %v2675_v44  ;;  %v2677_v33 = vsel %vm1499_vm4, %v2675_v44, %v2673_v30  ;;  %v2666_v30 = vadd.f32 %v2664_v15, %v2662_v26 }
 0x459   :  { %v2684_v39 = vmul.f32 %v2676_v35, %v8383_v55  ;;  %v2685_v42 = vmul.f32 %v2677_v33, %v8383_v55 }
 0x45f   :  { %v2695_v41 = vpop.permute.xlu1 %2694  ;;  %v2681_v54 = vpop.permute.xlu0 %2680 }
 0x460   :  { %v2745_v22 = vpop.permute.xlu2 %2744  ;;  %v2682_v47 = vsel %vm1499_vm4, %v2679_v9, %v2681_v54  ;;  %v2683_v0 = vsel %vm1499_vm4, %v2681_v54, %v2679_v9  ;;  %vm8385_vm4 = vmmov %vm8379_vm14 }
 0x461   :  { %v2686_v9 = vmul.f32 %v2682_v47, %v8384_v11  ;;  %v2687_v13 = vmul.f32 %v2683_v0, %v8384_v11  ;;  %v2698_v5 = vsel %vm8385_vm4, %v2695_v41, %v2697_v38  ;;  %vm8386_vm11 = vmmov %vm8385_vm4 }
 0x462   :  { %v2699_v12 = vsel %vm8386_vm11, %v2697_v38, %v2695_v41  ;;  %v2667_v38 = vadd.f32 %v2665_v24, %v2663_v37  ;;  %v8388_v41 = vld [vmem:[#allocation106_spill] sm:$0xff] }
 0x463   :  { %v2706_v54 = vmul.f32 %v2698_v5, %v8388_v41  ;;  %v2689_v36 = vadd.f32 %v2687_v13, %v2685_v42  ;;  %v8397_v13 = vld [vmem:[#allocation84_spill] sm:$0xff] }
 0x465   :  { %v2691_v15 = vmul.f32 %v3893_v21, %v2689_v36 }
 0x467   :  { %v2703_v1 = vpop.permute.xlu1 %2702  ;;  %v2701_v32 = vpop.permute.xlu0 %2700 }
 0x468   :  { %v2763_v25 = vpop.permute.xlu2 %2762  ;;  %v2704_v10 = vsel %vm8379_vm14, %v2701_v32, %v2703_v1  ;;  %v2705_v50 = vsel %vm8380_vm15, %v2703_v1, %v2701_v32  ;;  %v2707_v1 = vmul.f32 %v2699_v12, %v8388_v41  ;;  %v2688_v32 = vadd.f32 %v2686_v9, %v2684_v39 }
 0x469   :  { %v2708_v63 = vmul.f32 %v2704_v10, %v8387_v61  ;;  %v2709_v4 = vmul.f32 %v2705_v50, %v8387_v61  ;;  %v2668_v10 = vmul.f32 %v8136_v62, %v2666_v30  ;;  %v2669_v50 = vmul.f32 %v3830_v34, %v2667_v38  ;;  %v8391_v62 = vld [vmem:[#allocation91_spill] sm:$0xff] }
 0x46a   :  { %v2690_v6 = vmul.f32 %v8048_v49, %v2688_v32 }
 0x46b   :  { %v2710_v47 = vadd.f32 %v2708_v63, %v2706_v54  ;;  %v2693_v63 = vadd.f32 %v2691_v15, %v2669_v50 }
 0x46c   :  { %v2692_v61 = vadd.f32 %v2690_v6, %v2668_v10 }
 0x46d   :  { %v2712_v39 = vmul.f32 %v3877_v20, %v2710_v47  ;;  %v8396_v20 = vld [vmem:[#allocation66_spill] sm:$0xff] }
 0x46f   :  { %v2723_v45 = vpop.permute.xlu1 %2722  ;;  %v2719_v46 = vpop.permute.xlu0 %2718 }
 0x470   :  { %v2726_v27 = vsel %vm1549_vm6, %v2723_v45, %v2725_v19  ;;  %v2727_v58 = vsel %vm1549_vm6, %v2725_v19, %v2723_v45  ;;  %v2720_v53 = vsel %vm1549_vm6, %v2717_v56, %v2719_v46  ;;  %v2721_v7 = vsel %vm1549_vm6, %v2719_v46, %v2717_v56  ;;  %v8390_v19 = vld [vmem:[#allocation45_spill] sm:$0xff]  ;;  %v2783_v33 = vpop.permute.xlu2 %2782 }
 0x471   :  { %v2730_v16 = vmul.f32 %v2726_v27, %v8389_v60  ;;  %v2731_v18 = vmul.f32 %v2727_v58, %v8389_v60  ;;  %v2728_v45 = vmul.f32 %v2720_v53, %v8390_v19  ;;  %v2729_v35 = vmul.f32 %v2721_v7, %v8390_v19  ;;  %v8401_v19 = vld [vmem:[#allocation16_spill] sm:$0xff] }
 0x472   :  { %v2711_v56 = vadd.f32 %v2709_v4, %v2707_v1  ;;  %vm8392_vm6 = vcmp.lt.s32.totalorder %v3626_v29, 78 }
 0x473   :  { %v2732_v24 = vadd.f32 %v2730_v16, %v2728_v45  ;;  %v2733_v23 = vadd.f32 %v2731_v18, %v2729_v35  ;;  %vm8393_vm5 = vmmov %vm8392_vm6 }
 0x474   :  { %vm8394_vm0 = vmmov %vm8393_vm5 }
 0x475   :  { %v2734_v4 = vmul.f32 %v3948_v48, %v2732_v24 }
 0x477   :  { %v2741_v31 = vpop.permute.xlu1 %2740  ;;  %v2739_v28 = vpop.permute.xlu0 %2738 }
 0x478   :  { %v2742_v26 = vsel %vm1574_vm3, %v2739_v28, %v2741_v31  ;;  %v2743_v37 = vsel %vm1574_vm3, %v2741_v31, %v2739_v28  ;;  %v2791_v38 = vpop.permute.xlu2 %2790 }
 0x479   :  { %v2750_v28 = vmul.f32 %v2742_v26, %v8396_v20 }
 0x47f   :  { %v2761_v43 = vpop.permute.xlu1 %2760  ;;  %v2747_v44 = vpop.permute.xlu0 %2746 }
 0x480   :  { %v2748_v46 = vsel %vm1574_vm3, %v2745_v22, %v2747_v44  ;;  %v2749_v0 = vsel %vm1574_vm3, %v2747_v44, %v2745_v22  ;;  %v2713_v22 = vmul.f32 %v3885_v40, %v2711_v56  ;;  %v2764_v21 = vsel %vm8392_vm6, %v2761_v43, %v2763_v25  ;;  %vm8395_vm3 = vmmov %vm8394_vm0 }
 0x481   :  { %v2752_v42 = vmul.f32 %v2748_v46, %v8391_v62  ;;  %v2753_v34 = vmul.f32 %v2749_v0, %v8391_v62  ;;  %v2765_v11 = vsel %vm8393_vm5, %v2763_v25, %v2761_v43  ;;  %v2751_v40 = vmul.f32 %v2743_v37, %v8396_v20  ;;  %v8398_v43 = vld [vmem:[#allocation83_spill] sm:$0xff]  ;;  %v8404_v46 = vld [vmem:[#allocation94_spill] sm:$0xff]  ;;  %v8406_v62 = vld [vmem:[#allocation81_spill] sm:$0xff] }
 0x482   :  { %v2735_v25 = vmul.f32 %v3953_v52, %v2733_v23  ;;  %v2772_v27 = vmul.f32 %v2764_v21, %v8398_v43  ;;  %v2773_v58 = vmul.f32 %v2765_v11, %v8398_v43  ;;  %v2714_v44 = vadd.f32 %v2712_v39, %v2692_v61  ;;  %v8405_v39 = vld [vmem:[#allocation77_spill] sm:$0xff] }
 0x483   :  { %v2754_v53 = vadd.f32 %v2752_v42, %v2750_v28  ;;  %v2755_v7 = vadd.f32 %v2753_v34, %v2751_v40  ;;  %v2715_v30 = vadd.f32 %v2713_v22, %v2693_v63 }
 0x484   :  { %v2736_v1 = vadd.f32 %v2734_v4, %v2714_v44 }
 0x485   :  { %v2737_v32 = vadd.f32 %v2735_v25, %v2715_v30  ;;  %v2756_v60 = vmul.f32 %v3997_v2, %v2754_v53  ;;  %v2757_v48 = vmul.f32 %v4027_v14, %v2755_v7 }
 0x487   :  { %v2769_v55 = vpop.permute.xlu1 %2768  ;;  %v2767_v49 = vpop.permute.xlu0 %2766  ;;  %v2758_v50 = vadd.f32 %v2756_v60, %v2736_v1  ;;  %v2759_v6 = vadd.f32 %v2757_v48, %v2737_v32 }
 0x488   :  { %v2770_v9 = vsel %vm8394_vm0, %v2767_v49, %v2769_v55  ;;  %v2771_v31 = vsel %vm8395_vm3, %v2769_v55, %v2767_v49 }
 0x489   :  { %v2774_v5 = vmul.f32 %v2770_v9, %v8397_v13  ;;  %v2775_v12 = vmul.f32 %v2771_v31, %v8397_v13 }
 0x48b   :  { %v2776_v41 = vadd.f32 %v2774_v5, %v2772_v27  ;;  %v2777_v54 = vadd.f32 %v2775_v12, %v2773_v58 }
 0x48d   :  { %v2778_v2 = vmul.f32 %v4076_v59, %v2776_v41  ;;  %v2779_v14 = vmul.f32 %v4079_v51, %v2777_v54 }
 0x48f   :  { %v2789_v36 = vpop.permute.xlu1 %2788  ;;  %v2785_v18 = vpop.permute.xlu0 %2784  ;;  %v2780_v23 = vadd.f32 %v2778_v2, %v2758_v50  ;;  %v2781_v26 = vadd.f32 %v2779_v14, %v2759_v6 }
 0x490   :  { %v2792_v52 = vsel %vm8399_vm7, %v2789_v36, %v2791_v38  ;;  %v2793_v16 = vsel %vm8400_vm8, %v2791_v38, %v2789_v36  ;;  %v2786_v47 = vsel %vm8402_vm2, %v2783_v33, %v2785_v18  ;;  %v2787_v56 = vsel %vm8403_vm1, %v2785_v18, %v2783_v33 }
 0x491   :  { %v2796_v45 = vmul.f32 %v2792_v52, %v8401_v19  ;;  %v2797_v35 = vmul.f32 %v2793_v16, %v8401_v19  ;;  %v2794_v0 = vmul.f32 %v2786_v47, %v8404_v46  ;;  %v2795_v10 = vmul.f32 %v2787_v56, %v8404_v46 }
 0x493   :  { %v2798_v15 = vadd.f32 %v2796_v45, %v2794_v0  ;;  %v2799_v24 = vadd.f32 %v2797_v35, %v2795_v10 }
 0x495   :  { %v2800_v37 = vmul.f32 %v4266_v8, %v2798_v15  ;;  %v2801_v55 = vmul.f32 %v4269_v57, %v2799_v24 }
 0x497   :  { %v2802_v29 = vadd.f32 %v2800_v37, %v2780_v23  ;;  %v2803_v33 = vadd.f32 %v2801_v55, %v2781_v26 }
 0x499   :  { %v2805_v59 = vmul.f32 %v8405_v39, %v2803_v33  ;;  %v2806_v51 = vadd.f32 %v2802_v29, %v7109_v17 }
 0x49b   :  { %v2807_v22 = vadd.f32 %v2805_v59, %v7112_v3  ;;  %v2808_v42 = vadd.f32 %v2806_v51, %v8406_v62  ;;  %v8408_v3 = vld [vmem:[#allocation13_spill] sm:$0xff] }
 0x49d   :  { %v2809_v34 = vadd.f32 %v2807_v22, %v8406_v62  ;;  %v2810_v49 = vmul.f32 0.16666667, %v2808_v42 }
 0x49f   :  { %v2811_v21 = vmul.f32 0.16666667, %v2809_v34  ;;  %v2812_v11 = vadd.f32 0.5, %v2810_v49 }
 0x4a1   :  { %v2813_v9 = vadd.f32 0.5, %v2811_v21  ;;  %v2814_v31 = vmax.f32 %v2812_v11, 0.0 }
 0x4a3   :  { %v2815_v8 = vmax.f32 %v2813_v9, 0.0  ;;  %v2816_v20 = vmin.f32 %v2814_v31, 1.0 }
 0x4a5   :  { %v2817_v57 = vmin.f32 %v2815_v8, 1.0  ;;  %v2818_v40 = vperm.slane %v2816_v20, 0 }
 0x4a7   :  { %v2819_v28 = vperm.slane %v2817_v57, 0 }
 0x4a9   :  { %v2822_v13 = vrot.slane %v2819_v28, 4 }
 0x4ab   :  { %v2823_v17 = vsel %vm8407_vm10, %v2818_v40, %v2822_v13 }
 0x4ac   :  { %v2825_v5 = vmul.f32 %v2823_v17, %v8408_v3 }
 0x4ae   :  { %2827 = vst [vmem:[#allocation8 + $0x8] sm:$0xff] %v2825_v5 }
 0x4af   :  { %2840 = dma.vmem_to_hbm [thread:$0]  %s2833_s21, 256, %s2835_s4, [#allocation7], %s8410_s6, %s8410_s6, %s8409_s5  }
 0x4b0   :  { %3083 = dma.done.wait [#allocation7], 256  }
 0x4b1   :  { %3084 = vsyncadd [#allocation7], 4294967040 }
 0x4b2   :  { %2845 = vsyncpa [#allocation6], 1 }
 0x4b3   :  { %2846 = vsyncpa [#allocation7], 1 }

</bundles_post_ra>
